<compile_context>
chip_gen: v7x
topology: tpu7x:2x2x1
jax: 0.10.0
libtpu: 0.0.40
codegen_flags: <defaults>
</compile_context>

<pallas_src>
import numpy as np

import jax
import jax.numpy as jnp
from jax.experimental import pallas as pl
from jax.experimental.pallas import tpu as pltpu

LRELU_SLOPE = 0.2
BN_EPS = 1e-5


# ---------------------------------------------------------------------------
# Fused Pallas kernel: whole encoder, activations never leave VMEM
# ---------------------------------------------------------------------------
def _encoder_kernel(*refs):
    """refs layout:
      [0]               x2d      (N*H0, W0*C0)              input activations
      [1+2l], [2+2l]    selh_l   (4, N*Hout, N*Hin)          0/1 H-tap selectors
                        wbig_l   (4, Win*Cin, Wout*Cout)     folded conv weights
      [13+4b .. +3]     gamma(1,C), beta(1,C), R(W*C,C), Rt(C,W*C)   BN layers 1..4
      [-1]              out      (N*H6, W6*z)
    """
    out_ref = refs[-1]
    x_ref = refs[0]

    X = x_ref[...]                                   # (N*H, W*C), stays in VMEM
    bn_slot = 0
    for l in range(6):
        selh_ref = refs[1 + 2 * l]
        wbig_ref = refs[2 + 2 * l]
        n_hout = selh_ref.shape[1]
        wc_out = wbig_ref.shape[2]

        acc = jnp.zeros((n_hout, wc_out), jnp.float32)
        for kh in range(4):
            # H-direction tap selection via a constant 0/1 matmul: avoids any
            # strided slicing / gathers inside the kernel (pure MXU work).
            t = jnp.dot(selh_ref[kh], X, preferred_element_type=jnp.float32)
            # W-direction 4-tap stride-2 conv folded into a block-banded matrix.
            acc = acc + jnp.dot(t, wbig_ref[kh], preferred_element_type=jnp.float32)

        if 1 <= l <= 4:
            # Fused training-mode BatchNorm (biased variance over N,H,W) epilogue.
            g_ref, b_ref, r_ref, rt_ref = refs[13 + 4 * bn_slot: 17 + 4 * bn_slot]
            bn_slot += 1
            gamma = g_ref[...]                       # (1, C)
            beta = b_ref[...]                        # (1, C)
            R = r_ref[...]                           # (W*C, C)  per-channel sum
            Rt = rt_ref[...]                         # (C, W*C)  per-channel bcast
            c_out = gamma.shape[1]
            m_cnt = float(acc.shape[0] * (wc_out // c_out))      # N*Hout*Wout
            colsum = jnp.sum(acc, axis=0, keepdims=True)                     # (1, W*C)
            mean_c = jnp.dot(colsum, R, preferred_element_type=jnp.float32) / m_cnt
            d = acc - jnp.dot(mean_c, Rt, preferred_element_type=jnp.float32)
            var_c = jnp.dot(jnp.sum(d * d, axis=0, keepdims=True), R,
                            preferred_element_type=jnp.float32) / m_cnt
            scale_c = gamma * jax.lax.rsqrt(var_c + BN_EPS)                  # (1, C)
            acc = (d * jnp.dot(scale_c, Rt, preferred_element_type=jnp.float32)
                   + jnp.dot(beta, Rt, preferred_element_type=jnp.float32))

        if l <= 4:                                   # LeakyReLU(0.2) after layers 0..4
            acc = jnp.where(acc > 0, acc, LRELU_SLOPE * acc)

        X = acc

    out_ref[...] = X


# ---------------------------------------------------------------------------
# Wrapper-side constant / weight preprocessing (one-time, tiny)
# ---------------------------------------------------------------------------
def _build_selh(n, hin, hout):
    """(4, N*Hout, N*Hin): SelH[kh, n*Hout+i, n*Hin+h] = 1 iff h == 2i-1+kh."""
    s = np.zeros((4, n * hout, n * hin), np.float32)
    for kh in range(4):
        for b in range(n):
            for i in range(hout):
                h = 2 * i - 1 + kh
                if 0 <= h < hin:
                    s[kh, b * hout + i, b * hin + h] = 1.0
    return jnp.asarray(s)


def _build_wsel(win, wout):
    """(4, Win, Wout): M[kw, w, j] = 1 iff w == 2j-1+kw (handles padding rows=0)."""
    m = np.zeros((4, win, wout), np.float32)
    for kw in range(4):
        for j in range(wout):
            w = 2 * j - 1 + kw
            if 0 <= w < win:
                m[kw, w, j] = 1.0
    return m


def _fold_weight(w_oihw, win):
    """(O, Cin, 4, 4) conv weight -> (4, Win*Cin, Wout*O) block-banded matrices."""
    o, cin, _, _ = w_oihw.shape
    wout = win // 2
    msel = jnp.asarray(_build_wsel(win, wout))            # (kw, win, wout)
    w_hwio = jnp.transpose(w_oihw, (2, 3, 1, 0))          # (kh, kw, cin, o)
    # wbig[kh, w, c, j, o] = sum_kw msel[kw, w, j] * w_hwio[kh, kw, c, o]
    wbig = jnp.einsum("qwj,hqco->hwcjo", msel, w_hwio)
    return wbig.reshape(4, win * cin, wout * o)


def _build_chan_reduce(wout, c):
    r = np.tile(np.eye(c, dtype=np.float32), (wout, 1))   # (Wout*C, C)
    return jnp.asarray(r), jnp.asarray(r.T.copy())


def encoder_forward(params, x_nchw):
    n, c0, h0, w0 = x_nchw.shape
    # NCHW -> lane-dense (N*H, W*C) slab.
    x2d = jnp.transpose(x_nchw, (0, 2, 3, 1)).reshape(n * h0, w0 * c0)

    hs = [h0]
    for _ in range(6):
        hs.append(hs[-1] // 2)

    inputs = [x2d]
    for l in range(6):
        inputs.append(_build_selh(n, hs[l], hs[l + 1]))
        inputs.append(_fold_weight(params[f"w{l}"], hs[l]))
    for l in range(1, 5):
        cout = params[f"w{l}"].shape[0]
        r, rt = _build_chan_reduce(hs[l + 1], cout)
        inputs.append(params[f"g{l}"].reshape(1, cout))
        inputs.append(params[f"b{l}"].reshape(1, cout))
        inputs.append(r)
        inputs.append(rt)

    z = params["w5"].shape[0]
    out = pl.pallas_call(
        _encoder_kernel,
        out_shape=jax.ShapeDtypeStruct((n * hs[6], hs[6] * z), jnp.float32),
        compiler_params=pltpu.CompilerParams(vmem_limit_bytes=32 * 1024 * 1024),
    )(*inputs)

    # (N*H6, W6*z) -> NCHW (N, z, H6, W6); H6 == W6 == 1 here.
    return out.reshape(n, hs[6], hs[6], z).transpose(0, 3, 1, 2)


# ---------------------------------------------------------------------------
# Parameter init (matches the module's weight_init) and pure-JAX reference
# ---------------------------------------------------------------------------
def init_params(key, z_size=2, channel=3, num_filters=8):
    nf = num_filters
    io = [(channel, nf), (nf, nf * 2), (nf * 2, nf * 4),
          (nf * 4, nf * 8), (nf * 8, nf * 8), (nf * 8, z_size)]
    params = {}
    for i, (cin, cout) in enumerate(io):
        key, k = jax.random.split(key)
        std = (2.0 / (cin * 16 + cout * 16)) ** 0.5   # xavier_normal, fan = C*4*4
        params[f"w{i}"] = std * jax.random.normal(k, (cout, cin, 4, 4), jnp.float32)
        if 1 <= i <= 4:                               # BatchNorm after convs 2..5
            key, k = jax.random.split(key)
            params[f"g{i}"] = 1.0 + 0.02 * jax.random.normal(k, (cout,), jnp.float32)
            params[f"b{i}"] = jnp.zeros((cout,), jnp.float32)
    return params


def ref_forward(params, x_nchw):
    def conv(x, w):
        return jax.lax.conv_general_dilated(
            x, jnp.transpose(w, (2, 3, 1, 0)), window_strides=(2, 2),
            padding=((1, 1), (1, 1)),
            dimension_numbers=("NHWC", "HWIO", "NHWC"))

    def lrelu(v):
        return jnp.where(v > 0, v, LRELU_SLOPE * v)

    x = jnp.transpose(x_nchw, (0, 2, 3, 1))
    x = lrelu(conv(x, params["w0"]))
    for i in range(1, 5):
        y = conv(x, params[f"w{i}"])
        mean = jnp.mean(y, axis=(0, 1, 2))
        var = jnp.var(y, axis=(0, 1, 2))
        y = (y - mean) * jax.lax.rsqrt(var + BN_EPS) * params[f"g{i}"] + params[f"b{i}"]
        x = lrelu(y)
    x = conv(x, params["w5"])
    return jnp.transpose(x, (0, 3, 1, 2))


if __name__ == "__main__":
    key = jax.random.PRNGKey(0)
    pkey, xkey = jax.random.split(key)
    params = init_params(pkey, z_size=2, channel=3, num_filters=8)
    x = jax.random.normal(xkey, (2, 3, 64, 64), jnp.float32)  # NCHW like PyTorch

    fwd = jax.jit(encoder_forward)
    out = jax.block_until_ready(fwd(params, x))
    assert out.shape == (2, 2, 1, 1), out.shape

    ref = jax.block_until_ready(ref_forward(params, x))
    # f32 everywhere; 1e-2 keeps headroom for MXU pass-count differences vs lax.conv.
    assert jnp.allclose(out, ref, atol=1e-2, rtol=1e-2), \
        float(jnp.max(jnp.abs(out - ref)))

    print("KERNEL_OK")
</pallas_src>

<mosaic_0001>
module attributes {stable_mosaic.version = 11 : i64} {
  func.func @_encoder_kernel(%arg0: memref<128x192xf32, #tpu.memory_space<vmem>>, %arg1: memref<4x64x128xf32, #tpu.memory_space<vmem>>, %arg2: memref<4x192x256xf32, #tpu.memory_space<vmem>>, %arg3: memref<4x32x64xf32, #tpu.memory_space<vmem>>, %arg4: memref<4x256x256xf32, #tpu.memory_space<vmem>>, %arg5: memref<4x16x32xf32, #tpu.memory_space<vmem>>, %arg6: memref<4x256x256xf32, #tpu.memory_space<vmem>>, %arg7: memref<4x8x16xf32, #tpu.memory_space<vmem>>, %arg8: memref<4x256x256xf32, #tpu.memory_space<vmem>>, %arg9: memref<4x4x8xf32, #tpu.memory_space<vmem>>, %arg10: memref<4x256x128xf32, #tpu.memory_space<vmem>>, %arg11: memref<4x2x4xf32, #tpu.memory_space<vmem>>, %arg12: memref<4x128x2xf32, #tpu.memory_space<vmem>>, %arg13: memref<1x16xf32, #tpu.memory_space<vmem>>, %arg14: memref<1x16xf32, #tpu.memory_space<vmem>>, %arg15: memref<256x16xf32, #tpu.memory_space<vmem>>, %arg16: memref<16x256xf32, #tpu.memory_space<vmem>>, %arg17: memref<1x32xf32, #tpu.memory_space<vmem>>, %arg18: memref<1x32xf32, #tpu.memory_space<vmem>>, %arg19: memref<256x32xf32, #tpu.memory_space<vmem>>, %arg20: memref<32x256xf32, #tpu.memory_space<vmem>>, %arg21: memref<1x64xf32, #tpu.memory_space<vmem>>, %arg22: memref<1x64xf32, #tpu.memory_space<vmem>>, %arg23: memref<256x64xf32, #tpu.memory_space<vmem>>, %arg24: memref<64x256xf32, #tpu.memory_space<vmem>>, %arg25: memref<1x64xf32, #tpu.memory_space<vmem>>, %arg26: memref<1x64xf32, #tpu.memory_space<vmem>>, %arg27: memref<128x64xf32, #tpu.memory_space<vmem>>, %arg28: memref<64x128xf32, #tpu.memory_space<vmem>>, %arg29: memref<2x2xf32, #tpu.memory_space<vmem>>) attributes {dimension_semantics = [], scalar_prefetch = 0 : i64, scratch_operands = 0 : i64, tpu.core_type = #tpu.core_type<tc>} {
    %c0 = arith.constant 0 : index
    %c0_0 = arith.constant 0 : index
    %0 = vector.load %arg0[%c0, %c0_0] : memref<128x192xf32, #tpu.memory_space<vmem>>, vector<128x192xf32>
    %cst = arith.constant 0.000000e+00 : f32
    %1 = vector.broadcast %cst : f32 to vector<64x256xf32>
    %c0_1 = arith.constant 0 : index
    %c0_2 = arith.constant 0 : index
    %c0_3 = arith.constant 0 : index
    %2 = vector.load %arg1[%c0_1, %c0_2, %c0_3] : memref<4x64x128xf32, #tpu.memory_space<vmem>>, vector<1x64x128xf32>
    %3 = vector.shape_cast %2 : vector<1x64x128xf32> to vector<64x128xf32>
    %cst_4 = arith.constant dense<0.000000e+00> : vector<64x192xf32>
    %4 = tpu.matmul %3, %0, %cst_4 {dimension_numbers = #tpu.dot_dimension_numbers<[1], [0], [0], [1], [0, 0, 1, 1], [], []>} : vector<64x128xf32>, vector<128x192xf32>, vector<64x192xf32> -> vector<64x192xf32>
    %c0_5 = arith.constant 0 : index
    %c0_6 = arith.constant 0 : index
    %c0_7 = arith.constant 0 : index
    %5 = vector.load %arg2[%c0_5, %c0_6, %c0_7] : memref<4x192x256xf32, #tpu.memory_space<vmem>>, vector<1x192x256xf32>
    %6 = vector.shape_cast %5 : vector<1x192x256xf32> to vector<192x256xf32>
    %cst_8 = arith.constant dense<0.000000e+00> : vector<64x256xf32>
    %7 = tpu.matmul %4, %6, %cst_8 {dimension_numbers = #tpu.dot_dimension_numbers<[1], [0], [0], [1], [0, 0, 1, 1], [], []>} : vector<64x192xf32>, vector<192x256xf32>, vector<64x256xf32> -> vector<64x256xf32>
    %8 = arith.addf %1, %7 : vector<64x256xf32>
    %c1 = arith.constant 1 : index
    %c0_9 = arith.constant 0 : index
    %c0_10 = arith.constant 0 : index
    %9 = vector.load %arg1[%c1, %c0_9, %c0_10] : memref<4x64x128xf32, #tpu.memory_space<vmem>>, vector<1x64x128xf32>
    %10 = vector.shape_cast %9 : vector<1x64x128xf32> to vector<64x128xf32>
    %cst_11 = arith.constant dense<0.000000e+00> : vector<64x192xf32>
    %11 = tpu.matmul %10, %0, %cst_11 {dimension_numbers = #tpu.dot_dimension_numbers<[1], [0], [0], [1], [0, 0, 1, 1], [], []>} : vector<64x128xf32>, vector<128x192xf32>, vector<64x192xf32> -> vector<64x192xf32>
    %c1_12 = arith.constant 1 : index
    %c0_13 = arith.constant 0 : index
    %c0_14 = arith.constant 0 : index
    %12 = vector.load %arg2[%c1_12, %c0_13, %c0_14] : memref<4x192x256xf32, #tpu.memory_space<vmem>>, vector<1x192x256xf32>
    %13 = vector.shape_cast %12 : vector<1x192x256xf32> to vector<192x256xf32>
    %cst_15 = arith.constant dense<0.000000e+00> : vector<64x256xf32>
    %14 = tpu.matmul %11, %13, %cst_15 {dimension_numbers = #tpu.dot_dimension_numbers<[1], [0], [0], [1], [0, 0, 1, 1], [], []>} : vector<64x192xf32>, vector<192x256xf32>, vector<64x256xf32> -> vector<64x256xf32>
    %15 = arith.addf %8, %14 : vector<64x256xf32>
    %c2 = arith.constant 2 : index
    %c0_16 = arith.constant 0 : index
    %c0_17 = arith.constant 0 : index
    %16 = vector.load %arg1[%c2, %c0_16, %c0_17] : memref<4x64x128xf32, #tpu.memory_space<vmem>>, vector<1x64x128xf32>
    %17 = vector.shape_cast %16 : vector<1x64x128xf32> to vector<64x128xf32>
    %cst_18 = arith.constant dense<0.000000e+00> : vector<64x192xf32>
    %18 = tpu.matmul %17, %0, %cst_18 {dimension_numbers = #tpu.dot_dimension_numbers<[1], [0], [0], [1], [0, 0, 1, 1], [], []>} : vector<64x128xf32>, vector<128x192xf32>, vector<64x192xf32> -> vector<64x192xf32>
    %c2_19 = arith.constant 2 : index
    %c0_20 = arith.constant 0 : index
    %c0_21 = arith.constant 0 : index
    %19 = vector.load %arg2[%c2_19, %c0_20, %c0_21] : memref<4x192x256xf32, #tpu.memory_space<vmem>>, vector<1x192x256xf32>
    %20 = vector.shape_cast %19 : vector<1x192x256xf32> to vector<192x256xf32>
    %cst_22 = arith.constant dense<0.000000e+00> : vector<64x256xf32>
    %21 = tpu.matmul %18, %20, %cst_22 {dimension_numbers = #tpu.dot_dimension_numbers<[1], [0], [0], [1], [0, 0, 1, 1], [], []>} : vector<64x192xf32>, vector<192x256xf32>, vector<64x256xf32> -> vector<64x256xf32>
    %22 = arith.addf %15, %21 : vector<64x256xf32>
    %c3 = arith.constant 3 : index
    %c0_23 = arith.constant 0 : index
    %c0_24 = arith.constant 0 : index
    %23 = vector.load %arg1[%c3, %c0_23, %c0_24] : memref<4x64x128xf32, #tpu.memory_space<vmem>>, vector<1x64x128xf32>
    %24 = vector.shape_cast %23 : vector<1x64x128xf32> to vector<64x128xf32>
    %cst_25 = arith.constant dense<0.000000e+00> : vector<64x192xf32>
    %25 = tpu.matmul %24, %0, %cst_25 {dimension_numbers = #tpu.dot_dimension_numbers<[1], [0], [0], [1], [0, 0, 1, 1], [], []>} : vector<64x128xf32>, vector<128x192xf32>, vector<64x192xf32> -> vector<64x192xf32>
    %c3_26 = arith.constant 3 : index
    %c0_27 = arith.constant 0 : index
    %c0_28 = arith.constant 0 : index
    %26 = vector.load %arg2[%c3_26, %c0_27, %c0_28] : memref<4x192x256xf32, #tpu.memory_space<vmem>>, vector<1x192x256xf32>
    %27 = vector.shape_cast %26 : vector<1x192x256xf32> to vector<192x256xf32>
    %cst_29 = arith.constant dense<0.000000e+00> : vector<64x256xf32>
    %28 = tpu.matmul %25, %27, %cst_29 {dimension_numbers = #tpu.dot_dimension_numbers<[1], [0], [0], [1], [0, 0, 1, 1], [], []>} : vector<64x192xf32>, vector<192x256xf32>, vector<64x256xf32> -> vector<64x256xf32>
    %29 = arith.addf %22, %28 : vector<64x256xf32>
    %cst_30 = arith.constant 0.000000e+00 : f32
    %30 = vector.broadcast %cst_30 : f32 to vector<64x256xf32>
    %31 = arith.cmpf ogt, %29, %30 : vector<64x256xf32>
    %cst_31 = arith.constant 2.000000e-01 : f32
    %32 = vector.broadcast %cst_31 : f32 to vector<64x256xf32>
    %33 = arith.mulf %32, %29 : vector<64x256xf32>
    %34 = arith.select %31, %29, %33 : vector<64x256xi1>, vector<64x256xf32>
    %cst_32 = arith.constant 0.000000e+00 : f32
    %35 = vector.broadcast %cst_32 : f32 to vector<32x256xf32>
    %c0_33 = arith.constant 0 : index
    %c0_34 = arith.constant 0 : index
    %c0_35 = arith.constant 0 : index
    %36 = vector.load %arg3[%c0_33, %c0_34, %c0_35] : memref<4x32x64xf32, #tpu.memory_space<vmem>>, vector<1x32x64xf32>
    %37 = vector.shape_cast %36 : vector<1x32x64xf32> to vector<32x64xf32>
    %cst_36 = arith.constant dense<0.000000e+00> : vector<32x256xf32>
    %38 = tpu.matmul %37, %34, %cst_36 {dimension_numbers = #tpu.dot_dimension_numbers<[1], [0], [0], [1], [0, 0, 1, 1], [], []>} : vector<32x64xf32>, vector<64x256xf32>, vector<32x256xf32> -> vector<32x256xf32>
    %c0_37 = arith.constant 0 : index
    %c0_38 = arith.constant 0 : index
    %c0_39 = arith.constant 0 : index
    %39 = vector.load %arg4[%c0_37, %c0_38, %c0_39] : memref<4x256x256xf32, #tpu.memory_space<vmem>>, vector<1x256x256xf32>
    %40 = vector.shape_cast %39 : vector<1x256x256xf32> to vector<256x256xf32>
    %cst_40 = arith.constant dense<0.000000e+00> : vector<32x256xf32>
    %41 = tpu.matmul %38, %40, %cst_40 {dimension_numbers = #tpu.dot_dimension_numbers<[1], [0], [0], [1], [0, 0, 1, 1], [], []>} : vector<32x256xf32>, vector<256x256xf32>, vector<32x256xf32> -> vector<32x256xf32>
    %42 = arith.addf %35, %41 : vector<32x256xf32>
    %c1_41 = arith.constant 1 : index
    %c0_42 = arith.constant 0 : index
    %c0_43 = arith.constant 0 : index
    %43 = vector.load %arg3[%c1_41, %c0_42, %c0_43] : memref<4x32x64xf32, #tpu.memory_space<vmem>>, vector<1x32x64xf32>
    %44 = vector.shape_cast %43 : vector<1x32x64xf32> to vector<32x64xf32>
    %cst_44 = arith.constant dense<0.000000e+00> : vector<32x256xf32>
    %45 = tpu.matmul %44, %34, %cst_44 {dimension_numbers = #tpu.dot_dimension_numbers<[1], [0], [0], [1], [0, 0, 1, 1], [], []>} : vector<32x64xf32>, vector<64x256xf32>, vector<32x256xf32> -> vector<32x256xf32>
    %c1_45 = arith.constant 1 : index
    %c0_46 = arith.constant 0 : index
    %c0_47 = arith.constant 0 : index
    %46 = vector.load %arg4[%c1_45, %c0_46, %c0_47] : memref<4x256x256xf32, #tpu.memory_space<vmem>>, vector<1x256x256xf32>
    %47 = vector.shape_cast %46 : vector<1x256x256xf32> to vector<256x256xf32>
    %cst_48 = arith.constant dense<0.000000e+00> : vector<32x256xf32>
    %48 = tpu.matmul %45, %47, %cst_48 {dimension_numbers = #tpu.dot_dimension_numbers<[1], [0], [0], [1], [0, 0, 1, 1], [], []>} : vector<32x256xf32>, vector<256x256xf32>, vector<32x256xf32> -> vector<32x256xf32>
    %49 = arith.addf %42, %48 : vector<32x256xf32>
    %c2_49 = arith.constant 2 : index
    %c0_50 = arith.constant 0 : index
    %c0_51 = arith.constant 0 : index
    %50 = vector.load %arg3[%c2_49, %c0_50, %c0_51] : memref<4x32x64xf32, #tpu.memory_space<vmem>>, vector<1x32x64xf32>
    %51 = vector.shape_cast %50 : vector<1x32x64xf32> to vector<32x64xf32>
    %cst_52 = arith.constant dense<0.000000e+00> : vector<32x256xf32>
    %52 = tpu.matmul %51, %34, %cst_52 {dimension_numbers = #tpu.dot_dimension_numbers<[1], [0], [0], [1], [0, 0, 1, 1], [], []>} : vector<32x64xf32>, vector<64x256xf32>, vector<32x256xf32> -> vector<32x256xf32>
    %c2_53 = arith.constant 2 : index
    %c0_54 = arith.constant 0 : index
    %c0_55 = arith.constant 0 : index
    %53 = vector.load %arg4[%c2_53, %c0_54, %c0_55] : memref<4x256x256xf32, #tpu.memory_space<vmem>>, vector<1x256x256xf32>
    %54 = vector.shape_cast %53 : vector<1x256x256xf32> to vector<256x256xf32>
    %cst_56 = arith.constant dense<0.000000e+00> : vector<32x256xf32>
    %55 = tpu.matmul %52, %54, %cst_56 {dimension_numbers = #tpu.dot_dimension_numbers<[1], [0], [0], [1], [0, 0, 1, 1], [], []>} : vector<32x256xf32>, vector<256x256xf32>, vector<32x256xf32> -> vector<32x256xf32>
    %56 = arith.addf %49, %55 : vector<32x256xf32>
    %c3_57 = arith.constant 3 : index
    %c0_58 = arith.constant 0 : index
    %c0_59 = arith.constant 0 : index
    %57 = vector.load %arg3[%c3_57, %c0_58, %c0_59] : memref<4x32x64xf32, #tpu.memory_space<vmem>>, vector<1x32x64xf32>
    %58 = vector.shape_cast %57 : vector<1x32x64xf32> to vector<32x64xf32>
    %cst_60 = arith.constant dense<0.000000e+00> : vector<32x256xf32>
    %59 = tpu.matmul %58, %34, %cst_60 {dimension_numbers = #tpu.dot_dimension_numbers<[1], [0], [0], [1], [0, 0, 1, 1], [], []>} : vector<32x64xf32>, vector<64x256xf32>, vector<32x256xf32> -> vector<32x256xf32>
    %c3_61 = arith.constant 3 : index
    %c0_62 = arith.constant 0 : index
    %c0_63 = arith.constant 0 : index
    %60 = vector.load %arg4[%c3_61, %c0_62, %c0_63] : memref<4x256x256xf32, #tpu.memory_space<vmem>>, vector<1x256x256xf32>
    %61 = vector.shape_cast %60 : vector<1x256x256xf32> to vector<256x256xf32>
    %cst_64 = arith.constant dense<0.000000e+00> : vector<32x256xf32>
    %62 = tpu.matmul %59, %61, %cst_64 {dimension_numbers = #tpu.dot_dimension_numbers<[1], [0], [0], [1], [0, 0, 1, 1], [], []>} : vector<32x256xf32>, vector<256x256xf32>, vector<32x256xf32> -> vector<32x256xf32>
    %63 = arith.addf %56, %62 : vector<32x256xf32>
    %c0_65 = arith.constant 0 : index
    %c0_66 = arith.constant 0 : index
    %64 = vector.load %arg13[%c0_65, %c0_66] : memref<1x16xf32, #tpu.memory_space<vmem>>, vector<1x16xf32>
    %c0_67 = arith.constant 0 : index
    %c0_68 = arith.constant 0 : index
    %65 = vector.load %arg14[%c0_67, %c0_68] : memref<1x16xf32, #tpu.memory_space<vmem>>, vector<1x16xf32>
    %c0_69 = arith.constant 0 : index
    %c0_70 = arith.constant 0 : index
    %66 = vector.load %arg15[%c0_69, %c0_70] : memref<256x16xf32, #tpu.memory_space<vmem>>, vector<256x16xf32>
    %c0_71 = arith.constant 0 : index
    %c0_72 = arith.constant 0 : index
    %67 = vector.load %arg16[%c0_71, %c0_72] : memref<16x256xf32, #tpu.memory_space<vmem>>, vector<16x256xf32>
    %cst_73 = arith.constant dense<0.000000e+00> : vector<256xf32>
    %68 = vector.multi_reduction <add>, %63, %cst_73 [0] : vector<32x256xf32> to vector<256xf32>
    %69 = vector.shape_cast %68 : vector<256xf32> to vector<1x256xf32>
    %cst_74 = arith.constant dense<0.000000e+00> : vector<1x16xf32>
    %70 = tpu.matmul %69, %66, %cst_74 {dimension_numbers = #tpu.dot_dimension_numbers<[1], [0], [0], [1], [0, 0, 1, 1], [], []>} : vector<1x256xf32>, vector<256x16xf32>, vector<1x16xf32> -> vector<1x16xf32>
    %cst_75 = arith.constant 5.120000e+02 : f32
    %71 = vector.broadcast %cst_75 : f32 to vector<1x16xf32>
    %72 = arith.divf %70, %71 : vector<1x16xf32>
    %cst_76 = arith.constant dense<0.000000e+00> : vector<1x256xf32>
    %73 = tpu.matmul %72, %67, %cst_76 {dimension_numbers = #tpu.dot_dimension_numbers<[1], [0], [0], [1], [0, 0, 1, 1], [], []>} : vector<1x16xf32>, vector<16x256xf32>, vector<1x256xf32> -> vector<1x256xf32>
    %74 = vector.broadcast %73 : vector<1x256xf32> to vector<32x256xf32>
    %75 = arith.subf %63, %74 : vector<32x256xf32>
    %76 = arith.mulf %75, %75 : vector<32x256xf32>
    %cst_77 = arith.constant dense<0.000000e+00> : vector<256xf32>
    %77 = vector.multi_reduction <add>, %76, %cst_77 [0] : vector<32x256xf32> to vector<256xf32>
    %78 = vector.shape_cast %77 : vector<256xf32> to vector<1x256xf32>
    %cst_78 = arith.constant dense<0.000000e+00> : vector<1x16xf32>
    %79 = tpu.matmul %78, %66, %cst_78 {dimension_numbers = #tpu.dot_dimension_numbers<[1], [0], [0], [1], [0, 0, 1, 1], [], []>} : vector<1x256xf32>, vector<256x16xf32>, vector<1x16xf32> -> vector<1x16xf32>
    %cst_79 = arith.constant 5.120000e+02 : f32
    %80 = vector.broadcast %cst_79 : f32 to vector<1x16xf32>
    %81 = arith.divf %79, %80 : vector<1x16xf32>
    %cst_80 = arith.constant 9.99999974E-6 : f32
    %82 = vector.broadcast %cst_80 : f32 to vector<1x16xf32>
    %83 = arith.addf %81, %82 : vector<1x16xf32>
    %84 = math.rsqrt %83 : vector<1x16xf32>
    %85 = arith.mulf %64, %84 : vector<1x16xf32>
    %cst_81 = arith.constant dense<0.000000e+00> : vector<1x256xf32>
    %86 = tpu.matmul %85, %67, %cst_81 {dimension_numbers = #tpu.dot_dimension_numbers<[1], [0], [0], [1], [0, 0, 1, 1], [], []>} : vector<1x16xf32>, vector<16x256xf32>, vector<1x256xf32> -> vector<1x256xf32>
    %87 = vector.broadcast %86 : vector<1x256xf32> to vector<32x256xf32>
    %88 = arith.mulf %75, %87 : vector<32x256xf32>
    %cst_82 = arith.constant dense<0.000000e+00> : vector<1x256xf32>
    %89 = tpu.matmul %65, %67, %cst_82 {dimension_numbers = #tpu.dot_dimension_numbers<[1], [0], [0], [1], [0, 0, 1, 1], [], []>} : vector<1x16xf32>, vector<16x256xf32>, vector<1x256xf32> -> vector<1x256xf32>
    %90 = vector.broadcast %89 : vector<1x256xf32> to vector<32x256xf32>
    %91 = arith.addf %88, %90 : vector<32x256xf32>
    %cst_83 = arith.constant 0.000000e+00 : f32
    %92 = vector.broadcast %cst_83 : f32 to vector<32x256xf32>
    %93 = arith.cmpf ogt, %91, %92 : vector<32x256xf32>
    %cst_84 = arith.constant 2.000000e-01 : f32
    %94 = vector.broadcast %cst_84 : f32 to vector<32x256xf32>
    %95 = arith.mulf %94, %91 : vector<32x256xf32>
    %96 = arith.select %93, %91, %95 : vector<32x256xi1>, vector<32x256xf32>
    %cst_85 = arith.constant 0.000000e+00 : f32
    %97 = vector.broadcast %cst_85 : f32 to vector<16x256xf32>
    %c0_86 = arith.constant 0 : index
    %c0_87 = arith.constant 0 : index
    %c0_88 = arith.constant 0 : index
    %98 = vector.load %arg5[%c0_86, %c0_87, %c0_88] : memref<4x16x32xf32, #tpu.memory_space<vmem>>, vector<1x16x32xf32>
    %99 = vector.shape_cast %98 : vector<1x16x32xf32> to vector<16x32xf32>
    %cst_89 = arith.constant dense<0.000000e+00> : vector<16x256xf32>
    %100 = tpu.matmul %99, %96, %cst_89 {dimension_numbers = #tpu.dot_dimension_numbers<[1], [0], [0], [1], [0, 0, 1, 1], [], []>} : vector<16x32xf32>, vector<32x256xf32>, vector<16x256xf32> -> vector<16x256xf32>
    %c0_90 = arith.constant 0 : index
    %c0_91 = arith.constant 0 : index
    %c0_92 = arith.constant 0 : index
    %101 = vector.load %arg6[%c0_90, %c0_91, %c0_92] : memref<4x256x256xf32, #tpu.memory_space<vmem>>, vector<1x256x256xf32>
    %102 = vector.shape_cast %101 : vector<1x256x256xf32> to vector<256x256xf32>
    %cst_93 = arith.constant dense<0.000000e+00> : vector<16x256xf32>
    %103 = tpu.matmul %100, %102, %cst_93 {dimension_numbers = #tpu.dot_dimension_numbers<[1], [0], [0], [1], [0, 0, 1, 1], [], []>} : vector<16x256xf32>, vector<256x256xf32>, vector<16x256xf32> -> vector<16x256xf32>
    %104 = arith.addf %97, %103 : vector<16x256xf32>
    %c1_94 = arith.constant 1 : index
    %c0_95 = arith.constant 0 : index
    %c0_96 = arith.constant 0 : index
    %105 = vector.load %arg5[%c1_94, %c0_95, %c0_96] : memref<4x16x32xf32, #tpu.memory_space<vmem>>, vector<1x16x32xf32>
    %106 = vector.shape_cast %105 : vector<1x16x32xf32> to vector<16x32xf32>
    %cst_97 = arith.constant dense<0.000000e+00> : vector<16x256xf32>
    %107 = tpu.matmul %106, %96, %cst_97 {dimension_numbers = #tpu.dot_dimension_numbers<[1], [0], [0], [1], [0, 0, 1, 1], [], []>} : vector<16x32xf32>, vector<32x256xf32>, vector<16x256xf32> -> vector<16x256xf32>
    %c1_98 = arith.constant 1 : index
    %c0_99 = arith.constant 0 : index
    %c0_100 = arith.constant 0 : index
    %108 = vector.load %arg6[%c1_98, %c0_99, %c0_100] : memref<4x256x256xf32, #tpu.memory_space<vmem>>, vector<1x256x256xf32>
    %109 = vector.shape_cast %108 : vector<1x256x256xf32> to vector<256x256xf32>
    %cst_101 = arith.constant dense<0.000000e+00> : vector<16x256xf32>
    %110 = tpu.matmul %107, %109, %cst_101 {dimension_numbers = #tpu.dot_dimension_numbers<[1], [0], [0], [1], [0, 0, 1, 1], [], []>} : vector<16x256xf32>, vector<256x256xf32>, vector<16x256xf32> -> vector<16x256xf32>
    %111 = arith.addf %104, %110 : vector<16x256xf32>
    %c2_102 = arith.constant 2 : index
    %c0_103 = arith.constant 0 : index
    %c0_104 = arith.constant 0 : index
    %112 = vector.load %arg5[%c2_102, %c0_103, %c0_104] : memref<4x16x32xf32, #tpu.memory_space<vmem>>, vector<1x16x32xf32>
    %113 = vector.shape_cast %112 : vector<1x16x32xf32> to vector<16x32xf32>
    %cst_105 = arith.constant dense<0.000000e+00> : vector<16x256xf32>
    %114 = tpu.matmul %113, %96, %cst_105 {dimension_numbers = #tpu.dot_dimension_numbers<[1], [0], [0], [1], [0, 0, 1, 1], [], []>} : vector<16x32xf32>, vector<32x256xf32>, vector<16x256xf32> -> vector<16x256xf32>
    %c2_106 = arith.constant 2 : index
    %c0_107 = arith.constant 0 : index
    %c0_108 = arith.constant 0 : index
    %115 = vector.load %arg6[%c2_106, %c0_107, %c0_108] : memref<4x256x256xf32, #tpu.memory_space<vmem>>, vector<1x256x256xf32>
    %116 = vector.shape_cast %115 : vector<1x256x256xf32> to vector<256x256xf32>
    %cst_109 = arith.constant dense<0.000000e+00> : vector<16x256xf32>
    %117 = tpu.matmul %114, %116, %cst_109 {dimension_numbers = #tpu.dot_dimension_numbers<[1], [0], [0], [1], [0, 0, 1, 1], [], []>} : vector<16x256xf32>, vector<256x256xf32>, vector<16x256xf32> -> vector<16x256xf32>
    %118 = arith.addf %111, %117 : vector<16x256xf32>
    %c3_110 = arith.constant 3 : index
    %c0_111 = arith.constant 0 : index
    %c0_112 = arith.constant 0 : index
    %119 = vector.load %arg5[%c3_110, %c0_111, %c0_112] : memref<4x16x32xf32, #tpu.memory_space<vmem>>, vector<1x16x32xf32>
    %120 = vector.shape_cast %119 : vector<1x16x32xf32> to vector<16x32xf32>
    %cst_113 = arith.constant dense<0.000000e+00> : vector<16x256xf32>
    %121 = tpu.matmul %120, %96, %cst_113 {dimension_numbers = #tpu.dot_dimension_numbers<[1], [0], [0], [1], [0, 0, 1, 1], [], []>} : vector<16x32xf32>, vector<32x256xf32>, vector<16x256xf32> -> vector<16x256xf32>
    %c3_114 = arith.constant 3 : index
    %c0_115 = arith.constant 0 : index
    %c0_116 = arith.constant 0 : index
    %122 = vector.load %arg6[%c3_114, %c0_115, %c0_116] : memref<4x256x256xf32, #tpu.memory_space<vmem>>, vector<1x256x256xf32>
    %123 = vector.shape_cast %122 : vector<1x256x256xf32> to vector<256x256xf32>
    %cst_117 = arith.constant dense<0.000000e+00> : vector<16x256xf32>
    %124 = tpu.matmul %121, %123, %cst_117 {dimension_numbers = #tpu.dot_dimension_numbers<[1], [0], [0], [1], [0, 0, 1, 1], [], []>} : vector<16x256xf32>, vector<256x256xf32>, vector<16x256xf32> -> vector<16x256xf32>
    %125 = arith.addf %118, %124 : vector<16x256xf32>
    %c0_118 = arith.constant 0 : index
    %c0_119 = arith.constant 0 : index
    %126 = vector.load %arg17[%c0_118, %c0_119] : memref<1x32xf32, #tpu.memory_space<vmem>>, vector<1x32xf32>
    %c0_120 = arith.constant 0 : index
    %c0_121 = arith.constant 0 : index
    %127 = vector.load %arg18[%c0_120, %c0_121] : memref<1x32xf32, #tpu.memory_space<vmem>>, vector<1x32xf32>
    %c0_122 = arith.constant 0 : index
    %c0_123 = arith.constant 0 : index
    %128 = vector.load %arg19[%c0_122, %c0_123] : memref<256x32xf32, #tpu.memory_space<vmem>>, vector<256x32xf32>
    %c0_124 = arith.constant 0 : index
    %c0_125 = arith.constant 0 : index
    %129 = vector.load %arg20[%c0_124, %c0_125] : memref<32x256xf32, #tpu.memory_space<vmem>>, vector<32x256xf32>
    %cst_126 = arith.constant dense<0.000000e+00> : vector<256xf32>
    %130 = vector.multi_reduction <add>, %125, %cst_126 [0] : vector<16x256xf32> to vector<256xf32>
    %131 = vector.shape_cast %130 : vector<256xf32> to vector<1x256xf32>
    %cst_127 = arith.constant dense<0.000000e+00> : vector<1x32xf32>
    %132 = tpu.matmul %131, %128, %cst_127 {dimension_numbers = #tpu.dot_dimension_numbers<[1], [0], [0], [1], [0, 0, 1, 1], [], []>} : vector<1x256xf32>, vector<256x32xf32>, vector<1x32xf32> -> vector<1x32xf32>
    %cst_128 = arith.constant 1.280000e+02 : f32
    %133 = vector.broadcast %cst_128 : f32 to vector<1x32xf32>
    %134 = arith.divf %132, %133 : vector<1x32xf32>
    %cst_129 = arith.constant dense<0.000000e+00> : vector<1x256xf32>
    %135 = tpu.matmul %134, %129, %cst_129 {dimension_numbers = #tpu.dot_dimension_numbers<[1], [0], [0], [1], [0, 0, 1, 1], [], []>} : vector<1x32xf32>, vector<32x256xf32>, vector<1x256xf32> -> vector<1x256xf32>
    %136 = vector.broadcast %135 : vector<1x256xf32> to vector<16x256xf32>
    %137 = arith.subf %125, %136 : vector<16x256xf32>
    %138 = arith.mulf %137, %137 : vector<16x256xf32>
    %cst_130 = arith.constant dense<0.000000e+00> : vector<256xf32>
    %139 = vector.multi_reduction <add>, %138, %cst_130 [0] : vector<16x256xf32> to vector<256xf32>
    %140 = vector.shape_cast %139 : vector<256xf32> to vector<1x256xf32>
    %cst_131 = arith.constant dense<0.000000e+00> : vector<1x32xf32>
    %141 = tpu.matmul %140, %128, %cst_131 {dimension_numbers = #tpu.dot_dimension_numbers<[1], [0], [0], [1], [0, 0, 1, 1], [], []>} : vector<1x256xf32>, vector<256x32xf32>, vector<1x32xf32> -> vector<1x32xf32>
    %cst_132 = arith.constant 1.280000e+02 : f32
    %142 = vector.broadcast %cst_132 : f32 to vector<1x32xf32>
    %143 = arith.divf %141, %142 : vector<1x32xf32>
    %cst_133 = arith.constant 9.99999974E-6 : f32
    %144 = vector.broadcast %cst_133 : f32 to vector<1x32xf32>
    %145 = arith.addf %143, %144 : vector<1x32xf32>
    %146 = math.rsqrt %145 : vector<1x32xf32>
    %147 = arith.mulf %126, %146 : vector<1x32xf32>
    %cst_134 = arith.constant dense<0.000000e+00> : vector<1x256xf32>
    %148 = tpu.matmul %147, %129, %cst_134 {dimension_numbers = #tpu.dot_dimension_numbers<[1], [0], [0], [1], [0, 0, 1, 1], [], []>} : vector<1x32xf32>, vector<32x256xf32>, vector<1x256xf32> -> vector<1x256xf32>
    %149 = vector.broadcast %148 : vector<1x256xf32> to vector<16x256xf32>
    %150 = arith.mulf %137, %149 : vector<16x256xf32>
    %cst_135 = arith.constant dense<0.000000e+00> : vector<1x256xf32>
    %151 = tpu.matmul %127, %129, %cst_135 {dimension_numbers = #tpu.dot_dimension_numbers<[1], [0], [0], [1], [0, 0, 1, 1], [], []>} : vector<1x32xf32>, vector<32x256xf32>, vector<1x256xf32> -> vector<1x256xf32>
    %152 = vector.broadcast %151 : vector<1x256xf32> to vector<16x256xf32>
    %153 = arith.addf %150, %152 : vector<16x256xf32>
    %cst_136 = arith.constant 0.000000e+00 : f32
    %154 = vector.broadcast %cst_136 : f32 to vector<16x256xf32>
    %155 = arith.cmpf ogt, %153, %154 : vector<16x256xf32>
    %cst_137 = arith.constant 2.000000e-01 : f32
    %156 = vector.broadcast %cst_137 : f32 to vector<16x256xf32>
    %157 = arith.mulf %156, %153 : vector<16x256xf32>
    %158 = arith.select %155, %153, %157 : vector<16x256xi1>, vector<16x256xf32>
    %cst_138 = arith.constant 0.000000e+00 : f32
    %159 = vector.broadcast %cst_138 : f32 to vector<8x256xf32>
    %c0_139 = arith.constant 0 : index
    %c0_140 = arith.constant 0 : index
    %c0_141 = arith.constant 0 : index
    %160 = vector.load %arg7[%c0_139, %c0_140, %c0_141] : memref<4x8x16xf32, #tpu.memory_space<vmem>>, vector<1x8x16xf32>
    %161 = vector.shape_cast %160 : vector<1x8x16xf32> to vector<8x16xf32>
    %cst_142 = arith.constant dense<0.000000e+00> : vector<8x256xf32>
    %162 = tpu.matmul %161, %158, %cst_142 {dimension_numbers = #tpu.dot_dimension_numbers<[1], [0], [0], [1], [0, 0, 1, 1], [], []>} : vector<8x16xf32>, vector<16x256xf32>, vector<8x256xf32> -> vector<8x256xf32>
    %c0_143 = arith.constant 0 : index
    %c0_144 = arith.constant 0 : index
    %c0_145 = arith.constant 0 : index
    %163 = vector.load %arg8[%c0_143, %c0_144, %c0_145] : memref<4x256x256xf32, #tpu.memory_space<vmem>>, vector<1x256x256xf32>
    %164 = vector.shape_cast %163 : vector<1x256x256xf32> to vector<256x256xf32>
    %cst_146 = arith.constant dense<0.000000e+00> : vector<8x256xf32>
    %165 = tpu.matmul %162, %164, %cst_146 {dimension_numbers = #tpu.dot_dimension_numbers<[1], [0], [0], [1], [0, 0, 1, 1], [], []>} : vector<8x256xf32>, vector<256x256xf32>, vector<8x256xf32> -> vector<8x256xf32>
    %166 = arith.addf %159, %165 : vector<8x256xf32>
    %c1_147 = arith.constant 1 : index
    %c0_148 = arith.constant 0 : index
    %c0_149 = arith.constant 0 : index
    %167 = vector.load %arg7[%c1_147, %c0_148, %c0_149] : memref<4x8x16xf32, #tpu.memory_space<vmem>>, vector<1x8x16xf32>
    %168 = vector.shape_cast %167 : vector<1x8x16xf32> to vector<8x16xf32>
    %cst_150 = arith.constant dense<0.000000e+00> : vector<8x256xf32>
    %169 = tpu.matmul %168, %158, %cst_150 {dimension_numbers = #tpu.dot_dimension_numbers<[1], [0], [0], [1], [0, 0, 1, 1], [], []>} : vector<8x16xf32>, vector<16x256xf32>, vector<8x256xf32> -> vector<8x256xf32>
    %c1_151 = arith.constant 1 : index
    %c0_152 = arith.constant 0 : index
    %c0_153 = arith.constant 0 : index
    %170 = vector.load %arg8[%c1_151, %c0_152, %c0_153] : memref<4x256x256xf32, #tpu.memory_space<vmem>>, vector<1x256x256xf32>
    %171 = vector.shape_cast %170 : vector<1x256x256xf32> to vector<256x256xf32>
    %cst_154 = arith.constant dense<0.000000e+00> : vector<8x256xf32>
    %172 = tpu.matmul %169, %171, %cst_154 {dimension_numbers = #tpu.dot_dimension_numbers<[1], [0], [0], [1], [0, 0, 1, 1], [], []>} : vector<8x256xf32>, vector<256x256xf32>, vector<8x256xf32> -> vector<8x256xf32>
    %173 = arith.addf %166, %172 : vector<8x256xf32>
    %c2_155 = arith.constant 2 : index
    %c0_156 = arith.constant 0 : index
    %c0_157 = arith.constant 0 : index
    %174 = vector.load %arg7[%c2_155, %c0_156, %c0_157] : memref<4x8x16xf32, #tpu.memory_space<vmem>>, vector<1x8x16xf32>
    %175 = vector.shape_cast %174 : vector<1x8x16xf32> to vector<8x16xf32>
    %cst_158 = arith.constant dense<0.000000e+00> : vector<8x256xf32>
    %176 = tpu.matmul %175, %158, %cst_158 {dimension_numbers = #tpu.dot_dimension_numbers<[1], [0], [0], [1], [0, 0, 1, 1], [], []>} : vector<8x16xf32>, vector<16x256xf32>, vector<8x256xf32> -> vector<8x256xf32>
    %c2_159 = arith.constant 2 : index
    %c0_160 = arith.constant 0 : index
    %c0_161 = arith.constant 0 : index
    %177 = vector.load %arg8[%c2_159, %c0_160, %c0_161] : memref<4x256x256xf32, #tpu.memory_space<vmem>>, vector<1x256x256xf32>
    %178 = vector.shape_cast %177 : vector<1x256x256xf32> to vector<256x256xf32>
    %cst_162 = arith.constant dense<0.000000e+00> : vector<8x256xf32>
    %179 = tpu.matmul %176, %178, %cst_162 {dimension_numbers = #tpu.dot_dimension_numbers<[1], [0], [0], [1], [0, 0, 1, 1], [], []>} : vector<8x256xf32>, vector<256x256xf32>, vector<8x256xf32> -> vector<8x256xf32>
    %180 = arith.addf %173, %179 : vector<8x256xf32>
    %c3_163 = arith.constant 3 : index
    %c0_164 = arith.constant 0 : index
    %c0_165 = arith.constant 0 : index
    %181 = vector.load %arg7[%c3_163, %c0_164, %c0_165] : memref<4x8x16xf32, #tpu.memory_space<vmem>>, vector<1x8x16xf32>
    %182 = vector.shape_cast %181 : vector<1x8x16xf32> to vector<8x16xf32>
    %cst_166 = arith.constant dense<0.000000e+00> : vector<8x256xf32>
    %183 = tpu.matmul %182, %158, %cst_166 {dimension_numbers = #tpu.dot_dimension_numbers<[1], [0], [0], [1], [0, 0, 1, 1], [], []>} : vector<8x16xf32>, vector<16x256xf32>, vector<8x256xf32> -> vector<8x256xf32>
    %c3_167 = arith.constant 3 : index
    %c0_168 = arith.constant 0 : index
    %c0_169 = arith.constant 0 : index
    %184 = vector.load %arg8[%c3_167, %c0_168, %c0_169] : memref<4x256x256xf32, #tpu.memory_space<vmem>>, vector<1x256x256xf32>
    %185 = vector.shape_cast %184 : vector<1x256x256xf32> to vector<256x256xf32>
    %cst_170 = arith.constant dense<0.000000e+00> : vector<8x256xf32>
    %186 = tpu.matmul %183, %185, %cst_170 {dimension_numbers = #tpu.dot_dimension_numbers<[1], [0], [0], [1], [0, 0, 1, 1], [], []>} : vector<8x256xf32>, vector<256x256xf32>, vector<8x256xf32> -> vector<8x256xf32>
    %187 = arith.addf %180, %186 : vector<8x256xf32>
    %c0_171 = arith.constant 0 : index
    %c0_172 = arith.constant 0 : index
    %188 = vector.load %arg21[%c0_171, %c0_172] : memref<1x64xf32, #tpu.memory_space<vmem>>, vector<1x64xf32>
    %c0_173 = arith.constant 0 : index
    %c0_174 = arith.constant 0 : index
    %189 = vector.load %arg22[%c0_173, %c0_174] : memref<1x64xf32, #tpu.memory_space<vmem>>, vector<1x64xf32>
    %c0_175 = arith.constant 0 : index
    %c0_176 = arith.constant 0 : index
    %190 = vector.load %arg23[%c0_175, %c0_176] : memref<256x64xf32, #tpu.memory_space<vmem>>, vector<256x64xf32>
    %c0_177 = arith.constant 0 : index
    %c0_178 = arith.constant 0 : index
    %191 = vector.load %arg24[%c0_177, %c0_178] : memref<64x256xf32, #tpu.memory_space<vmem>>, vector<64x256xf32>
    %cst_179 = arith.constant dense<0.000000e+00> : vector<256xf32>
    %192 = vector.multi_reduction <add>, %187, %cst_179 [0] : vector<8x256xf32> to vector<256xf32>
    %193 = vector.shape_cast %192 : vector<256xf32> to vector<1x256xf32>
    %cst_180 = arith.constant dense<0.000000e+00> : vector<1x64xf32>
    %194 = tpu.matmul %193, %190, %cst_180 {dimension_numbers = #tpu.dot_dimension_numbers<[1], [0], [0], [1], [0, 0, 1, 1], [], []>} : vector<1x256xf32>, vector<256x64xf32>, vector<1x64xf32> -> vector<1x64xf32>
    %cst_181 = arith.constant 3.200000e+01 : f32
    %195 = vector.broadcast %cst_181 : f32 to vector<1x64xf32>
    %196 = arith.divf %194, %195 : vector<1x64xf32>
    %cst_182 = arith.constant dense<0.000000e+00> : vector<1x256xf32>
    %197 = tpu.matmul %196, %191, %cst_182 {dimension_numbers = #tpu.dot_dimension_numbers<[1], [0], [0], [1], [0, 0, 1, 1], [], []>} : vector<1x64xf32>, vector<64x256xf32>, vector<1x256xf32> -> vector<1x256xf32>
    %198 = vector.broadcast %197 : vector<1x256xf32> to vector<8x256xf32>
    %199 = arith.subf %187, %198 : vector<8x256xf32>
    %200 = arith.mulf %199, %199 : vector<8x256xf32>
    %cst_183 = arith.constant dense<0.000000e+00> : vector<256xf32>
    %201 = vector.multi_reduction <add>, %200, %cst_183 [0] : vector<8x256xf32> to vector<256xf32>
    %202 = vector.shape_cast %201 : vector<256xf32> to vector<1x256xf32>
    %cst_184 = arith.constant dense<0.000000e+00> : vector<1x64xf32>
    %203 = tpu.matmul %202, %190, %cst_184 {dimension_numbers = #tpu.dot_dimension_numbers<[1], [0], [0], [1], [0, 0, 1, 1], [], []>} : vector<1x256xf32>, vector<256x64xf32>, vector<1x64xf32> -> vector<1x64xf32>
    %cst_185 = arith.constant 3.200000e+01 : f32
    %204 = vector.broadcast %cst_185 : f32 to vector<1x64xf32>
    %205 = arith.divf %203, %204 : vector<1x64xf32>
    %cst_186 = arith.constant 9.99999974E-6 : f32
    %206 = vector.broadcast %cst_186 : f32 to vector<1x64xf32>
    %207 = arith.addf %205, %206 : vector<1x64xf32>
    %208 = math.rsqrt %207 : vector<1x64xf32>
    %209 = arith.mulf %188, %208 : vector<1x64xf32>
    %cst_187 = arith.constant dense<0.000000e+00> : vector<1x256xf32>
    %210 = tpu.matmul %209, %191, %cst_187 {dimension_numbers = #tpu.dot_dimension_numbers<[1], [0], [0], [1], [0, 0, 1, 1], [], []>} : vector<1x64xf32>, vector<64x256xf32>, vector<1x256xf32> -> vector<1x256xf32>
    %211 = vector.broadcast %210 : vector<1x256xf32> to vector<8x256xf32>
    %212 = arith.mulf %199, %211 : vector<8x256xf32>
    %cst_188 = arith.constant dense<0.000000e+00> : vector<1x256xf32>
    %213 = tpu.matmul %189, %191, %cst_188 {dimension_numbers = #tpu.dot_dimension_numbers<[1], [0], [0], [1], [0, 0, 1, 1], [], []>} : vector<1x64xf32>, vector<64x256xf32>, vector<1x256xf32> -> vector<1x256xf32>
    %214 = vector.broadcast %213 : vector<1x256xf32> to vector<8x256xf32>
    %215 = arith.addf %212, %214 : vector<8x256xf32>
    %cst_189 = arith.constant 0.000000e+00 : f32
    %216 = vector.broadcast %cst_189 : f32 to vector<8x256xf32>
    %217 = arith.cmpf ogt, %215, %216 : vector<8x256xf32>
    %cst_190 = arith.constant 2.000000e-01 : f32
    %218 = vector.broadcast %cst_190 : f32 to vector<8x256xf32>
    %219 = arith.mulf %218, %215 : vector<8x256xf32>
    %220 = arith.select %217, %215, %219 : vector<8x256xi1>, vector<8x256xf32>
    %cst_191 = arith.constant 0.000000e+00 : f32
    %221 = vector.broadcast %cst_191 : f32 to vector<4x128xf32>
    %c0_192 = arith.constant 0 : index
    %c0_193 = arith.constant 0 : index
    %c0_194 = arith.constant 0 : index
    %222 = vector.load %arg9[%c0_192, %c0_193, %c0_194] : memref<4x4x8xf32, #tpu.memory_space<vmem>>, vector<1x4x8xf32>
    %223 = vector.shape_cast %222 : vector<1x4x8xf32> to vector<4x8xf32>
    %cst_195 = arith.constant dense<0.000000e+00> : vector<4x256xf32>
    %224 = tpu.matmul %223, %220, %cst_195 {dimension_numbers = #tpu.dot_dimension_numbers<[1], [0], [0], [1], [0, 0, 1, 1], [], []>} : vector<4x8xf32>, vector<8x256xf32>, vector<4x256xf32> -> vector<4x256xf32>
    %c0_196 = arith.constant 0 : index
    %c0_197 = arith.constant 0 : index
    %c0_198 = arith.constant 0 : index
    %225 = vector.load %arg10[%c0_196, %c0_197, %c0_198] : memref<4x256x128xf32, #tpu.memory_space<vmem>>, vector<1x256x128xf32>
    %226 = vector.shape_cast %225 : vector<1x256x128xf32> to vector<256x128xf32>
    %cst_199 = arith.constant dense<0.000000e+00> : vector<4x128xf32>
    %227 = tpu.matmul %224, %226, %cst_199 {dimension_numbers = #tpu.dot_dimension_numbers<[1], [0], [0], [1], [0, 0, 1, 1], [], []>} : vector<4x256xf32>, vector<256x128xf32>, vector<4x128xf32> -> vector<4x128xf32>
    %228 = arith.addf %221, %227 : vector<4x128xf32>
    %c1_200 = arith.constant 1 : index
    %c0_201 = arith.constant 0 : index
    %c0_202 = arith.constant 0 : index
    %229 = vector.load %arg9[%c1_200, %c0_201, %c0_202] : memref<4x4x8xf32, #tpu.memory_space<vmem>>, vector<1x4x8xf32>
    %230 = vector.shape_cast %229 : vector<1x4x8xf32> to vector<4x8xf32>
    %cst_203 = arith.constant dense<0.000000e+00> : vector<4x256xf32>
    %231 = tpu.matmul %230, %220, %cst_203 {dimension_numbers = #tpu.dot_dimension_numbers<[1], [0], [0], [1], [0, 0, 1, 1], [], []>} : vector<4x8xf32>, vector<8x256xf32>, vector<4x256xf32> -> vector<4x256xf32>
    %c1_204 = arith.constant 1 : index
    %c0_205 = arith.constant 0 : index
    %c0_206 = arith.constant 0 : index
    %232 = vector.load %arg10[%c1_204, %c0_205, %c0_206] : memref<4x256x128xf32, #tpu.memory_space<vmem>>, vector<1x256x128xf32>
    %233 = vector.shape_cast %232 : vector<1x256x128xf32> to vector<256x128xf32>
    %cst_207 = arith.constant dense<0.000000e+00> : vector<4x128xf32>
    %234 = tpu.matmul %231, %233, %cst_207 {dimension_numbers = #tpu.dot_dimension_numbers<[1], [0], [0], [1], [0, 0, 1, 1], [], []>} : vector<4x256xf32>, vector<256x128xf32>, vector<4x128xf32> -> vector<4x128xf32>
    %235 = arith.addf %228, %234 : vector<4x128xf32>
    %c2_208 = arith.constant 2 : index
    %c0_209 = arith.constant 0 : index
    %c0_210 = arith.constant 0 : index
    %236 = vector.load %arg9[%c2_208, %c0_209, %c0_210] : memref<4x4x8xf32, #tpu.memory_space<vmem>>, vector<1x4x8xf32>
    %237 = vector.shape_cast %236 : vector<1x4x8xf32> to vector<4x8xf32>
    %cst_211 = arith.constant dense<0.000000e+00> : vector<4x256xf32>
    %238 = tpu.matmul %237, %220, %cst_211 {dimension_numbers = #tpu.dot_dimension_numbers<[1], [0], [0], [1], [0, 0, 1, 1], [], []>} : vector<4x8xf32>, vector<8x256xf32>, vector<4x256xf32> -> vector<4x256xf32>
    %c2_212 = arith.constant 2 : index
    %c0_213 = arith.constant 0 : index
    %c0_214 = arith.constant 0 : index
    %239 = vector.load %arg10[%c2_212, %c0_213, %c0_214] : memref<4x256x128xf32, #tpu.memory_space<vmem>>, vector<1x256x128xf32>
    %240 = vector.shape_cast %239 : vector<1x256x128xf32> to vector<256x128xf32>
    %cst_215 = arith.constant dense<0.000000e+00> : vector<4x128xf32>
    %241 = tpu.matmul %238, %240, %cst_215 {dimension_numbers = #tpu.dot_dimension_numbers<[1], [0], [0], [1], [0, 0, 1, 1], [], []>} : vector<4x256xf32>, vector<256x128xf32>, vector<4x128xf32> -> vector<4x128xf32>
    %242 = arith.addf %235, %241 : vector<4x128xf32>
    %c3_216 = arith.constant 3 : index
    %c0_217 = arith.constant 0 : index
    %c0_218 = arith.constant 0 : index
    %243 = vector.load %arg9[%c3_216, %c0_217, %c0_218] : memref<4x4x8xf32, #tpu.memory_space<vmem>>, vector<1x4x8xf32>
    %244 = vector.shape_cast %243 : vector<1x4x8xf32> to vector<4x8xf32>
    %cst_219 = arith.constant dense<0.000000e+00> : vector<4x256xf32>
    %245 = tpu.matmul %244, %220, %cst_219 {dimension_numbers = #tpu.dot_dimension_numbers<[1], [0], [0], [1], [0, 0, 1, 1], [], []>} : vector<4x8xf32>, vector<8x256xf32>, vector<4x256xf32> -> vector<4x256xf32>
    %c3_220 = arith.constant 3 : index
    %c0_221 = arith.constant 0 : index
    %c0_222 = arith.constant 0 : index
    %246 = vector.load %arg10[%c3_220, %c0_221, %c0_222] : memref<4x256x128xf32, #tpu.memory_space<vmem>>, vector<1x256x128xf32>
    %247 = vector.shape_cast %246 : vector<1x256x128xf32> to vector<256x128xf32>
    %cst_223 = arith.constant dense<0.000000e+00> : vector<4x128xf32>
    %248 = tpu.matmul %245, %247, %cst_223 {dimension_numbers = #tpu.dot_dimension_numbers<[1], [0], [0], [1], [0, 0, 1, 1], [], []>} : vector<4x256xf32>, vector<256x128xf32>, vector<4x128xf32> -> vector<4x128xf32>
    %249 = arith.addf %242, %248 : vector<4x128xf32>
    %c0_224 = arith.constant 0 : index
    %c0_225 = arith.constant 0 : index
    %250 = vector.load %arg25[%c0_224, %c0_225] : memref<1x64xf32, #tpu.memory_space<vmem>>, vector<1x64xf32>
    %c0_226 = arith.constant 0 : index
    %c0_227 = arith.constant 0 : index
    %251 = vector.load %arg26[%c0_226, %c0_227] : memref<1x64xf32, #tpu.memory_space<vmem>>, vector<1x64xf32>
    %c0_228 = arith.constant 0 : index
    %c0_229 = arith.constant 0 : index
    %252 = vector.load %arg27[%c0_228, %c0_229] : memref<128x64xf32, #tpu.memory_space<vmem>>, vector<128x64xf32>
    %c0_230 = arith.constant 0 : index
    %c0_231 = arith.constant 0 : index
    %253 = vector.load %arg28[%c0_230, %c0_231] : memref<64x128xf32, #tpu.memory_space<vmem>>, vector<64x128xf32>
    %cst_232 = arith.constant dense<0.000000e+00> : vector<128xf32>
    %254 = vector.multi_reduction <add>, %249, %cst_232 [0] : vector<4x128xf32> to vector<128xf32>
    %255 = vector.shape_cast %254 : vector<128xf32> to vector<1x128xf32>
    %cst_233 = arith.constant dense<0.000000e+00> : vector<1x64xf32>
    %256 = tpu.matmul %255, %252, %cst_233 {dimension_numbers = #tpu.dot_dimension_numbers<[1], [0], [0], [1], [0, 0, 1, 1], [], []>} : vector<1x128xf32>, vector<128x64xf32>, vector<1x64xf32> -> vector<1x64xf32>
    %cst_234 = arith.constant 8.000000e+00 : f32
    %257 = vector.broadcast %cst_234 : f32 to vector<1x64xf32>
    %258 = arith.divf %256, %257 : vector<1x64xf32>
    %cst_235 = arith.constant dense<0.000000e+00> : vector<1x128xf32>
    %259 = tpu.matmul %258, %253, %cst_235 {dimension_numbers = #tpu.dot_dimension_numbers<[1], [0], [0], [1], [0, 0, 1, 1], [], []>} : vector<1x64xf32>, vector<64x128xf32>, vector<1x128xf32> -> vector<1x128xf32>
    %260 = vector.broadcast %259 : vector<1x128xf32> to vector<4x128xf32>
    %261 = arith.subf %249, %260 : vector<4x128xf32>
    %262 = arith.mulf %261, %261 : vector<4x128xf32>
    %cst_236 = arith.constant dense<0.000000e+00> : vector<128xf32>
    %263 = vector.multi_reduction <add>, %262, %cst_236 [0] : vector<4x128xf32> to vector<128xf32>
    %264 = vector.shape_cast %263 : vector<128xf32> to vector<1x128xf32>
    %cst_237 = arith.constant dense<0.000000e+00> : vector<1x64xf32>
    %265 = tpu.matmul %264, %252, %cst_237 {dimension_numbers = #tpu.dot_dimension_numbers<[1], [0], [0], [1], [0, 0, 1, 1], [], []>} : vector<1x128xf32>, vector<128x64xf32>, vector<1x64xf32> -> vector<1x64xf32>
    %cst_238 = arith.constant 8.000000e+00 : f32
    %266 = vector.broadcast %cst_238 : f32 to vector<1x64xf32>
    %267 = arith.divf %265, %266 : vector<1x64xf32>
    %cst_239 = arith.constant 9.99999974E-6 : f32
    %268 = vector.broadcast %cst_239 : f32 to vector<1x64xf32>
    %269 = arith.addf %267, %268 : vector<1x64xf32>
    %270 = math.rsqrt %269 : vector<1x64xf32>
    %271 = arith.mulf %250, %270 : vector<1x64xf32>
    %cst_240 = arith.constant dense<0.000000e+00> : vector<1x128xf32>
    %272 = tpu.matmul %271, %253, %cst_240 {dimension_numbers = #tpu.dot_dimension_numbers<[1], [0], [0], [1], [0, 0, 1, 1], [], []>} : vector<1x64xf32>, vector<64x128xf32>, vector<1x128xf32> -> vector<1x128xf32>
    %273 = vector.broadcast %272 : vector<1x128xf32> to vector<4x128xf32>
    %274 = arith.mulf %261, %273 : vector<4x128xf32>
    %cst_241 = arith.constant dense<0.000000e+00> : vector<1x128xf32>
    %275 = tpu.matmul %251, %253, %cst_241 {dimension_numbers = #tpu.dot_dimension_numbers<[1], [0], [0], [1], [0, 0, 1, 1], [], []>} : vector<1x64xf32>, vector<64x128xf32>, vector<1x128xf32> -> vector<1x128xf32>
    %276 = vector.broadcast %275 : vector<1x128xf32> to vector<4x128xf32>
    %277 = arith.addf %274, %276 : vector<4x128xf32>
    %cst_242 = arith.constant 0.000000e+00 : f32
    %278 = vector.broadcast %cst_242 : f32 to vector<4x128xf32>
    %279 = arith.cmpf ogt, %277, %278 : vector<4x128xf32>
    %cst_243 = arith.constant 2.000000e-01 : f32
    %280 = vector.broadcast %cst_243 : f32 to vector<4x128xf32>
    %281 = arith.mulf %280, %277 : vector<4x128xf32>
    %282 = arith.select %279, %277, %281 : vector<4x128xi1>, vector<4x128xf32>
    %cst_244 = arith.constant 0.000000e+00 : f32
    %283 = vector.broadcast %cst_244 : f32 to vector<2x2xf32>
    %c0_245 = arith.constant 0 : index
    %c0_246 = arith.constant 0 : index
    %c0_247 = arith.constant 0 : index
    %284 = vector.load %arg11[%c0_245, %c0_246, %c0_247] : memref<4x2x4xf32, #tpu.memory_space<vmem>>, vector<1x2x4xf32>
    %285 = vector.shape_cast %284 : vector<1x2x4xf32> to vector<2x4xf32>
    %cst_248 = arith.constant dense<0.000000e+00> : vector<2x128xf32>
    %286 = tpu.matmul %285, %282, %cst_248 {dimension_numbers = #tpu.dot_dimension_numbers<[1], [0], [0], [1], [0, 0, 1, 1], [], []>} : vector<2x4xf32>, vector<4x128xf32>, vector<2x128xf32> -> vector<2x128xf32>
    %c0_249 = arith.constant 0 : index
    %c0_250 = arith.constant 0 : index
    %c0_251 = arith.constant 0 : index
    %287 = vector.load %arg12[%c0_249, %c0_250, %c0_251] : memref<4x128x2xf32, #tpu.memory_space<vmem>>, vector<1x128x2xf32>
    %288 = vector.shape_cast %287 : vector<1x128x2xf32> to vector<128x2xf32>
    %cst_252 = arith.constant dense<0.000000e+00> : vector<2x2xf32>
    %289 = tpu.matmul %286, %288, %cst_252 {dimension_numbers = #tpu.dot_dimension_numbers<[1], [0], [0], [1], [0, 0, 1, 1], [], []>} : vector<2x128xf32>, vector<128x2xf32>, vector<2x2xf32> -> vector<2x2xf32>
    %290 = arith.addf %283, %289 : vector<2x2xf32>
    %c1_253 = arith.constant 1 : index
    %c0_254 = arith.constant 0 : index
    %c0_255 = arith.constant 0 : index
    %291 = vector.load %arg11[%c1_253, %c0_254, %c0_255] : memref<4x2x4xf32, #tpu.memory_space<vmem>>, vector<1x2x4xf32>
    %292 = vector.shape_cast %291 : vector<1x2x4xf32> to vector<2x4xf32>
    %cst_256 = arith.constant dense<0.000000e+00> : vector<2x128xf32>
    %293 = tpu.matmul %292, %282, %cst_256 {dimension_numbers = #tpu.dot_dimension_numbers<[1], [0], [0], [1], [0, 0, 1, 1], [], []>} : vector<2x4xf32>, vector<4x128xf32>, vector<2x128xf32> -> vector<2x128xf32>
    %c1_257 = arith.constant 1 : index
    %c0_258 = arith.constant 0 : index
    %c0_259 = arith.constant 0 : index
    %294 = vector.load %arg12[%c1_257, %c0_258, %c0_259] : memref<4x128x2xf32, #tpu.memory_space<vmem>>, vector<1x128x2xf32>
    %295 = vector.shape_cast %294 : vector<1x128x2xf32> to vector<128x2xf32>
    %cst_260 = arith.constant dense<0.000000e+00> : vector<2x2xf32>
    %296 = tpu.matmul %293, %295, %cst_260 {dimension_numbers = #tpu.dot_dimension_numbers<[1], [0], [0], [1], [0, 0, 1, 1], [], []>} : vector<2x128xf32>, vector<128x2xf32>, vector<2x2xf32> -> vector<2x2xf32>
    %297 = arith.addf %290, %296 : vector<2x2xf32>
    %c2_261 = arith.constant 2 : index
    %c0_262 = arith.constant 0 : index
    %c0_263 = arith.constant 0 : index
    %298 = vector.load %arg11[%c2_261, %c0_262, %c0_263] : memref<4x2x4xf32, #tpu.memory_space<vmem>>, vector<1x2x4xf32>
    %299 = vector.shape_cast %298 : vector<1x2x4xf32> to vector<2x4xf32>
    %cst_264 = arith.constant dense<0.000000e+00> : vector<2x128xf32>
    %300 = tpu.matmul %299, %282, %cst_264 {dimension_numbers = #tpu.dot_dimension_numbers<[1], [0], [0], [1], [0, 0, 1, 1], [], []>} : vector<2x4xf32>, vector<4x128xf32>, vector<2x128xf32> -> vector<2x128xf32>
    %c2_265 = arith.constant 2 : index
    %c0_266 = arith.constant 0 : index
    %c0_267 = arith.constant 0 : index
    %301 = vector.load %arg12[%c2_265, %c0_266, %c0_267] : memref<4x128x2xf32, #tpu.memory_space<vmem>>, vector<1x128x2xf32>
    %302 = vector.shape_cast %301 : vector<1x128x2xf32> to vector<128x2xf32>
    %cst_268 = arith.constant dense<0.000000e+00> : vector<2x2xf32>
    %303 = tpu.matmul %300, %302, %cst_268 {dimension_numbers = #tpu.dot_dimension_numbers<[1], [0], [0], [1], [0, 0, 1, 1], [], []>} : vector<2x128xf32>, vector<128x2xf32>, vector<2x2xf32> -> vector<2x2xf32>
    %304 = arith.addf %297, %303 : vector<2x2xf32>
    %c3_269 = arith.constant 3 : index
    %c0_270 = arith.constant 0 : index
    %c0_271 = arith.constant 0 : index
    %305 = vector.load %arg11[%c3_269, %c0_270, %c0_271] : memref<4x2x4xf32, #tpu.memory_space<vmem>>, vector<1x2x4xf32>
    %306 = vector.shape_cast %305 : vector<1x2x4xf32> to vector<2x4xf32>
    %cst_272 = arith.constant dense<0.000000e+00> : vector<2x128xf32>
    %307 = tpu.matmul %306, %282, %cst_272 {dimension_numbers = #tpu.dot_dimension_numbers<[1], [0], [0], [1], [0, 0, 1, 1], [], []>} : vector<2x4xf32>, vector<4x128xf32>, vector<2x128xf32> -> vector<2x128xf32>
    %c3_273 = arith.constant 3 : index
    %c0_274 = arith.constant 0 : index
    %c0_275 = arith.constant 0 : index
    %308 = vector.load %arg12[%c3_273, %c0_274, %c0_275] : memref<4x128x2xf32, #tpu.memory_space<vmem>>, vector<1x128x2xf32>
    %309 = vector.shape_cast %308 : vector<1x128x2xf32> to vector<128x2xf32>
    %cst_276 = arith.constant dense<0.000000e+00> : vector<2x2xf32>
    %310 = tpu.matmul %307, %309, %cst_276 {dimension_numbers = #tpu.dot_dimension_numbers<[1], [0], [0], [1], [0, 0, 1, 1], [], []>} : vector<2x128xf32>, vector<128x2xf32>, vector<2x2xf32> -> vector<2x2xf32>
    %311 = arith.addf %304, %310 : vector<2x2xf32>
    %c0_277 = arith.constant 0 : index
    %c0_278 = arith.constant 0 : index
    %312 = vector.load %arg29[%c0_277, %c0_278] : memref<2x2xf32, #tpu.memory_space<vmem>>, vector<2x2xf32>
    tpu.vector_store %arg29[%c0_277, %c0_278], %311 {strides = array<i32>} : memref<2x2xf32, #tpu.memory_space<vmem>>, vector<2x2xf32>,
    return
  }
}

</mosaic_0001>

<bundles_post_ra>
// kernel: encoder_forward.1
= control target key start
LH: loop header
LB: loop body
LE: loop exit
PB: predicated region body
PF: predicated region fallthrough
CT: control target
= control target key end

     0   :  { %s11339_s6 = smov 1   ;;  %s11340_s10 = smov 2   ;;  %s13988_s0 = inlined_call_operand.smem [shape: u32[30], index: -1, kind: input, shape index: {}] }
   0x1   :  { %s11380_s5 = sld [smem:[%s13988_s0]]   ;;  %s11341_s14 = smov 3  }
   0x2   :  { %s11385_s9 = sld [smem:[%s13988_s0 + %s11339_s6]]   ;;  %s11342_s18 = smov 4  }
   0x3   :  { %s11390_s13 = sld [smem:[%s13988_s0 + %s11340_s10]]   ;;  %s11343_s22 = smov 5  }
   0x4   :  { %s11395_s17 = sld [smem:[%s13988_s0 + %s11341_s14]]   ;;  %s11344_s26 = smov 6  }
   0x5   :  { %s11400_s21 = sld [smem:[%s13988_s0 + %s11342_s18]]   ;;  %s11345_s30 = smov 7  }
   0x6   :  { %s11405_s25 = sld [smem:[%s13988_s0 + %s11343_s22]]   ;;  %s11346_s4 = smov 8  }
   0x7   :  { %s11410_s29 = sld [smem:[%s13988_s0 + %s11344_s26]]   ;;  %s11347_s10 = smov 9  }
   0x8   :  { %s11415_s3 = sld [smem:[%s13988_s0 + %s11345_s30]]   ;;  %s11348_s15 = smov 10  }
   0x9   :  { %s11420_s8 = sld [smem:[%s13988_s0 + %s11346_s4]]   ;;  %s11349_s20 = smov 11  }
   0xa   :  { %s11425_s14 = sld [smem:[%s13988_s0 + %s11347_s10]]   ;;  %s11350_s26 = smov 12  }
   0xb   :  { %s11430_s19 = sld [smem:[%s13988_s0 + %s11348_s15]]   ;;  %s11351_s1 = smov 13  }
   0xc   :  { %s11435_s24 = sld [smem:[%s13988_s0 + %s11349_s20]]   ;;  %s11352_s7 = smov 14  }
   0xd   :  { %s11440_s30 = sld [smem:[%s13988_s0 + %s11350_s26]]   ;;  %s11353_s15 = smov 15  }
   0xe   :  { %13997 = sst [smem:[#allocation5_spill]] %s11415_s3  ;;  %s11354_s22 = smov 16  }
   0xf   :  { %13998 = sst [smem:[#allocation6_spill]] %s11420_s8  ;;  %s11355_s28 = smov 17  }
  0x10   :  { %13999 = sst [smem:[#allocation7_spill]] %s11425_s14 }
  0x11   :  { %14000 = sst [smem:[#allocation8_spill]] %s11430_s19 }
  0x12   :  { %14001 = sst [smem:[#allocation9_spill]] %s11435_s24 }
  0x13   :  { %14002 = sst [smem:[#allocation10_spill]] %s11440_s30 }
  0x14   :  { %s11445_s6 = sld [smem:[%s13988_s0 + %s11351_s1]]  }
  0x15   :  { %s11450_s12 = sld [smem:[%s13988_s0 + %s11352_s7]]   ;;  %s11356_s7 = smov 18  }
  0x16   :  { %s11455_s20 = sld [smem:[%s13988_s0 + %s11353_s15]]   ;;  %s11357_s15 = smov 19  }
  0x17   :  { %s11460_s27 = sld [smem:[%s13988_s0 + %s11354_s22]]   ;;  %s11358_s22 = smov 20  }
  0x18   :  { %s11465_s4 = sld [smem:[%s13988_s0 + %s11355_s28]]   ;;  %s11359_s28 = smov 21  }
  0x19   :  { %s11470_s30 = sld [smem:[%s13988_s0 + %s11356_s7]]   ;;  %s11360_s7 = smov 22  }
  0x1a   :  { %s11475_s24 = sld [smem:[%s13988_s0 + %s11357_s15]]   ;;  %s11361_s15 = smov 23  }
  0x1b   :  { %s11480_s14 = sld [smem:[%s13988_s0 + %s11358_s22]]   ;;  %s11362_s22 = smov 24  }
  0x1c   :  { %s11485_s19 = sld [smem:[%s13988_s0 + %s11359_s28]]   ;;  %s11363_s28 = smov 25  }
  0x1d   :  { %s11490_s3 = sld [smem:[%s13988_s0 + %s11360_s7]]   ;;  %s11364_s7 = smov 26  }
  0x1e   :  { %s11495_s8 = sld [smem:[%s13988_s0 + %s11361_s15]]   ;;  %s11365_s15 = smov 27  }
  0x1f   :  { %14003 = sst [smem:[#allocation11_spill]] %s11470_s30 }
  0x20   :  { %s11500_s30 = sld [smem:[%s13988_s0 + %s11362_s22]]   ;;  %s11366_s22 = smov 28  }
  0x22   :  { %14004 = sst [smem:[#allocation12_spill]] %s11485_s19 }
  0x23   :  { %14005 = sst [smem:[#allocation13_spill]] %s11490_s3 }
  0x24   :  { %14006 = sst [smem:[#allocation14_spill]] %s11495_s8 }
  0x25   :  { %s11505_s19 = sld [smem:[%s13988_s0 + %s11363_s28]]   ;;  %s11367_s28 = smov 29  }
  0x26   :  { %14007 = sst [smem:[#allocation15_spill]] %s11500_s30 }
  0x27   :  { %s11510_s3 = sld [smem:[%s13988_s0 + %s11364_s7]]  }
  0x28   :  { %s11515_s8 = sld [smem:[%s13988_s0 + %s11365_s15]]  }
  0x29   :  { %s11520_s30 = sld [smem:[%s13988_s0 + %s11366_s22]]  }
  0x2b   :  { %14008 = sst [smem:[#allocation16_spill]] %s11505_s19 }
  0x2c   :  { %s11525_s19 = sld [smem:[%s13988_s0 + %s11367_s28]]  }
  0x2d   :  { %v124_v0 = vld [vmem:[%s11380_s5 + $0x8] sm:$0xff]  ;;  %v126_v1 = vld [vmem:[%s11380_s5 + $0x18] sm:$0xff]  ;;  %v123_v2 = vld [vmem:[%s11380_s5] sm:$0xff]  ;;  %v11368_v7 = vmov 0.0  }
  0x2e   :  { %v11530_v3 = vpack.c.bf16 %v126_v1, %v124_v0  ;;  %v125_v4 = vld [vmem:[%s11380_s5 + $0x10] sm:$0xff]  ;;  %v128_v5 = vld [vmem:[%s11380_s5 + $0x28] sm:$0xff]  ;;  %v130_v6 = vld [vmem:[%s11380_s5 + $0x38] sm:$0xff]  ;;  %397 = vmatprep.mubr.f32.mxu1 %v11368_v7  ;;  %227 = vmatprep.mubr.f32.mxu0 %v11368_v7 }
  0x2f   :  { %v11537_v8 = vpack.c.bf16 %v125_v4, %v123_v2  ;;  %v11539_v9 = vpack.c.bf16 %v130_v6, %v128_v5  ;;  %v127_v10 = vld [vmem:[%s11380_s5 + $0x20] sm:$0xff]  ;;  %v129_v11 = vld [vmem:[%s11380_s5 + $0x30] sm:$0xff]  ;;  %v132_v12 = vld [vmem:[%s11380_s5 + $0x48] sm:$0xff] }
  0x30   :  { %9427 = vmatprep.subr.bf16.mxu1 %v11530_v3  ;;  %v134_v13 = vld [vmem:[%s11380_s5 + $0x58] sm:$0xff]  ;;  %9395 = vmatprep.subr.bf16.mxu0 %v11530_v3  ;;  %v11548_v14 = vpack.c.bf16 %v129_v11, %v127_v10  ;;  %v131_v16 = vld [vmem:[%s11380_s5 + $0x40] sm:$0xff]  ;;  %v133_v17 = vld [vmem:[%s11380_s5 + $0x50] sm:$0xff] }
  0x31   :  { %9429 = vmatpush1.bf16.msra.mxu1 %v11537_v8  ;;  %9397 = vmatpush1.bf16.msra.mxu0 %v11537_v8  ;;  %v11552_v15 = vpack.c.bf16 %v134_v13, %v132_v12  ;;  %v136_v18 = vld [vmem:[%s11380_s5 + $0x68] sm:$0xff]  ;;  %v138_v19 = vld [vmem:[%s11380_s5 + $0x78] sm:$0xff]  ;;  %v11560_v20 = vpack.c.bf16 %v133_v17, %v131_v16  ;;  %v135_v22 = vld [vmem:[%s11380_s5 + $0x60] sm:$0xff] }
  0x32   :  { %9431 = vmatprep.subr.bf16.mxu1 %v11539_v9  ;;  %9399 = vmatprep.subr.bf16.mxu0 %v11539_v9  ;;  %v11564_v21 = vpack.c.bf16 %v138_v19, %v136_v18  ;;  %v137_v23 = vld [vmem:[%s11380_s5 + $0x70] sm:$0xff]  ;;  %v140_v24 = vld [vmem:[%s11380_s5 + $0x88] sm:$0xff]  ;;  %v142_v25 = vld [vmem:[%s11380_s5 + $0x98] sm:$0xff] }
  0x33   :  { %v11572_v26 = vpack.c.bf16 %v137_v23, %v135_v22  ;;  %v11576_v27 = vpack.c.bf16 %v142_v25, %v140_v24  ;;  %v139_v28 = vld [vmem:[%s11380_s5 + $0x80] sm:$0xff]  ;;  %v141_v29 = vld [vmem:[%s11380_s5 + $0x90] sm:$0xff]  ;;  %v144_v30 = vld [vmem:[%s11380_s5 + $0xa8] sm:$0xff] }
  0x34   :  { %v146_v31 = vld [vmem:[%s11380_s5 + $0xb8] sm:$0xff]  ;;  %v11584_v32 = vpack.c.bf16 %v141_v29, %v139_v28  ;;  %v143_v34 = vld [vmem:[%s11380_s5 + $0xa0] sm:$0xff]  ;;  %v145_v35 = vld [vmem:[%s11380_s5 + $0xb0] sm:$0xff] }
  0x35   :  { %9433 = vmatpush1.bf16.msra.mxu1 %v11548_v14  ;;  %9401 = vmatpush1.bf16.msra.mxu0 %v11548_v14  ;;  %v11588_v33 = vpack.c.bf16 %v146_v31, %v144_v30  ;;  %v148_v36 = vld [vmem:[%s11380_s5 + $0xc8] sm:$0xff]  ;;  %v150_v37 = vld [vmem:[%s11380_s5 + $0xd8] sm:$0xff]  ;;  %v11596_v38 = vpack.c.bf16 %v145_v35, %v143_v34  ;;  %v147_v40 = vld [vmem:[%s11380_s5 + $0xc0] sm:$0xff] }
  0x36   :  { %9435 = vmatprep.subr.bf16.mxu1 %v11552_v15  ;;  %9403 = vmatprep.subr.bf16.mxu0 %v11552_v15  ;;  %v11600_v39 = vpack.c.bf16 %v150_v37, %v148_v36  ;;  %v149_v41 = vld [vmem:[%s11380_s5 + $0xd0] sm:$0xff]  ;;  %v152_v42 = vld [vmem:[%s11380_s5 + $0xe8] sm:$0xff]  ;;  %v154_v43 = vld [vmem:[%s11380_s5 + $0xf8] sm:$0xff] }
  0x37   :  { %v11608_v44 = vpack.c.bf16 %v149_v41, %v147_v40  ;;  %v11612_v45 = vpack.c.bf16 %v154_v43, %v152_v42  ;;  %v151_v46 = vld [vmem:[%s11380_s5 + $0xe0] sm:$0xff]  ;;  %v153_v47 = vld [vmem:[%s11380_s5 + $0xf0] sm:$0xff]  ;;  %v7630_v48 = vld [vmem:[%s11390_s13 + $0x188] sm:$0xff] }
  0x38   :  { %v7632_v49 = vld [vmem:[%s11390_s13 + $0x198] sm:$0xff]  ;;  %v11620_v50 = vpack.c.bf16 %v153_v47, %v151_v46  ;;  %v7629_v52 = vld [vmem:[%s11390_s13 + $0x180] sm:$0xff]  ;;  %v7631_v53 = vld [vmem:[%s11390_s13 + $0x190] sm:$0xff] }
  0x39   :  { %9437 = vmatpush1.bf16.msra.mxu1 %v11560_v20  ;;  %9405 = vmatpush1.bf16.msra.mxu0 %v11560_v20  ;;  %v9458_v51 = vpack.c.bf16 %v7632_v49, %v7630_v48  ;;  %v7621_v54 = vld [vmem:[%s11385_s9 + $0x40] sm:$0xff]  ;;  %v9460_v56 = vpack.c.bf16 %v7631_v53, %v7629_v52  ;;  %v7634_v57 = vld [vmem:[%s11390_s13 + $0x1a8] sm:$0xff]  ;;  %v7636_v58 = vld [vmem:[%s11390_s13 + $0x1b8] sm:$0xff] }
  0x3a   :  { %9439 = vmatprep.subr.bf16.mxu1 %v11564_v21  ;;  %9407 = vmatprep.subr.bf16.mxu0 %v11564_v21  ;;  %v155_v55 = vld [vmem:[%s11385_s9] sm:$0xff]  ;;  %v7622_v59 = vld [vmem:[%s11385_s9 + $0x48] sm:$0xff] }
  0x3b   :  { %v156_v60 = vld [vmem:[%s11385_s9 + $0x8] sm:$0xff] }
  0x3d   :  { %9441 = vmatpush1.bf16.msra.mxu1 %v11572_v26  ;;  %9409 = vmatpush1.bf16.msra.mxu0 %v11572_v26 }
  0x3e   :  { %9443 = vmatprep.subr.bf16.mxu1 %v11576_v27  ;;  %9411 = vmatprep.subr.bf16.mxu0 %v11576_v27 }
  0x41   :  { %9445 = vmatpush1.bf16.msra.mxu1 %v11584_v32  ;;  %9413 = vmatpush1.bf16.msra.mxu0 %v11584_v32 }
  0x42   :  { %9447 = vmatprep.subr.bf16.mxu1 %v11588_v33  ;;  %9415 = vmatprep.subr.bf16.mxu0 %v11588_v33 }
  0x45   :  { %9449 = vmatpush1.bf16.msra.mxu1 %v11596_v38  ;;  %9417 = vmatpush1.bf16.msra.mxu0 %v11596_v38 }
  0x46   :  { %9451 = vmatprep.subr.bf16.mxu1 %v11600_v39  ;;  %9419 = vmatprep.subr.bf16.mxu0 %v11600_v39 }
  0x49   :  { %9453 = vmatpush1.bf16.msra.mxu1 %v11608_v44  ;;  %9421 = vmatpush1.bf16.msra.mxu0 %v11608_v44 }
  0x4a   :  { %9455 = vmatprep.subr.bf16.mxu1 %v11612_v45  ;;  %9423 = vmatprep.subr.bf16.mxu0 %v11612_v45 }
  0x4d   :  { %9457 = vmatpush1.bf16.msra.mxu1 %v11620_v50  ;;  %9425 = vmatpush1.bf16.msra.mxu0 %v11620_v50 }
  0x4e   :  { %9555 = vmatprep.subr.bf16.mxu1 %v11530_v3  ;;  %9459 = vmatprep.subr.bf16.mxu0 %v9458_v51 }
  0x50   :  { %398 = vmatmul.mubr.f32.vlgmr.msra.gmra.mrb[0].mxu1 %v7621_v54  ;;  %228 = vmatmul.mubr.f32.vlgmr.msra.gmra.mrb[0].mxu0 %v155_v55 }
  0x51   :  { %403 = vmatprep.mubr.f32.mxu1 %v11368_v7  ;;  %9557 = vmatpush1.bf16.msra.mxu1 %v11537_v8 }
  0x52   :  { %233 = vmatprep.mubr.f32.mxu0 %v11368_v7  ;;  %9559 = vmatprep.subr.bf16.mxu1 %v11539_v9 }
  0x53   :  { %64 = vsyncpa [#allocation3], 0  ;;  %9461 = vmatpush1.bf16.msra.mxu0 %v9460_v56  ;;  %v9462_v61 = vpack.c.bf16 %v7636_v58, %v7634_v57  ;;  %v7633_v62 = vld [vmem:[%s11390_s13 + $0x1a0] sm:$0xff]  ;;  %v7635_v63 = vld [vmem:[%s11390_s13 + $0x1b0] sm:$0xff]  ;;  %vm495_vm0 = vcmask 523264   ;;  %s14009_s0 = sld [smem:[#allocation11_spill]] }
  0x54   :  { %404 = vmatmul.mubr.f32.gmra.mrb[2].mxu1 %v7622_v59  ;;  %234 = vmatmul.mubr.f32.gmra.mrb[2].mxu0 %v156_v60  ;;  %v7623_v0 = vld [vmem:[%s11385_s9 + $0x50] sm:$0xff]  ;;  %v9464_v2 = vpack.c.bf16 %v7635_v63, %v7633_v62  ;;  %v7638_v4 = vld [vmem:[%s11390_s13 + $0x1c8] sm:$0xff]  ;;  %v7640_v5 = vld [vmem:[%s11390_s13 + $0x1d8] sm:$0xff]  ;;  %s14010_s5 = sld [smem:[#allocation6_spill]] }
  0x55   :  { %409 = vmatprep.mubr.f32.mxu1 %v11368_v7  ;;  %9561 = vmatpush1.bf16.msra.mxu1 %v11548_v14  ;;  %v157_v1 = vld [vmem:[%s11385_s9 + $0x10] sm:$0xff]  ;;  %v7624_v6 = vld [vmem:[%s11385_s9 + $0x58] sm:$0xff]  ;;  %v9466_v11 = vpack.c.bf16 %v7640_v5, %v7638_v4  ;;  %v7637_v12 = vld [vmem:[%s11390_s13 + $0x1c0] sm:$0xff] }
  0x56   :  { %239 = vmatprep.mubr.f32.mxu0 %v11368_v7  ;;  %9563 = vmatprep.subr.bf16.mxu1 %v11552_v15  ;;  %v158_v10 = vld [vmem:[%s11385_s9 + $0x18] sm:$0xff]  ;;  %v7639_v13 = vld [vmem:[%s11390_s13 + $0x1d0] sm:$0xff]  ;;  %v7625_v16 = vld [vmem:[%s11385_s9 + $0x60] sm:$0xff] }
  0x57   :  { %9463 = vmatprep.subr.bf16.mxu0 %v9462_v61  ;;  %v159_v17 = vld [vmem:[%s11385_s9 + $0x20] sm:$0xff]  ;;  %v9468_v18 = vpack.c.bf16 %v7639_v13, %v7637_v12  ;;  %v7642_v19 = vld [vmem:[%s11390_s13 + $0x1e8] sm:$0xff]  ;;  %v7644_v22 = vld [vmem:[%s11390_s13 + $0x1f8] sm:$0xff] }
  0x58   :  { %410 = vmatmul.mubr.f32.gmra.mrb[4].mxu1 %v7623_v0  ;;  %240 = vmatmul.mubr.f32.gmra.mrb[4].mxu0 %v157_v1  ;;  %v7626_v23 = vld [vmem:[%s11385_s9 + $0x68] sm:$0xff]  ;;  %v9470_v25 = vpack.c.bf16 %v7644_v22, %v7642_v19  ;;  %v7641_v28 = vld [vmem:[%s11390_s13 + $0x1e0] sm:$0xff]  ;;  %v7643_v29 = vld [vmem:[%s11390_s13 + $0x1f0] sm:$0xff] }
  0x59   :  { %415 = vmatprep.mubr.f32.mxu1 %v11368_v7  ;;  %9565 = vmatpush1.bf16.msra.mxu1 %v11560_v20  ;;  %v160_v24 = vld [vmem:[%s11385_s9 + $0x28] sm:$0xff]  ;;  %v7627_v30 = vld [vmem:[%s11385_s9 + $0x70] sm:$0xff]  ;;  %v9472_v34 = vpack.c.bf16 %v7643_v29, %v7641_v28  ;;  %v7648_v36 = vld [vmem:[%s11390_s13 + $0x218] sm:$0xff] }
  0x5a   :  { %245 = vmatprep.mubr.f32.mxu0 %v11368_v7  ;;  %9567 = vmatprep.subr.bf16.mxu1 %v11564_v21  ;;  %v161_v31 = vld [vmem:[%s11385_s9 + $0x30] sm:$0xff]  ;;  %v7646_v35 = vld [vmem:[%s11390_s13 + $0x208] sm:$0xff]  ;;  %v7628_v37 = vld [vmem:[%s11385_s9 + $0x78] sm:$0xff] }
  0x5b   :  { %9465 = vmatpush1.bf16.msra.mxu0 %v9464_v2  ;;  %v7645_v40 = vld [vmem:[%s11390_s13 + $0x200] sm:$0xff]  ;;  %v7647_v41 = vld [vmem:[%s11390_s13 + $0x210] sm:$0xff]  ;;  %v162_v42 = vld [vmem:[%s11385_s9 + $0x38] sm:$0xff]  ;;  %v9474_v47 = vpack.c.bf16 %v7648_v36, %v7646_v35 }
  0x5c   :  { %416 = vmatmul.mubr.f32.gmra.mrb[6].mxu1 %v7624_v6  ;;  %246 = vmatmul.mubr.f32.gmra.mrb[6].mxu0 %v158_v10  ;;  %v7650_v43 = vld [vmem:[%s11390_s13 + $0x228] sm:$0xff]  ;;  %v7652_v46 = vld [vmem:[%s11390_s13 + $0x238] sm:$0xff]  ;;  %v9476_v48 = vpack.c.bf16 %v7647_v41, %v7645_v40  ;;  %v7649_v51 = vld [vmem:[%s11390_s13 + $0x220] sm:$0xff] }
  0x5d   :  { %421 = vmatprep.mubr.f32.mxu1 %v11368_v7  ;;  %9569 = vmatpush1.bf16.msra.mxu1 %v11572_v26  ;;  %v9478_v49 = vpack.c.bf16 %v7652_v46, %v7650_v43  ;;  %v7651_v52 = vld [vmem:[%s11390_s13 + $0x230] sm:$0xff]  ;;  %v7693_v53 = vld [vmem:[%s11385_s9 + $0x80] sm:$0xff]  ;;  %v7654_v54 = vld [vmem:[%s11390_s13 + $0x248] sm:$0xff] }
  0x5e   :  { %251 = vmatprep.mubr.f32.mxu0 %v11368_v7  ;;  %9571 = vmatprep.subr.bf16.mxu1 %v11576_v27  ;;  %v7656_v55 = vld [vmem:[%s11390_s13 + $0x258] sm:$0xff]  ;;  %v9480_v56 = vpack.c.bf16 %v7651_v52, %v7649_v51  ;;  %v7653_v58 = vld [vmem:[%s11390_s13 + $0x240] sm:$0xff]  ;;  %v7655_v59 = vld [vmem:[%s11390_s13 + $0x250] sm:$0xff] }
  0x5f   :  { %9467 = vmatprep.subr.bf16.mxu0 %v9466_v11  ;;  %v9482_v57 = vpack.c.bf16 %v7656_v55, %v7654_v54  ;;  %v7694_v60 = vld [vmem:[%s11385_s9 + $0x88] sm:$0xff]  ;;  %v9484_v62 = vpack.c.bf16 %v7655_v59, %v7653_v58  ;;  %v7657_v0 = vld [vmem:[%s11390_s13 + $0x260] sm:$0xff]  ;;  %v7659_v1 = vld [vmem:[%s11390_s13 + $0x270] sm:$0xff] }
  0x60   :  { %422 = vmatmul.mubr.f32.gmra.mrb[8].mxu1 %v7625_v16  ;;  %252 = vmatmul.mubr.f32.gmra.mrb[8].mxu0 %v159_v17  ;;  %v7658_v61 = vld [vmem:[%s11390_s13 + $0x268] sm:$0xff]  ;;  %v7664_v4 = vld [vmem:[%s11390_s13 + $0x298] sm:$0xff]  ;;  %v7661_v6 = vld [vmem:[%s11390_s13 + $0x280] sm:$0xff] }
  0x61   :  { %427 = vmatprep.mubr.f32.mxu1 %v11368_v7  ;;  %9573 = vmatpush1.bf16.msra.mxu1 %v11584_v32  ;;  %v7662_v2 = vld [vmem:[%s11390_s13 + $0x288] sm:$0xff]  ;;  %v7663_v10 = vld [vmem:[%s11390_s13 + $0x290] sm:$0xff]  ;;  %v7668_v12 = vld [vmem:[%s11390_s13 + $0x2b8] sm:$0xff] }
  0x62   :  { %257 = vmatprep.mubr.f32.mxu0 %v11368_v7  ;;  %9575 = vmatprep.subr.bf16.mxu1 %v11588_v33  ;;  %v9490_v5 = vpack.c.bf16 %v7664_v4, %v7662_v2  ;;  %v7666_v11 = vld [vmem:[%s11390_s13 + $0x2a8] sm:$0xff]  ;;  %v7665_v16 = vld [vmem:[%s11390_s13 + $0x2a0] sm:$0xff]  ;;  %v7667_v17 = vld [vmem:[%s11390_s13 + $0x2b0] sm:$0xff] }
  0x63   :  { %9469 = vmatpush1.bf16.msra.mxu0 %v9468_v18  ;;  %v9494_v13 = vpack.c.bf16 %v7668_v12, %v7666_v11  ;;  %v7670_v18 = vld [vmem:[%s11390_s13 + $0x2c8] sm:$0xff]  ;;  %v7672_v19 = vld [vmem:[%s11390_s13 + $0x2d8] sm:$0xff]  ;;  %v7763_v41 = vld [vmem:[%s11385_s9 + $0xf0] sm:$0xff] }
  0x64   :  { %428 = vmatmul.mubr.f32.gmra.mrb[10].mxu1 %v7626_v23  ;;  %258 = vmatmul.mubr.f32.gmra.mrb[10].mxu0 %v160_v24  ;;  %v9498_v22 = vpack.c.bf16 %v7672_v19, %v7670_v18  ;;  %v7669_v23 = vld [vmem:[%s11390_s13 + $0x2c0] sm:$0xff]  ;;  %v7671_v24 = vld [vmem:[%s11390_s13 + $0x2d0] sm:$0xff]  ;;  %v7676_v28 = vld [vmem:[%s11390_s13 + $0x2f8] sm:$0xff] }
  0x65   :  { %433 = vmatprep.mubr.f32.mxu1 %v11368_v7  ;;  %9577 = vmatpush1.bf16.msra.mxu1 %v11596_v38  ;;  %v7762_v35 = vld [vmem:[%s11385_s9 + $0xe8] sm:$0xff]  ;;  %v276_v43 = vld [vmem:[%s11390_s13] sm:$0xff]  ;;  %v278_v46 = vld [vmem:[%s11390_s13 + $0x10] sm:$0xff] }
  0x66   :  { %263 = vmatprep.mubr.f32.mxu0 %v11368_v7  ;;  %9579 = vmatprep.subr.bf16.mxu1 %v11600_v39  ;;  %v277_v36 = vld [vmem:[%s11390_s13 + $0x8] sm:$0xff]  ;;  %v9508_v51 = vpack.c.bf16 %v278_v46, %v276_v43  ;;  %v280_v55 = vld [vmem:[%s11390_s13 + $0x20] sm:$0xff]  ;;  %v287_v59 = vld [vmem:[%s11390_s13 + $0x58] sm:$0xff] }
  0x67   :  { %9471 = vmatprep.subr.bf16.mxu0 %v9470_v25  ;;  %v7674_v25 = vld [vmem:[%s11390_s13 + $0x2e8] sm:$0xff]  ;;  %v291_v4 = vld [vmem:[%s11390_s13 + $0x78] sm:$0xff]  ;;  %v290_v11 = vld [vmem:[%s11390_s13 + $0x70] sm:$0xff] }
  0x68   :  { %434 = vmatmul.mubr.f32.gmra.mrb[12].mxu1 %v7627_v30  ;;  %264 = vmatmul.mubr.f32.gmra.mrb[12].mxu0 %v161_v31  ;;  %v9502_v29 = vpack.c.bf16 %v7676_v28, %v7674_v25  ;;  %v7673_v30 = vld [vmem:[%s11390_s13 + $0x2e0] sm:$0xff]  ;;  %v7675_v31 = vld [vmem:[%s11390_s13 + $0x2f0] sm:$0xff]  ;;  %v285_v58 = vld [vmem:[%s11390_s13 + $0x48] sm:$0xff] }
  0x69   :  { %439 = vmatprep.mubr.f32.mxu1 %v11368_v7  ;;  %9581 = vmatpush1.bf16.msra.mxu1 %v11608_v44  ;;  %v289_v2 = vld [vmem:[%s11390_s13 + $0x68] sm:$0xff]  ;;  %v299_v25 = vld [vmem:[%s11390_s13 + $0xb8] sm:$0xff] }
  0x6a   :  { %269 = vmatprep.mubr.f32.mxu0 %v11368_v7  ;;  %9583 = vmatprep.subr.bf16.mxu1 %v11612_v45  ;;  %v307_v43 = vld [vmem:[%s11390_s13 + $0xf8] sm:$0xff] }
  0x6b   :  { %9473 = vmatpush1.bf16.msra.mxu0 %v9472_v34  ;;  %v9504_v34 = vpack.c.bf16 %v7675_v31, %v7673_v30  ;;  %v296_v31 = vld [vmem:[%s11390_s13 + $0xa0] sm:$0xff] }
  0x6c   :  { %440 = vmatmul.mubr.f32.gmra.mrb[14].mxu1 %v7628_v37  ;;  %270 = vmatmul.mubr.f32.gmra.mrb[14].mxu0 %v162_v42  ;;  %v279_v37 = vld [vmem:[%s11390_s13 + $0x18] sm:$0xff] }
  0x6d   :  { %9585 = vmatpush1.bf16.msra.mxu1 %v11620_v50  ;;  %843 = vmatprep.mubr.f32.mxu1 %v11368_v7  ;;  %v9506_v40 = vpack.c.bf16 %v279_v37, %v277_v36  ;;  %v7764_v42 = vld [vmem:[%s11385_s9 + $0xf8] sm:$0xff]  ;;  %v300_v36 = vld [vmem:[%s11390_s13 + $0xc0] sm:$0xff]  ;;  %v302_v37 = vld [vmem:[%s11390_s13 + $0xd0] sm:$0xff] }
  0x6e   :  { %9635 = vmatprep.subr.bf16.mxu1 %v11530_v3  ;;  %9475 = vmatprep.subr.bf16.mxu0 %v9474_v47  ;;  %v7660_v3 = vld [vmem:[%s11390_s13 + $0x278] sm:$0xff]  ;;  %v281_v47 = vld [vmem:[%s11390_s13 + $0x28] sm:$0xff]  ;;  %v9532_v46 = vpack.c.bf16 %v302_v37, %v300_v36  ;;  %v7701_v36 = vld [vmem:[%s11390_s13 + $0x300] sm:$0xff] }
  0x6f   :  { %9477 = vmatpush1.bf16.msra.mxu0 %v9476_v48  ;;  %v9486_v63 = vpack.c.bf16 %v7660_v3, %v7658_v61  ;;  %v283_v48 = vld [vmem:[%s11390_s13 + $0x38] sm:$0xff]  ;;  %v7703_v37 = vld [vmem:[%s11390_s13 + $0x310] sm:$0xff] }
  0x70   :  { %844 = vmatmul.mubr.f32.vlgmr.msra.gmra.mrb[16].mxu1 %v7693_v53  ;;  %9479 = vmatprep.subr.bf16.mxu0 %v9478_v49  ;;  %v9510_v54 = vpack.c.bf16 %v283_v48, %v281_v47 }
  0x71   :  { %9637 = vmatpush1.bf16.msra.mxu1 %v11537_v8  ;;  %849 = vmatprep.mubr.f32.mxu1 %v11368_v7  ;;  %v7695_v8 = vld [vmem:[%s11385_s9 + $0x90] sm:$0xff] }
  0x72   :  { %9639 = vmatprep.subr.bf16.mxu1 %v11539_v9  ;;  %v9488_v9 = vpack.c.bf16 %v7659_v1, %v7657_v0  ;;  %v286_v0 = vld [vmem:[%s11390_s13 + $0x50] sm:$0xff] }
  0x73   :  { %9481 = vmatpush1.bf16.msra.mxu0 %v9480_v56  ;;  %v282_v56 = vld [vmem:[%s11390_s13 + $0x30] sm:$0xff] }
  0x74   :  { %850 = vmatmul.mubr.f32.gmra.mrb[18].mxu1 %v7694_v60  ;;  %9483 = vmatprep.subr.bf16.mxu0 %v9482_v57  ;;  %v9512_v60 = vpack.c.bf16 %v282_v56, %v280_v55  ;;  %v309_v56 = vld [vmem:[%s11390_s13 + $0x108] sm:$0xff] }
  0x75   :  { %9641 = vmatpush1.bf16.msra.mxu1 %v11548_v14  ;;  %855 = vmatprep.mubr.f32.mxu1 %v11368_v7  ;;  %v7696_v14 = vld [vmem:[%s11385_s9 + $0x98] sm:$0xff] }
  0x76   :  { %9643 = vmatprep.subr.bf16.mxu1 %v11552_v15  ;;  %v9492_v15 = vpack.c.bf16 %v7663_v10, %v7661_v6  ;;  %v9518_v10 = vpack.c.bf16 %v291_v4, %v289_v2  ;;  %v313_v4 = vld [vmem:[%s11390_s13 + $0x128] sm:$0xff] }
  0x77   :  { %9485 = vmatpush1.bf16.msra.mxu0 %v9484_v62  ;;  %v9514_v62 = vpack.c.bf16 %v287_v59, %v285_v58  ;;  %v311_v58 = vld [vmem:[%s11390_s13 + $0x118] sm:$0xff] }
  0x78   :  { %856 = vmatmul.mubr.f32.gmra.mrb[20].mxu1 %v7695_v8  ;;  %9487 = vmatprep.subr.bf16.mxu0 %v9486_v63  ;;  %v284_v63 = vld [vmem:[%s11390_s13 + $0x40] sm:$0xff] }
  0x79   :  { %9645 = vmatpush1.bf16.msra.mxu1 %v11560_v20  ;;  %861 = vmatprep.mubr.f32.mxu1 %v11368_v7  ;;  %v7697_v20 = vld [vmem:[%s11385_s9 + $0xa0] sm:$0xff] }
  0x7a   :  { %9647 = vmatprep.subr.bf16.mxu1 %v11564_v21  ;;  %v9496_v21 = vpack.c.bf16 %v7667_v17, %v7665_v16  ;;  %v295_v16 = vld [vmem:[%s11390_s13 + $0x98] sm:$0xff] }
  0x7b   :  { %9489 = vmatpush1.bf16.msra.mxu0 %v9488_v9  ;;  %v9516_v9 = vpack.c.bf16 %v286_v0, %v284_v63  ;;  %v308_v63 = vld [vmem:[%s11390_s13 + $0x100] sm:$0xff]  ;;  %v310_v0 = vld [vmem:[%s11390_s13 + $0x110] sm:$0xff] }
  0x7c   :  { %862 = vmatmul.mubr.f32.gmra.mrb[22].mxu1 %v7696_v14  ;;  %9491 = vmatprep.subr.bf16.mxu0 %v9490_v5  ;;  %v288_v14 = vld [vmem:[%s11390_s13 + $0x60] sm:$0xff] }
  0x7d   :  { %9649 = vmatpush1.bf16.msra.mxu1 %v11572_v26  ;;  %867 = vmatprep.mubr.f32.mxu1 %v11368_v7  ;;  %v7698_v26 = vld [vmem:[%s11385_s9 + $0xa8] sm:$0xff]  ;;  %v9520_v17 = vpack.c.bf16 %v290_v11, %v288_v14  ;;  %v312_v11 = vld [vmem:[%s11390_s13 + $0x120] sm:$0xff] }
  0x7e   :  { %9651 = vmatprep.subr.bf16.mxu1 %v11576_v27  ;;  %v9500_v27 = vpack.c.bf16 %v7671_v24, %v7669_v23 }
  0x7f   :  { %9493 = vmatpush1.bf16.msra.mxu0 %v9492_v15 }
  0x80   :  { %868 = vmatmul.mubr.f32.gmra.mrb[24].mxu1 %v7697_v20  ;;  %9495 = vmatprep.subr.bf16.mxu0 %v9494_v13  ;;  %v293_v13 = vld [vmem:[%s11390_s13 + $0x88] sm:$0xff] }
  0x81   :  { %9653 = vmatpush1.bf16.msra.mxu1 %v11584_v32  ;;  %873 = vmatprep.mubr.f32.mxu1 %v11368_v7  ;;  %v7699_v32 = vld [vmem:[%s11385_s9 + $0xb0] sm:$0xff]  ;;  %v9522_v19 = vpack.c.bf16 %v295_v16, %v293_v13  ;;  %v317_v16 = vld [vmem:[%s11390_s13 + $0x148] sm:$0xff] }
  0x82   :  { %9655 = vmatprep.subr.bf16.mxu1 %v11588_v33  ;;  %v7700_v33 = vld [vmem:[%s11385_s9 + $0xb8] sm:$0xff] }
  0x83   :  { %9497 = vmatpush1.bf16.msra.mxu0 %v9496_v21  ;;  %v292_v21 = vld [vmem:[%s11390_s13 + $0x80] sm:$0xff] }
  0x84   :  { %874 = vmatmul.mubr.f32.gmra.mrb[26].mxu1 %v7698_v26  ;;  %9499 = vmatprep.subr.bf16.mxu0 %v9498_v22  ;;  %v294_v22 = vld [vmem:[%s11390_s13 + $0x90] sm:$0xff]  ;;  %v297_v26 = vld [vmem:[%s11390_s13 + $0xa8] sm:$0xff] }
  0x85   :  { %9657 = vmatpush1.bf16.msra.mxu1 %v11596_v38  ;;  %879 = vmatprep.mubr.f32.mxu1 %v11368_v7  ;;  %v7757_v38 = vld [vmem:[%s11385_s9 + $0xc0] sm:$0xff]  ;;  %v9524_v28 = vpack.c.bf16 %v294_v22, %v292_v21  ;;  %v9526_v30 = vpack.c.bf16 %v299_v25, %v297_v26  ;;  %v318_v22 = vld [vmem:[%s11390_s13 + $0x150] sm:$0xff]  ;;  %v321_v26 = vld [vmem:[%s11390_s13 + $0x168] sm:$0xff] }
  0x86   :  { %9659 = vmatprep.subr.bf16.mxu1 %v11600_v39  ;;  %v7758_v39 = vld [vmem:[%s11385_s9 + $0xc8] sm:$0xff]  ;;  %v316_v21 = vld [vmem:[%s11390_s13 + $0x140] sm:$0xff]  ;;  %v323_v25 = vld [vmem:[%s11390_s13 + $0x178] sm:$0xff] }
  0x87   :  { %9501 = vmatpush1.bf16.msra.mxu0 %v9500_v27 }
  0x88   :  { %880 = vmatmul.mubr.f32.gmra.mrb[28].mxu1 %v7699_v32  ;;  %9503 = vmatprep.subr.bf16.mxu0 %v9502_v29  ;;  %v298_v32 = vld [vmem:[%s11390_s13 + $0xb0] sm:$0xff] }
  0x89   :  { %9661 = vmatpush1.bf16.msra.mxu1 %v11608_v44  ;;  %885 = vmatprep.mubr.f32.mxu1 %v11368_v7  ;;  %v7759_v44 = vld [vmem:[%s11385_s9 + $0xd0] sm:$0xff] }
  0x8a   :  { %9663 = vmatprep.subr.bf16.mxu1 %v11612_v45  ;;  %v7760_v45 = vld [vmem:[%s11385_s9 + $0xd8] sm:$0xff] }
  0x8b   :  { %9505 = vmatpush1.bf16.msra.mxu0 %v9504_v34 }
  0x8c   :  { %886 = vmatmul.mubr.f32.gmra.mrb[30].mxu1 %v7700_v33  ;;  %9507 = vmatprep.subr.bf16.mxu0 %v9506_v40 }
  0x8d   :  { %9665 = vmatpush1.bf16.msra.mxu1 %v11620_v50  ;;  %1167 = vmatprep.mubr.f32.mxu1 %v11368_v7  ;;  %v7761_v50 = vld [vmem:[%s11385_s9 + $0xe0] sm:$0xff]  ;;  %s14011_s9 = sld [smem:[#allocation5_spill]] }
  0x90   :  { %1168 = vmatmul.mubr.f32.vlgmr.msra.gmra.mrb[32].mxu1 %v7757_v38  ;;  %v301_v38 = vld [vmem:[%s11390_s13 + $0xc8] sm:$0xff] }
  0x91   :  { %1173 = vmatprep.mubr.f32.mxu1 %v11368_v7 }
  0x94   :  { %1174 = vmatmul.mubr.f32.gmra.mrb[34].mxu1 %v7758_v39  ;;  %v303_v39 = vld [vmem:[%s11390_s13 + $0xd8] sm:$0xff] }
  0x95   :  { %1179 = vmatprep.mubr.f32.mxu1 %v11368_v7 }
  0x98   :  { %1180 = vmatmul.mubr.f32.gmra.mrb[36].mxu1 %v7759_v44  ;;  %v9528_v44 = vpack.c.bf16 %v298_v32, %v296_v31  ;;  %v320_v31 = vld [vmem:[%s11390_s13 + $0x160] sm:$0xff]  ;;  %v322_v32 = vld [vmem:[%s11390_s13 + $0x170] sm:$0xff] }
  0x99   :  { %1185 = vmatprep.mubr.f32.mxu1 %v11368_v7 }
  0x9c   :  { %1186 = vmatmul.mubr.f32.gmra.mrb[38].mxu1 %v7760_v45 }
  0x9d   :  { %1191 = vmatprep.mubr.f32.mxu1 %v11368_v7 }
  0xa0   :  { %1192 = vmatmul.mubr.f32.gmra.mrb[40].mxu1 %v7761_v50 }
  0xa1   :  { %1197 = vmatprep.mubr.f32.mxu1 %v11368_v7 }
  0xa4   :  { %1198 = vmatmul.mubr.f32.gmra.mrb[42].mxu1 %v7762_v35  ;;  %v9530_v35 = vpack.c.bf16 %v303_v39, %v301_v38  ;;  %v7702_v38 = vld [vmem:[%s11390_s13 + $0x308] sm:$0xff]  ;;  %v7704_v39 = vld [vmem:[%s11390_s13 + $0x318] sm:$0xff] }
  0xa5   :  { %1203 = vmatprep.mubr.f32.mxu1 %v11368_v7 }
  0xa8   :  { %1204 = vmatmul.mubr.f32.gmra.mrb[44].mxu1 %v7763_v41 }
  0xa9   :  { %1209 = vmatprep.mubr.f32.mxu1 %v11368_v7 }
  0xac   :  { %1210 = vmatmul.mubr.f32.gmra.mrb[46].mxu1 %v7764_v42  ;;  %v305_v42 = vld [vmem:[%s11390_s13 + $0xe8] sm:$0xff] }
  0xad   :  { %1546 = vmatprep.mubr.f32.mxu1 %v11368_v7 }
 0x123   :  { %v399_v49 = vpop.f32.mrb[0].mxu1  ;;  %v11774_v52 = vpop.f32.mrb[0].mxu0 }
 0x124   :  { %v401_v53 = vpop.f32.mrb[1].mxu1  ;;  %v11778_v57 = vpop.f32.mrb[1].mxu0 }
 0x125   :  { %7677 = vmatprep.mubr.msk.f32.mxu0 %vm495_vm0, %v401_v53  ;;  %v306_v53 = vld [vmem:[%s11390_s13 + $0xf0] sm:$0xff] }
 0x126   :  { %585 = vmatmul.mubr.f32.vlgmr.msra.gmra.mrb[16].mxu0 %v399_v49  ;;  %v9534_v49 = vpack.c.bf16 %v307_v43, %v305_v42  ;;  %v7706_v42 = vld [vmem:[%s11390_s13 + $0x328] sm:$0xff]  ;;  %v7708_v43 = vld [vmem:[%s11390_s13 + $0x338] sm:$0xff] }
 0x127   :  { %9509 = vmatpush1.bf16.msra.mxu0 %v9508_v51  ;;  %v405_v61 = vpop.f32.mrb[2].mxu1  ;;  %v11783_v3 = vpop.f32.mrb[2].mxu0  ;;  %v304_v51 = vld [vmem:[%s11390_s13 + $0xe0] sm:$0xff] }
 0x128   :  { %9511 = vmatprep.subr.bf16.mxu0 %v9510_v54  ;;  %v407_v1 = vpop.f32.mrb[3].mxu1  ;;  %v11787_v8 = vpop.f32.mrb[3].mxu0  ;;  %v9536_v59 = vpack.c.bf16 %v306_v53, %v304_v51  ;;  %v7705_v51 = vld [vmem:[%s11390_s13 + $0x320] sm:$0xff]  ;;  %v7707_v53 = vld [vmem:[%s11390_s13 + $0x330] sm:$0xff] }
 0x129   :  { %7678 = vmatprep.mubr.msk.f32.mxu0 %vm495_vm0, %v407_v1 }
 0x12a   :  { %591 = vmatmul.mubr.f32.gmra.mrb[18].mxu0 %v405_v61 }
 0x12b   :  { %9513 = vmatpush1.bf16.msra.mxu0 %v9512_v60  ;;  %v411_v5 = vpop.f32.mrb[4].mxu1  ;;  %v11792_v6 = vpop.f32.mrb[4].mxu0 }
 0x12c   :  { %9515 = vmatprep.subr.bf16.mxu0 %v9514_v62  ;;  %v413_v12 = vpop.f32.mrb[5].mxu1  ;;  %v11796_v15 = vpop.f32.mrb[5].mxu0  ;;  %v9538_v62 = vpack.c.bf16 %v311_v58, %v309_v56  ;;  %v7710_v56 = vld [vmem:[%s11390_s13 + $0x348] sm:$0xff]  ;;  %v7712_v58 = vld [vmem:[%s11390_s13 + $0x358] sm:$0xff] }
 0x12d   :  { %7679 = vmatprep.mubr.msk.f32.mxu0 %vm495_vm0, %v413_v12  ;;  %v314_v12 = vld [vmem:[%s11390_s13 + $0x130] sm:$0xff] }
 0x12e   :  { %597 = vmatmul.mubr.f32.gmra.mrb[20].mxu0 %v411_v5  ;;  %v9540_v5 = vpack.c.bf16 %v310_v0, %v308_v63  ;;  %v7709_v63 = vld [vmem:[%s11390_s13 + $0x340] sm:$0xff]  ;;  %v7711_v0 = vld [vmem:[%s11390_s13 + $0x350] sm:$0xff] }
 0x12f   :  { %9517 = vmatpush1.bf16.msra.mxu0 %v9516_v9  ;;  %v417_v20 = vpop.f32.mrb[6].mxu1  ;;  %v11801_v18 = vpop.f32.mrb[6].mxu0  ;;  %v315_v9 = vld [vmem:[%s11390_s13 + $0x138] sm:$0xff] }
 0x130   :  { %9519 = vmatprep.subr.bf16.mxu0 %v9518_v10  ;;  %v419_v23 = vpop.f32.mrb[7].mxu1  ;;  %v11805_v24 = vpop.f32.mrb[7].mxu0  ;;  %v9542_v14 = vpack.c.bf16 %v315_v9, %v313_v4  ;;  %v7714_v4 = vld [vmem:[%s11390_s13 + $0x368] sm:$0xff]  ;;  %v7716_v9 = vld [vmem:[%s11390_s13 + $0x378] sm:$0xff] }
 0x131   :  { %7680 = vmatprep.mubr.msk.f32.mxu0 %vm495_vm0, %v419_v23 }
 0x132   :  { %603 = vmatmul.mubr.f32.gmra.mrb[22].mxu0 %v417_v20  ;;  %v9544_v20 = vpack.c.bf16 %v314_v12, %v312_v11  ;;  %v7715_v11 = vld [vmem:[%s11390_s13 + $0x370] sm:$0xff] }
 0x133   :  { %9521 = vmatpush1.bf16.msra.mxu0 %v9520_v17  ;;  %v423_v27 = vpop.f32.mrb[8].mxu1  ;;  %v11810_v29 = vpop.f32.mrb[8].mxu0  ;;  %v319_v17 = vld [vmem:[%s11390_s13 + $0x158] sm:$0xff] }
 0x134   :  { %9523 = vmatprep.subr.bf16.mxu0 %v9522_v19  ;;  %v425_v34 = vpop.f32.mrb[9].mxu1  ;;  %v11814_v33 = vpop.f32.mrb[9].mxu0 }
 0x135   :  { %7681 = vmatprep.mubr.msk.f32.mxu0 %vm495_vm0, %v425_v34 }
 0x136   :  { %609 = vmatmul.mubr.f32.gmra.mrb[24].mxu0 %v423_v27 }
 0x137   :  { %9525 = vmatpush1.bf16.msra.mxu0 %v9524_v28  ;;  %v429_v45 = vpop.f32.mrb[10].mxu1  ;;  %v11819_v50 = vpop.f32.mrb[10].mxu0  ;;  %v9548_v28 = vpack.c.bf16 %v318_v22, %v316_v21  ;;  %v7719_v21 = vld [vmem:[%s11390_s13 + $0x390] sm:$0xff] }
 0x138   :  { %9527 = vmatprep.subr.bf16.mxu0 %v9526_v30  ;;  %v431_v40 = vpop.f32.mrb[11].mxu1  ;;  %v11823_v41 = vpop.f32.mrb[11].mxu0  ;;  %v9550_v30 = vpack.c.bf16 %v323_v25, %v321_v26  ;;  %v7722_v26 = vld [vmem:[%s11390_s13 + $0x3a8] sm:$0xff]  ;;  %v7724_v25 = vld [vmem:[%s11390_s13 + $0x3b8] sm:$0xff] }
 0x139   :  { %7682 = vmatprep.mubr.msk.f32.mxu0 %vm495_vm0, %v431_v40 }
 0x13a   :  { %615 = vmatmul.mubr.f32.gmra.mrb[26].mxu0 %v429_v45 }
 0x13b   :  { %9529 = vmatpush1.bf16.msra.mxu0 %v9528_v44  ;;  %v435_v47 = vpop.f32.mrb[12].mxu1  ;;  %v11828_v48 = vpop.f32.mrb[12].mxu0  ;;  %v9552_v44 = vpack.c.bf16 %v322_v32, %v320_v31  ;;  %v7723_v31 = vld [vmem:[%s11390_s13 + $0x3b0] sm:$0xff] }
 0x13c   :  { %9531 = vmatprep.subr.bf16.mxu0 %v9530_v35  ;;  %v437_v54 = vpop.f32.mrb[13].mxu1  ;;  %v11832_v55 = vpop.f32.mrb[13].mxu0  ;;  %v9586_v35 = vpack.c.bf16 %v7704_v39, %v7702_v38  ;;  %v7726_v38 = vld [vmem:[%s11390_s13 + $0x3c8] sm:$0xff]  ;;  %v7728_v39 = vld [vmem:[%s11390_s13 + $0x3d8] sm:$0xff] }
 0x13d   :  { %7683 = vmatprep.mubr.msk.f32.mxu0 %vm495_vm0, %v437_v54 }
 0x13e   :  { %621 = vmatmul.mubr.f32.gmra.mrb[28].mxu0 %v435_v47 }
 0x13f   :  { %9533 = vmatpush1.bf16.msra.mxu0 %v9532_v46  ;;  %v441_v60 = vpop.f32.mrb[14].mxu1  ;;  %v11837_v61 = vpop.f32.mrb[14].mxu0  ;;  %v9588_v46 = vpack.c.bf16 %v7703_v37, %v7701_v36  ;;  %v7727_v36 = vld [vmem:[%s11390_s13 + $0x3d0] sm:$0xff] }
 0x140   :  { %9535 = vmatprep.subr.bf16.mxu0 %v9534_v49  ;;  %v443_v1 = vpop.f32.mrb[15].mxu1  ;;  %v11841_v2 = vpop.f32.mrb[15].mxu0  ;;  %v9590_v49 = vpack.c.bf16 %v7708_v43, %v7706_v42  ;;  %v7730_v42 = vld [vmem:[%s11390_s13 + $0x3e8] sm:$0xff]  ;;  %v7732_v43 = vld [vmem:[%s11390_s13 + $0x3f8] sm:$0xff] }
 0x141   :  { %7684 = vmatprep.mubr.msk.f32.mxu0 %vm495_vm0, %v443_v1 }
 0x142   :  { %627 = vmatmul.mubr.f32.gmra.mrb[30].mxu0 %v441_v60 }
 0x143   :  { %9537 = vmatpush1.bf16.msra.mxu0 %v9536_v59  ;;  %7685 = vmatprep.mubr.msk.f32.mxu0 %vm495_vm0, %v11778_v57  ;;  %v11848_v10 = vpop.f32.mrb[16].mxu1  ;;  %v9546_v57 = vpack.c.bf16 %v319_v17, %v317_v16  ;;  %v9592_v59 = vpack.c.bf16 %v7707_v53, %v7705_v51  ;;  %v7718_v16 = vld [vmem:[%s11390_s13 + $0x388] sm:$0xff]  ;;  %v7720_v17 = vld [vmem:[%s11390_s13 + $0x398] sm:$0xff]  ;;  %v7731_v51 = vld [vmem:[%s11390_s13 + $0x3f0] sm:$0xff] }
 0x144   :  { %9539 = vmatprep.subr.bf16.mxu0 %v9538_v62  ;;  %v11852_v13 = vpop.f32.mrb[17].mxu1  ;;  %v9594_v62 = vpack.c.bf16 %v7712_v58, %v7710_v56  ;;  %v7734_v56 = vld [vmem:[%s11390_s13 + $0x408] sm:$0xff]  ;;  %v7736_v58 = vld [vmem:[%s11390_s13 + $0x418] sm:$0xff] }
 0x147   :  { %9541 = vmatpush1.bf16.msra.mxu0 %v9540_v5  ;;  %v11856_v19 = vpop.f32.mrb[18].mxu1  ;;  %v9598_v5 = vpack.c.bf16 %v7716_v9, %v7714_v4  ;;  %v7738_v4 = vld [vmem:[%s11390_s13 + $0x428] sm:$0xff]  ;;  %v7740_v9 = vld [vmem:[%s11390_s13 + $0x438] sm:$0xff] }
 0x148   :  { %9543 = vmatprep.subr.bf16.mxu0 %v9542_v14  ;;  %v11860_v23 = vpop.f32.mrb[19].mxu1  ;;  %v7713_v14 = vld [vmem:[%s11390_s13 + $0x360] sm:$0xff] }
 0x14b   :  { %9545 = vmatpush1.bf16.msra.mxu0 %v9544_v20  ;;  %v11864_v27 = vpop.f32.mrb[20].mxu1  ;;  %v9602_v20 = vpack.c.bf16 %v7720_v17, %v7718_v16  ;;  %v7742_v16 = vld [vmem:[%s11390_s13 + $0x448] sm:$0xff]  ;;  %v7744_v17 = vld [vmem:[%s11390_s13 + $0x458] sm:$0xff] }
 0x14c   :  { %9547 = vmatprep.subr.bf16.mxu0 %v9546_v57  ;;  %v11868_v34 = vpop.f32.mrb[21].mxu1  ;;  %v7717_v57 = vld [vmem:[%s11390_s13 + $0x380] sm:$0xff] }
 0x14f   :  { %9549 = vmatpush1.bf16.msra.mxu0 %v9548_v28  ;;  %v11872_v45 = vpop.f32.mrb[22].mxu1  ;;  %v9606_v28 = vpack.c.bf16 %v7724_v25, %v7722_v26  ;;  %v7746_v26 = vld [vmem:[%s11390_s13 + $0x468] sm:$0xff]  ;;  %v7748_v25 = vld [vmem:[%s11390_s13 + $0x478] sm:$0xff] }
 0x150   :  { %9551 = vmatprep.subr.bf16.mxu0 %v9550_v30  ;;  %v11876_v40 = vpop.f32.mrb[23].mxu1  ;;  %v7721_v30 = vld [vmem:[%s11390_s13 + $0x3a0] sm:$0xff] }
 0x153   :  { %9553 = vmatpush1.bf16.msra.mxu0 %v9552_v44  ;;  %v11880_v47 = vpop.f32.mrb[24].mxu1  ;;  %v9610_v44 = vpack.c.bf16 %v7728_v39, %v7726_v38  ;;  %v7747_v38 = vld [vmem:[%s11390_s13 + $0x470] sm:$0xff] }
 0x154   :  { %9587 = vmatprep.subr.bf16.mxu0 %v9586_v35  ;;  %v11884_v54 = vpop.f32.mrb[25].mxu1  ;;  %v7725_v35 = vld [vmem:[%s11390_s13 + $0x3c0] sm:$0xff] }
 0x156   :  { %722 = vmatmul.mubr.f32.vlgmr.msra.gmra.mrb[16].mxu0 %v11774_v52  ;;  %v9596_v52 = vpack.c.bf16 %v7711_v0, %v7709_v63  ;;  %v7735_v63 = vld [vmem:[%s11390_s13 + $0x410] sm:$0xff] }
 0x157   :  { %9589 = vmatpush1.bf16.msra.mxu0 %v9588_v46  ;;  %7686 = vmatprep.mubr.msk.f32.mxu0 %vm495_vm0, %v11787_v8  ;;  %v11891_v60 = vpop.f32.mrb[26].mxu1  ;;  %v9614_v46 = vpack.c.bf16 %v7732_v43, %v7730_v42  ;;  %v7765_v43 = vld [vmem:[%s11390_s13 + $0x480] sm:$0xff] }
 0x158   :  { %9591 = vmatprep.subr.bf16.mxu0 %v9590_v49  ;;  %v11895_v1 = vpop.f32.mrb[27].mxu1  ;;  %v7729_v49 = vld [vmem:[%s11390_s13 + $0x3e0] sm:$0xff] }
 0x15a   :  { %728 = vmatmul.mubr.f32.gmra.mrb[18].mxu0 %v11783_v3  ;;  %v9600_v3 = vpack.c.bf16 %v7715_v11, %v7713_v14  ;;  %v7739_v14 = vld [vmem:[%s11390_s13 + $0x430] sm:$0xff] }
 0x15b   :  { %9593 = vmatpush1.bf16.msra.mxu0 %v9592_v59  ;;  %7687 = vmatprep.mubr.msk.f32.mxu0 %vm495_vm0, %v11796_v15  ;;  %v11902_v8 = vpop.f32.mrb[28].mxu1  ;;  %v9618_v59 = vpack.c.bf16 %v7736_v58, %v7734_v56 }
 0x15c   :  { %9595 = vmatprep.subr.bf16.mxu0 %v9594_v62  ;;  %v11906_v12 = vpop.f32.mrb[29].mxu1  ;;  %v7733_v62 = vld [vmem:[%s11390_s13 + $0x400] sm:$0xff] }
 0x15e   :  { %734 = vmatmul.mubr.f32.gmra.mrb[20].mxu0 %v11792_v6  ;;  %v9604_v6 = vpack.c.bf16 %v7719_v21, %v7717_v57  ;;  %v7743_v57 = vld [vmem:[%s11390_s13 + $0x450] sm:$0xff] }
 0x15f   :  { %9597 = vmatpush1.bf16.msra.mxu0 %v9596_v52  ;;  %7688 = vmatprep.mubr.msk.f32.mxu0 %vm495_vm0, %v11805_v24  ;;  %v11913_v15 = vpop.f32.mrb[30].mxu1  ;;  %v9622_v52 = vpack.c.bf16 %v7740_v9, %v7738_v4 }
 0x160   :  { %9599 = vmatprep.subr.bf16.mxu0 %v9598_v5  ;;  %v11917_v22 = vpop.f32.mrb[31].mxu1  ;;  %v7737_v5 = vld [vmem:[%s11390_s13 + $0x420] sm:$0xff] }
 0x162   :  { %740 = vmatmul.mubr.f32.gmra.mrb[22].mxu0 %v11801_v18  ;;  %v9608_v18 = vpack.c.bf16 %v7723_v31, %v7721_v30  ;;  %v9630_v30 = vpack.c.bf16 %v7748_v25, %v7746_v26  ;;  %v7745_v31 = vld [vmem:[%s11390_s13 + $0x460] sm:$0xff]  ;;  %v7786_v26 = vld [vmem:[%s11390_s13 + $0x528] sm:$0xff]  ;;  %v7788_v25 = vld [vmem:[%s11390_s13 + $0x538] sm:$0xff] }
 0x163   :  { %9601 = vmatpush1.bf16.msra.mxu0 %v9600_v3  ;;  %7689 = vmatprep.mubr.msk.f32.mxu0 %vm495_vm0, %v11814_v33  ;;  %v11924_v24 = vpop.f32.mrb[32].mxu1 }
 0x164   :  { %9603 = vmatprep.subr.bf16.mxu0 %v9602_v20  ;;  %v11928_v32 = vpop.f32.mrb[33].mxu1  ;;  %v7741_v20 = vld [vmem:[%s11390_s13 + $0x440] sm:$0xff] }
 0x166   :  { %746 = vmatmul.mubr.f32.gmra.mrb[24].mxu0 %v11810_v29  ;;  %v9612_v29 = vpack.c.bf16 %v7727_v36, %v7725_v35  ;;  %v9632_v35 = vpack.c.bf16 %v7747_v38, %v7745_v31  ;;  %v7790_v31 = vld [vmem:[%s11390_s13 + $0x548] sm:$0xff]  ;;  %v7792_v38 = vld [vmem:[%s11390_s13 + $0x558] sm:$0xff] }
 0x167   :  { %9605 = vmatpush1.bf16.msra.mxu0 %v9604_v6  ;;  %7690 = vmatprep.mubr.msk.f32.mxu0 %vm495_vm0, %v11823_v41  ;;  %v11935_v33 = vpop.f32.mrb[34].mxu1  ;;  %v9628_v6 = vpack.c.bf16 %v7743_v57, %v7741_v20  ;;  %v7781_v20 = vld [vmem:[%s11390_s13 + $0x500] sm:$0xff]  ;;  %v7783_v57 = vld [vmem:[%s11390_s13 + $0x510] sm:$0xff] }
 0x168   :  { %9607 = vmatprep.subr.bf16.mxu0 %v9606_v28  ;;  %v11939_v37 = vpop.f32.mrb[35].mxu1 }
 0x16a   :  { %752 = vmatmul.mubr.f32.gmra.mrb[26].mxu0 %v11819_v50  ;;  %v9616_v50 = vpack.c.bf16 %v7731_v51, %v7729_v49  ;;  %v7770_v49 = vld [vmem:[%s11390_s13 + $0x4a8] sm:$0xff]  ;;  %v7772_v51 = vld [vmem:[%s11390_s13 + $0x4b8] sm:$0xff] }
 0x16b   :  { %9609 = vmatpush1.bf16.msra.mxu0 %v9608_v18  ;;  %7691 = vmatprep.mubr.msk.f32.mxu0 %vm495_vm0, %v11832_v55  ;;  %v11946_v41 = vpop.f32.mrb[36].mxu1  ;;  %v7766_v18 = vld [vmem:[%s11390_s13 + $0x488] sm:$0xff]  ;;  %v9670_v58 = vpack.c.bf16 %v7772_v51, %v7770_v49  ;;  %v7800_v51 = vld [vmem:[%s11390_s13 + $0x598] sm:$0xff] }
 0x16c   :  { %9611 = vmatprep.subr.bf16.mxu0 %v9610_v44  ;;  %v11950_v53 = vpop.f32.mrb[37].mxu1  ;;  %v7768_v44 = vld [vmem:[%s11390_s13 + $0x498] sm:$0xff]  ;;  %v7798_v49 = vld [vmem:[%s11390_s13 + $0x588] sm:$0xff] }
 0x16d   :  { %v9666_v42 = vpack.c.bf16 %v7768_v44, %v7766_v18  ;;  %v7789_v18 = vld [vmem:[%s11390_s13 + $0x540] sm:$0xff]  ;;  %v7791_v44 = vld [vmem:[%s11390_s13 + $0x550] sm:$0xff] }
 0x16e   :  { %758 = vmatmul.mubr.f32.gmra.mrb[28].mxu0 %v11828_v48  ;;  %v9620_v48 = vpack.c.bf16 %v7735_v63, %v7733_v62  ;;  %v7774_v62 = vld [vmem:[%s11390_s13 + $0x4c8] sm:$0xff]  ;;  %v7776_v63 = vld [vmem:[%s11390_s13 + $0x4d8] sm:$0xff] }
 0x16f   :  { %9613 = vmatpush1.bf16.msra.mxu0 %v9612_v29  ;;  %7692 = vmatprep.mubr.msk.f32.mxu0 %vm495_vm0, %v11841_v2  ;;  %v11957_v55 = vpop.f32.mrb[38].mxu1  ;;  %v7767_v29 = vld [vmem:[%s11390_s13 + $0x490] sm:$0xff]  ;;  %v9674_v9 = vpack.c.bf16 %v7776_v63, %v7774_v62  ;;  %v7801_v62 = vld [vmem:[%s11390_s13 + $0x5a0] sm:$0xff] }
 0x170   :  { %9615 = vmatprep.subr.bf16.mxu0 %v9614_v46  ;;  %v11961_v0 = vpop.f32.mrb[39].mxu1  ;;  %v9668_v56 = vpack.c.bf16 %v7767_v29, %v7765_v43  ;;  %v7793_v43 = vld [vmem:[%s11390_s13 + $0x560] sm:$0xff]  ;;  %v7795_v29 = vld [vmem:[%s11390_s13 + $0x570] sm:$0xff] }
 0x171   :  { %v7803_v63 = vld [vmem:[%s11390_s13 + $0x5b0] sm:$0xff] }
 0x172   :  { %764 = vmatmul.mubr.f32.gmra.mrb[30].mxu0 %v11837_v61  ;;  %v9624_v61 = vpack.c.bf16 %v7739_v14, %v7737_v5  ;;  %v7778_v5 = vld [vmem:[%s11390_s13 + $0x4e8] sm:$0xff]  ;;  %v7780_v14 = vld [vmem:[%s11390_s13 + $0x4f8] sm:$0xff] }
 0x173   :  { %9617 = vmatpush1.bf16.msra.mxu0 %v9616_v50  ;;  %7749 = vmatprep.mubr.msk.f32.mxu0 %vm495_vm0, %v11852_v13  ;;  %v11968_v2 = vpop.f32.mrb[40].mxu1  ;;  %v9626_v13 = vpack.c.bf16 %v7744_v17, %v7742_v16  ;;  %v7769_v50 = vld [vmem:[%s11390_s13 + $0x4a0] sm:$0xff]  ;;  %v7779_v17 = vld [vmem:[%s11390_s13 + $0x4f0] sm:$0xff] }
 0x174   :  { %9619 = vmatprep.subr.bf16.mxu0 %v9618_v59  ;;  %v11972_v11 = vpop.f32.mrb[41].mxu1  ;;  %v7771_v59 = vld [vmem:[%s11390_s13 + $0x4b0] sm:$0xff]  ;;  %v7777_v16 = vld [vmem:[%s11390_s13 + $0x4e0] sm:$0xff] }
 0x175   :  { %v9672_v4 = vpack.c.bf16 %v7771_v59, %v7769_v50  ;;  %v7802_v50 = vld [vmem:[%s11390_s13 + $0x5a8] sm:$0xff]  ;;  %v7804_v59 = vld [vmem:[%s11390_s13 + $0x5b8] sm:$0xff] }
 0x177   :  { %9621 = vmatpush1.bf16.msra.mxu0 %v9620_v48  ;;  %v11976_v3 = vpop.f32.mrb[42].mxu1  ;;  %v7773_v48 = vld [vmem:[%s11390_s13 + $0x4c0] sm:$0xff] }
 0x178   :  { %9623 = vmatprep.subr.bf16.mxu0 %v9622_v52  ;;  %v11980_v21 = vpop.f32.mrb[43].mxu1  ;;  %v7775_v52 = vld [vmem:[%s11390_s13 + $0x4d0] sm:$0xff] }
 0x17b   :  { %9625 = vmatpush1.bf16.msra.mxu0 %v9624_v61  ;;  %v11984_v28 = vpop.f32.mrb[44].mxu1  ;;  %v7782_v61 = vld [vmem:[%s11390_s13 + $0x508] sm:$0xff] }
 0x17c   :  { %9627 = vmatprep.subr.bf16.mxu0 %v9626_v13  ;;  %v11988_v39 = vpop.f32.mrb[45].mxu1  ;;  %v7784_v13 = vld [vmem:[%s11390_s13 + $0x518] sm:$0xff] }
 0x17f   :  { %9629 = vmatpush1.bf16.msra.mxu0 %v9628_v6  ;;  %v11992_v36 = vpop.f32.mrb[46].mxu1  ;;  %v7785_v6 = vld [vmem:[%s11390_s13 + $0x520] sm:$0xff] }
 0x180   :  { %9631 = vmatprep.subr.bf16.mxu0 %v9630_v30  ;;  %v11996_v46 = vpop.f32.mrb[47].mxu1  ;;  %v7787_v30 = vld [vmem:[%s11390_s13 + $0x530] sm:$0xff] }
 0x183   :  { %9633 = vmatpush1.bf16.msra.mxu0 %v9632_v35  ;;  %v7794_v35 = vld [vmem:[%s11390_s13 + $0x568] sm:$0xff] }
 0x184   :  { %9667 = vmatprep.subr.bf16.mxu0 %v9666_v42  ;;  %v7796_v42 = vld [vmem:[%s11390_s13 + $0x578] sm:$0xff] }
 0x186   :  { %1030 = vmatmul.mubr.f32.vlgmr.msra.gmra.mrb[16].mxu0 %v11848_v10  ;;  %v9676_v10 = vpack.c.bf16 %v7775_v52, %v7773_v48  ;;  %v9704_v48 = vpack.c.bf16 %v7803_v63, %v7801_v62 }
 0x187   :  { %9669 = vmatpush1.bf16.msra.mxu0 %v9668_v56  ;;  %7750 = vmatprep.mubr.msk.f32.mxu0 %vm495_vm0, %v11860_v23  ;;  %v9678_v23 = vpack.c.bf16 %v7780_v14, %v7778_v5  ;;  %v7797_v56 = vld [vmem:[%s11390_s13 + $0x580] sm:$0xff]  ;;  %v7807_v5 = vld [vmem:[%s11390_s13 + $0x5d0] sm:$0xff]  ;;  %v7810_v14 = vld [vmem:[%s11390_s13 + $0x5e8] sm:$0xff] }
 0x188   :  { %9671 = vmatprep.subr.bf16.mxu0 %v9670_v58  ;;  %v7799_v58 = vld [vmem:[%s11390_s13 + $0x590] sm:$0xff] }
 0x18a   :  { %1036 = vmatmul.mubr.f32.gmra.mrb[18].mxu0 %v11856_v19  ;;  %v9680_v19 = vpack.c.bf16 %v7779_v17, %v7777_v16  ;;  %v7809_v16 = vld [vmem:[%s11390_s13 + $0x5e0] sm:$0xff]  ;;  %v7811_v17 = vld [vmem:[%s11390_s13 + $0x5f0] sm:$0xff] }
 0x18b   :  { %9673 = vmatpush1.bf16.msra.mxu0 %v9672_v4  ;;  %7751 = vmatprep.mubr.msk.f32.mxu0 %vm495_vm0, %v11868_v34  ;;  %v9682_v34 = vpack.c.bf16 %v7784_v13, %v7782_v61  ;;  %v7806_v4 = vld [vmem:[%s11390_s13 + $0x5c8] sm:$0xff]  ;;  %v9712_v61 = vpack.c.bf16 %v7811_v17, %v7809_v16  ;;  %v1468_v16 = vld [vmem:[%s11395_s17 + $0x10] sm:$0xff] }
 0x18c   :  { %9675 = vmatprep.subr.bf16.mxu0 %v9674_v9  ;;  %v7808_v9 = vld [vmem:[%s11390_s13 + $0x5d8] sm:$0xff]  ;;  %v7899_v17 = vld [vmem:[%s11395_s17 + $0x50] sm:$0xff] }
 0x18d   :  { %v9706_v52 = vpack.c.bf16 %v7808_v9, %v7806_v4 }
 0x18e   :  { %1042 = vmatmul.mubr.f32.gmra.mrb[20].mxu0 %v11864_v27  ;;  %v9684_v27 = vpack.c.bf16 %v7783_v57, %v7781_v20 }
 0x18f   :  { %9677 = vmatpush1.bf16.msra.mxu0 %v9676_v10  ;;  %7752 = vmatprep.mubr.msk.f32.mxu0 %vm495_vm0, %v11876_v40  ;;  %v9686_v40 = vpack.c.bf16 %v7788_v25, %v7786_v26  ;;  %v7812_v10 = vld [vmem:[%s11390_s13 + $0x5f8] sm:$0xff] }
 0x190   :  { %9679 = vmatprep.subr.bf16.mxu0 %v9678_v23 }
 0x192   :  { %1048 = vmatmul.mubr.f32.gmra.mrb[22].mxu0 %v11872_v45  ;;  %v9688_v45 = vpack.c.bf16 %v7787_v30, %v7785_v6 }
 0x193   :  { %9681 = vmatpush1.bf16.msra.mxu0 %v9680_v19  ;;  %7753 = vmatprep.mubr.msk.f32.mxu0 %vm495_vm0, %v11884_v54  ;;  %v9690_v54 = vpack.c.bf16 %v7792_v38, %v7790_v31 }
 0x194   :  { %9683 = vmatprep.subr.bf16.mxu0 %v9682_v34 }
 0x196   :  { %1054 = vmatmul.mubr.f32.gmra.mrb[24].mxu0 %v11880_v47  ;;  %v9692_v47 = vpack.c.bf16 %v7791_v44, %v7789_v18 }
 0x197   :  { %9685 = vmatpush1.bf16.msra.mxu0 %v9684_v27  ;;  %7754 = vmatprep.mubr.msk.f32.mxu0 %vm495_vm0, %v11895_v1  ;;  %v9694_v1 = vpack.c.bf16 %v7796_v42, %v7794_v35 }
 0x198   :  { %9687 = vmatprep.subr.bf16.mxu0 %v9686_v40 }
 0x19a   :  { %1060 = vmatmul.mubr.f32.gmra.mrb[26].mxu0 %v11891_v60  ;;  %v9696_v60 = vpack.c.bf16 %v7795_v29, %v7793_v43 }
 0x19b   :  { %9689 = vmatpush1.bf16.msra.mxu0 %v9688_v45  ;;  %7755 = vmatprep.mubr.msk.f32.mxu0 %vm495_vm0, %v11906_v12  ;;  %v9698_v12 = vpack.c.bf16 %v7800_v51, %v7798_v49 }
 0x19c   :  { %9691 = vmatprep.subr.bf16.mxu0 %v9690_v54 }
 0x19e   :  { %1066 = vmatmul.mubr.f32.gmra.mrb[28].mxu0 %v11902_v8  ;;  %v9700_v8 = vpack.c.bf16 %v7799_v58, %v7797_v56 }
 0x19f   :  { %9693 = vmatpush1.bf16.msra.mxu0 %v9692_v47  ;;  %7756 = vmatprep.mubr.msk.f32.mxu0 %vm495_vm0, %v11917_v22  ;;  %v9702_v22 = vpack.c.bf16 %v7804_v59, %v7802_v50 }
 0x1a0   :  { %9695 = vmatprep.subr.bf16.mxu0 %v9694_v1 }
 0x1a2   :  { %1072 = vmatmul.mubr.f32.gmra.mrb[30].mxu0 %v11913_v15  ;;  %v7805_v15 = vld [vmem:[%s11390_s13 + $0x5c0] sm:$0xff]  ;;  %s14012_s13 = sld [smem:[#allocation14_spill]] }
 0x1a3   :  { %9697 = vmatpush1.bf16.msra.mxu0 %v9696_v60  ;;  %7813 = vmatprep.mubr.msk.f32.mxu0 %vm495_vm0, %v11928_v32  ;;  %v9708_v23 = vpack.c.bf16 %v7807_v5, %v7805_v15  ;;  %v9710_v32 = vpack.c.bf16 %v7812_v10, %v7810_v14  ;;  %v1466_v14 = vld [vmem:[%s11395_s17] sm:$0xff] }
 0x1a4   :  { %9699 = vmatprep.subr.bf16.mxu0 %v9698_v12  ;;  %v7897_v10 = vld [vmem:[%s11395_s17 + $0x40] sm:$0xff] }
 0x1a7   :  { %9701 = vmatpush1.bf16.msra.mxu0 %v9700_v8 }
 0x1a8   :  { %9703 = vmatprep.subr.bf16.mxu0 %v9702_v22 }
 0x1ab   :  { %9705 = vmatpush1.bf16.msra.mxu0 %v9704_v48 }
 0x1ac   :  { %9707 = vmatprep.subr.bf16.mxu0 %v9706_v52 }
 0x1af   :  { %9709 = vmatpush1.bf16.msra.mxu0 %v9708_v23  ;;  %v1467_v23 = vld [vmem:[%s11395_s17 + $0x8] sm:$0xff] }
 0x1b0   :  { %9711 = vmatprep.subr.bf16.mxu0 %v9710_v32  ;;  %v7898_v32 = vld [vmem:[%s11395_s17 + $0x48] sm:$0xff] }
 0x1b3   :  { %9713 = vmatpush1.bf16.msra.mxu0 %v9712_v61  ;;  %v7834_v61 = vld [vmem:[%s11400_s21 + $0x208] sm:$0xff] }
 0x1b6   :  { %1354 = vmatmul.mubr.f32.vlgmr.msra.gmra.mrb[16].mxu0 %v11924_v24 }
 0x1b7   :  { %7814 = vmatprep.mubr.msk.f32.mxu0 %vm495_vm0, %v11939_v37 }
 0x1ba   :  { %1360 = vmatmul.mubr.f32.gmra.mrb[18].mxu0 %v11935_v33 }
 0x1bb   :  { %7815 = vmatprep.mubr.msk.f32.mxu0 %vm495_vm0, %v11950_v53 }
 0x1be   :  { %1366 = vmatmul.mubr.f32.gmra.mrb[20].mxu0 %v11946_v41 }
 0x1bf   :  { %7816 = vmatprep.mubr.msk.f32.mxu0 %vm495_vm0, %v11961_v0 }
 0x1c2   :  { %1372 = vmatmul.mubr.f32.gmra.mrb[22].mxu0 %v11957_v55 }
 0x1c3   :  { %7817 = vmatprep.mubr.msk.f32.mxu0 %vm495_vm0, %v11972_v11 }
 0x1c6   :  { %1378 = vmatmul.mubr.f32.gmra.mrb[24].mxu0 %v11968_v2 }
 0x1c7   :  { %7818 = vmatprep.mubr.msk.f32.mxu0 %vm495_vm0, %v11980_v21 }
 0x1ca   :  { %1384 = vmatmul.mubr.f32.gmra.mrb[26].mxu0 %v11976_v3 }
 0x1cb   :  { %7819 = vmatprep.mubr.msk.f32.mxu0 %vm495_vm0, %v11988_v39 }
 0x1ce   :  { %1390 = vmatmul.mubr.f32.gmra.mrb[28].mxu0 %v11984_v28 }
 0x1cf   :  { %7820 = vmatprep.mubr.msk.f32.mxu0 %vm495_vm0, %v11996_v46 }
 0x1d2   :  { %1396 = vmatmul.mubr.f32.gmra.mrb[30].mxu0 %v11992_v36 }
 0x1d3   :  { %2065 = vmatprep.mubr.f32.mxu0 %v11368_v7 }
 0x289   :  { %v1355_v24 = vpop.f32.mrb[16].mxu0 }
 0x28a   :  { %v1357_v33 = vpop.f32.mrb[17].mxu0  ;;  %v1434_v37 = vmul.f32 0.2, %v1355_v24  ;;  %vm1418_vm1 = vcmp.gt.f32.partialorder %v1355_v24, 0.0 }
 0x28b   :  { %v1435_v41 = vmul.f32 0.2, %v1357_v33  ;;  %vm1419_vm2 = vcmp.gt.f32.partialorder %v1357_v33, 0.0 }
 0x28c   :  { %v1450_v11 = vsel %vm1418_vm1, %v1355_v24, %v1434_v37  ;;  %v7836_v24 = vld [vmem:[%s11400_s21 + $0x218] sm:$0xff] }
 0x28d   :  { %v1361_v53 = vpop.f32.mrb[18].mxu0  ;;  %v1451_v21 = vsel %vm1419_vm2, %v1357_v33, %v1435_v41  ;;  %v1469_v33 = vld [vmem:[%s11395_s17 + $0x18] sm:$0xff]  ;;  %v9746_v41 = vpack.c.bf16 %v7836_v24, %v7834_v61  ;;  %vm2648_vm2 = vcmask 130048  }
 0x28e   :  { %vm1420_vm3 = vcmp.gt.f32.partialorder %v1361_v53, 0.0  ;;  %v1436_v55 = vmul.f32 0.2, %v1361_v53  ;;  %v1363_v0 = vpop.f32.mrb[19].mxu0  ;;  %v7900_v37 = vld [vmem:[%s11395_s17 + $0x58] sm:$0xff] }
 0x28f   :  { %vm1421_vm4 = vcmp.gt.f32.partialorder %v1363_v0, 0.0  ;;  %v1437_v2 = vmul.f32 0.2, %v1363_v0 }
 0x290   :  { %v1452_v3 = vsel %vm1420_vm3, %v1361_v53, %v1436_v55  ;;  %v7833_v53 = vld [vmem:[%s11400_s21 + $0x200] sm:$0xff]  ;;  %v7835_v55 = vld [vmem:[%s11400_s21 + $0x210] sm:$0xff] }
 0x291   :  { %v12089_v28 = vpack.c.bf16 %v1452_v3, %v1450_v11  ;;  %v1453_v39 = vsel %vm1421_vm4, %v1363_v0, %v1437_v2  ;;  %v1367_v36 = vpop.f32.mrb[20].mxu0  ;;  %v7838_v0 = vld [vmem:[%s11400_s21 + $0x228] sm:$0xff]  ;;  %v7840_v2 = vld [vmem:[%s11400_s21 + $0x238] sm:$0xff]  ;;  %v7825_v11 = vld [vmem:[%s11395_s17 + $0x20] sm:$0xff]  ;;  %v9748_v3 = vpack.c.bf16 %v7835_v55, %v7833_v53 }
 0x292   :  { %v12091_v46 = vpack.c.bf16 %v1453_v39, %v1451_v21  ;;  %v1369_v13 = vpop.f32.mrb[21].mxu0  ;;  %v1438_v19 = vmul.f32 0.2, %v1367_v36  ;;  %vm1422_vm5 = vcmp.gt.f32.partialorder %v1367_v36, 0.0  ;;  %v7969_v21 = vld [vmem:[%s11395_s17 + $0x60] sm:$0xff]  ;;  %v7876_v53 = vld [vmem:[%s11400_s21 + $0x358] sm:$0xff] }
 0x293   :  { %v1439_v34 = vmul.f32 0.2, %v1369_v13  ;;  %vm1423_vm6 = vcmp.gt.f32.partialorder %v1369_v13, 0.0  ;;  %v7837_v39 = vld [vmem:[%s11400_s21 + $0x220] sm:$0xff] }
 0x294   :  { %9715 = vmatprep.subr.bf16.mxu1 %v12091_v46  ;;  %9875 = vmatprep.subr.bf16.mxu0 %v12091_v46  ;;  %v1454_v27 = vsel %vm1422_vm5, %v1367_v36, %v1438_v19  ;;  %v7839_v36 = vld [vmem:[%s11400_s21 + $0x230] sm:$0xff]  ;;  %v7826_v19 = vld [vmem:[%s11395_s17 + $0x28] sm:$0xff] }
 0x295   :  { %v1373_v20 = vpop.f32.mrb[22].mxu0  ;;  %9717 = vmatpush1.bf16.msra.mxu1 %v12089_v28  ;;  %9877 = vmatpush1.bf16.msra.mxu0 %v12089_v28  ;;  %v1455_v6 = vsel %vm1423_vm6, %v1369_v13, %v1439_v34  ;;  %v7844_v13 = vld [vmem:[%s11400_s21 + $0x258] sm:$0xff]  ;;  %v9752_v34 = vpack.c.bf16 %v7839_v36, %v7837_v39  ;;  %v7877_v36 = vld [vmem:[%s11400_s21 + $0x360] sm:$0xff] }
 0x296   :  { %vm1424_vm7 = vcmp.gt.f32.partialorder %v1373_v20, 0.0  ;;  %v1440_v57 = vmul.f32 0.2, %v1373_v20  ;;  %v1375_v26 = vpop.f32.mrb[23].mxu0 }
 0x297   :  { %vm1425_vm8 = vcmp.gt.f32.partialorder %v1375_v26, 0.0  ;;  %v1441_v25 = vmul.f32 0.2, %v1375_v26 }
 0x298   :  { %v1456_v40 = vsel %vm1424_vm7, %v1373_v20, %v1440_v57  ;;  %v7970_v20 = vld [vmem:[%s11395_s17 + $0x68] sm:$0xff] }
 0x299   :  { %v12097_v30 = vpack.c.bf16 %v1456_v40, %v1454_v27  ;;  %v1457_v31 = vsel %vm1425_vm8, %v1375_v26, %v1441_v25  ;;  %v1379_v38 = vpop.f32.mrb[24].mxu0  ;;  %v7841_v26 = vld [vmem:[%s11400_s21 + $0x240] sm:$0xff]  ;;  %v7843_v25 = vld [vmem:[%s11400_s21 + $0x250] sm:$0xff]  ;;  %v7846_v27 = vld [vmem:[%s11400_s21 + $0x268] sm:$0xff] }
 0x29a   :  { %v9718_v45 = vpack.c.bf16 %v1457_v31, %v1455_v6  ;;  %v1381_v54 = vpop.f32.mrb[25].mxu0  ;;  %v1442_v18 = vmul.f32 0.2, %v1379_v38  ;;  %vm1426_vm9 = vcmp.gt.f32.partialorder %v1379_v38, 0.0  ;;  %v7848_v40 = vld [vmem:[%s11400_s21 + $0x278] sm:$0xff]  ;;  %v7827_v6 = vld [vmem:[%s11395_s17 + $0x30] sm:$0xff] }
 0x29b   :  { %v1443_v44 = vmul.f32 0.2, %v1381_v54  ;;  %vm1427_vm10 = vcmp.gt.f32.partialorder %v1381_v54, 0.0  ;;  %v9758_v31 = vpack.c.bf16 %v7848_v40, %v7846_v27  ;;  %v7971_v27 = vld [vmem:[%s11395_s17 + $0x70] sm:$0xff]  ;;  %v7886_v40 = vld [vmem:[%s11400_s21 + $0x3a8] sm:$0xff] }
 0x29c   :  { %9719 = vmatprep.subr.bf16.mxu1 %v9718_v45  ;;  %9879 = vmatprep.subr.bf16.mxu0 %v9718_v45  ;;  %v1458_v43 = vsel %vm1426_vm9, %v1379_v38, %v1442_v18  ;;  %v7845_v38 = vld [vmem:[%s11400_s21 + $0x260] sm:$0xff]  ;;  %v7852_v18 = vld [vmem:[%s11400_s21 + $0x298] sm:$0xff] }
 0x29d   :  { %v1385_v35 = vpop.f32.mrb[26].mxu0  ;;  %9721 = vmatpush1.bf16.msra.mxu1 %v12097_v30  ;;  %9881 = vmatpush1.bf16.msra.mxu0 %v12097_v30  ;;  %v1459_v49 = vsel %vm1427_vm10, %v1381_v54, %v1443_v44  ;;  %v7850_v54 = vld [vmem:[%s11400_s21 + $0x288] sm:$0xff]  ;;  %v7828_v44 = vld [vmem:[%s11395_s17 + $0x38] sm:$0xff] }
 0x29e   :  { %vm1428_vm11 = vcmp.gt.f32.partialorder %v1385_v35, 0.0  ;;  %v1444_v42 = vmul.f32 0.2, %v1385_v35  ;;  %v1387_v47 = vpop.f32.mrb[27].mxu0 }
 0x29f   :  { %vm1429_vm12 = vcmp.gt.f32.partialorder %v1387_v47, 0.0  ;;  %v1445_v1 = vmul.f32 0.2, %v1387_v47 }
 0x2a0   :  { %v1460_v29 = vsel %vm1428_vm11, %v1385_v35, %v1444_v42  ;;  %v9762_v42 = vpack.c.bf16 %v7852_v18, %v7850_v54  ;;  %v7972_v54 = vld [vmem:[%s11395_s17 + $0x78] sm:$0xff]  ;;  %v7890_v18 = vld [vmem:[%s11400_s21 + $0x3c8] sm:$0xff]  ;;  %vm3045_vm11 = vcmask 261120   ;;  %s14013_s17 = sld [smem:[#allocation15_spill]] }
 0x2a1   :  { %v9724_v51 = vpack.c.bf16 %v1460_v29, %v1458_v43  ;;  %v1461_v60 = vsel %vm1429_vm12, %v1387_v47, %v1445_v1  ;;  %v1391_v12 = vpop.f32.mrb[28].mxu0  ;;  %v7849_v47 = vld [vmem:[%s11400_s21 + $0x280] sm:$0xff]  ;;  %v7851_v1 = vld [vmem:[%s11400_s21 + $0x290] sm:$0xff]  ;;  %v7854_v43 = vld [vmem:[%s11400_s21 + $0x2a8] sm:$0xff] }
 0x2a2   :  { %v9722_v56 = vpack.c.bf16 %v1461_v60, %v1459_v49  ;;  %v1393_v58 = vpop.f32.mrb[29].mxu0  ;;  %v1446_v50 = vmul.f32 0.2, %v1391_v12  ;;  %vm1430_vm13 = vcmp.gt.f32.partialorder %v1391_v12, 0.0  ;;  %v7856_v29 = vld [vmem:[%s11400_s21 + $0x2b8] sm:$0xff]  ;;  %v9764_v49 = vpack.c.bf16 %v7851_v1, %v7849_v47  ;;  %v7853_v60 = vld [vmem:[%s11400_s21 + $0x2a0] sm:$0xff] }
 0x2a3   :  { %v1447_v59 = vmul.f32 0.2, %v1393_v58  ;;  %vm1431_vm14 = vcmp.gt.f32.partialorder %v1393_v58, 0.0  ;;  %v7891_v47 = vld [vmem:[%s11400_s21 + $0x3d0] sm:$0xff] }
 0x2a4   :  { %9723 = vmatprep.subr.bf16.mxu1 %v9722_v56  ;;  %9883 = vmatprep.subr.bf16.mxu0 %v9722_v56  ;;  %v1462_v4 = vsel %vm1430_vm13, %v1391_v12, %v1446_v50  ;;  %v7855_v12 = vld [vmem:[%s11400_s21 + $0x2b0] sm:$0xff] }
 0x2a5   :  { %v1397_v8 = vpop.f32.mrb[30].mxu0  ;;  %9725 = vmatpush1.bf16.msra.mxu1 %v9724_v51  ;;  %9885 = vmatpush1.bf16.msra.mxu0 %v9724_v51  ;;  %v1463_v48 = vsel %vm1431_vm14, %v1393_v58, %v1447_v59  ;;  %v7860_v58 = vld [vmem:[%s11400_s21 + $0x2d8] sm:$0xff]  ;;  %v9768_v50 = vpack.c.bf16 %v7855_v12, %v7853_v60  ;;  %v7895_v60 = vld [vmem:[%s11400_s21 + $0x3f0] sm:$0xff] }
 0x2a6   :  { %vm1432_vm15 = vcmp.gt.f32.partialorder %v1397_v8, 0.0  ;;  %v1448_v22 = vmul.f32 0.2, %v1397_v8  ;;  %v1399_v62 = vpop.f32.mrb[31].mxu0 }
 0x2a7   :  { %vm1433_vm1 = vcmp.gt.f32.partialorder %v1399_v62, 0.0  ;;  %v1449_v63 = vmul.f32 0.2, %v1399_v62 }
 0x2a8   :  { %v1464_v9 = vsel %vm1432_vm15, %v1397_v8, %v1448_v22  ;;  %v7857_v8 = vld [vmem:[%s11400_s21 + $0x2c0] sm:$0xff]  ;;  %v7859_v22 = vld [vmem:[%s11400_s21 + $0x2d0] sm:$0xff] }
 0x2a9   :  { %v9728_v52 = vpack.c.bf16 %v1464_v9, %v1462_v4  ;;  %v1465_v15 = vsel %vm1433_vm1, %v1399_v62, %v1449_v63  ;;  %v7862_v62 = vld [vmem:[%s11400_s21 + $0x2e8] sm:$0xff]  ;;  %v7864_v63 = vld [vmem:[%s11400_s21 + $0x2f8] sm:$0xff]  ;;  %v9772_v4 = vpack.c.bf16 %v7859_v22, %v7857_v8 }
 0x2aa   :  { %v9726_v5 = vpack.c.bf16 %v1465_v15, %v1463_v48  ;;  %v9774_v9 = vpack.c.bf16 %v7864_v63, %v7862_v62  ;;  %v7861_v48 = vld [vmem:[%s11400_s21 + $0x2e0] sm:$0xff]  ;;  %v7866_v15 = vld [vmem:[%s11400_s21 + $0x308] sm:$0xff] }
 0x2ac   :  { %9727 = vmatprep.subr.bf16.mxu1 %v9726_v5  ;;  %9887 = vmatprep.subr.bf16.mxu0 %v9726_v5 }
 0x2ad   :  { %9729 = vmatpush1.bf16.msra.mxu1 %v9728_v52  ;;  %9889 = vmatpush1.bf16.msra.mxu0 %v9728_v52 }
 0x2ae   :  { %9731 = vmatprep.subr.bf16.mxu1 %v12091_v46  ;;  %9955 = vmatprep.subr.bf16.mxu0 %v12091_v46  ;;  %v7842_v46 = vld [vmem:[%s11400_s21 + $0x248] sm:$0xff] }
 0x2af   :  { %v9754_v57 = vpack.c.bf16 %v7844_v13, %v7842_v46  ;;  %v7879_v46 = vld [vmem:[%s11400_s21 + $0x370] sm:$0xff] }
 0x2b0   :  { %7821 = vmatmul.mubr.msk.f32.vlgmr.msra.gmra.mrb[48].mxu1 %vm495_vm0, %v1466_v14  ;;  %7901 = vmatmul.mubr.msk.f32.vlgmr.msra.gmra.mrb[32].mxu0 %vm495_vm0, %v7897_v10  ;;  %v9792_v13 = vpack.c.bf16 %v7879_v46, %v7877_v36 }
 0x2b1   :  { %9733 = vmatpush1.bf16.msra.mxu1 %v12089_v28  ;;  %9957 = vmatpush1.bf16.msra.mxu0 %v12089_v28  ;;  %v9750_v28 = vpack.c.bf16 %v7840_v2, %v7838_v0  ;;  %v7873_v2 = vld [vmem:[%s11400_s21 + $0x340] sm:$0xff] }
 0x2b2   :  { %9735 = vmatprep.subr.bf16.mxu1 %v9718_v45  ;;  %9959 = vmatprep.subr.bf16.mxu0 %v9718_v45  ;;  %v7847_v45 = vld [vmem:[%s11400_s21 + $0x270] sm:$0xff] }
 0x2b3   :  { %1552 = vmatprep.mubr.f32.mxu1 %v11368_v7  ;;  %2071 = vmatprep.mubr.f32.mxu0 %v11368_v7  ;;  %v9760_v35 = vpack.c.bf16 %v7847_v45, %v7845_v38  ;;  %v7887_v38 = vld [vmem:[%s11400_s21 + $0x3b0] sm:$0xff] }
 0x2b4   :  { %7822 = vmatmul.mubr.msk.f32.gmra.mrb[50].mxu1 %vm495_vm0, %v1467_v23  ;;  %7902 = vmatmul.mubr.msk.f32.gmra.mrb[34].mxu0 %vm495_vm0, %v7898_v32  ;;  %v7865_v23 = vld [vmem:[%s11400_s21 + $0x300] sm:$0xff]  ;;  %v7867_v32 = vld [vmem:[%s11400_s21 + $0x310] sm:$0xff] }
 0x2b5   :  { %9737 = vmatpush1.bf16.msra.mxu1 %v12097_v30  ;;  %9961 = vmatpush1.bf16.msra.mxu0 %v12097_v30  ;;  %v9756_v30 = vpack.c.bf16 %v7843_v25, %v7841_v26  ;;  %v9780_v61 = vpack.c.bf16 %v7867_v32, %v7865_v23  ;;  %v7883_v26 = vld [vmem:[%s11400_s21 + $0x390] sm:$0xff] }
 0x2b6   :  { %9739 = vmatprep.subr.bf16.mxu1 %v9722_v56  ;;  %9963 = vmatprep.subr.bf16.mxu0 %v9722_v56  ;;  %v7858_v56 = vld [vmem:[%s11400_s21 + $0x2c8] sm:$0xff] }
 0x2b7   :  { %1558 = vmatprep.mubr.f32.mxu1 %v11368_v7  ;;  %2077 = vmatprep.mubr.f32.mxu0 %v11368_v7  ;;  %v9770_v59 = vpack.c.bf16 %v7860_v58, %v7858_v56  ;;  %v1572_v56 = vld [vmem:[%s11400_s21 + $0x8] sm:$0xff]  ;;  %v1574_v58 = vld [vmem:[%s11400_s21 + $0x18] sm:$0xff] }
 0x2b8   :  { %7823 = vmatmul.mubr.msk.f32.gmra.mrb[52].mxu1 %vm495_vm0, %v1468_v16  ;;  %7903 = vmatmul.mubr.msk.f32.gmra.mrb[36].mxu0 %vm495_vm0, %v7899_v17  ;;  %v7870_v16 = vld [vmem:[%s11400_s21 + $0x328] sm:$0xff]  ;;  %v7872_v17 = vld [vmem:[%s11400_s21 + $0x338] sm:$0xff] }
 0x2b9   :  { %9741 = vmatpush1.bf16.msra.mxu1 %v9724_v51  ;;  %9965 = vmatpush1.bf16.msra.mxu0 %v9724_v51  ;;  %v9766_v51 = vpack.c.bf16 %v7856_v29, %v7854_v43  ;;  %v9782_v24 = vpack.c.bf16 %v7872_v17, %v7870_v16  ;;  %v7894_v43 = vld [vmem:[%s11400_s21 + $0x3e8] sm:$0xff]  ;;  %v7896_v29 = vld [vmem:[%s11400_s21 + $0x3f8] sm:$0xff] }
 0x2ba   :  { %9743 = vmatprep.subr.bf16.mxu1 %v9726_v5  ;;  %9967 = vmatprep.subr.bf16.mxu0 %v9726_v5  ;;  %v7868_v5 = vld [vmem:[%s11400_s21 + $0x318] sm:$0xff] }
 0x2bb   :  { %1564 = vmatprep.mubr.f32.mxu1 %v11368_v7  ;;  %2083 = vmatprep.mubr.f32.mxu0 %v11368_v7  ;;  %v9778_v10 = vpack.c.bf16 %v7868_v5, %v7866_v15  ;;  %v1573_v15 = vld [vmem:[%s11400_s21 + $0x10] sm:$0xff]  ;;  %v1576_v5 = vld [vmem:[%s11400_s21 + $0x28] sm:$0xff] }
 0x2bc   :  { %7824 = vmatmul.mubr.msk.f32.gmra.mrb[54].mxu1 %vm495_vm0, %v1469_v33  ;;  %7904 = vmatmul.mubr.msk.f32.gmra.mrb[38].mxu0 %vm495_vm0, %v7900_v37  ;;  %v7869_v33 = vld [vmem:[%s11400_s21 + $0x320] sm:$0xff]  ;;  %v7871_v37 = vld [vmem:[%s11400_s21 + $0x330] sm:$0xff] }
 0x2bd   :  { %9745 = vmatpush1.bf16.msra.mxu1 %v9728_v52  ;;  %9969 = vmatpush1.bf16.msra.mxu0 %v9728_v52  ;;  %v7863_v52 = vld [vmem:[%s11400_s21 + $0x2f0] sm:$0xff]  ;;  %v9784_v55 = vpack.c.bf16 %v7871_v37, %v7869_v33  ;;  %v1580_v37 = vld [vmem:[%s11400_s21 + $0x48] sm:$0xff] }
 0x2be   :  { %1716 = vmatprep.mubr.f32.mxu1 %v11368_v7  ;;  %9747 = vmatprep.subr.bf16.mxu1 %v9746_v41  ;;  %v9776_v14 = vpack.c.bf16 %v7863_v52, %v7861_v48  ;;  %v7874_v41 = vld [vmem:[%s11400_s21 + $0x348] sm:$0xff]  ;;  %v1571_v52 = vld [vmem:[%s11400_s21] sm:$0xff] }
 0x2bf   :  { %2333 = vmatprep.mubr.f32.mxu0 %v11368_v7  ;;  %v9786_v0 = vpack.c.bf16 %v7876_v53, %v7874_v41  ;;  %v9812_v23 = vpack.c.bf16 %v1573_v15, %v1571_v52  ;;  %v1582_v41 = vld [vmem:[%s11400_s21 + $0x58] sm:$0xff] }
 0x2c0   :  { %7829 = vmatmul.mubr.msk.f32.vlgmr.msra.gmra.mrb[56].mxu1 %vm495_vm0, %v7825_v11  ;;  %7973 = vmatmul.mubr.msk.f32.vlgmr.msra.gmra.mrb[40].mxu0 %vm495_vm0, %v7969_v21  ;;  %v7875_v11 = vld [vmem:[%s11400_s21 + $0x350] sm:$0xff]  ;;  %v7880_v21 = vld [vmem:[%s11400_s21 + $0x378] sm:$0xff] }
 0x2c1   :  { %1722 = vmatprep.mubr.f32.mxu1 %v11368_v7  ;;  %9749 = vmatpush1.bf16.msra.mxu1 %v9748_v3  ;;  %v7878_v3 = vld [vmem:[%s11400_s21 + $0x368] sm:$0xff] }
 0x2c2   :  { %9751 = vmatprep.subr.bf16.mxu1 %v9750_v28  ;;  %2339 = vmatprep.mubr.f32.mxu0 %v11368_v7  ;;  %v9788_v28 = vpack.c.bf16 %v7875_v11, %v7873_v2  ;;  %v9790_v39 = vpack.c.bf16 %v7880_v21, %v7878_v3  ;;  %v9818_v2 = vpack.c.bf16 %v1582_v41, %v1580_v37  ;;  %v1579_v11 = vld [vmem:[%s11400_s21 + $0x40] sm:$0xff]  ;;  %v1581_v3 = vld [vmem:[%s11400_s21 + $0x50] sm:$0xff]  ;;  %v1584_v21 = vld [vmem:[%s11400_s21 + $0x68] sm:$0xff] }
 0x2c3   :  { %v9820_v36 = vpack.c.bf16 %v1581_v3, %v1579_v11  ;;  %v1612_v37 = vld [vmem:[%s11400_s21 + $0x148] sm:$0xff]  ;;  %v1614_v41 = vld [vmem:[%s11400_s21 + $0x158] sm:$0xff] }
 0x2c4   :  { %7830 = vmatmul.mubr.msk.f32.gmra.mrb[58].mxu1 %vm495_vm0, %v7826_v19  ;;  %7974 = vmatmul.mubr.msk.f32.gmra.mrb[42].mxu0 %vm495_vm0, %v7970_v20  ;;  %v7882_v19 = vld [vmem:[%s11400_s21 + $0x388] sm:$0xff]  ;;  %v1618_v3 = vld [vmem:[%s11400_s21 + $0x178] sm:$0xff] }
 0x2c5   :  { %1728 = vmatprep.mubr.f32.mxu1 %v11368_v7  ;;  %9753 = vmatpush1.bf16.msra.mxu1 %v9752_v34  ;;  %v7884_v34 = vld [vmem:[%s11400_s21 + $0x398] sm:$0xff]  ;;  %v1616_v11 = vld [vmem:[%s11400_s21 + $0x168] sm:$0xff] }
 0x2c6   :  { %9755 = vmatprep.subr.bf16.mxu1 %v9754_v57  ;;  %2345 = vmatprep.mubr.f32.mxu0 %v11368_v7  ;;  %v9794_v20 = vpack.c.bf16 %v7884_v34, %v7882_v19  ;;  %v7881_v57 = vld [vmem:[%s11400_s21 + $0x380] sm:$0xff]  ;;  %v1585_v34 = vld [vmem:[%s11400_s21 + $0x70] sm:$0xff] }
 0x2c7   :  { %v9796_v25 = vpack.c.bf16 %v7883_v26, %v7881_v57  ;;  %v1583_v19 = vld [vmem:[%s11400_s21 + $0x60] sm:$0xff]  ;;  %v1590_v57 = vld [vmem:[%s11400_s21 + $0x98] sm:$0xff] }
 0x2c8   :  { %7831 = vmatmul.mubr.msk.f32.gmra.mrb[60].mxu1 %vm495_vm0, %v7827_v6  ;;  %7975 = vmatmul.mubr.msk.f32.gmra.mrb[44].mxu0 %vm495_vm0, %v7971_v27  ;;  %v7888_v6 = vld [vmem:[%s11400_s21 + $0x3b8] sm:$0xff] }
 0x2c9   :  { %1734 = vmatprep.mubr.f32.mxu1 %v11368_v7  ;;  %9757 = vmatpush1.bf16.msra.mxu1 %v9756_v30  ;;  %v9798_v30 = vpack.c.bf16 %v7888_v6, %v7886_v40  ;;  %v1587_v6 = vld [vmem:[%s11400_s21 + $0x80] sm:$0xff] }
 0x2ca   :  { %9759 = vmatprep.subr.bf16.mxu1 %v9758_v31  ;;  %2351 = vmatprep.mubr.f32.mxu0 %v11368_v7  ;;  %v7885_v31 = vld [vmem:[%s11400_s21 + $0x3a0] sm:$0xff] }
 0x2cb   :  { %v9800_v45 = vpack.c.bf16 %v7887_v38, %v7885_v31  ;;  %v1592_v31 = vld [vmem:[%s11400_s21 + $0xa8] sm:$0xff]  ;;  %v1594_v38 = vld [vmem:[%s11400_s21 + $0xb8] sm:$0xff] }
 0x2cc   :  { %7832 = vmatmul.mubr.msk.f32.gmra.mrb[62].mxu1 %vm495_vm0, %v7828_v44  ;;  %7976 = vmatmul.mubr.msk.f32.gmra.mrb[46].mxu0 %vm495_vm0, %v7972_v54  ;;  %v7892_v44 = vld [vmem:[%s11400_s21 + $0x3d8] sm:$0xff]  ;;  %v9830_v54 = vpack.c.bf16 %v1594_v38, %v1592_v31  ;;  %v1628_v38 = vld [vmem:[%s11400_s21 + $0x1c8] sm:$0xff] }
 0x2cd   :  { %9761 = vmatpush1.bf16.msra.mxu1 %v9760_v35  ;;  %v9802_v35 = vpack.c.bf16 %v7892_v44, %v7890_v18  ;;  %v1591_v18 = vld [vmem:[%s11400_s21 + $0xa0] sm:$0xff]  ;;  %v1593_v44 = vld [vmem:[%s11400_s21 + $0xb0] sm:$0xff] }
 0x2ce   :  { %9763 = vmatprep.subr.bf16.mxu1 %v9762_v42  ;;  %v7889_v42 = vld [vmem:[%s11400_s21 + $0x3c0] sm:$0xff] }
 0x2cf   :  { %v9804_v1 = vpack.c.bf16 %v7891_v47, %v7889_v42  ;;  %v1598_v42 = vld [vmem:[%s11400_s21 + $0xd8] sm:$0xff]  ;;  %v9832_v47 = vpack.c.bf16 %v1593_v44, %v1591_v18 }
 0x2d1   :  { %9765 = vmatpush1.bf16.msra.mxu1 %v9764_v49  ;;  %v9806_v49 = vpack.c.bf16 %v7896_v29, %v7894_v43  ;;  %v1595_v43 = vld [vmem:[%s11400_s21 + $0xc0] sm:$0xff]  ;;  %v1597_v29 = vld [vmem:[%s11400_s21 + $0xd0] sm:$0xff] }
 0x2d2   :  { %9767 = vmatprep.subr.bf16.mxu1 %v9766_v51  ;;  %v7893_v51 = vld [vmem:[%s11400_s21 + $0x3e0] sm:$0xff] }
 0x2d3   :  { %v9808_v12 = vpack.c.bf16 %v7895_v60, %v7893_v51  ;;  %v1602_v51 = vld [vmem:[%s11400_s21 + $0xf8] sm:$0xff]  ;;  %v9836_v60 = vpack.c.bf16 %v1597_v29, %v1595_v43 }
 0x2d4   :  { %v1634_v43 = vld [vmem:[%s11400_s21 + $0x1f8] sm:$0xff] }
 0x2d5   :  { %9769 = vmatpush1.bf16.msra.mxu1 %v9768_v50  ;;  %v9810_v50 = vpack.c.bf16 %v1574_v58, %v1572_v56  ;;  %v1599_v56 = vld [vmem:[%s11400_s21 + $0xe0] sm:$0xff]  ;;  %v1601_v58 = vld [vmem:[%s11400_s21 + $0xf0] sm:$0xff] }
 0x2d6   :  { %9771 = vmatprep.subr.bf16.mxu1 %v9770_v59  ;;  %v9840_v52 = vpack.c.bf16 %v1601_v58, %v1599_v56  ;;  %v7906_v58 = vld [vmem:[%s11400_s21 + $0x408] sm:$0xff] }
 0x2d9   :  { %9773 = vmatpush1.bf16.msra.mxu1 %v9772_v4 }
 0x2da   :  { %9775 = vmatprep.subr.bf16.mxu1 %v9774_v9 }
 0x2dd   :  { %9777 = vmatpush1.bf16.msra.mxu1 %v9776_v14  ;;  %v1578_v14 = vld [vmem:[%s11400_s21 + $0x38] sm:$0xff] }
 0x2de   :  { %9779 = vmatprep.subr.bf16.mxu1 %v9778_v10  ;;  %v9814_v17 = vpack.c.bf16 %v1578_v14, %v1576_v5  ;;  %v1603_v5 = vld [vmem:[%s11400_s21 + $0x100] sm:$0xff]  ;;  %v1605_v14 = vld [vmem:[%s11400_s21 + $0x110] sm:$0xff] }
 0x2e1   :  { %9781 = vmatpush1.bf16.msra.mxu1 %v9780_v61  ;;  %v1575_v61 = vld [vmem:[%s11400_s21 + $0x20] sm:$0xff] }
 0x2e2   :  { %9783 = vmatprep.subr.bf16.mxu1 %v9782_v24  ;;  %v1577_v24 = vld [vmem:[%s11400_s21 + $0x30] sm:$0xff] }
 0x2e5   :  { %9785 = vmatpush1.bf16.msra.mxu1 %v9784_v55  ;;  %v9816_v55 = vpack.c.bf16 %v1577_v24, %v1575_v61  ;;  %v1607_v61 = vld [vmem:[%s11400_s21 + $0x120] sm:$0xff]  ;;  %v1609_v24 = vld [vmem:[%s11400_s21 + $0x130] sm:$0xff] }
 0x2e6   :  { %9787 = vmatprep.subr.bf16.mxu1 %v9786_v0 }
 0x2e9   :  { %9789 = vmatpush1.bf16.msra.mxu1 %v9788_v28  ;;  %v1586_v28 = vld [vmem:[%s11400_s21 + $0x78] sm:$0xff] }
 0x2ea   :  { %9791 = vmatprep.subr.bf16.mxu1 %v9790_v39 }
 0x2ed   :  { %9793 = vmatpush1.bf16.msra.mxu1 %v9792_v13  ;;  %v9822_v13 = vpack.c.bf16 %v1586_v28, %v1584_v21  ;;  %v9854_v28 = vpack.c.bf16 %v1618_v3, %v1616_v11 }
 0x2ee   :  { %9795 = vmatprep.subr.bf16.mxu1 %v9794_v20  ;;  %v1588_v20 = vld [vmem:[%s11400_s21 + $0x88] sm:$0xff] }
 0x2ef   :  { %v9826_v40 = vpack.c.bf16 %v1590_v57, %v1588_v20  ;;  %v1619_v20 = vld [vmem:[%s11400_s21 + $0x180] sm:$0xff]  ;;  %v1621_v57 = vld [vmem:[%s11400_s21 + $0x190] sm:$0xff] }
 0x2f1   :  { %9797 = vmatpush1.bf16.msra.mxu1 %v9796_v25  ;;  %v9824_v25 = vpack.c.bf16 %v1585_v34, %v1583_v19 }
 0x2f2   :  { %9799 = vmatprep.subr.bf16.mxu1 %v9798_v30  ;;  %v1589_v30 = vld [vmem:[%s11400_s21 + $0x90] sm:$0xff] }
 0x2f5   :  { %9801 = vmatpush1.bf16.msra.mxu1 %v9800_v45  ;;  %v9828_v45 = vpack.c.bf16 %v1589_v30, %v1587_v6  ;;  %v1623_v6 = vld [vmem:[%s11400_s21 + $0x1a0] sm:$0xff]  ;;  %v1625_v30 = vld [vmem:[%s11400_s21 + $0x1b0] sm:$0xff] }
 0x2f6   :  { %9803 = vmatprep.subr.bf16.mxu1 %v9802_v35  ;;  %v1596_v35 = vld [vmem:[%s11400_s21 + $0xc8] sm:$0xff]  ;;  %v9864_v18 = vpack.c.bf16 %v1625_v30, %v1623_v6  ;;  %v7928_v30 = vld [vmem:[%s11400_s21 + $0x4b8] sm:$0xff] }
 0x2f7   :  { %v7926_v6 = vld [vmem:[%s11400_s21 + $0x4a8] sm:$0xff] }
 0x2f9   :  { %9805 = vmatpush1.bf16.msra.mxu1 %v9804_v1  ;;  %v9834_v1 = vpack.c.bf16 %v1598_v42, %v1596_v35  ;;  %v1627_v35 = vld [vmem:[%s11400_s21 + $0x1c0] sm:$0xff]  ;;  %v1629_v42 = vld [vmem:[%s11400_s21 + $0x1d0] sm:$0xff] }
 0x2fa   :  { %9807 = vmatprep.subr.bf16.mxu1 %v9806_v49  ;;  %v1600_v49 = vld [vmem:[%s11400_s21 + $0xe8] sm:$0xff] }
 0x2fd   :  { %9809 = vmatpush1.bf16.msra.mxu1 %v9808_v12  ;;  %v9838_v12 = vpack.c.bf16 %v1602_v51, %v1600_v49  ;;  %v9868_v49 = vpack.c.bf16 %v1629_v42, %v1627_v35  ;;  %v9910_v35 = vpack.c.bf16 %v7928_v30, %v7926_v6  ;;  %v7925_v42 = vld [vmem:[%s11400_s21 + $0x4a0] sm:$0xff]  ;;  %v7954_v6 = vld [vmem:[%s11400_s21 + $0x588] sm:$0xff]  ;;  %v7956_v30 = vld [vmem:[%s11400_s21 + $0x598] sm:$0xff] }
 0x2fe   :  { %9811 = vmatprep.subr.bf16.mxu1 %v9810_v50  ;;  %v1604_v50 = vld [vmem:[%s11400_s21 + $0x108] sm:$0xff] }
 0x383   :  { %v12219_v59 = vpop.f32.mrb[48].mxu1  ;;  %v12237_v32 = vpop.f32.mrb[32].mxu0 }
 0x384   :  { %v1550_v8 = vpop.f32.mrb[49].mxu1  ;;  %v12241_v33 = vpop.f32.mrb[33].mxu0 }
 0x387   :  { %v12221_v22 = vpop.f32.mrb[50].mxu1  ;;  %v12291_v31 = vpop.f32.mrb[34].mxu0 }
 0x388   :  { %v12223_v62 = vpop.f32.mrb[51].mxu1 }
 0x38b   :  { %v12225_v63 = vpop.f32.mrb[52].mxu1 }
 0x38c   :  { %v12227_v4 = vpop.f32.mrb[53].mxu1 }
 0x38f   :  { %v12229_v9 = vpop.f32.mrb[54].mxu1 }
 0x390   :  { %v12231_v48 = vpop.f32.mrb[55].mxu1 }
 0x393   :  { %v1718_v10 = vpop.f32.mrb[56].mxu1 }
 0x394   :  { %v1720_v16 = vpop.f32.mrb[57].mxu1 }
 0x395   :  { %1870 = vmatprep.mubr.f32.mxu1 %v1720_v16  ;;  %v9844_v16 = vpack.c.bf16 %v1605_v14, %v1603_v5  ;;  %v7905_v5 = vld [vmem:[%s11400_s21 + $0x400] sm:$0xff]  ;;  %v7907_v14 = vld [vmem:[%s11400_s21 + $0x410] sm:$0xff] }
 0x396   :  { %1871 = vmatmul.mubr.f32.vlgmr.msra.gmra.mrb[64].mxu1 %v1718_v10  ;;  %v1608_v10 = vld [vmem:[%s11400_s21 + $0x128] sm:$0xff] }
 0x397   :  { %9813 = vmatpush1.bf16.msra.mxu1 %v9812_v23  ;;  %v1724_v53 = vpop.f32.mrb[58].mxu1  ;;  %v1610_v23 = vld [vmem:[%s11400_s21 + $0x138] sm:$0xff] }
 0x398   :  { %v1726_v0 = vpop.f32.mrb[59].mxu1  ;;  %9815 = vmatprep.subr.bf16.mxu1 %v9814_v17  ;;  %v9846_v17 = vpack.c.bf16 %v1610_v23, %v1608_v10  ;;  %v7910_v23 = vld [vmem:[%s11400_s21 + $0x428] sm:$0xff] }
 0x399   :  { %1876 = vmatprep.mubr.f32.mxu1 %v1726_v0  ;;  %v1611_v0 = vld [vmem:[%s11400_s21 + $0x140] sm:$0xff] }
 0x39a   :  { %1877 = vmatmul.mubr.f32.gmra.mrb[66].mxu1 %v1724_v53  ;;  %v9848_v53 = vpack.c.bf16 %v1609_v24, %v1607_v61 }
 0x39b   :  { %9817 = vmatpush1.bf16.msra.mxu1 %v9816_v55  ;;  %v1730_v39 = vpop.f32.mrb[60].mxu1  ;;  %v9850_v55 = vpack.c.bf16 %v1614_v41, %v1612_v37  ;;  %v7909_v37 = vld [vmem:[%s11400_s21 + $0x420] sm:$0xff]  ;;  %v7911_v41 = vld [vmem:[%s11400_s21 + $0x430] sm:$0xff] }
 0x39c   :  { %v1732_v46 = vpop.f32.mrb[61].mxu1  ;;  %9819 = vmatprep.subr.bf16.mxu1 %v9818_v2  ;;  %v1613_v2 = vld [vmem:[%s11400_s21 + $0x150] sm:$0xff] }
 0x39d   :  { %1882 = vmatprep.mubr.f32.mxu1 %v1732_v46  ;;  %v9852_v21 = vpack.c.bf16 %v1613_v2, %v1611_v0  ;;  %v1620_v46 = vld [vmem:[%s11400_s21 + $0x188] sm:$0xff]  ;;  %v9896_v2 = vpack.c.bf16 %v7911_v41, %v7909_v37  ;;  %v7937_v37 = vld [vmem:[%s11400_s21 + $0x500] sm:$0xff]  ;;  %v7939_v41 = vld [vmem:[%s11400_s21 + $0x510] sm:$0xff] }
 0x39e   :  { %1883 = vmatmul.mubr.f32.gmra.mrb[68].mxu1 %v1730_v39  ;;  %v1615_v39 = vld [vmem:[%s11400_s21 + $0x160] sm:$0xff] }
 0x39f   :  { %9821 = vmatpush1.bf16.msra.mxu1 %v9820_v36  ;;  %v1736_v26 = vpop.f32.mrb[62].mxu1  ;;  %v1617_v36 = vld [vmem:[%s11400_s21 + $0x170] sm:$0xff] }
 0x3a0   :  { %v1738_v27 = vpop.f32.mrb[63].mxu1  ;;  %9823 = vmatprep.subr.bf16.mxu1 %v9822_v13  ;;  %v1622_v13 = vld [vmem:[%s11400_s21 + $0x198] sm:$0xff]  ;;  %v9856_v19 = vpack.c.bf16 %v1617_v36, %v1615_v39  ;;  %v7918_v39 = vld [vmem:[%s11400_s21 + $0x468] sm:$0xff] }
 0x3a1   :  { %1888 = vmatprep.mubr.f32.mxu1 %v1738_v27  ;;  %v9858_v34 = vpack.c.bf16 %v1622_v13, %v1620_v46  ;;  %v9860_v27 = vpack.c.bf16 %v1621_v57, %v1619_v20  ;;  %v7920_v36 = vld [vmem:[%s11400_s21 + $0x478] sm:$0xff]  ;;  %v7922_v20 = vld [vmem:[%s11400_s21 + $0x488] sm:$0xff] }
 0x3a2   :  { %1889 = vmatmul.mubr.f32.gmra.mrb[70].mxu1 %v1736_v26  ;;  %v1624_v26 = vld [vmem:[%s11400_s21 + $0x1a8] sm:$0xff]  ;;  %v9902_v13 = vpack.c.bf16 %v7920_v36, %v7918_v39  ;;  %v7948_v36 = vld [vmem:[%s11400_s21 + $0x558] sm:$0xff] }
 0x3a3   :  { %9825 = vmatpush1.bf16.msra.mxu1 %v9824_v25  ;;  %1959 = vmatprep.mubr.f32.mxu1 %v1550_v8  ;;  %v1606_v8 = vld [vmem:[%s11400_s21 + $0x118] sm:$0xff]  ;;  %v7946_v39 = vld [vmem:[%s11400_s21 + $0x548] sm:$0xff] }
 0x3a4   :  { %9827 = vmatprep.subr.bf16.mxu1 %v9826_v40  ;;  %v9842_v15 = vpack.c.bf16 %v1606_v8, %v1604_v50  ;;  %v1626_v25 = vld [vmem:[%s11400_s21 + $0x1b8] sm:$0xff] }
 0x3a5   :  { %v9862_v40 = vpack.c.bf16 %v1626_v25, %v1624_v26  ;;  %v7908_v50 = vld [vmem:[%s11400_s21 + $0x418] sm:$0xff] }
 0x3a7   :  { %9829 = vmatpush1.bf16.msra.mxu1 %v9828_v45  ;;  %v1630_v45 = vld [vmem:[%s11400_s21 + $0x1d8] sm:$0xff] }
 0x3a8   :  { %9831 = vmatprep.subr.bf16.mxu1 %v9830_v54  ;;  %v12295_v54 = vpop.f32.mrb[35].mxu0  ;;  %v9866_v44 = vpack.c.bf16 %v1630_v45, %v1628_v38  ;;  %v2539_v38 = vld [vmem:[%s11455_s20 + $0x88] sm:$0xff] }
 0x3ab   :  { %9833 = vmatpush1.bf16.msra.mxu1 %v9832_v47  ;;  %v12299_v47 = vpop.f32.mrb[36].mxu0 }
 0x3ac   :  { %9835 = vmatprep.subr.bf16.mxu1 %v9834_v1  ;;  %v1632_v1 = vld [vmem:[%s11400_s21 + $0x1e8] sm:$0xff]  ;;  %v12303_v29 = vpop.f32.mrb[37].mxu0 }
 0x3ad   :  { %v9870_v51 = vpack.c.bf16 %v1634_v43, %v1632_v1  ;;  %v12307_v56 = vpop.f32.mrb[38].mxu0  ;;  %v7927_v1 = vld [vmem:[%s11400_s21 + $0x4b0] sm:$0xff] }
 0x3ae   :  { %v12311_v8 = vpop.f32.mrb[39].mxu0 }
 0x3af   :  { %9837 = vmatpush1.bf16.msra.mxu1 %v9836_v60  ;;  %v1631_v60 = vld [vmem:[%s11400_s21 + $0x1e0] sm:$0xff]  ;;  %v12315_v10 = vpop.f32.mrb[40].mxu0 }
 0x3b0   :  { %9839 = vmatprep.subr.bf16.mxu1 %v9838_v12  ;;  %v1633_v12 = vld [vmem:[%s11400_s21 + $0x1f0] sm:$0xff]  ;;  %v12319_v61 = vpop.f32.mrb[41].mxu0 }
 0x3b1   :  { %v12326_v0 = vpop.f32.mrb[42].mxu0 }
 0x3b2   :  { %v12329_v11 = vpop.f32.mrb[43].mxu0 }
 0x3b3   :  { %9841 = vmatpush1.bf16.msra.mxu1 %v9840_v52  ;;  %v9872_v52 = vpack.c.bf16 %v1633_v12, %v1631_v60  ;;  %v7929_v60 = vld [vmem:[%s11400_s21 + $0x4c0] sm:$0xff]  ;;  %v7931_v12 = vld [vmem:[%s11400_s21 + $0x4d0] sm:$0xff] }
 0x3b4   :  { %9843 = vmatprep.subr.bf16.mxu1 %v9842_v15  ;;  %v9890_v15 = vpack.c.bf16 %v7908_v50, %v7906_v58  ;;  %v7934_v58 = vld [vmem:[%s11400_s21 + $0x4e8] sm:$0xff]  ;;  %v7936_v50 = vld [vmem:[%s11400_s21 + $0x4f8] sm:$0xff] }
 0x3b7   :  { %9845 = vmatpush1.bf16.msra.mxu1 %v9844_v16  ;;  %v7912_v16 = vld [vmem:[%s11400_s21 + $0x438] sm:$0xff] }
 0x3b8   :  { %9847 = vmatprep.subr.bf16.mxu1 %v9846_v17  ;;  %v9892_v17 = vpack.c.bf16 %v7907_v14, %v7905_v5  ;;  %v9894_v24 = vpack.c.bf16 %v7912_v16, %v7910_v23  ;;  %v7933_v5 = vld [vmem:[%s11400_s21 + $0x4e0] sm:$0xff]  ;;  %v7935_v14 = vld [vmem:[%s11400_s21 + $0x4f0] sm:$0xff]  ;;  %v7938_v23 = vld [vmem:[%s11400_s21 + $0x508] sm:$0xff] }
 0x3b9   :  { %v7940_v16 = vld [vmem:[%s11400_s21 + $0x518] sm:$0xff] }
 0x3bb   :  { %9849 = vmatpush1.bf16.msra.mxu1 %v9848_v53  ;;  %v7914_v53 = vld [vmem:[%s11400_s21 + $0x448] sm:$0xff] }
 0x3bc   :  { %9851 = vmatprep.subr.bf16.mxu1 %v9850_v55  ;;  %v7916_v55 = vld [vmem:[%s11400_s21 + $0x458] sm:$0xff] }
 0x3bd   :  { %v9898_v3 = vpack.c.bf16 %v7916_v55, %v7914_v53  ;;  %v7942_v53 = vld [vmem:[%s11400_s21 + $0x528] sm:$0xff]  ;;  %v7944_v55 = vld [vmem:[%s11400_s21 + $0x538] sm:$0xff] }
 0x3bf   :  { %9853 = vmatpush1.bf16.msra.mxu1 %v9852_v21  ;;  %v7913_v21 = vld [vmem:[%s11400_s21 + $0x440] sm:$0xff] }
 0x3c0   :  { %9855 = vmatprep.subr.bf16.mxu1 %v9854_v28  ;;  %v7915_v28 = vld [vmem:[%s11400_s21 + $0x450] sm:$0xff] }
 0x3c3   :  { %9857 = vmatpush1.bf16.msra.mxu1 %v9856_v19  ;;  %v7917_v19 = vld [vmem:[%s11400_s21 + $0x460] sm:$0xff] }
 0x3c4   :  { %9859 = vmatprep.subr.bf16.mxu1 %v9858_v34  ;;  %v7919_v34 = vld [vmem:[%s11400_s21 + $0x470] sm:$0xff] }
 0x3c5   :  { %v9904_v57 = vpack.c.bf16 %v7919_v34, %v7917_v19  ;;  %v7945_v19 = vld [vmem:[%s11400_s21 + $0x540] sm:$0xff]  ;;  %v7947_v34 = vld [vmem:[%s11400_s21 + $0x550] sm:$0xff] }
 0x3c7   :  { %9861 = vmatpush1.bf16.msra.mxu1 %v9860_v27  ;;  %v7921_v27 = vld [vmem:[%s11400_s21 + $0x480] sm:$0xff] }
 0x3c8   :  { %9863 = vmatprep.subr.bf16.mxu1 %v9862_v40  ;;  %v7923_v40 = vld [vmem:[%s11400_s21 + $0x490] sm:$0xff] }
 0x3c9   :  { %v9908_v45 = vpack.c.bf16 %v7923_v40, %v7921_v27  ;;  %v7949_v27 = vld [vmem:[%s11400_s21 + $0x560] sm:$0xff]  ;;  %v7951_v40 = vld [vmem:[%s11400_s21 + $0x570] sm:$0xff] }
 0x3cb   :  { %9865 = vmatpush1.bf16.msra.mxu1 %v9864_v18 }
 0x3cc   :  { %9867 = vmatprep.subr.bf16.mxu1 %v9866_v44  ;;  %v2523_v44 = vld [vmem:[%s11455_s20 + $0x8] sm:$0xff] }
 0x3cf   :  { %9869 = vmatpush1.bf16.msra.mxu1 %v9868_v49  ;;  %v7932_v49 = vld [vmem:[%s11400_s21 + $0x4d8] sm:$0xff] }
 0x3d0   :  { %9871 = vmatprep.subr.bf16.mxu1 %v9870_v51 }
 0x3d3   :  { %9873 = vmatpush1.bf16.msra.mxu1 %v9872_v52  ;;  %v9916_v52 = vpack.c.bf16 %v7931_v12, %v7929_v60 }
 0x3d4   :  { %9891 = vmatprep.subr.bf16.mxu1 %v9890_v15  ;;  %v9918_v15 = vpack.c.bf16 %v7936_v50, %v7934_v58  ;;  %v7961_v58 = vld [vmem:[%s11400_s21 + $0x5c0] sm:$0xff]  ;;  %v7963_v50 = vld [vmem:[%s11400_s21 + $0x5d0] sm:$0xff] }
 0x3d6   :  { %1960 = vmatmul.mubr.f32.vlgmr.msra.gmra.mrb[64].mxu1 %v12219_v59  ;;  %v12336_v59 = vpop.f32.mrb[44].mxu0 }
 0x3d7   :  { %1965 = vmatprep.mubr.f32.mxu1 %v12223_v62  ;;  %9893 = vmatpush1.bf16.msra.mxu1 %v9892_v17  ;;  %v9900_v62 = vpack.c.bf16 %v7915_v28, %v7913_v21  ;;  %v12339_v46 = vpop.f32.mrb[45].mxu0  ;;  %v9920_v17 = vpack.c.bf16 %v7935_v14, %v7933_v5  ;;  %v7941_v21 = vld [vmem:[%s11400_s21 + $0x520] sm:$0xff]  ;;  %v7943_v28 = vld [vmem:[%s11400_s21 + $0x530] sm:$0xff]  ;;  %v9948_v5 = vpack.c.bf16 %v7963_v50, %v7961_v58 }
 0x3d8   :  { %9895 = vmatprep.subr.bf16.mxu1 %v9894_v24  ;;  %v9922_v24 = vpack.c.bf16 %v7940_v16, %v7938_v23  ;;  %v7965_v23 = vld [vmem:[%s11400_s21 + $0x5e0] sm:$0xff]  ;;  %v7967_v16 = vld [vmem:[%s11400_s21 + $0x5f0] sm:$0xff] }
 0x3d9   :  { %v8005_v58 = vld [vmem:[%s11400_s21 + $0x6e0] sm:$0xff]  ;;  %v8007_v50 = vld [vmem:[%s11400_s21 + $0x6f0] sm:$0xff] }
 0x3da   :  { %1966 = vmatmul.mubr.f32.gmra.mrb[66].mxu1 %v12221_v22  ;;  %v7924_v22 = vld [vmem:[%s11400_s21 + $0x498] sm:$0xff] }
 0x3db   :  { %1971 = vmatprep.mubr.f32.mxu1 %v12227_v4  ;;  %9897 = vmatpush1.bf16.msra.mxu1 %v9896_v2  ;;  %v12346_v4 = vpop.f32.mrb[46].mxu0  ;;  %v9906_v25 = vpack.c.bf16 %v7924_v22, %v7922_v20  ;;  %v9924_v2 = vpack.c.bf16 %v7939_v41, %v7937_v37  ;;  %v7950_v20 = vld [vmem:[%s11400_s21 + $0x568] sm:$0xff]  ;;  %v7952_v22 = vld [vmem:[%s11400_s21 + $0x578] sm:$0xff]  ;;  %v9952_v37 = vpack.c.bf16 %v7967_v16, %v7965_v23  ;;  %v8009_v23 = vld [vmem:[%s11400_s21 + $0x700] sm:$0xff] }
 0x3dc   :  { %9899 = vmatprep.subr.bf16.mxu1 %v9898_v3  ;;  %v12349_v26 = vpop.f32.mrb[47].mxu0  ;;  %v9926_v3 = vpack.c.bf16 %v7944_v55, %v7942_v53  ;;  %v7977_v53 = vld [vmem:[%s11400_s21 + $0x600] sm:$0xff]  ;;  %v7979_v55 = vld [vmem:[%s11400_s21 + $0x610] sm:$0xff] }
 0x3dd   :  { %v8011_v16 = vld [vmem:[%s11400_s21 + $0x710] sm:$0xff] }
 0x3de   :  { %1972 = vmatmul.mubr.f32.gmra.mrb[68].mxu1 %v12225_v63  ;;  %v2538_v63 = vld [vmem:[%s11455_s20 + $0x80] sm:$0xff] }
 0x3df   :  { %1977 = vmatprep.mubr.f32.mxu1 %v12231_v48  ;;  %9901 = vmatpush1.bf16.msra.mxu1 %v9900_v62  ;;  %v2522_v48 = vld [vmem:[%s11455_s20] sm:$0xff]  ;;  %v12360_v18 = vpack.c.bf16 %v2539_v38, %v2538_v63  ;;  %v9928_v62 = vpack.c.bf16 %v7943_v28, %v7941_v21  ;;  %v9936_v63 = vpack.c.bf16 %v7951_v40, %v7949_v27  ;;  %v7991_v40 = vld [vmem:[%s11400_s21 + $0x670] sm:$0xff] }
 0x3e0   :  { %9903 = vmatprep.subr.bf16.mxu1 %v9902_v13  ;;  %v12365_v43 = vpack.c.bf16 %v2523_v44, %v2522_v48  ;;  %v9930_v13 = vpack.c.bf16 %v7948_v36, %v7946_v39  ;;  %v9938_v38 = vpack.c.bf16 %v7956_v30, %v7954_v6  ;;  %v7953_v48 = vld [vmem:[%s11400_s21 + $0x580] sm:$0xff]  ;;  %v7958_v44 = vld [vmem:[%s11400_s21 + $0x5a8] sm:$0xff]  ;;  %v9972_v21 = vpack.c.bf16 %v7979_v55, %v7977_v53  ;;  %v7983_v36 = vld [vmem:[%s11400_s21 + $0x630] sm:$0xff] }
 0x3e1   :  { %10035 = vmatprep.subr.bf16.mxu0 %v12360_v18  ;;  %v7981_v39 = vld [vmem:[%s11400_s21 + $0x620] sm:$0xff]  ;;  %v7994_v6 = vld [vmem:[%s11400_s21 + $0x688] sm:$0xff]  ;;  %v7996_v30 = vld [vmem:[%s11400_s21 + $0x698] sm:$0xff] }
 0x3e2   :  { %1978 = vmatmul.mubr.f32.gmra.mrb[70].mxu1 %v12229_v9  ;;  %v7930_v9 = vld [vmem:[%s11400_s21 + $0x4c8] sm:$0xff]  ;;  %10037 = vmatpush3.bf16.msra.mxu0 %v12365_v43  ;;  %v8013_v53 = vld [vmem:[%s11400_s21 + $0x720] sm:$0xff]  ;;  %v8015_v55 = vld [vmem:[%s11400_s21 + $0x730] sm:$0xff] }
 0x3e3   :  { %9905 = vmatpush1.bf16.msra.mxu1 %v9904_v57  ;;  %2219 = vmatprep.mubr.f32.mxu1 %v12241_v33  ;;  %v9912_v33 = vpack.c.bf16 %v7927_v1, %v7925_v42  ;;  %v9914_v51 = vpack.c.bf16 %v7932_v49, %v7930_v9  ;;  %v9932_v57 = vpack.c.bf16 %v7947_v34, %v7945_v19  ;;  %v7957_v9 = vld [vmem:[%s11400_s21 + $0x5a0] sm:$0xff]  ;;  %v7959_v49 = vld [vmem:[%s11400_s21 + $0x5b0] sm:$0xff] }
 0x3e4   :  { %9907 = vmatprep.subr.bf16.mxu1 %v9906_v25  ;;  %v9934_v25 = vpack.c.bf16 %v7952_v22, %v7950_v20  ;;  %v9944_v60 = vpack.c.bf16 %v7959_v49, %v7957_v9  ;;  %v9976_v19 = vpack.c.bf16 %v7983_v36, %v7981_v39  ;;  %v7985_v20 = vld [vmem:[%s11400_s21 + $0x640] sm:$0xff]  ;;  %v7987_v22 = vld [vmem:[%s11400_s21 + $0x650] sm:$0xff] }
 0x3e5   :  { %v8001_v49 = vld [vmem:[%s11400_s21 + $0x6c0] sm:$0xff]  ;;  %v8019_v36 = vld [vmem:[%s11400_s21 + $0x750] sm:$0xff] }
 0x3e6   :  { %v8017_v39 = vld [vmem:[%s11400_s21 + $0x740] sm:$0xff] }
 0x3e7   :  { %9909 = vmatpush1.bf16.msra.mxu1 %v9908_v45  ;;  %v7955_v45 = vld [vmem:[%s11400_s21 + $0x590] sm:$0xff] }
 0x3e8   :  { %9911 = vmatprep.subr.bf16.mxu1 %v9910_v35  ;;  %v7960_v35 = vld [vmem:[%s11400_s21 + $0x5b8] sm:$0xff]  ;;  %v9940_v42 = vpack.c.bf16 %v7955_v45, %v7953_v48  ;;  %v7998_v48 = vld [vmem:[%s11400_s21 + $0x6a8] sm:$0xff] }
 0x3e9   :  { %v9942_v1 = vpack.c.bf16 %v7960_v35, %v7958_v44  ;;  %v8000_v45 = vld [vmem:[%s11400_s21 + $0x6b8] sm:$0xff]  ;;  %v7999_v35 = vld [vmem:[%s11400_s21 + $0x6b0] sm:$0xff] }
 0x3ea   :  { %v9990_v44 = vpack.c.bf16 %v8000_v45, %v7998_v48  ;;  %v8034_v48 = vld [vmem:[%s11400_s21 + $0x7c8] sm:$0xff]  ;;  %v8036_v45 = vld [vmem:[%s11400_s21 + $0x7d8] sm:$0xff] }
 0x3eb   :  { %9913 = vmatpush1.bf16.msra.mxu1 %v9912_v33  ;;  %v7962_v33 = vld [vmem:[%s11400_s21 + $0x5c8] sm:$0xff] }
 0x3ec   :  { %9915 = vmatprep.subr.bf16.mxu1 %v9914_v51  ;;  %v7964_v51 = vld [vmem:[%s11400_s21 + $0x5d8] sm:$0xff] }
 0x3ed   :  { %v9946_v12 = vpack.c.bf16 %v7964_v51, %v7962_v33  ;;  %v8003_v33 = vld [vmem:[%s11400_s21 + $0x6d0] sm:$0xff]  ;;  %v8006_v51 = vld [vmem:[%s11400_s21 + $0x6e8] sm:$0xff] }
 0x3ef   :  { %9917 = vmatpush1.bf16.msra.mxu1 %v9916_v52  ;;  %v7966_v52 = vld [vmem:[%s11400_s21 + $0x5e8] sm:$0xff] }
 0x3f0   :  { %9919 = vmatprep.subr.bf16.mxu1 %v9918_v15  ;;  %v7968_v15 = vld [vmem:[%s11400_s21 + $0x5f8] sm:$0xff] }
 0x3f1   :  { %v9950_v14 = vpack.c.bf16 %v7968_v15, %v7966_v52  ;;  %v8010_v52 = vld [vmem:[%s11400_s21 + $0x708] sm:$0xff]  ;;  %v8012_v15 = vld [vmem:[%s11400_s21 + $0x718] sm:$0xff] }
 0x3f3   :  { %9921 = vmatpush1.bf16.msra.mxu1 %v9920_v17  ;;  %v7978_v17 = vld [vmem:[%s11400_s21 + $0x608] sm:$0xff] }
 0x3f4   :  { %9923 = vmatprep.subr.bf16.mxu1 %v9922_v24  ;;  %v7980_v24 = vld [vmem:[%s11400_s21 + $0x618] sm:$0xff] }
 0x3f5   :  { %v9970_v41 = vpack.c.bf16 %v7980_v24, %v7978_v17  ;;  %v8014_v17 = vld [vmem:[%s11400_s21 + $0x728] sm:$0xff]  ;;  %v8016_v24 = vld [vmem:[%s11400_s21 + $0x738] sm:$0xff] }
 0x3f7   :  { %9925 = vmatpush1.bf16.msra.mxu1 %v9924_v2  ;;  %v7982_v2 = vld [vmem:[%s11400_s21 + $0x628] sm:$0xff] }
 0x3f8   :  { %9927 = vmatprep.subr.bf16.mxu1 %v9926_v3  ;;  %v7984_v3 = vld [vmem:[%s11400_s21 + $0x638] sm:$0xff] }
 0x3f9   :  { %v9974_v28 = vpack.c.bf16 %v7984_v3, %v7982_v2  ;;  %v8018_v2 = vld [vmem:[%s11400_s21 + $0x748] sm:$0xff]  ;;  %v8020_v3 = vld [vmem:[%s11400_s21 + $0x758] sm:$0xff] }
 0x3fb   :  { %9929 = vmatpush1.bf16.msra.mxu1 %v9928_v62  ;;  %v7986_v62 = vld [vmem:[%s11400_s21 + $0x648] sm:$0xff] }
 0x3fc   :  { %9931 = vmatprep.subr.bf16.mxu1 %v9930_v13  ;;  %v7988_v13 = vld [vmem:[%s11400_s21 + $0x658] sm:$0xff] }
 0x3fd   :  { %v9978_v34 = vpack.c.bf16 %v7988_v13, %v7986_v62  ;;  %v8022_v62 = vld [vmem:[%s11400_s21 + $0x768] sm:$0xff]  ;;  %v8024_v13 = vld [vmem:[%s11400_s21 + $0x778] sm:$0xff] }
 0x3ff   :  { %9933 = vmatpush1.bf16.msra.mxu1 %v9932_v57  ;;  %v7990_v57 = vld [vmem:[%s11400_s21 + $0x668] sm:$0xff] }
 0x400   :  { %9935 = vmatprep.subr.bf16.mxu1 %v9934_v25  ;;  %v7992_v25 = vld [vmem:[%s11400_s21 + $0x678] sm:$0xff] }
 0x401   :  { %v9982_v27 = vpack.c.bf16 %v7992_v25, %v7990_v57  ;;  %v8026_v57 = vld [vmem:[%s11400_s21 + $0x788] sm:$0xff]  ;;  %v8028_v25 = vld [vmem:[%s11400_s21 + $0x798] sm:$0xff] }
 0x403   :  { %9937 = vmatpush1.bf16.msra.mxu1 %v9936_v63  ;;  %v9986_v63 = vpack.c.bf16 %v7996_v30, %v7994_v6  ;;  %v8030_v6 = vld [vmem:[%s11400_s21 + $0x7a8] sm:$0xff]  ;;  %v8032_v30 = vld [vmem:[%s11400_s21 + $0x7b8] sm:$0xff] }
 0x404   :  { %9939 = vmatprep.subr.bf16.mxu1 %v9938_v38  ;;  %v7995_v38 = vld [vmem:[%s11400_s21 + $0x690] sm:$0xff] }
 0x407   :  { %9941 = vmatpush1.bf16.msra.mxu1 %v9940_v42  ;;  %v8002_v42 = vld [vmem:[%s11400_s21 + $0x6c8] sm:$0xff] }
 0x408   :  { %9943 = vmatprep.subr.bf16.mxu1 %v9942_v1  ;;  %v8004_v1 = vld [vmem:[%s11400_s21 + $0x6d8] sm:$0xff] }
 0x40b   :  { %9945 = vmatpush1.bf16.msra.mxu1 %v9944_v60  ;;  %v9996_v60 = vpack.c.bf16 %v8003_v33, %v8001_v49  ;;  %v8037_v49 = vld [vmem:[%s11400_s21 + $0x7e0] sm:$0xff]  ;;  %v8039_v33 = vld [vmem:[%s11400_s21 + $0x7f0] sm:$0xff] }
 0x40c   :  { %9947 = vmatprep.subr.bf16.mxu1 %v9946_v12 }
 0x40f   :  { %9949 = vmatpush1.bf16.msra.mxu1 %v9948_v5  ;;  %v10000_v5 = vpack.c.bf16 %v8007_v50, %v8005_v58  ;;  %v2527_v58 = vld [vmem:[%s11455_s20 + $0x28] sm:$0xff] }
 0x410   :  { %9951 = vmatprep.subr.bf16.mxu1 %v9950_v14  ;;  %v10002_v14 = vpack.c.bf16 %v8012_v15, %v8010_v52  ;;  %v2544_v52 = vld [vmem:[%s11455_s20 + $0xb0] sm:$0xff]  ;;  %v2545_v15 = vld [vmem:[%s11455_s20 + $0xb8] sm:$0xff] }
 0x413   :  { %9953 = vmatpush1.bf16.msra.mxu1 %v9952_v37  ;;  %v10004_v37 = vpack.c.bf16 %v8011_v16, %v8009_v23  ;;  %v2529_v23 = vld [vmem:[%s11455_s20 + $0x38] sm:$0xff] }
 0x414   :  { %9971 = vmatprep.subr.bf16.mxu1 %v9970_v41  ;;  %v10006_v41 = vpack.c.bf16 %v8016_v24, %v8014_v17  ;;  %v2546_v17 = vld [vmem:[%s11455_s20 + $0xc0] sm:$0xff]  ;;  %v2547_v24 = vld [vmem:[%s11455_s20 + $0xc8] sm:$0xff] }
 0x416   :  { %2220 = vmatmul.mubr.f32.vlgmr.msra.gmra.mrb[64].mxu1 %v12237_v32  ;;  %v9980_v32 = vpack.c.bf16 %v7987_v22, %v7985_v20  ;;  %v8021_v20 = vld [vmem:[%s11400_s21 + $0x760] sm:$0xff]  ;;  %v8023_v22 = vld [vmem:[%s11400_s21 + $0x770] sm:$0xff] }
 0x417   :  { %9973 = vmatpush1.bf16.msra.mxu1 %v9972_v21  ;;  %2225 = vmatprep.mubr.f32.mxu1 %v12295_v54  ;;  %v7989_v54 = vld [vmem:[%s11400_s21 + $0x660] sm:$0xff]  ;;  %v10008_v21 = vpack.c.bf16 %v8015_v55, %v8013_v53  ;;  %v2531_v53 = vld [vmem:[%s11455_s20 + $0x48] sm:$0xff] }
 0x418   :  { %9975 = vmatprep.subr.bf16.mxu1 %v9974_v28  ;;  %v10010_v28 = vpack.c.bf16 %v8020_v3, %v8018_v2  ;;  %v2548_v2 = vld [vmem:[%s11455_s20 + $0xd0] sm:$0xff]  ;;  %v2549_v3 = vld [vmem:[%s11455_s20 + $0xd8] sm:$0xff] }
 0x41a   :  { %2226 = vmatmul.mubr.f32.gmra.mrb[66].mxu1 %v12291_v31  ;;  %v9984_v31 = vpack.c.bf16 %v7991_v40, %v7989_v54  ;;  %v8025_v54 = vld [vmem:[%s11400_s21 + $0x780] sm:$0xff]  ;;  %v8027_v40 = vld [vmem:[%s11400_s21 + $0x790] sm:$0xff] }
 0x41b   :  { %9977 = vmatpush1.bf16.msra.mxu1 %v9976_v19  ;;  %2231 = vmatprep.mubr.f32.mxu1 %v12303_v29  ;;  %v7993_v29 = vld [vmem:[%s11400_s21 + $0x680] sm:$0xff]  ;;  %v10012_v19 = vpack.c.bf16 %v8019_v36, %v8017_v39  ;;  %v2533_v39 = vld [vmem:[%s11455_s20 + $0x58] sm:$0xff] }
 0x41c   :  { %9979 = vmatprep.subr.bf16.mxu1 %v9978_v34  ;;  %v10014_v34 = vpack.c.bf16 %v8024_v13, %v8022_v62  ;;  %v2550_v62 = vld [vmem:[%s11455_s20 + $0xe0] sm:$0xff]  ;;  %v2551_v13 = vld [vmem:[%s11455_s20 + $0xe8] sm:$0xff] }
 0x41e   :  { %2232 = vmatmul.mubr.f32.gmra.mrb[68].mxu1 %v12299_v47  ;;  %v9988_v47 = vpack.c.bf16 %v7995_v38, %v7993_v29  ;;  %v8029_v29 = vld [vmem:[%s11400_s21 + $0x7a0] sm:$0xff]  ;;  %v8031_v38 = vld [vmem:[%s11400_s21 + $0x7b0] sm:$0xff] }
 0x41f   :  { %9981 = vmatpush1.bf16.msra.mxu1 %v9980_v32  ;;  %2237 = vmatprep.mubr.f32.mxu1 %v12311_v8  ;;  %v7997_v8 = vld [vmem:[%s11400_s21 + $0x6a0] sm:$0xff]  ;;  %v10016_v32 = vpack.c.bf16 %v8023_v22, %v8021_v20  ;;  %v2535_v20 = vld [vmem:[%s11455_s20 + $0x68] sm:$0xff] }
 0x420   :  { %9983 = vmatprep.subr.bf16.mxu1 %v9982_v27  ;;  %v9992_v9 = vpack.c.bf16 %v7999_v35, %v7997_v8  ;;  %v10018_v27 = vpack.c.bf16 %v8028_v25, %v8026_v57  ;;  %v8033_v8 = vld [vmem:[%s11400_s21 + $0x7c0] sm:$0xff]  ;;  %v8035_v35 = vld [vmem:[%s11400_s21 + $0x7d0] sm:$0xff]  ;;  %v2553_v25 = vld [vmem:[%s11455_s20 + $0xf8] sm:$0xff] }
 0x421   :  { %v2552_v57 = vld [vmem:[%s11455_s20 + $0xf0] sm:$0xff] }
 0x422   :  { %2238 = vmatmul.mubr.f32.gmra.mrb[70].mxu1 %v12307_v56  ;;  %v9994_v56 = vpack.c.bf16 %v8004_v1, %v8002_v42  ;;  %v8038_v42 = vld [vmem:[%s11400_s21 + $0x7e8] sm:$0xff]  ;;  %v8040_v1 = vld [vmem:[%s11400_s21 + $0x7f8] sm:$0xff] }
 0x423   :  { %9985 = vmatpush1.bf16.msra.mxu1 %v9984_v31  ;;  %2487 = vmatprep.mubr.f32.mxu1 %v12319_v61  ;;  %v8008_v61 = vld [vmem:[%s11400_s21 + $0x6f8] sm:$0xff]  ;;  %v10020_v31 = vpack.c.bf16 %v8027_v40, %v8025_v54  ;;  %s14014_s21 = sld [smem:[#allocation8_spill]] }
 0x424   :  { %9987 = vmatprep.subr.bf16.mxu1 %v9986_v63  ;;  %v9998_v12 = vpack.c.bf16 %v8008_v61, %v8006_v51  ;;  %v10022_v63 = vpack.c.bf16 %v8032_v30, %v8030_v6  ;;  %v10032_v51 = vpack.c.bf16 %v8039_v33, %v8037_v49  ;;  %v2540_v61 = vld [vmem:[%s11455_s20 + $0x90] sm:$0xff]  ;;  %v2537_v54 = vld [vmem:[%s11455_s20 + $0x78] sm:$0xff] }
 0x427   :  { %9989 = vmatpush1.bf16.msra.mxu1 %v9988_v47  ;;  %v10024_v47 = vpack.c.bf16 %v8031_v38, %v8029_v29 }
 0x428   :  { %9991 = vmatprep.subr.bf16.mxu1 %v9990_v44  ;;  %v10026_v44 = vpack.c.bf16 %v8036_v45, %v8034_v48 }
 0x42b   :  { %9993 = vmatpush1.bf16.msra.mxu1 %v9992_v9  ;;  %v10028_v9 = vpack.c.bf16 %v8035_v35, %v8033_v8 }
 0x42c   :  { %9995 = vmatprep.subr.bf16.mxu1 %v9994_v56  ;;  %v10030_v56 = vpack.c.bf16 %v8040_v1, %v8038_v42 }
 0x42f   :  { %9997 = vmatpush1.bf16.msra.mxu1 %v9996_v60  ;;  %v2541_v60 = vld [vmem:[%s11455_s20 + $0x98] sm:$0xff] }
 0x430   :  { %9999 = vmatprep.subr.bf16.mxu1 %v9998_v12  ;;  %v2524_v12 = vld [vmem:[%s11455_s20 + $0x10] sm:$0xff] }
 0x433   :  { %10001 = vmatpush1.bf16.msra.mxu1 %v10000_v5  ;;  %v12510_v5 = vpack.c.bf16 %v2545_v15, %v2544_v52  ;;  %v2557_v52 = vld [vmem:[%s11460_s27 + $0x18] sm:$0xff] }
 0x434   :  { %10003 = vmatprep.subr.bf16.mxu1 %v10002_v14  ;;  %v2528_v14 = vld [vmem:[%s11455_s20 + $0x30] sm:$0xff] }
 0x435   :  { %v12514_v16 = vpack.c.bf16 %v2529_v23, %v2528_v14  ;;  %v2554_v14 = vld [vmem:[%s11460_s27] sm:$0xff]  ;;  %v2556_v23 = vld [vmem:[%s11460_s27 + $0x10] sm:$0xff] }
 0x437   :  { %10005 = vmatpush1.bf16.msra.mxu1 %v10004_v37  ;;  %v12520_v37 = vpack.c.bf16 %v2547_v24, %v2546_v17  ;;  %v12577_v17 = vpack.c.bf16 %v2556_v23, %v2554_v14  ;;  %v8058_v14 = vld [vmem:[%s11410_s29 + $0x240] sm:$0xff]  ;;  %v8060_v23 = vld [vmem:[%s11410_s29 + $0x250] sm:$0xff] }
 0x438   :  { %10007 = vmatprep.subr.bf16.mxu1 %v10006_v41  ;;  %v2530_v41 = vld [vmem:[%s11455_s20 + $0x40] sm:$0xff] }
 0x439   :  { %v12524_v55 = vpack.c.bf16 %v2531_v53, %v2530_v41 }
 0x43b   :  { %10009 = vmatpush1.bf16.msra.mxu1 %v10008_v21  ;;  %v12530_v21 = vpack.c.bf16 %v2549_v3, %v2548_v2 }
 0x43c   :  { %10011 = vmatprep.subr.bf16.mxu1 %v10010_v28  ;;  %v2532_v28 = vld [vmem:[%s11455_s20 + $0x50] sm:$0xff] }
 0x43d   :  { %v12534_v36 = vpack.c.bf16 %v2533_v39, %v2532_v28 }
 0x43f   :  { %10013 = vmatpush1.bf16.msra.mxu1 %v10012_v19  ;;  %v12540_v19 = vpack.c.bf16 %v2551_v13, %v2550_v62 }
 0x440   :  { %10015 = vmatprep.subr.bf16.mxu1 %v10014_v34  ;;  %v2534_v34 = vld [vmem:[%s11455_s20 + $0x60] sm:$0xff] }
 0x441   :  { %v12544_v22 = vpack.c.bf16 %v2535_v20, %v2534_v34 }
 0x443   :  { %10017 = vmatpush1.bf16.msra.mxu1 %v10016_v32  ;;  %v10062_v32 = vpack.c.bf16 %v2553_v25, %v2552_v57 }
 0x444   :  { %10019 = vmatprep.subr.bf16.mxu1 %v10018_v27  ;;  %v2536_v27 = vld [vmem:[%s11455_s20 + $0x70] sm:$0xff] }
 0x445   :  { %v10064_v40 = vpack.c.bf16 %v2537_v54, %v2536_v27 }
 0x447   :  { %10021 = vmatpush1.bf16.msra.mxu1 %v10020_v31 }
 0x448   :  { %10023 = vmatprep.subr.bf16.mxu1 %v10022_v63 }
 0x44b   :  { %10025 = vmatpush1.bf16.msra.mxu1 %v10024_v47 }
 0x44c   :  { %10027 = vmatprep.subr.bf16.mxu1 %v10026_v44 }
 0x44f   :  { %10029 = vmatpush1.bf16.msra.mxu1 %v10028_v9 }
 0x450   :  { %10031 = vmatprep.subr.bf16.mxu1 %v10030_v56 }
 0x453   :  { %10033 = vmatpush1.bf16.msra.mxu1 %v10032_v51 }
 0x456   :  { %2488 = vmatmul.mubr.f32.vlgmr.msra.gmra.mrb[64].mxu1 %v12315_v10  ;;  %v12490_v10 = vpack.c.bf16 %v2541_v60, %v2540_v61 }
 0x457   :  { %2493 = vmatprep.mubr.f32.mxu1 %v12329_v11  ;;  %v2525_v11 = vld [vmem:[%s11455_s20 + $0x18] sm:$0xff] }
 0x458   :  { %10039 = vmatprep.subr.bf16.mxu0 %v12490_v10 }
 0x45a   :  { %2494 = vmatmul.mubr.f32.gmra.mrb[66].mxu1 %v12326_v0  ;;  %v12494_v0 = vpack.c.bf16 %v2525_v11, %v2524_v12 }
 0x45b   :  { %2499 = vmatprep.mubr.f32.mxu1 %v12339_v46  ;;  %v2543_v46 = vld [vmem:[%s11455_s20 + $0xa8] sm:$0xff] }
 0x45c   :  { %10041 = vmatpush3.bf16.msra.mxu0 %v12494_v0 }
 0x45e   :  { %2500 = vmatmul.mubr.f32.gmra.mrb[68].mxu1 %v12336_v59  ;;  %v2542_v59 = vld [vmem:[%s11455_s20 + $0xa0] sm:$0xff] }
 0x45f   :  { %2505 = vmatprep.mubr.f32.mxu1 %v12349_v26  ;;  %v2526_v26 = vld [vmem:[%s11455_s20 + $0x20] sm:$0xff] }
 0x460   :  { %v12504_v50 = vpack.c.bf16 %v2527_v58, %v2526_v26  ;;  %v2555_v58 = vld [vmem:[%s11460_s27 + $0x8] sm:$0xff] }
 0x461   :  { %v12573_v15 = vpack.c.bf16 %v2557_v52, %v2555_v58  ;;  %v8061_v58 = vld [vmem:[%s11410_s29 + $0x258] sm:$0xff] }
 0x462   :  { %2506 = vmatmul.mubr.f32.gmra.mrb[70].mxu1 %v12346_v4  ;;  %v12500_v4 = vpack.c.bf16 %v2543_v46, %v2542_v59 }
 0x464   :  { %10043 = vmatprep.subr.bf16.mxu0 %v12500_v4 }
 0x465   :  { %10045 = vmatpush3.bf16.msra.mxu0 %v12504_v50 }
 0x466   :  { %10047 = vmatprep.subr.bf16.mxu0 %v12510_v5 }
 0x469   :  { %10049 = vmatpush3.bf16.msra.mxu0 %v12514_v16 }
 0x46a   :  { %10051 = vmatprep.subr.bf16.mxu0 %v12520_v37 }
 0x46d   :  { %10053 = vmatpush3.bf16.msra.mxu0 %v12524_v55 }
 0x46e   :  { %10055 = vmatprep.subr.bf16.mxu0 %v12530_v21 }
 0x471   :  { %10057 = vmatpush3.bf16.msra.mxu0 %v12534_v36 }
 0x472   :  { %10059 = vmatprep.subr.bf16.mxu0 %v12540_v19 }
 0x475   :  { %10061 = vmatpush3.bf16.msra.mxu0 %v12544_v22 }
 0x476   :  { %10063 = vmatprep.subr.bf16.mxu0 %v10062_v32 }
 0x479   :  { %10065 = vmatpush3.bf16.msra.mxu0 %v10064_v40 }
 0x47a   :  { %10067 = vmatprep.subr.bf16.mxu0 %v12573_v15 }
 0x529   :  { %v12552_v6 = vpop.f32.mrb[64].mxu1 }
 0x52a   :  { %v12554_v30 = vpop.f32.mrb[65].mxu1 }
 0x52d   :  { %v12556_v31 = vpop.f32.mrb[66].mxu1 }
 0x52e   :  { %v2558_v63 = vadd.f32 %v12556_v31, %v12552_v6  ;;  %v12560_v29 = vpop.f32.mrb[67].mxu1 }
 0x52f   :  { %v2567_v38 = vadd.f32 %v12560_v29, %v12554_v30 }
 0x531   :  { %v12564_v48 = vpop.f32.mrb[68].mxu1 }
 0x532   :  { %v2559_v45 = vadd.f32 %v2558_v63, %v12564_v48  ;;  %v12567_v47 = vpop.f32.mrb[69].mxu1 }
 0x533   :  { %v2568_v44 = vadd.f32 %v2567_v38, %v12567_v47 }
 0x535   :  { %v2507_v8 = vpop.f32.mrb[70].mxu1 }
 0x536   :  { %v2560_v35 = vadd.f32 %v2559_v45, %v2507_v8  ;;  %v2509_v42 = vpop.f32.mrb[71].mxu1 }
 0x537   :  { %v2569_v1 = vadd.f32 %v2568_v44, %v2509_v42 }
 0x538   :  { %v2561_v9 = vrot.slane %v2560_v35, 4 }
 0x539   :  { %v2570_v56 = vrot.slane %v2569_v1, 4 }
 0x53a   :  { %v2562_v49 = vadd.f32 %v2561_v9, %v2560_v35  ;;  %v8051_v9 = vld [vmem:[%s11410_s29 + $0x208] sm:$0xff] }
 0x53b   :  { %v2571_v33 = vadd.f32 %v2570_v56, %v2569_v1  ;;  %v8053_v56 = vld [vmem:[%s11410_s29 + $0x218] sm:$0xff] }
 0x53c   :  { %v2563_v51 = vrot.slane %v2562_v49, 2 }
 0x53d   :  { %v2572_v61 = vrot.slane %v2571_v33, 2 }
 0x53e   :  { %v2564_v60 = vadd.f32 %v2563_v51, %v2562_v49  ;;  %v8050_v49 = vld [vmem:[%s11410_s29 + $0x200] sm:$0xff]  ;;  %v8052_v51 = vld [vmem:[%s11410_s29 + $0x210] sm:$0xff] }
 0x53f   :  { %v2573_v12 = vadd.f32 %v2572_v61, %v2571_v33  ;;  %v10126_v33 = vpack.c.bf16 %v8053_v56, %v8051_v9  ;;  %v8055_v61 = vld [vmem:[%s11410_s29 + $0x228] sm:$0xff]  ;;  %v8089_v56 = vld [vmem:[%s11410_s29 + $0x338] sm:$0xff] }
 0x540   :  { %v2565_v11 = vrot.slane %v2564_v60, 1  ;;  %v8087_v9 = vld [vmem:[%s11410_s29 + $0x328] sm:$0xff] }
 0x541   :  { %v2574_v59 = vrot.slane %v2573_v12, 1  ;;  %10127 = vmatprep.subr.bf16.mxu1 %v10126_v33  ;;  %v10162_v33 = vpack.c.bf16 %v8089_v56, %v8087_v9 }
 0x542   :  { %v2566_v26 = vadd.f32 %v2565_v11, %v2564_v60  ;;  %v8057_v60 = vld [vmem:[%s11410_s29 + $0x238] sm:$0xff] }
 0x543   :  { %v2575_v46 = vadd.f32 %v2574_v59, %v2573_v12  ;;  %v10128_v12 = vpack.c.bf16 %v8052_v51, %v8050_v49  ;;  %v10130_v11 = vpack.c.bf16 %v8057_v60, %v8055_v61  ;;  %v8054_v59 = vld [vmem:[%s11410_s29 + $0x220] sm:$0xff]  ;;  %v8088_v61 = vld [vmem:[%s11410_s29 + $0x330] sm:$0xff]  ;;  %v8091_v60 = vld [vmem:[%s11410_s29 + $0x348] sm:$0xff] }
 0x544   :  { %v8086_v51 = vld [vmem:[%s11410_s29 + $0x320] sm:$0xff] }
 0x545   :  { %2640 = vmatprep.mubr.f32.mxu0 %v2575_v46  ;;  %v8056_v46 = vld [vmem:[%s11410_s29 + $0x230] sm:$0xff]  ;;  %10129 = vmatpush1.bf16.msra.mxu1 %v10128_v12  ;;  %v8093_v12 = vld [vmem:[%s11410_s29 + $0x358] sm:$0xff] }
 0x546   :  { %2641 = vmatmul.mubr.f32.vlgmr.msra.gmra.mrb[48].mxu0 %v2566_v26  ;;  %v8059_v26 = vld [vmem:[%s11410_s29 + $0x248] sm:$0xff]  ;;  %v10132_v52 = vpack.c.bf16 %v8056_v46, %v8054_v59  ;;  %10131 = vmatprep.subr.bf16.mxu1 %v10130_v11  ;;  %v10164_v11 = vpack.c.bf16 %v8088_v61, %v8086_v51  ;;  %v10166_v59 = vpack.c.bf16 %v8093_v12, %v8091_v60  ;;  %v8090_v46 = vld [vmem:[%s11410_s29 + $0x340] sm:$0xff] }
 0x547   :  { %2716 = vmatprep.mubr.f32.mxu0 %v11368_v7  ;;  %10069 = vmatpush1.bf16.msra.mxu0 %v12577_v17 }
 0x548   :  { %10071 = vmatprep.subr.bf16.mxu0 %v12360_v18  ;;  %v2723_v18 = vlaneseq }
 0x549   :  { %10133 = vmatpush1.bf16.msra.mxu1 %v10132_v52  ;;  %v8097_v52 = vld [vmem:[%s11410_s29 + $0x378] sm:$0xff] }
 0x619   :  { %v8652_v24 = vpop.f32.mrb[48].mxu0 }
 0x61a   :  { %v8653_v41 = vpop.f32.mrb[49].mxu0 }
 0x61b   :  { %v8654_v53 = vadd.f32 %v8653_v41, %v8652_v24  ;;  %v8063_v24 = vld [vmem:[%s11410_s29 + $0x268] sm:$0xff]  ;;  %v8065_v41 = vld [vmem:[%s11410_s29 + $0x278] sm:$0xff] }
 0x61d   :  { %v2647_v2 = vmul.f32 0.001953125, %v8654_v53  ;;  %v10136_v53 = vpack.c.bf16 %v8060_v23, %v8058_v14  ;;  %v8094_v23 = vld [vmem:[%s11410_s29 + $0x360] sm:$0xff] }
 0x61f   :  { %8041 = vmatmul.mubr.msk.f32.vlgmr.msra.gmra.mrb[50].mxu0 %vm2648_vm2, %v2647_v2  ;;  %v10138_v2 = vpack.c.bf16 %v8065_v41, %v8063_v24  ;;  %v8096_v24 = vld [vmem:[%s11410_s29 + $0x370] sm:$0xff] }
 0x620   :  { %10073 = vmatpush3.bf16.msra.mxu0 %v12365_v43  ;;  %v2724_v43 = vshrl.u32 %v2723_v18, 7  ;;  %v8062_v18 = vld [vmem:[%s11410_s29 + $0x260] sm:$0xff]  ;;  %v10172_v41 = vpack.c.bf16 %v8096_v24, %v8094_v23 }
 0x621   :  { %10075 = vmatprep.subr.bf16.mxu0 %v12490_v10 }
 0x622   :  { %v12597_v10 = vsub.s32 0, %v2724_v43  ;;  %v8064_v43 = vld [vmem:[%s11410_s29 + $0x270] sm:$0xff] }
 0x624   :  { %10077 = vmatpush3.bf16.msra.mxu0 %v12494_v0 }
 0x625   :  { %10079 = vmatprep.subr.bf16.mxu0 %v12500_v4 }
 0x628   :  { %10081 = vmatpush3.bf16.msra.mxu0 %v12504_v50 }
 0x629   :  { %10083 = vmatprep.subr.bf16.mxu0 %v12510_v5 }
 0x62c   :  { %10085 = vmatpush3.bf16.msra.mxu0 %v12514_v16 }
 0x62d   :  { %10087 = vmatprep.subr.bf16.mxu0 %v12520_v37 }
 0x630   :  { %10089 = vmatpush3.bf16.msra.mxu0 %v12524_v55 }
 0x631   :  { %10091 = vmatprep.subr.bf16.mxu0 %v12530_v21 }
 0x634   :  { %10093 = vmatpush3.bf16.msra.mxu0 %v12534_v36 }
 0x635   :  { %10095 = vmatprep.subr.bf16.mxu0 %v12540_v19 }
 0x638   :  { %10097 = vmatpush3.bf16.msra.mxu0 %v12544_v22 }
 0x639   :  { %10099 = vmatprep.subr.bf16.mxu0 %v10062_v32 }
 0x63c   :  { %10101 = vmatpush3.bf16.msra.mxu0 %v10064_v40 }
 0x63d   :  { %10103 = vmatprep.subr.bf16.mxu0 %v12573_v15 }
 0x6f2   :  { %v2718_v0 = vpop.f32.mrb[50].mxu0 }
 0x6f3   :  { %v2726_v4 = vrot.slane %v2718_v0, %v12597_v10  ;;  %v2720_v50 = vpop.f32.mrb[51].mxu0  ;;  %v8067_v0 = vld [vmem:[%s11410_s29 + $0x288] sm:$0xff] }
 0x6f4   :  { %v2730_v5 = vrot.slane %v2720_v50, %v12597_v10  ;;  %v10140_v50 = vpack.c.bf16 %v8064_v43, %v8062_v18 }
 0x6f5   :  { %v12602_v16 = vsub.f32 %v12552_v6, %v2726_v4  ;;  %v12605_v37 = vsub.f32 %v12556_v31, %v2726_v4  ;;  %v12608_v55 = vsub.f32 %v12564_v48, %v2726_v4  ;;  %v12610_v3 = vsub.f32 %v2507_v8, %v2726_v4  ;;  %v8069_v4 = vld [vmem:[%s11410_s29 + $0x298] sm:$0xff] }
 0x6f6   :  { %v12613_v21 = vsub.f32 %v12554_v30, %v2730_v5  ;;  %v12616_v28 = vsub.f32 %v12560_v29, %v2730_v5  ;;  %v12619_v39 = vsub.f32 %v12567_v47, %v2730_v5  ;;  %v12621_v36 = vsub.f32 %v2509_v42, %v2730_v5 }
 0x6f7   :  { %v2739_v62 = vmul.f32 %v12602_v16, %v12602_v16  ;;  %v2741_v13 = vmul.f32 %v12605_v37, %v12605_v37  ;;  %v2743_v20 = vmul.f32 %v12608_v55, %v12608_v55  ;;  %v2745_v32 = vmul.f32 %v12610_v3, %v12610_v3 }
 0x6f8   :  { %v2740_v19 = vmul.f32 %v12613_v21, %v12613_v21  ;;  %v2742_v34 = vmul.f32 %v12616_v28, %v12616_v28  ;;  %v2744_v57 = vmul.f32 %v12619_v39, %v12619_v39  ;;  %v2746_v54 = vmul.f32 %v12621_v36, %v12621_v36 }
 0x6f9   :  { %v2747_v22 = vadd.f32 %v2741_v13, %v2739_v62  ;;  %v10142_v5 = vpack.c.bf16 %v8069_v4, %v8067_v0  ;;  %v8066_v62 = vld [vmem:[%s11410_s29 + $0x280] sm:$0xff]  ;;  %v8068_v13 = vld [vmem:[%s11410_s29 + $0x290] sm:$0xff] }
 0x6fa   :  { %v2756_v25 = vadd.f32 %v2742_v34, %v2740_v19  ;;  %v8071_v19 = vld [vmem:[%s11410_s29 + $0x2a8] sm:$0xff]  ;;  %v8073_v34 = vld [vmem:[%s11410_s29 + $0x2b8] sm:$0xff]  ;;  %v2520_v4 = vld [vmem:[%s11445_s6] sm:$0x1] }
 0x6fb   :  { %v2748_v27 = vadd.f32 %v2747_v22, %v2743_v20  ;;  %v10144_v20 = vpack.c.bf16 %v8068_v13, %v8066_v62  ;;  %v10146_v22 = vpack.c.bf16 %v8073_v34, %v8071_v19  ;;  %v2521_v62 = vld [vmem:[%s11450_s12] sm:$0x1]  ;;  %v8099_v13 = vld [vmem:[%s11410_s29 + $0x388] sm:$0xff]  ;;  %v8101_v19 = vld [vmem:[%s11410_s29 + $0x398] sm:$0xff] }
 0x6fc   :  { %v2757_v40 = vadd.f32 %v2756_v25, %v2744_v57  ;;  %v8070_v57 = vld [vmem:[%s11410_s29 + $0x2a0] sm:$0xff]  ;;  %v8072_v25 = vld [vmem:[%s11410_s29 + $0x2b0] sm:$0xff]  ;;  %v10174_v34 = vpack.c.bf16 %v8101_v19, %v8099_v13 }
 0x6fd   :  { %v2749_v6 = vadd.f32 %v2748_v27, %v2745_v32  ;;  %v8075_v32 = vld [vmem:[%s11410_s29 + $0x2c8] sm:$0xff]  ;;  %v8077_v27 = vld [vmem:[%s11410_s29 + $0x2d8] sm:$0xff] }
 0x6fe   :  { %v2758_v30 = vadd.f32 %v2757_v40, %v2746_v54  ;;  %v10148_v54 = vpack.c.bf16 %v8072_v25, %v8070_v57  ;;  %v10150_v40 = vpack.c.bf16 %v8077_v27, %v8075_v32  ;;  %v8105_v25 = vld [vmem:[%s11410_s29 + $0x3b8] sm:$0xff]  ;;  %v8102_v27 = vld [vmem:[%s11410_s29 + $0x3a0] sm:$0xff] }
 0x6ff   :  { %v2750_v31 = vrot.slane %v2749_v6, 4 }
 0x700   :  { %v2759_v63 = vrot.slane %v2758_v30, 4 }
 0x701   :  { %v2751_v29 = vadd.f32 %v2750_v31, %v2749_v6  ;;  %v8074_v6 = vld [vmem:[%s11410_s29 + $0x2c0] sm:$0xff]  ;;  %v8079_v31 = vld [vmem:[%s11410_s29 + $0x2e8] sm:$0xff] }
 0x702   :  { %v2760_v38 = vadd.f32 %v2759_v63, %v2758_v30  ;;  %v8076_v30 = vld [vmem:[%s11410_s29 + $0x2d0] sm:$0xff]  ;;  %v8081_v63 = vld [vmem:[%s11410_s29 + $0x2f8] sm:$0xff] }
 0x703   :  { %v2752_v48 = vrot.slane %v2751_v29, 2 }
 0x704   :  { %v2761_v45 = vrot.slane %v2760_v38, 2 }
 0x705   :  { %v2753_v47 = vadd.f32 %v2752_v48, %v2751_v29  ;;  %v10152_v29 = vpack.c.bf16 %v8076_v30, %v8074_v6  ;;  %v8078_v48 = vld [vmem:[%s11410_s29 + $0x2e0] sm:$0xff]  ;;  %v8107_v6 = vld [vmem:[%s11410_s29 + $0x3c8] sm:$0xff]  ;;  %v8109_v30 = vld [vmem:[%s11410_s29 + $0x3d8] sm:$0xff] }
 0x706   :  { %v2762_v44 = vadd.f32 %v2761_v45, %v2760_v38  ;;  %v10154_v38 = vpack.c.bf16 %v8081_v63, %v8079_v31  ;;  %v8080_v45 = vld [vmem:[%s11410_s29 + $0x2f0] sm:$0xff]  ;;  %v10182_v31 = vpack.c.bf16 %v8109_v30, %v8107_v6  ;;  %v8106_v63 = vld [vmem:[%s11410_s29 + $0x3c0] sm:$0xff]  ;;  %v3134_v30 = vld [vmem:[%s11410_s29 + $0x28] sm:$0xff] }
 0x707   :  { %v2754_v8 = vrot.slane %v2753_v47, 1  ;;  %v3131_v6 = vld [vmem:[%s11410_s29 + $0x10] sm:$0xff] }
 0x708   :  { %v2763_v35 = vrot.slane %v2762_v44, 1 }
 0x709   :  { %v2755_v1 = vadd.f32 %v2754_v8, %v2753_v47  ;;  %v8083_v47 = vld [vmem:[%s11410_s29 + $0x308] sm:$0xff]  ;;  %v10156_v8 = vpack.c.bf16 %v8080_v45, %v8078_v48  ;;  %v8113_v45 = vld [vmem:[%s11410_s29 + $0x3f8] sm:$0xff] }
 0x70a   :  { %v2764_v42 = vadd.f32 %v2763_v35, %v2762_v44  ;;  %v8085_v44 = vld [vmem:[%s11410_s29 + $0x318] sm:$0xff]  ;;  %v8111_v48 = vld [vmem:[%s11410_s29 + $0x3e8] sm:$0xff] }
 0x70b   :  { %v10158_v35 = vpack.c.bf16 %v8085_v44, %v8083_v47  ;;  %v8110_v47 = vld [vmem:[%s11410_s29 + $0x3e0] sm:$0xff]  ;;  %v10186_v44 = vpack.c.bf16 %v8113_v45, %v8111_v48  ;;  %v3135_v45 = vld [vmem:[%s11410_s29 + $0x30] sm:$0xff] }
 0x70c   :  { %2829 = vmatprep.mubr.f32.mxu0 %v2764_v42  ;;  %v8082_v42 = vld [vmem:[%s11410_s29 + $0x300] sm:$0xff] }
 0x70d   :  { %2830 = vmatmul.mubr.f32.vlgmr.msra.gmra.mrb[52].mxu0 %v2755_v1  ;;  %v8084_v1 = vld [vmem:[%s11410_s29 + $0x310] sm:$0xff]  ;;  %v3133_v48 = vld [vmem:[%s11410_s29 + $0x20] sm:$0xff] }
 0x70e   :  { %10105 = vmatpush1.bf16.msra.mxu0 %v12577_v17  ;;  %2906 = vmatprep.mubr.f32.mxu0 %v11368_v7  ;;  %v10160_v49 = vpack.c.bf16 %v8084_v1, %v8082_v42 }
 0x70f   :  { %10107 = vmatprep.subr.bf16.mxu0 %v12573_v15  ;;  %v10134_v15 = vpack.c.bf16 %v8061_v58, %v8059_v26  ;;  %v8092_v26 = vld [vmem:[%s11410_s29 + $0x350] sm:$0xff]  ;;  %v8095_v58 = vld [vmem:[%s11410_s29 + $0x368] sm:$0xff] }
 0x710   :  { %v10170_v14 = vpack.c.bf16 %v8097_v52, %v8095_v58 }
 0x711   :  { %10135 = vmatprep.subr.bf16.mxu1 %v10134_v15  ;;  %v10168_v15 = vpack.c.bf16 %v8092_v26, %v8090_v46 }
 0x712   :  { %10137 = vmatpush1.bf16.msra.mxu1 %v10136_v53 }
 0x713   :  { %10139 = vmatprep.subr.bf16.mxu1 %v10138_v2 }
 0x716   :  { %10141 = vmatpush1.bf16.msra.mxu1 %v10140_v50 }
 0x717   :  { %10143 = vmatprep.subr.bf16.mxu1 %v10142_v5 }
 0x71a   :  { %10145 = vmatpush1.bf16.msra.mxu1 %v10144_v20  ;;  %v8098_v20 = vld [vmem:[%s11410_s29 + $0x380] sm:$0xff] }
 0x71b   :  { %10147 = vmatprep.subr.bf16.mxu1 %v10146_v22  ;;  %v8100_v22 = vld [vmem:[%s11410_s29 + $0x390] sm:$0xff] }
 0x71c   :  { %v10176_v57 = vpack.c.bf16 %v8100_v22, %v8098_v20 }
 0x71e   :  { %10149 = vmatpush1.bf16.msra.mxu1 %v10148_v54  ;;  %v8104_v54 = vld [vmem:[%s11410_s29 + $0x3b0] sm:$0xff] }
 0x71f   :  { %10151 = vmatprep.subr.bf16.mxu1 %v10150_v40  ;;  %v10180_v40 = vpack.c.bf16 %v8104_v54, %v8102_v27  ;;  %v3044_v27 = vld [vmem:[%s11405_s25 + $0x8] sm:$0xff] }
 0x722   :  { %10153 = vmatpush1.bf16.msra.mxu1 %v10152_v29  ;;  %v8108_v29 = vld [vmem:[%s11410_s29 + $0x3d0] sm:$0xff] }
 0x723   :  { %10155 = vmatprep.subr.bf16.mxu1 %v10154_v38  ;;  %v10184_v38 = vpack.c.bf16 %v8108_v29, %v8106_v63  ;;  %v8046_v63 = vld [vmem:[%s11405_s25 + $0x10] sm:$0xff] }
 0x726   :  { %10157 = vmatpush1.bf16.msra.mxu1 %v10156_v8  ;;  %v8112_v8 = vld [vmem:[%s11410_s29 + $0x3f0] sm:$0xff] }
 0x727   :  { %10159 = vmatprep.subr.bf16.mxu1 %v10158_v35  ;;  %v10188_v35 = vpack.c.bf16 %v8112_v8, %v8110_v47  ;;  %v3138_v47 = vld [vmem:[%s11410_s29 + $0x48] sm:$0xff]  ;;  %v8047_v8 = vld [vmem:[%s11405_s25 + $0x18] sm:$0xff] }
 0x72a   :  { %10161 = vmatpush1.bf16.msra.mxu1 %v10160_v49 }
 0x72b   :  { %10163 = vmatprep.subr.bf16.mxu1 %v10162_v33 }
 0x72e   :  { %10165 = vmatpush1.bf16.msra.mxu1 %v10164_v11 }
 0x72f   :  { %10167 = vmatprep.subr.bf16.mxu1 %v10166_v59 }
 0x732   :  { %10169 = vmatpush1.bf16.msra.mxu1 %v10168_v15 }
 0x733   :  { %10171 = vmatprep.subr.bf16.mxu1 %v10170_v14 }
 0x736   :  { %10173 = vmatpush1.bf16.msra.mxu1 %v10172_v41 }
 0x737   :  { %10175 = vmatprep.subr.bf16.mxu1 %v10174_v34 }
 0x73a   :  { %10177 = vmatpush1.bf16.msra.mxu1 %v10176_v57 }
 0x7e0   :  { %v8687_v53 = vpop.f32.mrb[52].mxu0 }
 0x7e1   :  { %v8688_v2 = vpop.f32.mrb[53].mxu0 }
 0x7e2   :  { %v8689_v18 = vadd.f32 %v8688_v2, %v8687_v53 }
 0x7e4   :  { %v2835_v43 = vmul.f32 0.001953125, %v8689_v18 }
 0x7e6   :  { %v2836_v0 = vadd.f32 1e-05, %v2835_v43 }
 0x7e8   :  { %11307 = vrsqrt.f32 %v2836_v0 }
 0x7f2   :  { %v11308_v50 = vpop.eup %11307 }
 0x7f3   :  { %v2838_v5 = vmul.f32 %v11308_v50, %v2520_v4 }
 0x7f5   :  { %8042 = vmatmul.mubr.msk.f32.vlgmr.msra.gmra.mrb[54].mxu0 %vm2648_vm2, %v2838_v5 }
 0x7f6   :  { %10109 = vmatpush1.bf16.msra.mxu0 %v12577_v17  ;;  %2996 = vmatprep.mubr.f32.mxu0 %v11368_v7  ;;  %v8103_v17 = vld [vmem:[%s11410_s29 + $0x3a8] sm:$0xff] }
 0x7f7   :  { %v10178_v32 = vpack.c.bf16 %v8105_v25, %v8103_v17  ;;  %v3043_v17 = vld [vmem:[%s11405_s25] sm:$0xff]  ;;  %v3130_v25 = vld [vmem:[%s11410_s29 + $0x8] sm:$0xff] }
 0x7f9   :  { %8043 = vmatmul.mubr.msk.f32.vlgmr.msra.gmra.mrb[56].mxu0 %vm2648_vm2, %v2521_v62  ;;  %10179 = vmatprep.subr.bf16.mxu1 %v10178_v32  ;;  %v3132_v32 = vld [vmem:[%s11410_s29 + $0x18] sm:$0xff] }
 0x7fa   :  { %3116 = vmatprep.mubr.f32.mxu0 %v11368_v7  ;;  %10181 = vmatpush1.bf16.msra.mxu1 %v10180_v40  ;;  %v10190_v54 = vpack.c.bf16 %v3132_v32, %v3130_v25  ;;  %v3129_v40 = vld [vmem:[%s11410_s29] sm:$0xff] }
 0x7fb   :  { %10183 = vmatprep.subr.bf16.mxu1 %v10182_v31  ;;  %v3136_v31 = vld [vmem:[%s11410_s29 + $0x38] sm:$0xff]  ;;  %v10192_v29 = vpack.c.bf16 %v3131_v6, %v3129_v40  ;;  %v3170_v40 = vld [vmem:[%s11410_s29 + $0x148] sm:$0xff] }
 0x7fc   :  { %v3172_v6 = vld [vmem:[%s11410_s29 + $0x158] sm:$0xff] }
 0x7fe   :  { %10185 = vmatpush1.bf16.msra.mxu1 %v10184_v38  ;;  %v10194_v38 = vpack.c.bf16 %v3136_v31, %v3134_v30  ;;  %v10230_v31 = vpack.c.bf16 %v3172_v6, %v3170_v40  ;;  %v8131_v40 = vld [vmem:[%s11410_s29 + $0x468] sm:$0xff]  ;;  %v8133_v6 = vld [vmem:[%s11410_s29 + $0x478] sm:$0xff] }
 0x7ff   :  { %10187 = vmatprep.subr.bf16.mxu1 %v10186_v44  ;;  %v3140_v44 = vld [vmem:[%s11410_s29 + $0x58] sm:$0xff] }
 0x802   :  { %10189 = vmatpush1.bf16.msra.mxu1 %v10188_v35  ;;  %v10196_v35 = vpack.c.bf16 %v3135_v45, %v3133_v48  ;;  %v3176_v48 = vld [vmem:[%s11410_s29 + $0x178] sm:$0xff] }
 0x8c8   :  { %v2908_v42 = vpop.f32.mrb[54].mxu0 }
 0x8c9   :  { %v2916_v1 = vrot.slane %v2908_v42, %v12597_v10  ;;  %v2910_v9 = vpop.f32.mrb[55].mxu0  ;;  %v10198_v42 = vpack.c.bf16 %v3140_v44, %v3138_v47  ;;  %v3173_v44 = vld [vmem:[%s11410_s29 + $0x160] sm:$0xff] }
 0x8ca   :  { %v2920_v56 = vrot.slane %v2910_v9, %v12597_v10  ;;  %v3139_v9 = vld [vmem:[%s11410_s29 + $0x50] sm:$0xff] }
 0x8cb   :  { %v2921_v49 = vmul.f32 %v2916_v1, %v12602_v16  ;;  %v2923_v33 = vmul.f32 %v2916_v1, %v12605_v37  ;;  %v2925_v61 = vmul.f32 %v2916_v1, %v12608_v55  ;;  %v2927_v60 = vmul.f32 %v2916_v1, %v12610_v3  ;;  %v3137_v1 = vld [vmem:[%s11410_s29 + $0x40] sm:$0xff] }
 0x8cc   :  { %v2998_v51 = vpop.f32.mrb[56].mxu0  ;;  %v2922_v12 = vmul.f32 %v2920_v56, %v12613_v21  ;;  %v2924_v46 = vmul.f32 %v2920_v56, %v12616_v28  ;;  %v2926_v26 = vmul.f32 %v2920_v56, %v12619_v39  ;;  %v2928_v58 = vmul.f32 %v2920_v56, %v12621_v36  ;;  %v3142_v56 = vld [vmem:[%s11410_s29 + $0x68] sm:$0xff] }
 0x8cd   :  { %v3006_v11 = vrot.slane %v2998_v51, %v12597_v10  ;;  %v3000_v59 = vpop.f32.mrb[57].mxu0 }
 0x8ce   :  { %v3010_v16 = vrot.slane %v3000_v59, %v12597_v10 }
 0x8cf   :  { %v3011_v52 = vadd.f32 %v3006_v11, %v2921_v49  ;;  %v3013_v37 = vadd.f32 %v3006_v11, %v2923_v33  ;;  %v3015_v15 = vadd.f32 %v3006_v11, %v2925_v61  ;;  %v3017_v14 = vadd.f32 %v3006_v11, %v2927_v60  ;;  %v3144_v49 = vld [vmem:[%s11410_s29 + $0x78] sm:$0xff]  ;;  %v3141_v61 = vld [vmem:[%s11410_s29 + $0x60] sm:$0xff]  ;;  %v3143_v60 = vld [vmem:[%s11410_s29 + $0x70] sm:$0xff] }
 0x8d0   :  { %v3012_v55 = vadd.f32 %v3010_v16, %v2922_v12  ;;  %v3014_v23 = vadd.f32 %v3010_v16, %v2924_v46  ;;  %v3016_v3 = vadd.f32 %v3010_v16, %v2926_v26  ;;  %v3018_v24 = vadd.f32 %v3010_v16, %v2928_v58  ;;  %v3146_v12 = vld [vmem:[%s11410_s29 + $0x88] sm:$0xff]  ;;  %v3148_v11 = vld [vmem:[%s11410_s29 + $0x98] sm:$0xff]  ;;  %v3145_v26 = vld [vmem:[%s11410_s29 + $0x80] sm:$0xff] }
 0x8d1   :  { %vm3019_vm3 = vcmp.gt.f32.partialorder %v3011_v52, 0.0  ;;  %vm3021_vm4 = vcmp.gt.f32.partialorder %v3013_v37, 0.0  ;;  %v3027_v21 = vmul.f32 0.2, %v3011_v52  ;;  %v3029_v41 = vmul.f32 0.2, %v3013_v37 }
 0x8d2   :  { %vm3020_vm5 = vcmp.gt.f32.partialorder %v3012_v55, 0.0  ;;  %vm3022_vm6 = vcmp.gt.f32.partialorder %v3014_v23, 0.0  ;;  %v3028_v28 = vmul.f32 0.2, %v3012_v55  ;;  %v3030_v39 = vmul.f32 0.2, %v3014_v23 }
 0x8d3   :  { %v3035_v53 = vsel %vm3019_vm3, %v3011_v52, %v3027_v21  ;;  %v3037_v36 = vsel %vm3021_vm4, %v3013_v37, %v3029_v41  ;;  %vm3024_vm7 = vcmp.gt.f32.partialorder %v3016_v3, 0.0  ;;  %vm3026_vm8 = vcmp.gt.f32.partialorder %v3018_v24, 0.0  ;;  %v3147_v58 = vld [vmem:[%s11410_s29 + $0x90] sm:$0xff]  ;;  %v3150_v16 = vld [vmem:[%s11410_s29 + $0xa8] sm:$0xff]  ;;  %v3152_v52 = vld [vmem:[%s11410_s29 + $0xb8] sm:$0xff] }
 0x8d4   :  { %v3036_v2 = vsel %vm3020_vm5, %v3012_v55, %v3028_v28  ;;  %v3038_v18 = vsel %vm3022_vm6, %v3014_v23, %v3030_v39  ;;  %v12725_v43 = vpack.c.bf16 %v3037_v36, %v3035_v53  ;;  %v3032_v0 = vmul.f32 0.2, %v3016_v3  ;;  %v3151_v55 = vld [vmem:[%s11410_s29 + $0xb0] sm:$0xff]  ;;  %v3154_v23 = vld [vmem:[%s11410_s29 + $0xc8] sm:$0xff]  ;;  %v3153_v41 = vld [vmem:[%s11410_s29 + $0xc0] sm:$0xff] }
 0x8d5   :  { %v12727_v4 = vpack.c.bf16 %v3038_v18, %v3036_v2  ;;  %v3034_v50 = vmul.f32 0.2, %v3018_v24  ;;  %vm3023_vm9 = vcmp.gt.f32.partialorder %v3015_v15, 0.0  ;;  %vm3025_vm10 = vcmp.gt.f32.partialorder %v3017_v14, 0.0  ;;  %v3155_v28 = vld [vmem:[%s11410_s29 + $0xd0] sm:$0xff]  ;;  %v3158_v39 = vld [vmem:[%s11410_s29 + $0xe8] sm:$0xff] }
 0x8d6   :  { %v3040_v5 = vsel %vm3024_vm7, %v3016_v3, %v3032_v0  ;;  %v3031_v62 = vmul.f32 0.2, %v3015_v15  ;;  %v3033_v13 = vmul.f32 0.2, %v3017_v14  ;;  %v10200_v33 = vpack.c.bf16 %v3139_v9, %v3137_v1  ;;  %v3156_v3 = vld [vmem:[%s11410_s29 + $0xd8] sm:$0xff]  ;;  %v3157_v18 = vld [vmem:[%s11410_s29 + $0xe0] sm:$0xff] }
 0x8d7   :  { %10111 = vmatprep.subr.bf16.mxu0 %v12727_v4  ;;  %10255 = vmatprep.subr.bf16.mxu1 %v12727_v4  ;;  %v3042_v19 = vsel %vm3026_vm8, %v3018_v24, %v3034_v50  ;;  %v10202_v51 = vpack.c.bf16 %v3144_v49, %v3142_v56  ;;  %v10204_v59 = vpack.c.bf16 %v3143_v60, %v3141_v61  ;;  %v3160_v53 = vld [vmem:[%s11410_s29 + $0xf8] sm:$0xff]  ;;  %v3159_v0 = vld [vmem:[%s11410_s29 + $0xf0] sm:$0xff]  ;;  %v3162_v50 = vld [vmem:[%s11410_s29 + $0x108] sm:$0xff]  ;;  %vm5783_vm3 = vcmask 64512  }
 0x8d8   :  { %10113 = vmatpush1.bf16.msra.mxu0 %v12725_v43  ;;  %v12732_v34 = vpack.c.bf16 %v3042_v19, %v3040_v5  ;;  %v3039_v20 = vsel %vm3023_vm9, %v3015_v15, %v3031_v62  ;;  %v3041_v22 = vsel %vm3025_vm10, %v3017_v14, %v3033_v13  ;;  %v10206_v46 = vpack.c.bf16 %v3148_v11, %v3146_v12  ;;  %v3149_v14 = vld [vmem:[%s11410_s29 + $0xa0] sm:$0xff]  ;;  %v3164_v5 = vld [vmem:[%s11410_s29 + $0x118] sm:$0xff]  ;;  %v3179_v49 = vld [vmem:[%s11410_s29 + $0x190] sm:$0xff] }
 0x8d9   :  { %v12734_v57 = vpack.c.bf16 %v3041_v22, %v3039_v20  ;;  %v10208_v37 = vpack.c.bf16 %v3147_v58, %v3145_v26  ;;  %v10210_v15 = vpack.c.bf16 %v3152_v52, %v3150_v16  ;;  %v10212_v24 = vpack.c.bf16 %v3151_v55, %v3149_v14  ;;  %v3161_v19 = vld [vmem:[%s11410_s29 + $0x100] sm:$0xff]  ;;  %v3163_v20 = vld [vmem:[%s11410_s29 + $0x110] sm:$0xff]  ;;  %v3166_v22 = vld [vmem:[%s11410_s29 + $0x128] sm:$0xff] }
 0x8da   :  { %10115 = vmatprep.subr.bf16.mxu0 %v12732_v34  ;;  %v10214_v21 = vpack.c.bf16 %v3156_v3, %v3154_v23  ;;  %v10216_v36 = vpack.c.bf16 %v3155_v28, %v3153_v41  ;;  %v10218_v2 = vpack.c.bf16 %v3160_v53, %v3158_v39  ;;  %v10220_v62 = vpack.c.bf16 %v3159_v0, %v3157_v18  ;;  %v3177_v56 = vld [vmem:[%s11410_s29 + $0x180] sm:$0xff]  ;;  %v3183_v11 = vld [vmem:[%s11410_s29 + $0x1b0] sm:$0xff]  ;;  %v8121_v41 = vld [vmem:[%s11410_s29 + $0x418] sm:$0xff] }
 0x8db   :  { %v10222_v13 = vpack.c.bf16 %v3164_v5, %v3162_v50  ;;  %v10224_v25 = vpack.c.bf16 %v3163_v20, %v3161_v19  ;;  %v10240_v61 = vpack.c.bf16 %v3179_v49, %v3177_v56  ;;  %v3181_v12 = vld [vmem:[%s11410_s29 + $0x1a0] sm:$0xff]  ;;  %v3187_v52 = vld [vmem:[%s11410_s29 + $0x1d0] sm:$0xff]  ;;  %v8127_v19 = vld [vmem:[%s11410_s29 + $0x448] sm:$0xff]  ;;  %vm11370_vm4 = vmmov 0  }
 0x8dc   :  { %10117 = vmatpush1.bf16.msra.mxu0 %v12734_v57  ;;  %v10244_v26 = vpack.c.bf16 %v3183_v11, %v3181_v12  ;;  %v3185_v16 = vld [vmem:[%s11410_s29 + $0x1c0] sm:$0xff]  ;;  %v3191_v3 = vld [vmem:[%s11410_s29 + $0x1f0] sm:$0xff]  ;;  %v8129_v20 = vld [vmem:[%s11410_s29 + $0x458] sm:$0xff]  ;;  %vm6525_vm5 = vcmask 1043456   ;;  %vm7576_vm7 = vcmask 9216  }
 0x8dd   :  { %10119 = vmatprep.subr.bf16.mxu0 %v12727_v4  ;;  %v10248_v14 = vpack.c.bf16 %v3187_v52, %v3185_v16  ;;  %v3189_v23 = vld [vmem:[%s11410_s29 + $0x1e0] sm:$0xff]  ;;  %v8120_v53 = vld [vmem:[%s11410_s29 + $0x410] sm:$0xff]  ;;  %v8139_v56 = vld [vmem:[%s11410_s29 + $0x4a8] sm:$0xff] }
 0x8de   :  { %v8118_v39 = vld [vmem:[%s11410_s29 + $0x400] sm:$0xff]  ;;  %v8141_v49 = vld [vmem:[%s11410_s29 + $0x4b8] sm:$0xff]  ;;  %v8140_v12 = vld [vmem:[%s11410_s29 + $0x4b0] sm:$0xff] }
 0x8df   :  { %8044 = vmatmul.mubr.msk.f32.vlgmr.msra.gmra.mrb[58].mxu0 %vm3045_vm11, %v3043_v17  ;;  %v3168_v17 = vld [vmem:[%s11410_s29 + $0x138] sm:$0xff]  ;;  %v10264_v0 = vpack.c.bf16 %v8120_v53, %v8118_v39  ;;  %v8143_v11 = vld [vmem:[%s11410_s29 + $0x4c8] sm:$0xff]  ;;  %v8144_v16 = vld [vmem:[%s11410_s29 + $0x4d0] sm:$0xff] }
 0x8e0   :  { %10121 = vmatpush1.bf16.msra.mxu0 %v12725_v43  ;;  %3122 = vmatprep.mubr.f32.mxu0 %v11368_v7  ;;  %v10226_v32 = vpack.c.bf16 %v3168_v17, %v3166_v22  ;;  %v8147_v52 = vld [vmem:[%s11410_s29 + $0x4e8] sm:$0xff]  ;;  %v8157_v53 = vld [vmem:[%s11410_s29 + $0x538] sm:$0xff] }
 0x8e1   :  { %10123 = vmatprep.subr.bf16.mxu0 %v12732_v34  ;;  %v8155_v39 = vld [vmem:[%s11410_s29 + $0x528] sm:$0xff] }
 0x8e3   :  { %8045 = vmatmul.mubr.msk.f32.gmra.mrb[60].mxu0 %vm3045_vm11, %v3044_v27  ;;  %v3165_v27 = vld [vmem:[%s11410_s29 + $0x120] sm:$0xff] }
 0x8e4   :  { %10125 = vmatpush1.bf16.msra.mxu0 %v12734_v57  ;;  %3266 = vmatprep.mubr.f32.mxu0 %v11368_v7 }
 0x8e5   :  { %10191 = vmatprep.subr.bf16.mxu0 %v10190_v54  ;;  %v3167_v54 = vld [vmem:[%s11410_s29 + $0x130] sm:$0xff] }
 0x8e6   :  { %v10228_v30 = vpack.c.bf16 %v3167_v54, %v3165_v27  ;;  %v8126_v27 = vld [vmem:[%s11410_s29 + $0x440] sm:$0xff]  ;;  %v8128_v54 = vld [vmem:[%s11410_s29 + $0x450] sm:$0xff] }
 0x8e7   :  { %8048 = vmatmul.mubr.msk.f32.vlgmr.msra.gmra.mrb[62].mxu0 %vm3045_vm11, %v8046_v63  ;;  %v3169_v63 = vld [vmem:[%s11410_s29 + $0x140] sm:$0xff] }
 0x8e8   :  { %3272 = vmatprep.mubr.f32.mxu0 %v11368_v7  ;;  %10193 = vmatpush1.bf16.msra.mxu0 %v10192_v29  ;;  %v3171_v29 = vld [vmem:[%s11410_s29 + $0x150] sm:$0xff] }
 0x8e9   :  { %10195 = vmatprep.subr.bf16.mxu0 %v10194_v38  ;;  %v3174_v38 = vld [vmem:[%s11410_s29 + $0x168] sm:$0xff]  ;;  %v10232_v45 = vpack.c.bf16 %v3171_v29, %v3169_v63  ;;  %v10274_v29 = vpack.c.bf16 %v8133_v6, %v8131_v40  ;;  %v8169_v6 = vld [vmem:[%s11410_s29 + $0x598] sm:$0xff] }
 0x8ea   :  { %v10234_v47 = vpack.c.bf16 %v3176_v48, %v3174_v38  ;;  %v8130_v38 = vld [vmem:[%s11410_s29 + $0x460] sm:$0xff]  ;;  %v8132_v48 = vld [vmem:[%s11410_s29 + $0x470] sm:$0xff]  ;;  %v8167_v40 = vld [vmem:[%s11410_s29 + $0x588] sm:$0xff] }
 0x8eb   :  { %8049 = vmatmul.mubr.msk.f32.gmra.mrb[64].mxu0 %vm3045_vm11, %v8047_v8  ;;  %v3175_v8 = vld [vmem:[%s11410_s29 + $0x170] sm:$0xff] }
 0x8ec   :  { %10197 = vmatpush1.bf16.msra.mxu0 %v10196_v35  ;;  %v3178_v35 = vld [vmem:[%s11410_s29 + $0x188] sm:$0xff]  ;;  %v10236_v1 = vpack.c.bf16 %v3175_v8, %v3173_v44 }
 0x8ed   :  { %10199 = vmatprep.subr.bf16.mxu0 %v10198_v42  ;;  %v3180_v42 = vld [vmem:[%s11410_s29 + $0x198] sm:$0xff] }
 0x8ee   :  { %v10238_v9 = vpack.c.bf16 %v3180_v42, %v3178_v35  ;;  %v10276_v35 = vpack.c.bf16 %v8132_v48, %v8130_v38  ;;  %v8171_v38 = vld [vmem:[%s11410_s29 + $0x5a8] sm:$0xff]  ;;  %v8173_v48 = vld [vmem:[%s11410_s29 + $0x5b8] sm:$0xff] }
 0x8f0   :  { %10201 = vmatpush1.bf16.msra.mxu0 %v10200_v33  ;;  %v3182_v33 = vld [vmem:[%s11410_s29 + $0x1a8] sm:$0xff] }
 0x8f1   :  { %10203 = vmatprep.subr.bf16.mxu0 %v10202_v51  ;;  %v3184_v51 = vld [vmem:[%s11410_s29 + $0x1b8] sm:$0xff] }
 0x8f2   :  { %v10242_v60 = vpack.c.bf16 %v3184_v51, %v3182_v33  ;;  %v8114_v33 = vld [vmem:[%s11405_s25 + $0x20] sm:$0xff] }
 0x8f4   :  { %10205 = vmatpush1.bf16.msra.mxu0 %v10204_v59  ;;  %v3186_v59 = vld [vmem:[%s11410_s29 + $0x1c8] sm:$0xff] }
 0x8f5   :  { %10207 = vmatprep.subr.bf16.mxu0 %v10206_v46  ;;  %v3188_v46 = vld [vmem:[%s11410_s29 + $0x1d8] sm:$0xff] }
 0x8f6   :  { %v10246_v58 = vpack.c.bf16 %v3188_v46, %v3186_v59  ;;  %v8145_v59 = vld [vmem:[%s11410_s29 + $0x4d8] sm:$0xff] }
 0x8f8   :  { %10209 = vmatpush1.bf16.msra.mxu0 %v10208_v37  ;;  %v3190_v37 = vld [vmem:[%s11410_s29 + $0x1e8] sm:$0xff] }
 0x8f9   :  { %10211 = vmatprep.subr.bf16.mxu0 %v10210_v15  ;;  %v3192_v15 = vld [vmem:[%s11410_s29 + $0x1f8] sm:$0xff] }
 0x8fa   :  { %v10250_v55 = vpack.c.bf16 %v3192_v15, %v3190_v37 }
 0x8fc   :  { %10213 = vmatpush1.bf16.msra.mxu0 %v10212_v24  ;;  %v10252_v24 = vpack.c.bf16 %v3191_v3, %v3189_v23  ;;  %v8151_v23 = vld [vmem:[%s11410_s29 + $0x508] sm:$0xff]  ;;  %v8153_v3 = vld [vmem:[%s11410_s29 + $0x518] sm:$0xff] }
 0x8fd   :  { %10215 = vmatprep.subr.bf16.mxu0 %v10214_v21  ;;  %v8119_v21 = vld [vmem:[%s11410_s29 + $0x408] sm:$0xff] }
 0x8fe   :  { %v10262_v28 = vpack.c.bf16 %v8121_v41, %v8119_v21  ;;  %v10294_v21 = vpack.c.bf16 %v8153_v3, %v8151_v23  ;;  %v8150_v41 = vld [vmem:[%s11410_s29 + $0x500] sm:$0xff]  ;;  %v3966_v23 = vld [vmem:[%s11475_s24 + $0x10] sm:$0xff]  ;;  %v3967_v3 = vld [vmem:[%s11475_s24 + $0x18] sm:$0xff] }
 0x900   :  { %10217 = vmatpush1.bf16.msra.mxu0 %v10216_v36  ;;  %v8123_v36 = vld [vmem:[%s11410_s29 + $0x428] sm:$0xff] }
 0x901   :  { %10219 = vmatprep.subr.bf16.mxu0 %v10218_v2  ;;  %v8125_v2 = vld [vmem:[%s11410_s29 + $0x438] sm:$0xff] }
 0x902   :  { %v10266_v5 = vpack.c.bf16 %v8125_v2, %v8123_v36  ;;  %v10298_v2 = vpack.c.bf16 %v8157_v53, %v8155_v39 }
 0x904   :  { %10221 = vmatpush1.bf16.msra.mxu0 %v10220_v62  ;;  %v8122_v62 = vld [vmem:[%s11410_s29 + $0x420] sm:$0xff] }
 0x905   :  { %10223 = vmatprep.subr.bf16.mxu0 %v10222_v13  ;;  %v8124_v13 = vld [vmem:[%s11410_s29 + $0x430] sm:$0xff] }
 0x906   :  { %v10268_v17 = vpack.c.bf16 %v8124_v13, %v8122_v62 }
 0x908   :  { %10225 = vmatpush1.bf16.msra.mxu0 %v10224_v25 }
 0x909   :  { %10227 = vmatprep.subr.bf16.mxu0 %v10226_v32  ;;  %v10270_v32 = vpack.c.bf16 %v8129_v20, %v8127_v19  ;;  %v8158_v19 = vld [vmem:[%s11410_s29 + $0x540] sm:$0xff]  ;;  %v8160_v20 = vld [vmem:[%s11410_s29 + $0x550] sm:$0xff] }
 0x90c   :  { %10229 = vmatpush1.bf16.msra.mxu0 %v10228_v30 }
 0x90d   :  { %10231 = vmatprep.subr.bf16.mxu0 %v10230_v31  ;;  %v10272_v31 = vpack.c.bf16 %v8128_v54, %v8126_v27  ;;  %v8162_v27 = vld [vmem:[%s11410_s29 + $0x560] sm:$0xff]  ;;  %v8164_v54 = vld [vmem:[%s11410_s29 + $0x570] sm:$0xff] }
 0x910   :  { %10233 = vmatpush1.bf16.msra.mxu0 %v10232_v45  ;;  %v8135_v45 = vld [vmem:[%s11410_s29 + $0x488] sm:$0xff] }
 0x911   :  { %10235 = vmatprep.subr.bf16.mxu0 %v10234_v47  ;;  %v8137_v47 = vld [vmem:[%s11410_s29 + $0x498] sm:$0xff] }
 0x912   :  { %v10278_v42 = vpack.c.bf16 %v8137_v47, %v8135_v45  ;;  %v10314_v47 = vpack.c.bf16 %v8173_v48, %v8171_v38 }
 0x914   :  { %10237 = vmatpush1.bf16.msra.mxu0 %v10236_v1  ;;  %v8134_v1 = vld [vmem:[%s11410_s29 + $0x480] sm:$0xff] }
 0x915   :  { %10239 = vmatprep.subr.bf16.mxu0 %v10238_v9  ;;  %v8136_v9 = vld [vmem:[%s11410_s29 + $0x490] sm:$0xff] }
 0x916   :  { %v10280_v51 = vpack.c.bf16 %v8136_v9, %v8134_v1  ;;  %v8177_v1 = vld [vmem:[%s11410_s29 + $0x5d8] sm:$0xff]  ;;  %v8174_v9 = vld [vmem:[%s11410_s29 + $0x5c0] sm:$0xff] }
 0x918   :  { %10241 = vmatpush1.bf16.msra.mxu0 %v10240_v61  ;;  %v10282_v61 = vpack.c.bf16 %v8141_v49, %v8139_v56  ;;  %v8176_v49 = vld [vmem:[%s11410_s29 + $0x5d0] sm:$0xff] }
 0x919   :  { %10243 = vmatprep.subr.bf16.mxu0 %v10242_v60  ;;  %v8138_v60 = vld [vmem:[%s11410_s29 + $0x4a0] sm:$0xff] }
 0x91a   :  { %v10284_v46 = vpack.c.bf16 %v8140_v12, %v8138_v60  ;;  %v8178_v60 = vld [vmem:[%s11410_s29 + $0x5e0] sm:$0xff] }
 0x91c   :  { %10245 = vmatpush1.bf16.msra.mxu0 %v10244_v26  ;;  %v10286_v26 = vpack.c.bf16 %v8145_v59, %v8143_v11  ;;  %v8180_v11 = vld [vmem:[%s11410_s29 + $0x5f0] sm:$0xff] }
 0x91d   :  { %10247 = vmatprep.subr.bf16.mxu0 %v10246_v58  ;;  %v8142_v58 = vld [vmem:[%s11410_s29 + $0x4c0] sm:$0xff]  ;;  %v10324_v59 = vpack.c.bf16 %v8180_v11, %v8178_v60 }
 0x91e   :  { %v10288_v37 = vpack.c.bf16 %v8144_v16, %v8142_v58  ;;  %v3980_v58 = vld [vmem:[%s11475_s24 + $0x80] sm:$0xff]  ;;  %v3981_v16 = vld [vmem:[%s11475_s24 + $0x88] sm:$0xff] }
 0x91f   :  { %v8206_v11 = vld [vmem:[%s11410_s29 + $0x6a0] sm:$0xff] }
 0x920   :  { %10249 = vmatpush1.bf16.msra.mxu0 %v10248_v14  ;;  %v8146_v14 = vld [vmem:[%s11410_s29 + $0x4e0] sm:$0xff] }
 0x921   :  { %10251 = vmatprep.subr.bf16.mxu0 %v10250_v55  ;;  %v8148_v55 = vld [vmem:[%s11410_s29 + $0x4f0] sm:$0xff] }
 0x924   :  { %10253 = vmatpush1.bf16.msra.mxu0 %v10252_v24  ;;  %v10292_v24 = vpack.c.bf16 %v8148_v55, %v8146_v14 }
 0x925   :  { %10263 = vmatprep.subr.bf16.mxu0 %v10262_v28  ;;  %v8152_v28 = vld [vmem:[%s11410_s29 + $0x510] sm:$0xff] }
 0x926   :  { %v10296_v36 = vpack.c.bf16 %v8152_v28, %v8150_v41 }
 0x9b2   :  { %v3118_v18 = vpop.f32.mrb[58].mxu0 }
 0x9b3   :  { %v3120_v50 = vpop.f32.mrb[59].mxu0 }
 0x9b4   :  { %3485 = vmatprep.mubr.f32.mxu0 %v3120_v50  ;;  %v8159_v50 = vld [vmem:[%s11410_s29 + $0x548] sm:$0xff] }
 0x9b5   :  { %3486 = vmatmul.mubr.f32.vlgmr.msra.gmra.mrb[66].mxu0 %v3118_v18  ;;  %v8154_v18 = vld [vmem:[%s11410_s29 + $0x520] sm:$0xff] }
 0x9b6   :  { %v3124_v22 = vpop.f32.mrb[60].mxu0  ;;  %10265 = vmatpush1.bf16.msra.mxu0 %v10264_v0  ;;  %v8156_v0 = vld [vmem:[%s11410_s29 + $0x530] sm:$0xff] }
 0x9b7   :  { %v3126_v25 = vpop.f32.mrb[61].mxu0  ;;  %10267 = vmatprep.subr.bf16.mxu0 %v10266_v5  ;;  %v8161_v5 = vld [vmem:[%s11410_s29 + $0x558] sm:$0xff]  ;;  %v10300_v62 = vpack.c.bf16 %v8156_v0, %v8154_v18  ;;  %v8188_v18 = vld [vmem:[%s11410_s29 + $0x610] sm:$0xff]  ;;  %v8191_v0 = vld [vmem:[%s11410_s29 + $0x628] sm:$0xff] }
 0x9b8   :  { %3491 = vmatprep.mubr.f32.mxu0 %v3126_v25  ;;  %v10302_v13 = vpack.c.bf16 %v8161_v5, %v8159_v50  ;;  %v10304_v25 = vpack.c.bf16 %v8160_v20, %v8158_v19  ;;  %v8193_v50 = vld [vmem:[%s11410_s29 + $0x638] sm:$0xff]  ;;  %v8190_v20 = vld [vmem:[%s11410_s29 + $0x620] sm:$0xff] }
 0x9b9   :  { %3492 = vmatmul.mubr.f32.gmra.mrb[68].mxu0 %v3124_v22  ;;  %v8163_v22 = vld [vmem:[%s11410_s29 + $0x568] sm:$0xff]  ;;  %v10338_v19 = vpack.c.bf16 %v8193_v50, %v8191_v0  ;;  %v8218_v50 = vld [vmem:[%s11410_s29 + $0x700] sm:$0xff] }
 0x9ba   :  { %v3268_v30 = vpop.f32.mrb[62].mxu0  ;;  %10269 = vmatpush1.bf16.msra.mxu0 %v10268_v17  ;;  %v8165_v17 = vld [vmem:[%s11410_s29 + $0x578] sm:$0xff] }
 0x9bb   :  { %v3270_v63 = vpop.f32.mrb[63].mxu0  ;;  %10271 = vmatprep.subr.bf16.mxu0 %v10270_v32  ;;  %v10306_v32 = vpack.c.bf16 %v8165_v17, %v8163_v22  ;;  %v8192_v22 = vld [vmem:[%s11410_s29 + $0x630] sm:$0xff]  ;;  %v8195_v17 = vld [vmem:[%s11410_s29 + $0x648] sm:$0xff] }
 0x9bc   :  { %3408 = vmatprep.mubr.f32.mxu1 %v3270_v63  ;;  %v8166_v63 = vld [vmem:[%s11410_s29 + $0x580] sm:$0xff] }
 0x9bd   :  { %3409 = vmatmul.mubr.f32.vlgmr.msra.gmra.mrb[72].mxu1 %v3268_v30  ;;  %v10308_v30 = vpack.c.bf16 %v8164_v54, %v8162_v27 }
 0x9be   :  { %10257 = vmatpush1.bf16.msra.mxu1 %v12725_v43  ;;  %v3274_v44 = vpop.f32.mrb[64].mxu0  ;;  %10273 = vmatpush1.bf16.msra.mxu0 %v10272_v31  ;;  %v10310_v31 = vpack.c.bf16 %v8169_v6, %v8167_v40  ;;  %v8194_v40 = vld [vmem:[%s11410_s29 + $0x640] sm:$0xff]  ;;  %v8196_v6 = vld [vmem:[%s11410_s29 + $0x650] sm:$0xff] }
 0x9bf   :  { %10259 = vmatprep.subr.bf16.mxu1 %v12732_v34  ;;  %v3276_v8 = vpop.f32.mrb[65].mxu0  ;;  %10275 = vmatprep.subr.bf16.mxu0 %v10274_v29  ;;  %v8168_v29 = vld [vmem:[%s11410_s29 + $0x590] sm:$0xff] }
 0x9c0   :  { %3414 = vmatprep.mubr.f32.mxu1 %v3276_v8  ;;  %v10312_v45 = vpack.c.bf16 %v8168_v29, %v8166_v63  ;;  %v8172_v8 = vld [vmem:[%s11410_s29 + $0x5b0] sm:$0xff]  ;;  %v8201_v63 = vld [vmem:[%s11410_s29 + $0x678] sm:$0xff]  ;;  %v10344_v29 = vpack.c.bf16 %v8196_v6, %v8194_v40  ;;  %v8226_v40 = vld [vmem:[%s11410_s29 + $0x740] sm:$0xff] }
 0x9c1   :  { %3415 = vmatmul.mubr.f32.gmra.mrb[74].mxu1 %v3274_v44  ;;  %v8170_v44 = vld [vmem:[%s11410_s29 + $0x5a0] sm:$0xff]  ;;  %v8228_v6 = vld [vmem:[%s11410_s29 + $0x750] sm:$0xff] }
 0x9c2   :  { %10261 = vmatpush1.bf16.msra.mxu1 %v12734_v57  ;;  %3571 = vmatprep.mubr.f32.mxu1 %v11368_v7 }
 0x9c3   :  { %10327 = vmatprep.subr.bf16.mxu1 %v12727_v4  ;;  %10277 = vmatpush1.bf16.msra.mxu0 %v10276_v35  ;;  %v8115_v4 = vld [vmem:[%s11405_s25 + $0x28] sm:$0xff]  ;;  %v10316_v35 = vpack.c.bf16 %v8172_v8, %v8170_v44 }
 0x9c4   :  { %10279 = vmatprep.subr.bf16.mxu0 %v10278_v42  ;;  %v8175_v42 = vld [vmem:[%s11410_s29 + $0x5c8] sm:$0xff] }
 0x9c5   :  { %8116 = vmatmul.mubr.msk.f32.vlgmr.msra.gmra.mrb[76].mxu1 %vm3045_vm11, %v8114_v33  ;;  %v10318_v56 = vpack.c.bf16 %v8177_v1, %v8175_v42  ;;  %v10320_v33 = vpack.c.bf16 %v8176_v49, %v8174_v9  ;;  %v8203_v8 = vld [vmem:[%s11410_s29 + $0x688] sm:$0xff]  ;;  %v8204_v49 = vld [vmem:[%s11410_s29 + $0x690] sm:$0xff] }
 0x9c6   :  { %10329 = vmatpush1.bf16.msra.mxu1 %v12725_v43  ;;  %3577 = vmatprep.mubr.f32.mxu1 %v11368_v7  ;;  %v8149_v43 = vld [vmem:[%s11410_s29 + $0x4f8] sm:$0xff] }
 0x9c7   :  { %10331 = vmatprep.subr.bf16.mxu1 %v12732_v34  ;;  %10281 = vmatpush1.bf16.msra.mxu0 %v10280_v51  ;;  %v8182_v34 = vld [vmem:[%s11405_s25 + $0x30] sm:$0xff]  ;;  %v10290_v15 = vpack.c.bf16 %v8149_v43, %v8147_v52  ;;  %v8179_v51 = vld [vmem:[%s11410_s29 + $0x5e8] sm:$0xff]  ;;  %v3964_v52 = vld [vmem:[%s11475_s24] sm:$0xff]  ;;  %v12905_v43 = vpack.c.bf16 %v3981_v16, %v3980_v58 }
 0x9c8   :  { %10283 = vmatprep.subr.bf16.mxu0 %v10282_v61  ;;  %v8181_v61 = vld [vmem:[%s11410_s29 + $0x5f8] sm:$0xff]  ;;  %v8210_v16 = vld [vmem:[%s11410_s29 + $0x6c0] sm:$0xff] }
 0x9c9   :  { %8117 = vmatmul.mubr.msk.f32.gmra.mrb[78].mxu1 %vm3045_vm11, %v8115_v4  ;;  %v10322_v12 = vpack.c.bf16 %v8181_v61, %v8179_v51  ;;  %v8187_v4 = vld [vmem:[%s11410_s29 + $0x608] sm:$0xff]  ;;  %v8209_v61 = vld [vmem:[%s11410_s29 + $0x6b8] sm:$0xff] }
 0x9ca   :  { %10333 = vmatpush1.bf16.msra.mxu1 %v12734_v57  ;;  %3803 = vmatprep.mubr.f32.mxu1 %v11368_v7  ;;  %v8183_v57 = vld [vmem:[%s11405_s25 + $0x38] sm:$0xff]  ;;  %v8207_v51 = vld [vmem:[%s11410_s29 + $0x6a8] sm:$0xff]  ;;  %s14015_s25 = sld [smem:[#allocation12_spill]] }
 0x9cb   :  { %10285 = vmatpush1.bf16.msra.mxu0 %v10284_v46  ;;  %v8189_v46 = vld [vmem:[%s11410_s29 + $0x618] sm:$0xff]  ;;  %10399 = vmatprep.subr.bf16.mxu1 %v12905_v43 }
 0x9cc   :  { %10287 = vmatprep.subr.bf16.mxu0 %v10286_v26  ;;  %v10334_v26 = vpack.c.bf16 %v8189_v46, %v8187_v4  ;;  %v8211_v4 = vld [vmem:[%s11410_s29 + $0x6c8] sm:$0xff]  ;;  %v8213_v46 = vld [vmem:[%s11410_s29 + $0x6d8] sm:$0xff] }
 0x9cd   :  { %8184 = vmatmul.mubr.msk.f32.vlgmr.msra.gmra.mrb[80].mxu1 %vm3045_vm11, %v8182_v34  ;;  %v3965_v34 = vld [vmem:[%s11475_s24 + $0x8] sm:$0xff]  ;;  %v10358_v58 = vpack.c.bf16 %v8213_v46, %v8211_v4 }
 0x9ce   :  { %3809 = vmatprep.mubr.f32.mxu1 %v11368_v7  ;;  %v12910_v14 = vpack.c.bf16 %v3965_v34, %v3964_v52  ;;  %v8212_v52 = vld [vmem:[%s11410_s29 + $0x6d0] sm:$0xff]  ;;  %v8215_v34 = vld [vmem:[%s11410_s29 + $0x6e8] sm:$0xff] }
 0x9cf   :  { %10289 = vmatpush1.bf16.msra.mxu0 %v10288_v37  ;;  %v3982_v37 = vld [vmem:[%s11475_s24 + $0x90] sm:$0xff] }
 0x9d0   :  { %10291 = vmatprep.subr.bf16.mxu0 %v10290_v15  ;;  %v3983_v15 = vld [vmem:[%s11475_s24 + $0x98] sm:$0xff]  ;;  %10401 = vmatpush3.bf16.msra.mxu1 %v12910_v14 }
 0x9d1   :  { %8185 = vmatmul.mubr.msk.f32.gmra.mrb[82].mxu1 %vm3045_vm11, %v8183_v57  ;;  %v12912_v55 = vpack.c.bf16 %v3983_v15, %v3982_v37  ;;  %v3984_v57 = vld [vmem:[%s11475_s24 + $0xa0] sm:$0xff]  ;;  %v8217_v37 = vld [vmem:[%s11410_s29 + $0x6f8] sm:$0xff]  ;;  %v10360_v15 = vpack.c.bf16 %v8212_v52, %v8210_v16  ;;  %v8247_v16 = vld [vmem:[%s11410_s29 + $0x7e8] sm:$0xff] }
 0x9d2   :  { %v8249_v52 = vld [vmem:[%s11410_s29 + $0x7f8] sm:$0xff] }
 0x9d3   :  { %10293 = vmatpush1.bf16.msra.mxu0 %v10292_v24  ;;  %v3985_v24 = vld [vmem:[%s11475_s24 + $0xa8] sm:$0xff]  ;;  %10403 = vmatprep.subr.bf16.mxu1 %v12912_v55 }
 0x9d4   :  { %10295 = vmatprep.subr.bf16.mxu0 %v10294_v21  ;;  %v12920_v21 = vpack.c.bf16 %v3967_v3, %v3966_v23  ;;  %v12923_v41 = vpack.c.bf16 %v3985_v24, %v3984_v57  ;;  %v10362_v23 = vpack.c.bf16 %v8217_v37, %v8215_v34  ;;  %v8214_v3 = vld [vmem:[%s11410_s29 + $0x6e0] sm:$0xff]  ;;  %v8216_v57 = vld [vmem:[%s11410_s29 + $0x6f0] sm:$0xff]  ;;  %v8219_v24 = vld [vmem:[%s11410_s29 + $0x708] sm:$0xff]  ;;  %v10394_v37 = vpack.c.bf16 %v8249_v52, %v8247_v16 }
 0x9d6   :  { %10405 = vmatpush3.bf16.msra.mxu1 %v12920_v21 }
 0x9d7   :  { %10297 = vmatpush1.bf16.msra.mxu0 %v10296_v36  ;;  %10407 = vmatprep.subr.bf16.mxu1 %v12923_v41 }
 0x9d8   :  { %10299 = vmatprep.subr.bf16.mxu0 %v10298_v2  ;;  %v8186_v2 = vld [vmem:[%s11410_s29 + $0x600] sm:$0xff] }
 0x9db   :  { %10301 = vmatpush1.bf16.msra.mxu0 %v10300_v62  ;;  %v10336_v62 = vpack.c.bf16 %v8188_v18, %v8186_v2  ;;  %v8221_v2 = vld [vmem:[%s11410_s29 + $0x718] sm:$0xff]  ;;  %v10364_v18 = vpack.c.bf16 %v8216_v57, %v8214_v3  ;;  %v3968_v57 = vld [vmem:[%s11475_s24 + $0x20] sm:$0xff] }
 0x9dc   :  { %10303 = vmatprep.subr.bf16.mxu0 %v10302_v13  ;;  %v10366_v0 = vpack.c.bf16 %v8221_v2, %v8219_v24  ;;  %v3969_v24 = vld [vmem:[%s11475_s24 + $0x28] sm:$0xff] }
 0x9dd   :  { %v13009_v2 = vpack.c.bf16 %v3969_v24, %v3968_v57  ;;  %v3996_v57 = vld [vmem:[%s11480_s14] sm:$0xff] }
 0x9df   :  { %10305 = vmatpush1.bf16.msra.mxu0 %v10304_v25  ;;  %v8197_v25 = vld [vmem:[%s11410_s29 + $0x658] sm:$0xff]  ;;  %10409 = vmatpush3.bf16.msra.mxu1 %v13009_v2 }
 0x9e0   :  { %10307 = vmatprep.subr.bf16.mxu0 %v10306_v32  ;;  %v10340_v32 = vpack.c.bf16 %v8192_v22, %v8190_v20  ;;  %v10342_v54 = vpack.c.bf16 %v8197_v25, %v8195_v17  ;;  %v8222_v22 = vld [vmem:[%s11410_s29 + $0x720] sm:$0xff]  ;;  %v8224_v17 = vld [vmem:[%s11410_s29 + $0x730] sm:$0xff]  ;;  %v8227_v25 = vld [vmem:[%s11410_s29 + $0x748] sm:$0xff] }
 0x9e3   :  { %10309 = vmatpush1.bf16.msra.mxu0 %v10308_v30 }
 0x9e4   :  { %10311 = vmatprep.subr.bf16.mxu0 %v10310_v31  ;;  %v8199_v31 = vld [vmem:[%s11410_s29 + $0x668] sm:$0xff] }
 0x9e5   :  { %v10346_v48 = vpack.c.bf16 %v8201_v63, %v8199_v31  ;;  %v8233_v31 = vld [vmem:[%s11410_s29 + $0x778] sm:$0xff]  ;;  %v10376_v63 = vpack.c.bf16 %v8228_v6, %v8226_v40  ;;  %v3992_v6 = vld [vmem:[%s11475_s24 + $0xe0] sm:$0xff] }
 0x9e7   :  { %10313 = vmatpush1.bf16.msra.mxu0 %v10312_v45  ;;  %v8198_v45 = vld [vmem:[%s11410_s29 + $0x660] sm:$0xff] }
 0x9e8   :  { %10315 = vmatprep.subr.bf16.mxu0 %v10314_v47  ;;  %v8200_v47 = vld [vmem:[%s11410_s29 + $0x670] sm:$0xff] }
 0x9e9   :  { %v10348_v42 = vpack.c.bf16 %v8200_v47, %v8198_v45  ;;  %v8232_v45 = vld [vmem:[%s11410_s29 + $0x770] sm:$0xff]  ;;  %v8235_v47 = vld [vmem:[%s11410_s29 + $0x788] sm:$0xff] }
 0x9eb   :  { %10317 = vmatpush1.bf16.msra.mxu0 %v10316_v35  ;;  %v8205_v35 = vld [vmem:[%s11410_s29 + $0x698] sm:$0xff] }
 0x9ec   :  { %10319 = vmatprep.subr.bf16.mxu0 %v10318_v56  ;;  %v10350_v9 = vpack.c.bf16 %v8205_v35, %v8203_v8  ;;  %v8202_v56 = vld [vmem:[%s11410_s29 + $0x680] sm:$0xff] }
 0x9ed   :  { %v10352_v60 = vpack.c.bf16 %v8204_v49, %v8202_v56  ;;  %v8239_v56 = vld [vmem:[%s11410_s29 + $0x7a8] sm:$0xff]  ;;  %v8241_v49 = vld [vmem:[%s11410_s29 + $0x7b8] sm:$0xff] }
 0x9ef   :  { %10321 = vmatpush1.bf16.msra.mxu0 %v10320_v33 }
 0x9f0   :  { %10323 = vmatprep.subr.bf16.mxu0 %v10322_v12  ;;  %v10354_v12 = vpack.c.bf16 %v8209_v61, %v8207_v51  ;;  %v10386_v61 = vpack.c.bf16 %v8241_v49, %v8239_v56  ;;  %v3999_v56 = vld [vmem:[%s11480_s14 + $0x18] sm:$0xff] }
 0x9f3   :  { %10325 = vmatpush1.bf16.msra.mxu0 %v10324_v59  ;;  %v8208_v59 = vld [vmem:[%s11410_s29 + $0x6b0] sm:$0xff] }
 0x9f4   :  { %10335 = vmatprep.subr.bf16.mxu0 %v10334_v26  ;;  %v10356_v26 = vpack.c.bf16 %v8208_v59, %v8206_v11  ;;  %v8243_v11 = vld [vmem:[%s11410_s29 + $0x7c8] sm:$0xff]  ;;  %v8245_v59 = vld [vmem:[%s11410_s29 + $0x7d8] sm:$0xff] }
 0x9f5   :  { %v10390_v46 = vpack.c.bf16 %v8245_v59, %v8243_v11 }
 0xa90   :  { %v12927_v28 = vpop.f32.mrb[72].mxu1 }
 0xa91   :  { %v12929_v39 = vpop.f32.mrb[73].mxu1 }
 0xa94   :  { %v12931_v53 = vpop.f32.mrb[74].mxu1 }
 0xa95   :  { %v12933_v36 = vpop.f32.mrb[75].mxu1 }
 0xa98   :  { %v3573_v5 = vpop.f32.mrb[76].mxu1 }
 0xa99   :  { %v3575_v13 = vpop.f32.mrb[77].mxu1 }
 0xa9a   :  { %3713 = vmatprep.mubr.f32.mxu0 %v3575_v13  ;;  %v8225_v13 = vld [vmem:[%s11410_s29 + $0x738] sm:$0xff] }
 0xa9b   :  { %3714 = vmatmul.mubr.f32.vlgmr.msra.gmra.mrb[66].mxu0 %v3573_v5  ;;  %v8220_v5 = vld [vmem:[%s11410_s29 + $0x710] sm:$0xff] }
 0xa9c   :  { %10337 = vmatpush1.bf16.msra.mxu0 %v10336_v62  ;;  %v3579_v27 = vpop.f32.mrb[78].mxu1  ;;  %v8223_v62 = vld [vmem:[%s11410_s29 + $0x728] sm:$0xff] }
 0xa9d   :  { %10339 = vmatprep.subr.bf16.mxu0 %v10338_v19  ;;  %v3581_v30 = vpop.f32.mrb[79].mxu1  ;;  %v10368_v19 = vpack.c.bf16 %v8220_v5, %v8218_v50  ;;  %v10370_v20 = vpack.c.bf16 %v8225_v13, %v8223_v62  ;;  %v3988_v5 = vld [vmem:[%s11475_s24 + $0xc0] sm:$0xff]  ;;  %v3989_v62 = vld [vmem:[%s11475_s24 + $0xc8] sm:$0xff] }
 0xa9e   :  { %3719 = vmatprep.mubr.f32.mxu0 %v3581_v30  ;;  %v8231_v30 = vld [vmem:[%s11410_s29 + $0x768] sm:$0xff]  ;;  %v13024_v13 = vpack.c.bf16 %v3989_v62, %v3988_v5  ;;  %v4000_v62 = vld [vmem:[%s11480_s14 + $0x20] sm:$0xff] }
 0xa9f   :  { %3720 = vmatmul.mubr.f32.gmra.mrb[68].mxu0 %v3579_v27  ;;  %v10372_v27 = vpack.c.bf16 %v8224_v17, %v8222_v22  ;;  %v3990_v17 = vld [vmem:[%s11475_s24 + $0xd0] sm:$0xff] }
 0xaa0   :  { %10341 = vmatpush1.bf16.msra.mxu0 %v10340_v32  ;;  %v12947_v38 = vpop.f32.mrb[80].mxu1  ;;  %v8229_v32 = vld [vmem:[%s11410_s29 + $0x758] sm:$0xff] }
 0xaa1   :  { %10343 = vmatprep.subr.bf16.mxu0 %v10342_v54  ;;  %v3807_v44 = vpop.f32.mrb[81].mxu1  ;;  %v10374_v54 = vpack.c.bf16 %v8229_v32, %v8227_v25  ;;  %v3991_v25 = vld [vmem:[%s11475_s24 + $0xd8] sm:$0xff] }
 0xaa2   :  { %3945 = vmatprep.mubr.f32.mxu0 %v3807_v44  ;;  %v8237_v44 = vld [vmem:[%s11410_s29 + $0x798] sm:$0xff]  ;;  %v13034_v32 = vpack.c.bf16 %v3991_v25, %v3990_v17 }
 0xaa3   :  { %v10382_v35 = vpack.c.bf16 %v8237_v44, %v8235_v47  ;;  %v3995_v47 = vld [vmem:[%s11475_s24 + $0xf8] sm:$0xff]  ;;  %v3978_v44 = vld [vmem:[%s11475_s24 + $0x70] sm:$0xff] }
 0xaa4   :  { %10345 = vmatpush1.bf16.msra.mxu0 %v10344_v29  ;;  %v12953_v1 = vpop.f32.mrb[82].mxu1  ;;  %v10378_v29 = vpack.c.bf16 %v8233_v31, %v8231_v30  ;;  %v3993_v30 = vld [vmem:[%s11475_s24 + $0xe8] sm:$0xff] }
 0xaa5   :  { %10347 = vmatprep.subr.bf16.mxu0 %v10346_v48  ;;  %v12957_v33 = vpop.f32.mrb[83].mxu1  ;;  %v8230_v48 = vld [vmem:[%s11410_s29 + $0x760] sm:$0xff]  ;;  %v13044_v31 = vpack.c.bf16 %v3993_v30, %v3992_v6 }
 0xaa6   :  { %v10380_v8 = vpack.c.bf16 %v8232_v45, %v8230_v48  ;;  %v3994_v45 = vld [vmem:[%s11475_s24 + $0xf0] sm:$0xff] }
 0xaa8   :  { %10349 = vmatpush1.bf16.msra.mxu0 %v10348_v42  ;;  %v8234_v42 = vld [vmem:[%s11410_s29 + $0x780] sm:$0xff] }
 0xaa9   :  { %10351 = vmatprep.subr.bf16.mxu0 %v10350_v9  ;;  %v8236_v9 = vld [vmem:[%s11410_s29 + $0x790] sm:$0xff] }
 0xaaa   :  { %v10384_v51 = vpack.c.bf16 %v8236_v9, %v8234_v42  ;;  %v3997_v9 = vld [vmem:[%s11480_s14 + $0x8] sm:$0xff] }
 0xaab   :  { %v13064_v49 = vpack.c.bf16 %v3999_v56, %v3997_v9 }
 0xaac   :  { %10353 = vmatpush1.bf16.msra.mxu0 %v10352_v60  ;;  %v8238_v60 = vld [vmem:[%s11410_s29 + $0x7a0] sm:$0xff] }
 0xaad   :  { %10355 = vmatprep.subr.bf16.mxu0 %v10354_v12  ;;  %v8240_v12 = vld [vmem:[%s11410_s29 + $0x7b0] sm:$0xff] }
 0xaae   :  { %v10388_v4 = vpack.c.bf16 %v8240_v12, %v8238_v60 }
 0xab0   :  { %10357 = vmatpush1.bf16.msra.mxu0 %v10356_v26  ;;  %v8242_v26 = vld [vmem:[%s11410_s29 + $0x7c0] sm:$0xff] }
 0xab1   :  { %10359 = vmatprep.subr.bf16.mxu0 %v10358_v58  ;;  %v8244_v58 = vld [vmem:[%s11410_s29 + $0x7d0] sm:$0xff] }
 0xab2   :  { %v10392_v34 = vpack.c.bf16 %v8244_v58, %v8242_v26 }
 0xab4   :  { %10361 = vmatpush1.bf16.msra.mxu0 %v10360_v15  ;;  %v8246_v15 = vld [vmem:[%s11410_s29 + $0x7e0] sm:$0xff] }
 0xab5   :  { %10363 = vmatprep.subr.bf16.mxu0 %v10362_v23  ;;  %v8248_v23 = vld [vmem:[%s11410_s29 + $0x7f0] sm:$0xff]  ;;  %s14016_s29 = sld [smem:[#allocation13_spill]] }
 0xab6   :  { %v10396_v3 = vpack.c.bf16 %v8248_v23, %v8246_v15 }
 0xab8   :  { %10365 = vmatpush1.bf16.msra.mxu0 %v10364_v18  ;;  %v3986_v18 = vld [vmem:[%s11475_s24 + $0xb0] sm:$0xff] }
 0xab9   :  { %10367 = vmatprep.subr.bf16.mxu0 %v10366_v0  ;;  %v3987_v0 = vld [vmem:[%s11475_s24 + $0xb8] sm:$0xff] }
 0xaba   :  { %v13013_v50 = vpack.c.bf16 %v3987_v0, %v3986_v18 }
 0xabc   :  { %10369 = vmatpush1.bf16.msra.mxu0 %v10368_v19  ;;  %10411 = vmatprep.subr.bf16.mxu1 %v13013_v50  ;;  %v3972_v19 = vld [vmem:[%s11475_s24 + $0x40] sm:$0xff] }
 0xabd   :  { %10371 = vmatprep.subr.bf16.mxu0 %v10370_v20  ;;  %v3973_v20 = vld [vmem:[%s11475_s24 + $0x48] sm:$0xff] }
 0xabe   :  { %v13028_v22 = vpack.c.bf16 %v3973_v20, %v3972_v19  ;;  %v4002_v19 = vld [vmem:[%s11480_s14 + $0x30] sm:$0xff] }
 0xabf   :  { %v13083_v20 = vpack.c.bf16 %v4002_v19, %v4000_v62 }
 0xac0   :  { %10373 = vmatpush1.bf16.msra.mxu0 %v10372_v27  ;;  %v3974_v27 = vld [vmem:[%s11475_s24 + $0x50] sm:$0xff] }
 0xac1   :  { %10375 = vmatprep.subr.bf16.mxu0 %v10374_v54  ;;  %v3975_v54 = vld [vmem:[%s11475_s24 + $0x58] sm:$0xff] }
 0xac2   :  { %v13038_v40 = vpack.c.bf16 %v3975_v54, %v3974_v27 }
 0xac4   :  { %10377 = vmatpush1.bf16.msra.mxu0 %v10376_v63  ;;  %v3976_v63 = vld [vmem:[%s11475_s24 + $0x60] sm:$0xff] }
 0xac5   :  { %10379 = vmatprep.subr.bf16.mxu0 %v10378_v29  ;;  %v3977_v29 = vld [vmem:[%s11475_s24 + $0x68] sm:$0xff] }
 0xac6   :  { %v13048_v48 = vpack.c.bf16 %v3977_v29, %v3976_v63 }
 0xac8   :  { %10381 = vmatpush1.bf16.msra.mxu0 %v10380_v8  ;;  %v13055_v8 = vpack.c.bf16 %v3995_v47, %v3994_v45 }
 0xac9   :  { %10383 = vmatprep.subr.bf16.mxu0 %v10382_v35  ;;  %v3979_v35 = vld [vmem:[%s11475_s24 + $0x78] sm:$0xff] }
 0xaca   :  { %v13058_v42 = vpack.c.bf16 %v3979_v35, %v3978_v44 }
 0xacc   :  { %10385 = vmatpush1.bf16.msra.mxu0 %v10384_v51 }
 0xacd   :  { %10387 = vmatprep.subr.bf16.mxu0 %v10386_v61 }
 0xad0   :  { %10389 = vmatpush1.bf16.msra.mxu0 %v10388_v4 }
 0xad1   :  { %10391 = vmatprep.subr.bf16.mxu0 %v10390_v46 }
 0xad4   :  { %10393 = vmatpush1.bf16.msra.mxu0 %v10392_v34 }
 0xad5   :  { %10395 = vmatprep.subr.bf16.mxu0 %v10394_v37 }
 0xad8   :  { %10397 = vmatpush1.bf16.msra.mxu0 %v10396_v3 }
 0xadb   :  { %3946 = vmatmul.mubr.f32.vlgmr.msra.gmra.mrb[66].mxu0 %v12947_v38  ;;  %v3970_v38 = vld [vmem:[%s11475_s24 + $0x30] sm:$0xff] }
 0xadc   :  { %3951 = vmatprep.mubr.f32.mxu0 %v12957_v33 }
 0xadf   :  { %3952 = vmatmul.mubr.f32.gmra.mrb[68].mxu0 %v12953_v1  ;;  %v3971_v1 = vld [vmem:[%s11475_s24 + $0x38] sm:$0xff]  ;;  %s14019_s24 = sld [smem:[#allocation9_spill]] }
 0xae0   :  { %4943 = vmatprep.mubr.f32.mxu0 %v11368_v7  ;;  %v13019_v33 = vpack.c.bf16 %v3971_v1, %v3970_v38  ;;  %v4001_v38 = vld [vmem:[%s11480_s14 + $0x28] sm:$0xff]  ;;  %v4003_v1 = vld [vmem:[%s11480_s14 + $0x38] sm:$0xff] }
 0xae1   :  { %v13079_v5 = vpack.c.bf16 %v4003_v1, %v4001_v38 }
 0xae2   :  { %10413 = vmatpush3.bf16.msra.mxu1 %v13019_v33 }
 0xae3   :  { %10415 = vmatprep.subr.bf16.mxu1 %v13024_v13 }
 0xae6   :  { %10417 = vmatpush3.bf16.msra.mxu1 %v13028_v22 }
 0xae7   :  { %10419 = vmatprep.subr.bf16.mxu1 %v13034_v32 }
 0xaea   :  { %10421 = vmatpush3.bf16.msra.mxu1 %v13038_v40 }
 0xaeb   :  { %10423 = vmatprep.subr.bf16.mxu1 %v13044_v31 }
 0xaee   :  { %10425 = vmatpush3.bf16.msra.mxu1 %v13048_v48 }
 0xaef   :  { %10427 = vmatprep.subr.bf16.mxu1 %v13055_v8 }
 0xaf2   :  { %10429 = vmatpush3.bf16.msra.mxu1 %v13058_v42 }
 0xaf3   :  { %10431 = vmatprep.subr.bf16.mxu1 %v13064_v49 }
 0xbae   :  { %v3947_v51 = vpop.f32.mrb[66].mxu0 }
 0xbaf   :  { %v11178_v61 = vadd.f32 %v3947_v51, %v12927_v28  ;;  %v3949_v60 = vpop.f32.mrb[67].mxu0 }
 0xbb0   :  { %v11179_v12 = vadd.f32 %v3949_v60, %v12929_v39 }
 0xbb2   :  { %v3953_v11 = vpop.f32.mrb[68].mxu0 }
 0xbb3   :  { %v11180_v59 = vadd.f32 %v3953_v11, %v12931_v53  ;;  %v3955_v4 = vpop.f32.mrb[69].mxu0  ;;  %v3998_v53 = vld [vmem:[%s11480_s14 + $0x10] sm:$0xff]  ;;  %s14017_s14 = sld [smem:[#allocation7_spill]] }
 0xbb4   :  { %v11181_v46 = vadd.f32 %v3955_v4, %v12933_v36  ;;  %v13073_v36 = vpack.c.bf16 %v3998_v53, %v3996_v57 }
 0xbb5   :  { %v4004_v26 = vadd.f32 %v11180_v59, %v11178_v61 }
 0xbb6   :  { %v4011_v58 = vadd.f32 %v11181_v46, %v11179_v12 }
 0xbb7   :  { %v4005_v16 = vrot.slane %v4004_v26, 4 }
 0xbb8   :  { %v4012_v52 = vrot.slane %v4011_v58, 4 }
 0xbb9   :  { %v4006_v34 = vadd.f32 %v4005_v16, %v4004_v26 }
 0xbba   :  { %v4013_v37 = vadd.f32 %v4012_v52, %v4011_v58 }
 0xbbb   :  { %v4007_v15 = vrot.slane %v4006_v34, 2 }
 0xbbc   :  { %v4014_v28 = vrot.slane %v4013_v37, 2 }
 0xbbd   :  { %v4008_v23 = vadd.f32 %v4007_v15, %v4006_v34 }
 0xbbe   :  { %v4015_v39 = vadd.f32 %v4014_v28, %v4013_v37 }
 0xbbf   :  { %v4009_v3 = vrot.slane %v4008_v23, 1 }
 0xbc0   :  { %v4016_v24 = vrot.slane %v4015_v39, 1 }
 0xbc1   :  { %v4010_v0 = vadd.f32 %v4009_v3, %v4008_v23 }
 0xbc2   :  { %v4017_v18 = vadd.f32 %v4016_v24, %v4015_v39 }
 0xbc4   :  { %4082 = vmatprep.mubr.f32.mxu1 %v4017_v18 }
 0xbc5   :  { %4083 = vmatmul.mubr.f32.vlgmr.msra.gmra.mrb[84].mxu1 %v4010_v0 }
 0xbc6   :  { %10433 = vmatpush1.bf16.msra.mxu1 %v13073_v36  ;;  %4157 = vmatprep.mubr.f32.mxu1 %v11368_v7 }
 0xbc7   :  { %10435 = vmatprep.subr.bf16.mxu1 %v13079_v5 }
 0xbca   :  { %10437 = vmatpush1.bf16.msra.mxu1 %v13083_v20 }
 0xbcb   :  { %10439 = vmatprep.subr.bf16.mxu1 %v12905_v43 }
 0xc98   :  { %v8722_v17 = vpop.f32.mrb[84].mxu1 }
 0xc99   :  { %v8723_v25 = vpop.f32.mrb[85].mxu1 }
 0xc9a   :  { %v8724_v27 = vadd.f32 %v8723_v25, %v8722_v17 }
 0xc9c   :  { %v4089_v54 = vmul.f32 0.0078125, %v8724_v27 }
 0xc9e   :  { %8250 = vmatmul.mubr.msk.f32.vlgmr.msra.gmra.mrb[86].mxu1 %vm3045_vm11, %v4089_v54  ;;  %v8257_v54 = vld [vmem:[%s14010_s5 + $0x208] sm:$0xff] }
 0xc9f   :  { %10441 = vmatpush3.bf16.msra.mxu1 %v12910_v14 }
 0xca0   :  { %10443 = vmatprep.subr.bf16.mxu1 %v12912_v55 }
 0xca3   :  { %10445 = vmatpush3.bf16.msra.mxu1 %v12920_v21 }
 0xca4   :  { %10447 = vmatprep.subr.bf16.mxu1 %v12923_v41 }
 0xca7   :  { %10449 = vmatpush3.bf16.msra.mxu1 %v13009_v2 }
 0xca8   :  { %10451 = vmatprep.subr.bf16.mxu1 %v13013_v50 }
 0xcab   :  { %10453 = vmatpush3.bf16.msra.mxu1 %v13019_v33 }
 0xcac   :  { %10455 = vmatprep.subr.bf16.mxu1 %v13024_v13 }
 0xcaf   :  { %10457 = vmatpush3.bf16.msra.mxu1 %v13028_v22 }
 0xcb0   :  { %10459 = vmatprep.subr.bf16.mxu1 %v13034_v32 }
 0xcb3   :  { %10461 = vmatpush3.bf16.msra.mxu1 %v13038_v40 }
 0xcb4   :  { %10463 = vmatprep.subr.bf16.mxu1 %v13044_v31 }
 0xcb7   :  { %10465 = vmatpush3.bf16.msra.mxu1 %v13048_v48 }
 0xcb8   :  { %10467 = vmatprep.subr.bf16.mxu1 %v13055_v8 }
 0xcbb   :  { %10469 = vmatpush3.bf16.msra.mxu1 %v13058_v42 }
 0xcbc   :  { %10471 = vmatprep.subr.bf16.mxu1 %v13064_v49 }
 0xd71   :  { %v4159_v43 = vpop.f32.mrb[86].mxu1 }
 0xd72   :  { %v4167_v14 = vrot.slane %v4159_v43, %v12597_v10  ;;  %v4161_v55 = vpop.f32.mrb[87].mxu1  ;;  %v8259_v43 = vld [vmem:[%s14010_s5 + $0x218] sm:$0xff] }
 0xd73   :  { %v4171_v21 = vrot.slane %v4161_v55, %v12597_v10  ;;  %v8320_v55 = vld [vmem:[%s14011_s9 + $0x10] sm:$0xff] }
 0xd74   :  { %v4172_v41 = vsub.f32 %v11178_v61, %v4167_v14  ;;  %v4174_v2 = vsub.f32 %v11180_v59, %v4167_v14  ;;  %v3962_v59 = vld [vmem:[%s11465_s4] sm:$0x1] }
 0xd75   :  { %v4173_v50 = vsub.f32 %v11179_v12, %v4171_v21  ;;  %v4175_v33 = vsub.f32 %v11181_v46, %v4171_v21  ;;  %v4452_v14 = vld [vmem:[%s14011_s9] sm:$0xff]  ;;  %v10494_v21 = vpack.c.bf16 %v8259_v43, %v8257_v54  ;;  %v8294_v54 = vld [vmem:[%s14010_s5 + $0x330] sm:$0xff]  ;;  %v8297_v43 = vld [vmem:[%s14010_s5 + $0x348] sm:$0xff] }
 0xd76   :  { %v4176_v13 = vmul.f32 %v4172_v41, %v4172_v41  ;;  %v4178_v22 = vmul.f32 %v4174_v2, %v4174_v2 }
 0xd77   :  { %v4177_v32 = vmul.f32 %v4173_v50, %v4173_v50  ;;  %v4179_v40 = vmul.f32 %v4175_v33, %v4175_v33 }
 0xd78   :  { %v4180_v6 = vadd.f32 %v4178_v22, %v4176_v13  ;;  %v8254_v13 = vld [vmem:[%s14011_s9 + $0x8] sm:$0xff] }
 0xd79   :  { %v4187_v30 = vadd.f32 %v4179_v40, %v4177_v32  ;;  %v8386_v32 = vld [vmem:[%s14011_s9 + $0x18] sm:$0xff] }
 0xd7a   :  { %v4181_v31 = vrot.slane %v4180_v6, 4 }
 0xd7b   :  { %v4188_v63 = vrot.slane %v4187_v30, 4 }
 0xd7c   :  { %v4182_v29 = vadd.f32 %v4181_v31, %v4180_v6  ;;  %v8260_v6 = vld [vmem:[%s14010_s5 + $0x220] sm:$0xff]  ;;  %v8265_v31 = vld [vmem:[%s14010_s5 + $0x248] sm:$0xff] }
 0xd7d   :  { %v4189_v48 = vadd.f32 %v4188_v63, %v4187_v30  ;;  %v8262_v30 = vld [vmem:[%s14010_s5 + $0x230] sm:$0xff]  ;;  %v8267_v63 = vld [vmem:[%s14010_s5 + $0x258] sm:$0xff] }
 0xd7e   :  { %v4183_v45 = vrot.slane %v4182_v29, 2 }
 0xd7f   :  { %v4190_v47 = vrot.slane %v4189_v48, 2 }
 0xd80   :  { %v4184_v44 = vadd.f32 %v4183_v45, %v4182_v29  ;;  %v10500_v29 = vpack.c.bf16 %v8262_v30, %v8260_v6  ;;  %v8264_v45 = vld [vmem:[%s14010_s5 + $0x240] sm:$0xff]  ;;  %v8305_v6 = vld [vmem:[%s14010_s5 + $0x388] sm:$0xff]  ;;  %v8307_v30 = vld [vmem:[%s14010_s5 + $0x398] sm:$0xff] }
 0xd81   :  { %v4191_v8 = vadd.f32 %v4190_v47, %v4189_v48  ;;  %v10502_v48 = vpack.c.bf16 %v8267_v63, %v8265_v31  ;;  %v8266_v47 = vld [vmem:[%s14010_s5 + $0x250] sm:$0xff]  ;;  %v10542_v63 = vpack.c.bf16 %v8307_v30, %v8305_v6 }
 0xd82   :  { %v4185_v35 = vrot.slane %v4184_v44, 1 }
 0xd83   :  { %v4192_v42 = vrot.slane %v4191_v8, 1 }
 0xd84   :  { %v4186_v56 = vadd.f32 %v4185_v35, %v4184_v44  ;;  %v8269_v44 = vld [vmem:[%s14010_s5 + $0x268] sm:$0xff]  ;;  %v10504_v35 = vpack.c.bf16 %v8266_v47, %v8264_v45  ;;  %v8311_v47 = vld [vmem:[%s14010_s5 + $0x3b8] sm:$0xff] }
 0xd85   :  { %v4193_v9 = vadd.f32 %v4192_v42, %v4191_v8  ;;  %v8271_v8 = vld [vmem:[%s14010_s5 + $0x278] sm:$0xff]  ;;  %v8309_v45 = vld [vmem:[%s14010_s5 + $0x3a8] sm:$0xff] }
 0xd86   :  { %v10506_v42 = vpack.c.bf16 %v8271_v8, %v8269_v44  ;;  %v10546_v8 = vpack.c.bf16 %v8311_v47, %v8309_v45 }
 0xd87   :  { %4258 = vmatprep.mubr.f32.mxu1 %v4193_v9  ;;  %v8268_v9 = vld [vmem:[%s14010_s5 + $0x260] sm:$0xff] }
 0xd88   :  { %4259 = vmatmul.mubr.f32.vlgmr.msra.gmra.mrb[88].mxu1 %v4186_v56  ;;  %v8270_v56 = vld [vmem:[%s14010_s5 + $0x270] sm:$0xff] }
 0xd89   :  { %10473 = vmatpush1.bf16.msra.mxu1 %v13073_v36  ;;  %4335 = vmatprep.mubr.f32.mxu1 %v11368_v7 }
 0xd8a   :  { %10475 = vmatprep.subr.bf16.mxu1 %v13079_v5 }
 0xd8d   :  { %10477 = vmatpush1.bf16.msra.mxu1 %v13083_v20 }
 0xd8e   :  { %10479 = vmatprep.subr.bf16.mxu1 %v13064_v49  ;;  %v3963_v49 = vld [vmem:[%s14009_s0] sm:$0x1] }
 0xe5b   :  { %v8757_v51 = vpop.f32.mrb[88].mxu1 }
 0xe5c   :  { %v8758_v61 = vpop.f32.mrb[89].mxu1 }
 0xe5d   :  { %v8759_v60 = vadd.f32 %v8758_v61, %v8757_v51  ;;  %v8273_v51 = vld [vmem:[%s14010_s5 + $0x288] sm:$0xff]  ;;  %v8275_v61 = vld [vmem:[%s14010_s5 + $0x298] sm:$0xff] }
 0xe5f   :  { %v4264_v12 = vmul.f32 0.0078125, %v8759_v60  ;;  %v10508_v60 = vpack.c.bf16 %v8270_v56, %v8268_v9  ;;  %v8313_v9 = vld [vmem:[%s14010_s5 + $0x3c8] sm:$0xff]  ;;  %v8315_v56 = vld [vmem:[%s14010_s5 + $0x3d8] sm:$0xff] }
 0xe61   :  { %v4265_v11 = vadd.f32 1e-05, %v4264_v12  ;;  %v10510_v12 = vpack.c.bf16 %v8275_v61, %v8273_v51  ;;  %v10550_v61 = vpack.c.bf16 %v8315_v56, %v8313_v9 }
 0xe63   :  { %11309 = vrsqrt.f32 %v4265_v11  ;;  %v8272_v11 = vld [vmem:[%s14010_s5 + $0x280] sm:$0xff] }
 0xe6d   :  { %v11310_v4 = vpop.eup %11309 }
 0xe6e   :  { %v4267_v46 = vmul.f32 %v11310_v4, %v3962_v59  ;;  %v8274_v59 = vld [vmem:[%s14010_s5 + $0x290] sm:$0xff]  ;;  %v8277_v4 = vld [vmem:[%s14010_s5 + $0x2a8] sm:$0xff] }
 0xe70   :  { %8251 = vmatmul.mubr.msk.f32.vlgmr.msra.gmra.mrb[90].mxu1 %vm3045_vm11, %v4267_v46  ;;  %v8279_v46 = vld [vmem:[%s14010_s5 + $0x2b8] sm:$0xff] }
 0xe71   :  { %10481 = vmatpush1.bf16.msra.mxu1 %v13073_v36  ;;  %4421 = vmatprep.mubr.f32.mxu1 %v11368_v7 }
 0xe72   :  { %10483 = vmatprep.subr.bf16.mxu1 %v13079_v5 }
 0xe75   :  { %10485 = vmatpush1.bf16.msra.mxu1 %v13083_v20 }
 0xe78   :  { %8252 = vmatmul.mubr.msk.f32.vlgmr.msra.gmra.mrb[92].mxu1 %vm3045_vm11, %v3963_v49  ;;  %v10512_v49 = vpack.c.bf16 %v8274_v59, %v8272_v11  ;;  %v8317_v59 = vld [vmem:[%s14010_s5 + $0x3e8] sm:$0xff] }
 0xe79   :  { %4520 = vmatprep.mubr.f32.mxu1 %v11368_v7 }
 0xf43   :  { %v4337_v26 = vpop.f32.mrb[90].mxu1 }
 0xf44   :  { %v4339_v58 = vpop.f32.mrb[91].mxu1  ;;  %v4345_v16 = vrot.slane %v4337_v26, %v12597_v10  ;;  %v10514_v26 = vpack.c.bf16 %v8279_v46, %v8277_v4  ;;  %v8319_v4 = vld [vmem:[%s14010_s5 + $0x3f8] sm:$0xff]  ;;  %v8316_v46 = vld [vmem:[%s14010_s5 + $0x3e0] sm:$0xff] }
 0xf45   :  { %v4349_v52 = vrot.slane %v4339_v58, %v12597_v10  ;;  %v8276_v58 = vld [vmem:[%s14010_s5 + $0x2a0] sm:$0xff] }
 0xf46   :  { %v4350_v37 = vmul.f32 %v4345_v16, %v4172_v41  ;;  %v4352_v15 = vmul.f32 %v4345_v16, %v4174_v2  ;;  %v8256_v41 = vld [vmem:[%s14010_s5 + $0x200] sm:$0xff]  ;;  %v8258_v2 = vld [vmem:[%s14010_s5 + $0x210] sm:$0xff] }
 0xf47   :  { %v4351_v39 = vmul.f32 %v4349_v52, %v4173_v50  ;;  %v4353_v3 = vmul.f32 %v4349_v52, %v4175_v33  ;;  %v8261_v50 = vld [vmem:[%s14010_s5 + $0x228] sm:$0xff]  ;;  %v8263_v33 = vld [vmem:[%s14010_s5 + $0x238] sm:$0xff]  ;;  %v10496_v22 = vpack.c.bf16 %v8258_v2, %v8256_v41  ;;  %v8278_v16 = vld [vmem:[%s14010_s5 + $0x2b0] sm:$0xff] }
 0xf48   :  { %v10498_v40 = vpack.c.bf16 %v8263_v33, %v8261_v50  ;;  %v8281_v52 = vld [vmem:[%s14010_s5 + $0x2c8] sm:$0xff]  ;;  %v8296_v41 = vld [vmem:[%s14010_s5 + $0x340] sm:$0xff]  ;;  %v8298_v2 = vld [vmem:[%s14010_s5 + $0x350] sm:$0xff] }
 0xf49   :  { %v8301_v50 = vld [vmem:[%s14010_s5 + $0x368] sm:$0xff]  ;;  %v8303_v33 = vld [vmem:[%s14010_s5 + $0x378] sm:$0xff] }
 0xf4b   :  { %v4423_v34 = vpop.f32.mrb[92].mxu1 }
 0xf4c   :  { %v4431_v28 = vrot.slane %v4423_v34, %v12597_v10  ;;  %v4425_v23 = vpop.f32.mrb[93].mxu1  ;;  %v8283_v34 = vld [vmem:[%s14010_s5 + $0x2d8] sm:$0xff] }
 0xf4d   :  { %v4435_v57 = vrot.slane %v4425_v23, %v12597_v10  ;;  %v8282_v23 = vld [vmem:[%s14010_s5 + $0x2d0] sm:$0xff] }
 0xf4e   :  { %v4436_v53 = vadd.f32 %v4431_v28, %v4350_v37  ;;  %v4438_v24 = vadd.f32 %v4431_v28, %v4352_v15  ;;  %v10516_v37 = vpack.c.bf16 %v8278_v16, %v8276_v58  ;;  %v10518_v15 = vpack.c.bf16 %v8283_v34, %v8281_v52  ;;  %v8280_v28 = vld [vmem:[%s14010_s5 + $0x2c0] sm:$0xff]  ;;  %v4528_v16 = vld [vmem:[%s14010_s5 + $0x8] sm:$0xff]  ;;  %v4530_v52 = vld [vmem:[%s14010_s5 + $0x18] sm:$0xff] }
 0xf4f   :  { %v4437_v18 = vadd.f32 %v4435_v57, %v4351_v39  ;;  %v4439_v36 = vadd.f32 %v4435_v57, %v4353_v3  ;;  %v8285_v39 = vld [vmem:[%s14010_s5 + $0x2e8] sm:$0xff]  ;;  %v8287_v3 = vld [vmem:[%s14010_s5 + $0x2f8] sm:$0xff]  ;;  %v10520_v57 = vpack.c.bf16 %v8282_v23, %v8280_v28  ;;  %v10558_v34 = vpack.c.bf16 %v4530_v52, %v4528_v16  ;;  %v4527_v28 = vld [vmem:[%s14010_s5] sm:$0xff] }
 0xf50   :  { %vm4440_vm12 = vcmp.gt.f32.partialorder %v4436_v53, 0.0  ;;  %vm4442_vm13 = vcmp.gt.f32.partialorder %v4438_v24, 0.0  ;;  %v4444_v0 = vmul.f32 0.2, %v4436_v53  ;;  %v4446_v38 = vmul.f32 0.2, %v4438_v24 }
 0xf51   :  { %vm4441_vm14 = vcmp.gt.f32.partialorder %v4437_v18, 0.0  ;;  %vm4443_vm15 = vcmp.gt.f32.partialorder %v4439_v36, 0.0  ;;  %v4445_v1 = vmul.f32 0.2, %v4437_v18  ;;  %v4447_v5 = vmul.f32 0.2, %v4439_v36 }
 0xf52   :  { %v4448_v62 = vsel %vm4440_vm12, %v4436_v53, %v4444_v0  ;;  %v4450_v19 = vsel %vm4442_vm13, %v4438_v24, %v4446_v38  ;;  %v10522_v53 = vpack.c.bf16 %v8287_v3, %v8285_v39  ;;  %v8284_v24 = vld [vmem:[%s14010_s5 + $0x2e0] sm:$0xff]  ;;  %v8291_v0 = vld [vmem:[%s14010_s5 + $0x318] sm:$0xff]  ;;  %v4529_v23 = vld [vmem:[%s14010_s5 + $0x10] sm:$0xff] }
 0xf53   :  { %v4449_v20 = vsel %vm4441_vm14, %v4437_v18, %v4445_v1  ;;  %v4451_v17 = vsel %vm4443_vm15, %v4439_v36, %v4447_v5  ;;  %v10488_v25 = vpack.c.bf16 %v4450_v19, %v4448_v62  ;;  %v8286_v18 = vld [vmem:[%s14010_s5 + $0x2f0] sm:$0xff]  ;;  %v8289_v36 = vld [vmem:[%s14010_s5 + $0x308] sm:$0xff]  ;;  %v8288_v5 = vld [vmem:[%s14010_s5 + $0x300] sm:$0xff] }
 0xf54   :  { %v10486_v27 = vpack.c.bf16 %v4451_v17, %v4449_v20  ;;  %v10524_v38 = vpack.c.bf16 %v8286_v18, %v8284_v24  ;;  %v10526_v1 = vpack.c.bf16 %v8291_v0, %v8289_v36  ;;  %v8290_v62 = vld [vmem:[%s14010_s5 + $0x310] sm:$0xff]  ;;  %v8293_v19 = vld [vmem:[%s14010_s5 + $0x328] sm:$0xff]  ;;  %v8295_v20 = vld [vmem:[%s14010_s5 + $0x338] sm:$0xff] }
 0xf55   :  { %v10528_v17 = vpack.c.bf16 %v8290_v62, %v8288_v5  ;;  %v4532_v39 = vld [vmem:[%s14010_s5 + $0x28] sm:$0xff]  ;;  %v4534_v3 = vld [vmem:[%s14010_s5 + $0x38] sm:$0xff]  ;;  %v4531_v0 = vld [vmem:[%s14010_s5 + $0x20] sm:$0xff] }
 0xf56   :  { %10487 = vmatprep.subr.bf16.mxu1 %v10486_v27  ;;  %10623 = vmatprep.subr.bf16.mxu0 %v10486_v27  ;;  %v10562_v36 = vpack.c.bf16 %v4534_v3, %v4532_v39  ;;  %v4536_v5 = vld [vmem:[%s14010_s5 + $0x48] sm:$0xff]  ;;  %v4538_v62 = vld [vmem:[%s14010_s5 + $0x58] sm:$0xff]  ;;  %v4563_v52 = vld [vmem:[%s14010_s5 + $0x120] sm:$0xff] }
 0xf57   :  { %10489 = vmatpush1.bf16.msra.mxu1 %v10488_v25  ;;  %10625 = vmatpush1.bf16.msra.mxu0 %v10488_v25  ;;  %v4567_v3 = vld [vmem:[%s14010_s5 + $0x140] sm:$0xff] }
 0xf58   :  { %10491 = vmatprep.subr.bf16.mxu1 %v10486_v27  ;;  %10691 = vmatprep.subr.bf16.mxu0 %v10486_v27  ;;  %v8292_v27 = vld [vmem:[%s14010_s5 + $0x320] sm:$0xff] }
 0xf5a   :  { %8253 = vmatmul.mubr.msk.f32.vlgmr.msra.gmra.mrb[94].mxu1 %vm2648_vm2, %v4452_v14  ;;  %8321 = vmatmul.mubr.msk.f32.vlgmr.msra.gmra.mrb[70].mxu0 %vm2648_vm2, %v8320_v55  ;;  %v8299_v14 = vld [vmem:[%s14010_s5 + $0x358] sm:$0xff]  ;;  %v10532_v55 = vpack.c.bf16 %v8294_v54, %v8292_v27  ;;  %v4540_v27 = vld [vmem:[%s14010_s5 + $0x68] sm:$0xff] }
 0xf5b   :  { %10493 = vmatpush1.bf16.msra.mxu1 %v10488_v25  ;;  %10693 = vmatpush1.bf16.msra.mxu0 %v10488_v25  ;;  %v10530_v25 = vpack.c.bf16 %v8295_v20, %v8293_v19  ;;  %v10566_v20 = vpack.c.bf16 %v4538_v62, %v4536_v5  ;;  %v4542_v54 = vld [vmem:[%s14010_s5 + $0x78] sm:$0xff]  ;;  %v4573_v5 = vld [vmem:[%s14010_s5 + $0x170] sm:$0xff]  ;;  %v4576_v62 = vld [vmem:[%s14010_s5 + $0x188] sm:$0xff] }
 0xf5c   :  { %4660 = vmatprep.mubr.f32.mxu1 %v11368_v7  ;;  %10495 = vmatprep.subr.bf16.mxu1 %v10494_v21  ;;  %v10534_v21 = vpack.c.bf16 %v8299_v14, %v8297_v43  ;;  %v10570_v14 = vpack.c.bf16 %v4542_v54, %v4540_v27  ;;  %v4577_v27 = vld [vmem:[%s14010_s5 + $0x190] sm:$0xff]  ;;  %v4580_v54 = vld [vmem:[%s14010_s5 + $0x1a8] sm:$0xff] }
 0xf5d   :  { %5157 = vmatprep.mubr.f32.mxu0 %v11368_v7 }
 0xf5e   :  { %8255 = vmatmul.mubr.msk.f32.vlgmr.msra.gmra.mrb[96].mxu1 %vm2648_vm2, %v8254_v13  ;;  %8387 = vmatmul.mubr.msk.f32.vlgmr.msra.gmra.mrb[72].mxu0 %vm2648_vm2, %v8386_v32  ;;  %v10536_v13 = vpack.c.bf16 %v8298_v2, %v8296_v41  ;;  %v8300_v32 = vld [vmem:[%s14010_s5 + $0x360] sm:$0xff]  ;;  %v4544_v41 = vld [vmem:[%s14010_s5 + $0x88] sm:$0xff]  ;;  %v4546_v2 = vld [vmem:[%s14010_s5 + $0x98] sm:$0xff] }
 0xf5f   :  { %10497 = vmatpush1.bf16.msra.mxu1 %v10496_v22  ;;  %v10538_v22 = vpack.c.bf16 %v8303_v33, %v8301_v50  ;;  %v10574_v33 = vpack.c.bf16 %v4546_v2, %v4544_v41  ;;  %v4581_v41 = vld [vmem:[%s14010_s5 + $0x1b0] sm:$0xff]  ;;  %v4584_v2 = vld [vmem:[%s14010_s5 + $0x1c8] sm:$0xff] }
 0xf60   :  { %10499 = vmatprep.subr.bf16.mxu1 %v10498_v40  ;;  %v8302_v40 = vld [vmem:[%s14010_s5 + $0x370] sm:$0xff] }
 0xf61   :  { %v10540_v31 = vpack.c.bf16 %v8302_v40, %v8300_v32  ;;  %v4548_v32 = vld [vmem:[%s14010_s5 + $0xa8] sm:$0xff]  ;;  %v4550_v40 = vld [vmem:[%s14010_s5 + $0xb8] sm:$0xff] }
 0xf62   :  { %v10578_v30 = vpack.c.bf16 %v4550_v40, %v4548_v32  ;;  %v4585_v32 = vld [vmem:[%s14010_s5 + $0x1d0] sm:$0xff]  ;;  %v4588_v40 = vld [vmem:[%s14010_s5 + $0x1e8] sm:$0xff] }
 0xf63   :  { %10501 = vmatpush1.bf16.msra.mxu1 %v10500_v29  ;;  %v8304_v29 = vld [vmem:[%s14010_s5 + $0x380] sm:$0xff] }
 0xf64   :  { %10503 = vmatprep.subr.bf16.mxu1 %v10502_v48  ;;  %v8306_v48 = vld [vmem:[%s14010_s5 + $0x390] sm:$0xff] }
 0xf65   :  { %v10544_v44 = vpack.c.bf16 %v8306_v48, %v8304_v29  ;;  %v4552_v29 = vld [vmem:[%s14010_s5 + $0xc8] sm:$0xff]  ;;  %v4554_v48 = vld [vmem:[%s14010_s5 + $0xd8] sm:$0xff] }
 0xf66   :  { %v10582_v47 = vpack.c.bf16 %v4554_v48, %v4552_v29  ;;  %v4589_v29 = vld [vmem:[%s14010_s5 + $0x1f0] sm:$0xff]  ;;  %v8323_v48 = vld [vmem:[%s14010_s5 + $0x408] sm:$0xff] }
 0xf67   :  { %10505 = vmatpush1.bf16.msra.mxu1 %v10504_v35  ;;  %v8308_v35 = vld [vmem:[%s14010_s5 + $0x3a0] sm:$0xff] }
 0xf68   :  { %10507 = vmatprep.subr.bf16.mxu1 %v10506_v42  ;;  %v8310_v42 = vld [vmem:[%s14010_s5 + $0x3b0] sm:$0xff] }
 0xf69   :  { %v10548_v51 = vpack.c.bf16 %v8310_v42, %v8308_v35  ;;  %v4556_v35 = vld [vmem:[%s14010_s5 + $0xe8] sm:$0xff]  ;;  %v4558_v42 = vld [vmem:[%s14010_s5 + $0xf8] sm:$0xff] }
 0xf6a   :  { %v10586_v56 = vpack.c.bf16 %v4558_v42, %v4556_v35  ;;  %v8324_v35 = vld [vmem:[%s14010_s5 + $0x410] sm:$0xff] }
 0xf6b   :  { %10509 = vmatpush1.bf16.msra.mxu1 %v10508_v60  ;;  %v8312_v60 = vld [vmem:[%s14010_s5 + $0x3c0] sm:$0xff] }
 0xf6c   :  { %10511 = vmatprep.subr.bf16.mxu1 %v10510_v12  ;;  %v8314_v12 = vld [vmem:[%s14010_s5 + $0x3d0] sm:$0xff] }
 0xf6d   :  { %v10552_v11 = vpack.c.bf16 %v8314_v12, %v8312_v60  ;;  %v4560_v60 = vld [vmem:[%s14010_s5 + $0x108] sm:$0xff]  ;;  %v4562_v12 = vld [vmem:[%s14010_s5 + $0x118] sm:$0xff] }
 0xf6f   :  { %10513 = vmatpush1.bf16.msra.mxu1 %v10512_v49  ;;  %v10554_v49 = vpack.c.bf16 %v8319_v4, %v8317_v59  ;;  %v10590_v59 = vpack.c.bf16 %v4562_v12, %v4560_v60  ;;  %v4559_v4 = vld [vmem:[%s14010_s5 + $0x100] sm:$0xff] }
 0xf70   :  { %10515 = vmatprep.subr.bf16.mxu1 %v10514_v26  ;;  %v8318_v26 = vld [vmem:[%s14010_s5 + $0x3f0] sm:$0xff]  ;;  %v8326_v12 = vld [vmem:[%s14010_s5 + $0x420] sm:$0xff] }
 0xf71   :  { %v10556_v58 = vpack.c.bf16 %v8318_v26, %v8316_v46  ;;  %v4561_v46 = vld [vmem:[%s14010_s5 + $0x110] sm:$0xff]  ;;  %v4566_v26 = vld [vmem:[%s14010_s5 + $0x138] sm:$0xff] }
 0xf73   :  { %10517 = vmatpush1.bf16.msra.mxu1 %v10516_v37 }
 0xf74   :  { %10519 = vmatprep.subr.bf16.mxu1 %v10518_v15 }
 0xf77   :  { %10521 = vmatpush1.bf16.msra.mxu1 %v10520_v57 }
 0xf78   :  { %10523 = vmatprep.subr.bf16.mxu1 %v10522_v53  ;;  %v10560_v53 = vpack.c.bf16 %v4529_v23, %v4527_v28  ;;  %v4570_v28 = vld [vmem:[%s14010_s5 + $0x158] sm:$0xff] }
 0xf7b   :  { %10525 = vmatpush1.bf16.msra.mxu1 %v10524_v38  ;;  %v4533_v38 = vld [vmem:[%s14010_s5 + $0x30] sm:$0xff] }
 0xf7c   :  { %10527 = vmatprep.subr.bf16.mxu1 %v10526_v1  ;;  %v10564_v19 = vpack.c.bf16 %v4533_v38, %v4531_v0  ;;  %v4571_v38 = vld [vmem:[%s14010_s5 + $0x160] sm:$0xff] }
 0xf7f   :  { %10529 = vmatpush1.bf16.msra.mxu1 %v10528_v17  ;;  %v4535_v17 = vld [vmem:[%s14010_s5 + $0x40] sm:$0xff] }
 0xf80   :  { %10531 = vmatprep.subr.bf16.mxu1 %v10530_v25  ;;  %v4537_v25 = vld [vmem:[%s14010_s5 + $0x50] sm:$0xff] }
 0xf81   :  { %v10568_v43 = vpack.c.bf16 %v4537_v25, %v4535_v17  ;;  %v4575_v25 = vld [vmem:[%s14010_s5 + $0x180] sm:$0xff] }
 0xf83   :  { %10533 = vmatpush1.bf16.msra.mxu1 %v10532_v55  ;;  %v4539_v55 = vld [vmem:[%s14010_s5 + $0x60] sm:$0xff] }
 0xf84   :  { %10535 = vmatprep.subr.bf16.mxu1 %v10534_v21  ;;  %v4541_v21 = vld [vmem:[%s14010_s5 + $0x70] sm:$0xff] }
 0xf85   :  { %v10572_v50 = vpack.c.bf16 %v4541_v21, %v4539_v55  ;;  %v4579_v21 = vld [vmem:[%s14010_s5 + $0x1a0] sm:$0xff] }
 0xf87   :  { %10537 = vmatpush1.bf16.msra.mxu1 %v10536_v13  ;;  %v4543_v13 = vld [vmem:[%s14010_s5 + $0x80] sm:$0xff] }
 0xf88   :  { %10539 = vmatprep.subr.bf16.mxu1 %v10538_v22  ;;  %v4545_v22 = vld [vmem:[%s14010_s5 + $0x90] sm:$0xff] }
 0xf89   :  { %v10576_v6 = vpack.c.bf16 %v4545_v22, %v4543_v13  ;;  %v4583_v22 = vld [vmem:[%s14010_s5 + $0x1c0] sm:$0xff] }
 0xf8b   :  { %10541 = vmatpush1.bf16.msra.mxu1 %v10540_v31  ;;  %v4547_v31 = vld [vmem:[%s14010_s5 + $0xa0] sm:$0xff] }
 0xf8c   :  { %10543 = vmatprep.subr.bf16.mxu1 %v10542_v63  ;;  %v4549_v63 = vld [vmem:[%s14010_s5 + $0xb0] sm:$0xff] }
 0xf8d   :  { %v10580_v45 = vpack.c.bf16 %v4549_v63, %v4547_v31  ;;  %v4587_v63 = vld [vmem:[%s14010_s5 + $0x1e0] sm:$0xff] }
 0xf8f   :  { %10545 = vmatpush1.bf16.msra.mxu1 %v10544_v44  ;;  %v4551_v44 = vld [vmem:[%s14010_s5 + $0xc0] sm:$0xff] }
 0xf90   :  { %10547 = vmatprep.subr.bf16.mxu1 %v10546_v8  ;;  %v4553_v8 = vld [vmem:[%s14010_s5 + $0xd0] sm:$0xff] }
 0xf91   :  { %v10584_v9 = vpack.c.bf16 %v4553_v8, %v4551_v44  ;;  %v8322_v8 = vld [vmem:[%s14010_s5 + $0x400] sm:$0xff] }
 0xf93   :  { %10549 = vmatpush1.bf16.msra.mxu1 %v10548_v51  ;;  %v4555_v51 = vld [vmem:[%s14010_s5 + $0xe0] sm:$0xff] }
 0xf94   :  { %10551 = vmatprep.subr.bf16.mxu1 %v10550_v61  ;;  %v4557_v61 = vld [vmem:[%s14010_s5 + $0xf0] sm:$0xff] }
 0xf97   :  { %10553 = vmatpush1.bf16.msra.mxu1 %v10552_v11  ;;  %v10588_v11 = vpack.c.bf16 %v4557_v61, %v4555_v51  ;;  %v10628_v51 = vpack.c.bf16 %v8324_v35, %v8322_v8  ;;  %v8347_v8 = vld [vmem:[%s14010_s5 + $0x4c8] sm:$0xff]  ;;  %v8349_v35 = vld [vmem:[%s14010_s5 + $0x4d8] sm:$0xff] }
 0xf98   :  { %10555 = vmatprep.subr.bf16.mxu1 %v10554_v49  ;;  %v4564_v49 = vld [vmem:[%s14010_s5 + $0x128] sm:$0xff] }
 0xf99   :  { %v10594_v16 = vpack.c.bf16 %v4566_v26, %v4564_v49  ;;  %v8332_v49 = vld [vmem:[%s14010_s5 + $0x450] sm:$0xff]  ;;  %v5320_v26 = vld [vmem:[%s14012_s13 + $0x80] sm:$0xff] }
 0xf9b   :  { %10557 = vmatpush1.bf16.msra.mxu1 %v10556_v58  ;;  %v10592_v58 = vpack.c.bf16 %v4561_v46, %v4559_v4  ;;  %v8333_v4 = vld [vmem:[%s14010_s5 + $0x458] sm:$0xff]  ;;  %v8330_v46 = vld [vmem:[%s14010_s5 + $0x440] sm:$0xff] }
 0xf9c   :  { %10559 = vmatprep.subr.bf16.mxu1 %v10558_v34  ;;  %v4565_v34 = vld [vmem:[%s14010_s5 + $0x130] sm:$0xff] }
 0xf9d   :  { %v10596_v23 = vpack.c.bf16 %v4565_v34, %v4563_v52 }
0x102d   :  { %v13201_v37 = vpop.f32.mrb[94].mxu1  ;;  %v13207_v24 = vpop.f32.mrb[70].mxu0 }
0x102e   :  { %v4524_v15 = vpop.f32.mrb[95].mxu1  ;;  %v13211_v1 = vpop.f32.mrb[71].mxu0 }
0x1031   :  { %v4662_v57 = vpop.f32.mrb[96].mxu1  ;;  %v13273_v42 = vpop.f32.mrb[72].mxu0 }
0x1032   :  { %v4664_v18 = vpop.f32.mrb[97].mxu1  ;;  %v13277_v61 = vpop.f32.mrb[73].mxu0 }
0x1033   :  { %4796 = vmatprep.mubr.f32.mxu1 %v4664_v18  ;;  %v4574_v18 = vld [vmem:[%s14010_s5 + $0x178] sm:$0xff] }
0x1034   :  { %4797 = vmatmul.mubr.f32.vlgmr.msra.gmra.mrb[98].mxu1 %v4662_v57  ;;  %v4569_v57 = vld [vmem:[%s14010_s5 + $0x150] sm:$0xff] }
0x1035   :  { %10561 = vmatpush1.bf16.msra.mxu1 %v10560_v53  ;;  %4867 = vmatprep.mubr.f32.mxu1 %v4524_v15  ;;  %v4568_v15 = vld [vmem:[%s14010_s5 + $0x148] sm:$0xff] }
0x1036   :  { %10563 = vmatprep.subr.bf16.mxu1 %v10562_v36  ;;  %v10598_v39 = vpack.c.bf16 %v4570_v28, %v4568_v15  ;;  %v4572_v53 = vld [vmem:[%s14010_s5 + $0x168] sm:$0xff]  ;;  %v10600_v36 = vpack.c.bf16 %v4569_v57, %v4567_v3  ;;  %v5322_v28 = vld [vmem:[%s14012_s13 + $0x90] sm:$0xff] }
0x1037   :  { %v10602_v0 = vpack.c.bf16 %v4574_v18, %v4572_v53  ;;  %v5305_v15 = vld [vmem:[%s14012_s13 + $0x8] sm:$0xff]  ;;  %v5306_v57 = vld [vmem:[%s14012_s13 + $0x10] sm:$0xff]  ;;  %v5307_v53 = vld [vmem:[%s14012_s13 + $0x18] sm:$0xff] }
0x1038   :  { %v5324_v18 = vld [vmem:[%s14012_s13 + $0xa0] sm:$0xff] }
0x1039   :  { %10565 = vmatpush1.bf16.msra.mxu1 %v10564_v19  ;;  %v4578_v19 = vld [vmem:[%s14010_s5 + $0x198] sm:$0xff] }
0x103a   :  { %10567 = vmatprep.subr.bf16.mxu1 %v10566_v20  ;;  %v10604_v20 = vpack.c.bf16 %v4573_v5, %v4571_v38  ;;  %v10606_v17 = vpack.c.bf16 %v4578_v19, %v4576_v62  ;;  %v13307_v38 = vpack.c.bf16 %v5307_v53, %v5306_v57  ;;  %v10636_v5 = vpack.c.bf16 %v8332_v49, %v8330_v46  ;;  %v8334_v62 = vld [vmem:[%s14010_s5 + $0x460] sm:$0xff]  ;;  %v8352_v49 = vld [vmem:[%s14010_s5 + $0x4f0] sm:$0xff] }
0x103b   :  { %v8350_v46 = vld [vmem:[%s14010_s5 + $0x4e0] sm:$0xff] }
0x103d   :  { %10569 = vmatpush1.bf16.msra.mxu1 %v10568_v43  ;;  %v4582_v43 = vld [vmem:[%s14010_s5 + $0x1b8] sm:$0xff] }
0x103e   :  { %10571 = vmatprep.subr.bf16.mxu1 %v10570_v14  ;;  %v10608_v14 = vpack.c.bf16 %v4577_v27, %v4575_v25  ;;  %v10610_v55 = vpack.c.bf16 %v4582_v43, %v4580_v54  ;;  %v8336_v27 = vld [vmem:[%s14010_s5 + $0x470] sm:$0xff]  ;;  %v5327_v43 = vld [vmem:[%s14012_s13 + $0xb8] sm:$0xff] }
0x103f   :  { %v5326_v54 = vld [vmem:[%s14012_s13 + $0xb0] sm:$0xff] }
0x1041   :  { %10573 = vmatpush1.bf16.msra.mxu1 %v10572_v50  ;;  %v4586_v50 = vld [vmem:[%s14010_s5 + $0x1d8] sm:$0xff] }
0x1042   :  { %10575 = vmatprep.subr.bf16.mxu1 %v10574_v33  ;;  %v10612_v33 = vpack.c.bf16 %v4581_v41, %v4579_v21  ;;  %v10614_v13 = vpack.c.bf16 %v4586_v50, %v4584_v2  ;;  %v10640_v41 = vpack.c.bf16 %v8336_v27, %v8334_v62  ;;  %v8338_v2 = vld [vmem:[%s14010_s5 + $0x480] sm:$0xff]  ;;  %v13325_v50 = vpack.c.bf16 %v5327_v43, %v5326_v54  ;;  %v8369_v27 = vld [vmem:[%s14010_s5 + $0x578] sm:$0xff] }
0x1045   :  { %10577 = vmatpush1.bf16.msra.mxu1 %v10576_v6  ;;  %v4590_v6 = vld [vmem:[%s14010_s5 + $0x1f8] sm:$0xff] }
0x1046   :  { %10579 = vmatprep.subr.bf16.mxu1 %v10578_v30  ;;  %v10616_v30 = vpack.c.bf16 %v4585_v32, %v4583_v22  ;;  %v10618_v31 = vpack.c.bf16 %v4590_v6, %v4588_v40  ;;  %v8340_v32 = vld [vmem:[%s14010_s5 + $0x490] sm:$0xff]  ;;  %v5328_v40 = vld [vmem:[%s14012_s13 + $0xc0] sm:$0xff]  ;;  %v5329_v6 = vld [vmem:[%s14012_s13 + $0xc8] sm:$0xff] }
0x1049   :  { %10581 = vmatpush1.bf16.msra.mxu1 %v10580_v45  ;;  %v8325_v45 = vld [vmem:[%s14010_s5 + $0x418] sm:$0xff] }
0x104a   :  { %10583 = vmatprep.subr.bf16.mxu1 %v10582_v47  ;;  %v10620_v47 = vpack.c.bf16 %v4589_v29, %v4587_v63  ;;  %v10626_v44 = vpack.c.bf16 %v8325_v45, %v8323_v48  ;;  %v10644_v29 = vpack.c.bf16 %v8340_v32, %v8338_v2  ;;  %v13338_v48 = vpack.c.bf16 %v5329_v6, %v5328_v40  ;;  %v8373_v2 = vld [vmem:[%s14010_s5 + $0x598] sm:$0xff]  ;;  %v8372_v32 = vld [vmem:[%s14010_s5 + $0x590] sm:$0xff]  ;;  %v8375_v40 = vld [vmem:[%s14010_s5 + $0x5a8] sm:$0xff] }
0x104b   :  { %v8377_v6 = vld [vmem:[%s14010_s5 + $0x5b8] sm:$0xff] }
0x104d   :  { %10585 = vmatpush1.bf16.msra.mxu1 %v10584_v9  ;;  %v8327_v9 = vld [vmem:[%s14010_s5 + $0x428] sm:$0xff] }
0x104e   :  { %10587 = vmatprep.subr.bf16.mxu1 %v10586_v56  ;;  %v8329_v56 = vld [vmem:[%s14010_s5 + $0x438] sm:$0xff] }
0x104f   :  { %v10630_v60 = vpack.c.bf16 %v8329_v56, %v8327_v9  ;;  %v10650_v56 = vpack.c.bf16 %v8349_v35, %v8347_v8 }
0x1051   :  { %10589 = vmatpush1.bf16.msra.mxu1 %v10588_v11  ;;  %v8328_v11 = vld [vmem:[%s14010_s5 + $0x430] sm:$0xff] }
0x1052   :  { %10591 = vmatprep.subr.bf16.mxu1 %v10590_v59  ;;  %v8331_v59 = vld [vmem:[%s14010_s5 + $0x448] sm:$0xff]  ;;  %v10632_v52 = vpack.c.bf16 %v8328_v11, %v8326_v12  ;;  %v8353_v11 = vld [vmem:[%s14010_s5 + $0x4f8] sm:$0xff] }
0x1053   :  { %v8351_v12 = vld [vmem:[%s14010_s5 + $0x4e8] sm:$0xff] }
0x1055   :  { %10593 = vmatpush1.bf16.msra.mxu1 %v10592_v58  ;;  %v5321_v58 = vld [vmem:[%s14012_s13 + $0x88] sm:$0xff] }
0x1056   :  { %10595 = vmatprep.subr.bf16.mxu1 %v10594_v16  ;;  %v5304_v16 = vld [vmem:[%s14012_s13] sm:$0xff]  ;;  %v13290_v34 = vpack.c.bf16 %v5321_v58, %v5320_v26  ;;  %v8355_v26 = vld [vmem:[%s14010_s5 + $0x508] sm:$0xff]  ;;  %v8357_v58 = vld [vmem:[%s14010_s5 + $0x518] sm:$0xff] }
0x1058   :  { %10759 = vmatprep.subr.bf16.mxu0 %v13290_v34 }
0x1059   :  { %10597 = vmatpush1.bf16.msra.mxu1 %v10596_v23  ;;  %v10634_v23 = vpack.c.bf16 %v8333_v4, %v8331_v59  ;;  %v10654_v4 = vpack.c.bf16 %v8353_v11, %v8351_v12 }
0x105a   :  { %10599 = vmatprep.subr.bf16.mxu1 %v10598_v39  ;;  %v13295_v39 = vpack.c.bf16 %v5305_v15, %v5304_v16  ;;  %v10656_v16 = vpack.c.bf16 %v8352_v49, %v8350_v46  ;;  %v8354_v15 = vld [vmem:[%s14010_s5 + $0x500] sm:$0xff]  ;;  %v8389_v46 = vld [vmem:[%s14010_s5 + $0x608] sm:$0xff]  ;;  %v8391_v49 = vld [vmem:[%s14010_s5 + $0x618] sm:$0xff] }
0x105c   :  { %10761 = vmatpush3.bf16.msra.mxu0 %v13295_v39 }
0x105d   :  { %10601 = vmatpush1.bf16.msra.mxu1 %v10600_v36  ;;  %v8335_v36 = vld [vmem:[%s14010_s5 + $0x468] sm:$0xff] }
0x105e   :  { %10603 = vmatprep.subr.bf16.mxu1 %v10602_v0  ;;  %v5325_v0 = vld [vmem:[%s14012_s13 + $0xa8] sm:$0xff] }
0x105f   :  { %v13311_v19 = vpack.c.bf16 %v5325_v0, %v5324_v18  ;;  %v8358_v18 = vld [vmem:[%s14010_s5 + $0x520] sm:$0xff]  ;;  %v8365_v0 = vld [vmem:[%s14010_s5 + $0x558] sm:$0xff] }
0x1061   :  { %10605 = vmatpush1.bf16.msra.mxu1 %v10604_v20  ;;  %v5308_v20 = vld [vmem:[%s14012_s13 + $0x20] sm:$0xff] }
0x1062   :  { %10607 = vmatprep.subr.bf16.mxu1 %v10606_v17  ;;  %v5309_v17 = vld [vmem:[%s14012_s13 + $0x28] sm:$0xff] }
0x1063   :  { %v13321_v21 = vpack.c.bf16 %v5309_v17, %v5308_v20  ;;  %v8362_v20 = vld [vmem:[%s14010_s5 + $0x540] sm:$0xff]  ;;  %v8364_v17 = vld [vmem:[%s14010_s5 + $0x550] sm:$0xff] }
0x1064   :  { %v10668_v54 = vpack.c.bf16 %v8364_v17, %v8362_v20  ;;  %v8401_v20 = vld [vmem:[%s14010_s5 + $0x668] sm:$0xff]  ;;  %v8403_v17 = vld [vmem:[%s14010_s5 + $0x678] sm:$0xff] }
0x1065   :  { %10609 = vmatpush1.bf16.msra.mxu1 %v10608_v14  ;;  %v8339_v14 = vld [vmem:[%s14010_s5 + $0x488] sm:$0xff] }
0x1066   :  { %10611 = vmatprep.subr.bf16.mxu1 %v10610_v55  ;;  %v8341_v55 = vld [vmem:[%s14010_s5 + $0x498] sm:$0xff] }
0x1067   :  { %v10642_v22 = vpack.c.bf16 %v8341_v55, %v8339_v14  ;;  %v8366_v14 = vld [vmem:[%s14010_s5 + $0x560] sm:$0xff]  ;;  %v8368_v55 = vld [vmem:[%s14010_s5 + $0x570] sm:$0xff] }
0x1069   :  { %10613 = vmatpush1.bf16.msra.mxu1 %v10612_v33  ;;  %v5310_v33 = vld [vmem:[%s14012_s13 + $0x30] sm:$0xff] }
0x106a   :  { %10615 = vmatprep.subr.bf16.mxu1 %v10614_v13  ;;  %v5311_v13 = vld [vmem:[%s14012_s13 + $0x38] sm:$0xff] }
0x106b   :  { %v13335_v63 = vpack.c.bf16 %v5311_v13, %v5310_v33  ;;  %v10672_v33 = vpack.c.bf16 %v8368_v55, %v8366_v14 }
0x106d   :  { %10617 = vmatpush1.bf16.msra.mxu1 %v10616_v30  ;;  %v8343_v30 = vld [vmem:[%s14010_s5 + $0x4a8] sm:$0xff] }
0x106e   :  { %10619 = vmatprep.subr.bf16.mxu1 %v10618_v31  ;;  %v8345_v31 = vld [vmem:[%s14010_s5 + $0x4b8] sm:$0xff] }
0x106f   :  { %v10646_v45 = vpack.c.bf16 %v8345_v31, %v8343_v30  ;;  %v10678_v31 = vpack.c.bf16 %v8377_v6, %v8375_v40  ;;  %v8408_v40 = vld [vmem:[%s14010_s5 + $0x6a0] sm:$0xff]  ;;  %v8410_v6 = vld [vmem:[%s14010_s5 + $0x6b0] sm:$0xff] }
0x1071   :  { %10621 = vmatpush1.bf16.msra.mxu1 %v10620_v47  ;;  %v8342_v47 = vld [vmem:[%s14010_s5 + $0x4a0] sm:$0xff] }
0x1072   :  { %10627 = vmatprep.subr.bf16.mxu1 %v10626_v44  ;;  %v8344_v44 = vld [vmem:[%s14010_s5 + $0x4b0] sm:$0xff] }
0x1073   :  { %v10648_v9 = vpack.c.bf16 %v8344_v44, %v8342_v47  ;;  %v8379_v47 = vld [vmem:[%s14010_s5 + $0x5c8] sm:$0xff]  ;;  %v8381_v44 = vld [vmem:[%s14010_s5 + $0x5d8] sm:$0xff] }
0x1074   :  { %4868 = vmatmul.mubr.f32.vlgmr.msra.gmra.mrb[98].mxu1 %v13201_v37  ;;  %v5323_v37 = vld [vmem:[%s14012_s13 + $0x98] sm:$0xff]  ;;  %v10682_v35 = vpack.c.bf16 %v8381_v44, %v8379_v47  ;;  %v8412_v47 = vld [vmem:[%s14010_s5 + $0x6c0] sm:$0xff]  ;;  %v8414_v44 = vld [vmem:[%s14010_s5 + $0x6d0] sm:$0xff] }
0x1075   :  { %10629 = vmatpush1.bf16.msra.mxu1 %v10628_v51  ;;  %5079 = vmatprep.mubr.f32.mxu1 %v13211_v1  ;;  %v13297_v3 = vpack.c.bf16 %v5323_v37, %v5322_v28  ;;  %v8337_v1 = vld [vmem:[%s14010_s5 + $0x478] sm:$0xff]  ;;  %v8346_v51 = vld [vmem:[%s14010_s5 + $0x4c0] sm:$0xff]  ;;  %v8356_v28 = vld [vmem:[%s14010_s5 + $0x510] sm:$0xff] }
0x1076   :  { %10631 = vmatprep.subr.bf16.mxu1 %v10630_v60  ;;  %v10638_v25 = vpack.c.bf16 %v8337_v1, %v8335_v36  ;;  %v8348_v60 = vld [vmem:[%s14010_s5 + $0x4d0] sm:$0xff]  ;;  %v8359_v37 = vld [vmem:[%s14010_s5 + $0x528] sm:$0xff]  ;;  %v10660_v57 = vpack.c.bf16 %v8356_v28, %v8354_v15  ;;  %v8395_v28 = vld [vmem:[%s14010_s5 + $0x638] sm:$0xff] }
0x1077   :  { %10763 = vmatprep.subr.bf16.mxu0 %v13297_v3  ;;  %v10652_v59 = vpack.c.bf16 %v8348_v60, %v8346_v51  ;;  %v8360_v36 = vld [vmem:[%s14010_s5 + $0x530] sm:$0xff]  ;;  %v8363_v1 = vld [vmem:[%s14010_s5 + $0x548] sm:$0xff]  ;;  %v8385_v60 = vld [vmem:[%s14010_s5 + $0x5f8] sm:$0xff] }
0x1078   :  { %10765 = vmatpush3.bf16.msra.mxu0 %v13307_v38  ;;  %v10666_v62 = vpack.c.bf16 %v8365_v0, %v8363_v1  ;;  %v8383_v51 = vld [vmem:[%s14010_s5 + $0x5e8] sm:$0xff] }
0x1079   :  { %10633 = vmatpush1.bf16.msra.mxu1 %v10632_v52  ;;  %10767 = vmatprep.subr.bf16.mxu0 %v13311_v19  ;;  %v10658_v52 = vpack.c.bf16 %v8357_v58, %v8355_v26  ;;  %v10686_v11 = vpack.c.bf16 %v8385_v60, %v8383_v51  ;;  %v10694_v58 = vpack.c.bf16 %v8391_v49, %v8389_v46  ;;  %v8393_v15 = vld [vmem:[%s14010_s5 + $0x628] sm:$0xff]  ;;  %v8416_v51 = vld [vmem:[%s14010_s5 + $0x6e0] sm:$0xff]  ;;  %v8418_v60 = vld [vmem:[%s14010_s5 + $0x6f0] sm:$0xff] }
0x107a   :  { %10635 = vmatprep.subr.bf16.mxu1 %v10634_v23  ;;  %v8361_v23 = vld [vmem:[%s14010_s5 + $0x538] sm:$0xff]  ;;  %v8420_v46 = vld [vmem:[%s14010_s5 + $0x700] sm:$0xff]  ;;  %v8422_v49 = vld [vmem:[%s14010_s5 + $0x710] sm:$0xff] }
0x107b   :  { %v10662_v53 = vpack.c.bf16 %v8361_v23, %v8359_v37  ;;  %v10698_v23 = vpack.c.bf16 %v8395_v28, %v8393_v15  ;;  %v8424_v15 = vld [vmem:[%s14010_s5 + $0x720] sm:$0xff]  ;;  %v8426_v28 = vld [vmem:[%s14010_s5 + $0x730] sm:$0xff] }
0x107c   :  { %10769 = vmatpush3.bf16.msra.mxu0 %v13321_v21 }
0x107d   :  { %10637 = vmatpush1.bf16.msra.mxu1 %v10636_v5  ;;  %10771 = vmatprep.subr.bf16.mxu0 %v13325_v50  ;;  %v10664_v5 = vpack.c.bf16 %v8360_v36, %v8358_v18  ;;  %v8397_v18 = vld [vmem:[%s14010_s5 + $0x648] sm:$0xff]  ;;  %v8399_v36 = vld [vmem:[%s14010_s5 + $0x658] sm:$0xff] }
0x107e   :  { %10639 = vmatprep.subr.bf16.mxu1 %v10638_v25  ;;  %v8367_v25 = vld [vmem:[%s14010_s5 + $0x568] sm:$0xff]  ;;  %v10702_v0 = vpack.c.bf16 %v8399_v36, %v8397_v18  ;;  %v8428_v18 = vld [vmem:[%s14010_s5 + $0x740] sm:$0xff]  ;;  %v8430_v36 = vld [vmem:[%s14010_s5 + $0x750] sm:$0xff] }
0x107f   :  { %v10670_v43 = vpack.c.bf16 %v8369_v27, %v8367_v25  ;;  %v8400_v27 = vld [vmem:[%s14010_s5 + $0x660] sm:$0xff] }
0x1080   :  { %10773 = vmatpush3.bf16.msra.mxu0 %v13335_v63 }
0x1081   :  { %10641 = vmatpush1.bf16.msra.mxu1 %v10640_v41  ;;  %10775 = vmatprep.subr.bf16.mxu0 %v13338_v48  ;;  %v8371_v41 = vld [vmem:[%s14010_s5 + $0x588] sm:$0xff] }
0x1082   :  { %10643 = vmatprep.subr.bf16.mxu1 %v10642_v22  ;;  %v10674_v13 = vpack.c.bf16 %v8373_v2, %v8371_v41  ;;  %v8370_v22 = vld [vmem:[%s14010_s5 + $0x580] sm:$0xff]  ;;  %v8406_v2 = vld [vmem:[%s14010_s5 + $0x690] sm:$0xff] }
0x1083   :  { %v10676_v30 = vpack.c.bf16 %v8372_v32, %v8370_v22  ;;  %v8404_v41 = vld [vmem:[%s14010_s5 + $0x680] sm:$0xff] }
0x1084   :  { %v10712_v22 = vpack.c.bf16 %v8406_v2, %v8404_v41 }
0x1085   :  { %10645 = vmatpush1.bf16.msra.mxu1 %v10644_v29  ;;  %v8374_v29 = vld [vmem:[%s14010_s5 + $0x5a0] sm:$0xff] }
0x1086   :  { %10647 = vmatprep.subr.bf16.mxu1 %v10646_v45  ;;  %v8376_v45 = vld [vmem:[%s14010_s5 + $0x5b0] sm:$0xff] }
0x1087   :  { %v10680_v8 = vpack.c.bf16 %v8376_v45, %v8374_v29  ;;  %v10716_v29 = vpack.c.bf16 %v8410_v6, %v8408_v40 }
0x1089   :  { %10649 = vmatpush1.bf16.msra.mxu1 %v10648_v9  ;;  %v8378_v9 = vld [vmem:[%s14010_s5 + $0x5c0] sm:$0xff] }
0x108a   :  { %10651 = vmatprep.subr.bf16.mxu1 %v10650_v56  ;;  %v8380_v56 = vld [vmem:[%s14010_s5 + $0x5d0] sm:$0xff] }
0x108b   :  { %v10684_v12 = vpack.c.bf16 %v8380_v56, %v8378_v9  ;;  %v10720_v9 = vpack.c.bf16 %v8414_v44, %v8412_v47 }
0x108d   :  { %10653 = vmatpush1.bf16.msra.mxu1 %v10652_v59  ;;  %v8382_v59 = vld [vmem:[%s14010_s5 + $0x5e0] sm:$0xff] }
0x108e   :  { %10655 = vmatprep.subr.bf16.mxu1 %v10654_v4  ;;  %v8384_v4 = vld [vmem:[%s14010_s5 + $0x5f0] sm:$0xff] }
0x108f   :  { %v10688_v26 = vpack.c.bf16 %v8384_v4, %v8382_v59  ;;  %v10724_v59 = vpack.c.bf16 %v8418_v60, %v8416_v51  ;;  %v5313_v51 = vld [vmem:[%s14012_s13 + $0x48] sm:$0xff] }
0x1091   :  { %10657 = vmatpush1.bf16.msra.mxu1 %v10656_v16  ;;  %v8388_v16 = vld [vmem:[%s14010_s5 + $0x600] sm:$0xff] }
0x1092   :  { %10659 = vmatprep.subr.bf16.mxu1 %v10658_v52  ;;  %v8390_v52 = vld [vmem:[%s14010_s5 + $0x610] sm:$0xff] }
0x1093   :  { %v10696_v37 = vpack.c.bf16 %v8390_v52, %v8388_v16  ;;  %v10728_v16 = vpack.c.bf16 %v8422_v49, %v8420_v46  ;;  %v5315_v46 = vld [vmem:[%s14012_s13 + $0x58] sm:$0xff] }
0x1095   :  { %10661 = vmatpush1.bf16.msra.mxu1 %v10660_v57  ;;  %v8392_v57 = vld [vmem:[%s14010_s5 + $0x620] sm:$0xff] }
0x1096   :  { %10663 = vmatprep.subr.bf16.mxu1 %v10662_v53  ;;  %v8394_v53 = vld [vmem:[%s14010_s5 + $0x630] sm:$0xff] }
0x1097   :  { %v10700_v1 = vpack.c.bf16 %v8394_v53, %v8392_v57  ;;  %v10732_v57 = vpack.c.bf16 %v8426_v28, %v8424_v15  ;;  %v5334_v28 = vld [vmem:[%s14012_s13 + $0xf0] sm:$0xff] }
0x1099   :  { %10665 = vmatpush1.bf16.msra.mxu1 %v10664_v5  ;;  %v8396_v5 = vld [vmem:[%s14010_s5 + $0x640] sm:$0xff] }
0x109a   :  { %10667 = vmatprep.subr.bf16.mxu1 %v10666_v62  ;;  %v8398_v62 = vld [vmem:[%s14010_s5 + $0x650] sm:$0xff] }
0x109b   :  { %v10704_v25 = vpack.c.bf16 %v8398_v62, %v8396_v5  ;;  %v10736_v5 = vpack.c.bf16 %v8430_v36, %v8428_v18  ;;  %v5337_v36 = vld [vmem:[%s14013_s17 + $0x8] sm:$0xff] }
0x109d   :  { %10669 = vmatpush1.bf16.msra.mxu1 %v10668_v54  ;;  %v8402_v54 = vld [vmem:[%s14010_s5 + $0x670] sm:$0xff] }
0x109e   :  { %10671 = vmatprep.subr.bf16.mxu1 %v10670_v43  ;;  %v8405_v43 = vld [vmem:[%s14010_s5 + $0x688] sm:$0xff]  ;;  %v10708_v14 = vpack.c.bf16 %v8402_v54, %v8400_v27 }
0x10a1   :  { %10673 = vmatpush1.bf16.msra.mxu1 %v10672_v33  ;;  %v8409_v33 = vld [vmem:[%s14010_s5 + $0x6a8] sm:$0xff] }
0x10a2   :  { %10675 = vmatprep.subr.bf16.mxu1 %v10674_v13  ;;  %v8411_v13 = vld [vmem:[%s14010_s5 + $0x6b8] sm:$0xff] }
0x10a3   :  { %v10714_v32 = vpack.c.bf16 %v8411_v13, %v8409_v33  ;;  %v8440_v33 = vld [vmem:[%s14010_s5 + $0x7a0] sm:$0xff]  ;;  %v8442_v13 = vld [vmem:[%s14010_s5 + $0x7b0] sm:$0xff] }
0x10a4   :  { %v10748_v40 = vpack.c.bf16 %v8442_v13, %v8440_v33  ;;  %v5341_v33 = vld [vmem:[%s14013_s17 + $0x28] sm:$0xff]  ;;  %v5343_v13 = vld [vmem:[%s14013_s17 + $0x38] sm:$0xff] }
0x10a5   :  { %10677 = vmatpush1.bf16.msra.mxu1 %v10676_v30  ;;  %v8413_v30 = vld [vmem:[%s14010_s5 + $0x6c8] sm:$0xff] }
0x10a6   :  { %10679 = vmatprep.subr.bf16.mxu1 %v10678_v31  ;;  %v8415_v31 = vld [vmem:[%s14010_s5 + $0x6d8] sm:$0xff] }
0x10a7   :  { %v10718_v45 = vpack.c.bf16 %v8415_v31, %v8413_v30  ;;  %v8444_v30 = vld [vmem:[%s14010_s5 + $0x7c0] sm:$0xff]  ;;  %v8446_v31 = vld [vmem:[%s14010_s5 + $0x7d0] sm:$0xff] }
0x10a8   :  { %v10752_v47 = vpack.c.bf16 %v8446_v31, %v8444_v30  ;;  %v5340_v30 = vld [vmem:[%s14013_s17 + $0x20] sm:$0xff]  ;;  %v5342_v31 = vld [vmem:[%s14013_s17 + $0x30] sm:$0xff] }
0x10a9   :  { %10681 = vmatpush1.bf16.msra.mxu1 %v10680_v8  ;;  %v8417_v8 = vld [vmem:[%s14010_s5 + $0x6e8] sm:$0xff] }
0x10aa   :  { %10683 = vmatprep.subr.bf16.mxu1 %v10682_v35  ;;  %v8419_v35 = vld [vmem:[%s14010_s5 + $0x6f8] sm:$0xff] }
0x10ab   :  { %v10722_v56 = vpack.c.bf16 %v8419_v35, %v8417_v8  ;;  %v8448_v8 = vld [vmem:[%s14010_s5 + $0x7e0] sm:$0xff]  ;;  %v8450_v35 = vld [vmem:[%s14010_s5 + $0x7f0] sm:$0xff] }
0x10ad   :  { %10685 = vmatpush1.bf16.msra.mxu1 %v10684_v12  ;;  %v8421_v12 = vld [vmem:[%s14010_s5 + $0x708] sm:$0xff] }
0x10ae   :  { %10687 = vmatprep.subr.bf16.mxu1 %v10686_v11  ;;  %v8423_v11 = vld [vmem:[%s14010_s5 + $0x718] sm:$0xff] }
0x10af   :  { %v10726_v4 = vpack.c.bf16 %v8423_v11, %v8421_v12  ;;  %v5330_v12 = vld [vmem:[%s14012_s13 + $0xd0] sm:$0xff]  ;;  %v5331_v11 = vld [vmem:[%s14012_s13 + $0xd8] sm:$0xff] }
0x10b1   :  { %10689 = vmatpush1.bf16.msra.mxu1 %v10688_v26  ;;  %v8425_v26 = vld [vmem:[%s14010_s5 + $0x728] sm:$0xff] }
0x10b2   :  { %10695 = vmatprep.subr.bf16.mxu1 %v10694_v58  ;;  %v8427_v58 = vld [vmem:[%s14010_s5 + $0x738] sm:$0xff] }
0x10b3   :  { %v10730_v52 = vpack.c.bf16 %v8427_v58, %v8425_v26  ;;  %v5333_v26 = vld [vmem:[%s14012_s13 + $0xe8] sm:$0xff] }
0x10b4   :  { %5080 = vmatmul.mubr.f32.vlgmr.msra.gmra.mrb[98].mxu1 %v13207_v24  ;;  %v10706_v24 = vpack.c.bf16 %v8403_v17, %v8401_v20  ;;  %v8432_v20 = vld [vmem:[%s14010_s5 + $0x760] sm:$0xff]  ;;  %v8434_v17 = vld [vmem:[%s14010_s5 + $0x770] sm:$0xff] }
0x10b5   :  { %10697 = vmatpush1.bf16.msra.mxu1 %v10696_v37  ;;  %5293 = vmatprep.mubr.f32.mxu1 %v13277_v61  ;;  %v8407_v61 = vld [vmem:[%s14010_s5 + $0x698] sm:$0xff]  ;;  %v8429_v37 = vld [vmem:[%s14010_s5 + $0x748] sm:$0xff]  ;;  %v10740_v27 = vpack.c.bf16 %v8434_v17, %v8432_v20 }
0x10b6   :  { %10699 = vmatprep.subr.bf16.mxu1 %v10698_v23  ;;  %v10710_v55 = vpack.c.bf16 %v8407_v61, %v8405_v43  ;;  %v8431_v23 = vld [vmem:[%s14010_s5 + $0x758] sm:$0xff]  ;;  %v8436_v43 = vld [vmem:[%s14010_s5 + $0x780] sm:$0xff]  ;;  %v8438_v61 = vld [vmem:[%s14010_s5 + $0x790] sm:$0xff] }
0x10b7   :  { %v10734_v53 = vpack.c.bf16 %v8431_v23, %v8429_v37  ;;  %v10744_v41 = vpack.c.bf16 %v8438_v61, %v8436_v43  ;;  %v5335_v37 = vld [vmem:[%s14012_s13 + $0xf8] sm:$0xff]  ;;  %v5318_v23 = vld [vmem:[%s14012_s13 + $0x70] sm:$0xff] }
0x10b9   :  { %10701 = vmatpush1.bf16.msra.mxu1 %v10700_v1  ;;  %v8433_v1 = vld [vmem:[%s14010_s5 + $0x768] sm:$0xff] }
0x10ba   :  { %10703 = vmatprep.subr.bf16.mxu1 %v10702_v0  ;;  %v8435_v0 = vld [vmem:[%s14010_s5 + $0x778] sm:$0xff] }
0x10bb   :  { %v10738_v62 = vpack.c.bf16 %v8435_v0, %v8433_v1  ;;  %v5339_v1 = vld [vmem:[%s14013_s17 + $0x18] sm:$0xff] }
0x10bc   :  { %v13488_v0 = vpack.c.bf16 %v5339_v1, %v5337_v36  ;;  %v5874_v36 = vld [vmem:[%s14014_s21 + $0x80] sm:$0xff]  ;;  %v5875_v1 = vld [vmem:[%s14014_s21 + $0x88] sm:$0xff] }
0x10bd   :  { %10705 = vmatpush1.bf16.msra.mxu1 %v10704_v25  ;;  %v8437_v25 = vld [vmem:[%s14010_s5 + $0x788] sm:$0xff] }
0x10be   :  { %10707 = vmatprep.subr.bf16.mxu1 %v10706_v24  ;;  %v8439_v24 = vld [vmem:[%s14010_s5 + $0x798] sm:$0xff] }
0x10bf   :  { %v10742_v54 = vpack.c.bf16 %v8439_v24, %v8437_v25 }
0x10c1   :  { %10709 = vmatpush1.bf16.msra.mxu1 %v10708_v14  ;;  %v8441_v14 = vld [vmem:[%s14010_s5 + $0x7a8] sm:$0xff] }
0x10c2   :  { %10711 = vmatprep.subr.bf16.mxu1 %v10710_v55  ;;  %v8443_v55 = vld [vmem:[%s14010_s5 + $0x7b8] sm:$0xff] }
0x10c3   :  { %v10746_v2 = vpack.c.bf16 %v8443_v55, %v8441_v14  ;;  %v5336_v55 = vld [vmem:[%s14013_s17] sm:$0xff] }
0x10c5   :  { %10713 = vmatpush1.bf16.msra.mxu1 %v10712_v22  ;;  %v8445_v22 = vld [vmem:[%s14010_s5 + $0x7c8] sm:$0xff] }
0x10c6   :  { %10715 = vmatprep.subr.bf16.mxu1 %v10714_v32  ;;  %v8447_v32 = vld [vmem:[%s14010_s5 + $0x7d8] sm:$0xff] }
0x10c7   :  { %v10750_v6 = vpack.c.bf16 %v8447_v32, %v8445_v22 }
0x10c9   :  { %10717 = vmatpush1.bf16.msra.mxu1 %v10716_v29  ;;  %v8449_v29 = vld [vmem:[%s14010_s5 + $0x7e8] sm:$0xff] }
0x10ca   :  { %10719 = vmatprep.subr.bf16.mxu1 %v10718_v45  ;;  %v8451_v45 = vld [vmem:[%s14010_s5 + $0x7f8] sm:$0xff] }
0x10cb   :  { %v10754_v44 = vpack.c.bf16 %v8451_v45, %v8449_v29  ;;  %v5345_v29 = vld [vmem:[%s14013_s17 + $0x48] sm:$0xff]  ;;  %v5347_v45 = vld [vmem:[%s14013_s17 + $0x58] sm:$0xff] }
0x10cd   :  { %10721 = vmatpush1.bf16.msra.mxu1 %v10720_v9  ;;  %v10756_v9 = vpack.c.bf16 %v8450_v35, %v8448_v8  ;;  %v5344_v8 = vld [vmem:[%s14013_s17 + $0x40] sm:$0xff]  ;;  %v5346_v35 = vld [vmem:[%s14013_s17 + $0x50] sm:$0xff] }
0x10ce   :  { %10723 = vmatprep.subr.bf16.mxu1 %v10722_v56  ;;  %v5312_v56 = vld [vmem:[%s14012_s13 + $0x40] sm:$0xff] }
0x10cf   :  { %v13453_v60 = vpack.c.bf16 %v5313_v51, %v5312_v56  ;;  %v5349_v56 = vld [vmem:[%s14013_s17 + $0x68] sm:$0xff]  ;;  %v5351_v51 = vld [vmem:[%s14013_s17 + $0x78] sm:$0xff] }
0x10d1   :  { %10725 = vmatpush1.bf16.msra.mxu1 %v10724_v59  ;;  %10777 = vmatpush3.bf16.msra.mxu0 %v13453_v60  ;;  %v13458_v59 = vpack.c.bf16 %v5331_v11, %v5330_v12  ;;  %v13527_v12 = vpack.c.bf16 %v5351_v51, %v5349_v56  ;;  %v5348_v11 = vld [vmem:[%s14013_s17 + $0x60] sm:$0xff]  ;;  %v5883_v51 = vld [vmem:[%s14014_s21 + $0xc8] sm:$0xff] }
0x10d2   :  { %10727 = vmatprep.subr.bf16.mxu1 %v10726_v4  ;;  %v5314_v4 = vld [vmem:[%s14012_s13 + $0x50] sm:$0xff]  ;;  %v5882_v56 = vld [vmem:[%s14014_s21 + $0xc0] sm:$0xff] }
0x10d3   :  { %v13462_v49 = vpack.c.bf16 %v5315_v46, %v5314_v4  ;;  %10779 = vmatprep.subr.bf16.mxu0 %v13458_v59  ;;  %v5350_v4 = vld [vmem:[%s14013_s17 + $0x70] sm:$0xff] }
0x10d4   :  { %v13531_v46 = vpack.c.bf16 %v5350_v4, %v5348_v11  ;;  %v10918_v11 = vpack.c.bf16 %v5883_v51, %v5882_v56  ;;  %v5866_v4 = vld [vmem:[%s14014_s21 + $0x40] sm:$0xff] }
0x10d5   :  { %10729 = vmatpush1.bf16.msra.mxu1 %v10728_v16  ;;  %10781 = vmatpush3.bf16.msra.mxu0 %v13462_v49  ;;  %v5316_v16 = vld [vmem:[%s14012_s13 + $0x60] sm:$0xff] }
0x10d6   :  { %10731 = vmatprep.subr.bf16.mxu1 %v10730_v52  ;;  %v5317_v52 = vld [vmem:[%s14012_s13 + $0x68] sm:$0xff] }
0x10d7   :  { %v13472_v15 = vpack.c.bf16 %v5317_v52, %v5316_v16 }
0x10d9   :  { %10733 = vmatpush1.bf16.msra.mxu1 %v10732_v57  ;;  %v13479_v57 = vpack.c.bf16 %v5335_v37, %v5334_v28 }
0x10da   :  { %10735 = vmatprep.subr.bf16.mxu1 %v10734_v53  ;;  %v5319_v53 = vld [vmem:[%s14012_s13 + $0x78] sm:$0xff] }
0x10db   :  { %v13482_v18 = vpack.c.bf16 %v5319_v53, %v5318_v23 }
0x10dd   :  { %10737 = vmatpush1.bf16.msra.mxu1 %v10736_v5 }
0x10de   :  { %10739 = vmatprep.subr.bf16.mxu1 %v10738_v62 }
0x10e1   :  { %10741 = vmatpush1.bf16.msra.mxu1 %v10740_v27 }
0x10e2   :  { %10743 = vmatprep.subr.bf16.mxu1 %v10742_v54 }
0x10e5   :  { %10745 = vmatpush1.bf16.msra.mxu1 %v10744_v41  ;;  %v5338_v41 = vld [vmem:[%s14013_s17 + $0x10] sm:$0xff] }
0x10e6   :  { %10747 = vmatprep.subr.bf16.mxu1 %v10746_v2  ;;  %v13503_v32 = vpack.c.bf16 %v5338_v41, %v5336_v55 }
0x10e9   :  { %10749 = vmatpush1.bf16.msra.mxu1 %v10748_v40 }
0x10ea   :  { %10751 = vmatprep.subr.bf16.mxu1 %v10750_v6  ;;  %v13505_v6 = vpack.c.bf16 %v5343_v13, %v5341_v33  ;;  %v5302_v33 = vld [vmem:[%s14015_s25] sm:$0x1] }
0x10ed   :  { %10753 = vmatpush1.bf16.msra.mxu1 %v10752_v47  ;;  %v13512_v47 = vpack.c.bf16 %v5342_v31, %v5340_v30  ;;  %v5862_v31 = vld [vmem:[%s14014_s21 + $0x20] sm:$0xff] }
0x10ee   :  { %10755 = vmatprep.subr.bf16.mxu1 %v10754_v44  ;;  %v13516_v44 = vpack.c.bf16 %v5347_v45, %v5345_v29  ;;  %v5863_v29 = vld [vmem:[%s14014_s21 + $0x28] sm:$0xff] }
0x10ef   :  { %v10912_v45 = vpack.c.bf16 %v5863_v29, %v5862_v31  ;;  %v8478_v31 = vld [vmem:[%s14014_s21 + $0x1a0] sm:$0xff]  ;;  %v8479_v29 = vld [vmem:[%s14014_s21 + $0x1a8] sm:$0xff] }
0x10f1   :  { %10757 = vmatpush1.bf16.msra.mxu1 %v10756_v9  ;;  %v13521_v9 = vpack.c.bf16 %v5346_v35, %v5344_v8  ;;  %v5864_v8 = vld [vmem:[%s14014_s21 + $0x30] sm:$0xff] }
0x10f4   :  { %5294 = vmatmul.mubr.f32.vlgmr.msra.gmra.mrb[98].mxu1 %v13273_v42  ;;  %v5332_v42 = vld [vmem:[%s14012_s13 + $0xe0] sm:$0xff] }
0x10f5   :  { %v13468_v58 = vpack.c.bf16 %v5333_v26, %v5332_v42 }
0x10f7   :  { %10783 = vmatprep.subr.bf16.mxu0 %v13468_v58 }
0x10f8   :  { %10785 = vmatpush3.bf16.msra.mxu0 %v13472_v15 }
0x10f9   :  { %10787 = vmatprep.subr.bf16.mxu0 %v13479_v57 }
0x10fc   :  { %10789 = vmatpush3.bf16.msra.mxu0 %v13482_v18 }
0x10fd   :  { %10791 = vmatprep.subr.bf16.mxu0 %v13488_v0 }
0x11c7   :  { %v13491_v5 = vpop.f32.mrb[98].mxu1 }
0x11c8   :  { %v5352_v62 = vrot.slane %v13491_v5, 4  ;;  %v13494_v20 = vpop.f32.mrb[99].mxu1 }
0x11c9   :  { %v5358_v17 = vrot.slane %v13494_v20, 4 }
0x11ca   :  { %v5353_v25 = vadd.f32 %v5352_v62, %v13491_v5  ;;  %v10902_v62 = vpack.c.bf16 %v5875_v1, %v5874_v36 }
0x11cb   :  { %v5359_v24 = vadd.f32 %v5358_v17, %v13494_v20  ;;  %v5876_v17 = vld [vmem:[%s14014_s21 + $0x90] sm:$0xff] }
0x11cc   :  { %v5354_v27 = vrot.slane %v5353_v25, 2  ;;  %10903 = vmatprep.subr.bf16.mxu1 %v10902_v62 }
0x11cd   :  { %v5360_v54 = vrot.slane %v5359_v24, 2 }
0x11ce   :  { %v5355_v43 = vadd.f32 %v5354_v27, %v5353_v25  ;;  %v5877_v25 = vld [vmem:[%s14014_s21 + $0x98] sm:$0xff] }
0x11cf   :  { %v5361_v61 = vadd.f32 %v5360_v54, %v5359_v24  ;;  %v10906_v27 = vpack.c.bf16 %v5877_v25, %v5876_v17  ;;  %v5860_v54 = vld [vmem:[%s14014_s21 + $0x10] sm:$0xff] }
0x11d0   :  { %v5356_v14 = vrot.slane %v5355_v43, 1 }
0x11d1   :  { %v5362_v2 = vrot.slane %v5361_v61, 1 }
0x11d2   :  { %v5357_v40 = vadd.f32 %v5356_v14, %v5355_v43  ;;  %v5861_v43 = vld [vmem:[%s14014_s21 + $0x18] sm:$0xff] }
0x11d3   :  { %v5363_v22 = vadd.f32 %v5362_v2, %v5361_v61  ;;  %v10908_v61 = vpack.c.bf16 %v5861_v43, %v5860_v54 }
0x11d5   :  { %5428 = vmatprep.mubr.f32.mxu0 %v5363_v22 }
0x11d6   :  { %5429 = vmatmul.mubr.f32.vlgmr.msra.gmra.mrb[74].mxu0 %v5357_v40  ;;  %v5303_v40 = vld [vmem:[%s14016_s29] sm:$0x1] }
0x11d7   :  { %10793 = vmatpush1.bf16.msra.mxu0 %v13503_v32  ;;  %5503 = vmatprep.mubr.f32.mxu0 %v11368_v7 }
0x11d8   :  { %10795 = vmatprep.subr.bf16.mxu0 %v13505_v6 }
0x11db   :  { %10797 = vmatpush1.bf16.msra.mxu0 %v13512_v47 }
0x11dc   :  { %10799 = vmatprep.subr.bf16.mxu0 %v13516_v44 }
0x11df   :  { %10801 = vmatpush1.bf16.msra.mxu0 %v13521_v9 }
0x11e0   :  { %10803 = vmatprep.subr.bf16.mxu0 %v13527_v12 }
0x11e3   :  { %10805 = vmatpush1.bf16.msra.mxu0 %v13531_v46 }
0x11e4   :  { %10807 = vmatprep.subr.bf16.mxu0 %v13290_v34 }
0x12a9   :  { %v8792_v42 = vpop.f32.mrb[74].mxu0 }
0x12aa   :  { %v8793_v26 = vpop.f32.mrb[75].mxu0 }
0x12ab   :  { %v8794_v16 = vadd.f32 %v8793_v26, %v8792_v42  ;;  %v5884_v42 = vld [vmem:[%s14014_s21 + $0xd0] sm:$0xff]  ;;  %v5885_v26 = vld [vmem:[%s14014_s21 + $0xd8] sm:$0xff] }
0x12ad   :  { %v5435_v52 = vmul.f32 0.03125, %v8794_v16 }
0x12af   :  { %8452 = vmatmul.mubr.msk.f32.vlgmr.msra.gmra.mrb[76].mxu0 %vm495_vm0, %v5435_v52  ;;  %v10922_v52 = vpack.c.bf16 %v5885_v26, %v5884_v42 }
0x12b0   :  { %10809 = vmatpush3.bf16.msra.mxu0 %v13295_v39 }
0x12b1   :  { %10811 = vmatprep.subr.bf16.mxu0 %v13297_v3 }
0x12b4   :  { %10813 = vmatpush3.bf16.msra.mxu0 %v13307_v38 }
0x12b5   :  { %10815 = vmatprep.subr.bf16.mxu0 %v13311_v19 }
0x12b8   :  { %10817 = vmatpush3.bf16.msra.mxu0 %v13321_v21 }
0x12b9   :  { %10819 = vmatprep.subr.bf16.mxu0 %v13325_v50 }
0x12bc   :  { %10821 = vmatpush3.bf16.msra.mxu0 %v13335_v63 }
0x12bd   :  { %10823 = vmatprep.subr.bf16.mxu0 %v13338_v48 }
0x12c0   :  { %10825 = vmatpush3.bf16.msra.mxu0 %v13453_v60 }
0x12c1   :  { %10827 = vmatprep.subr.bf16.mxu0 %v13458_v59 }
0x12c4   :  { %10829 = vmatpush3.bf16.msra.mxu0 %v13462_v49 }
0x12c5   :  { %10831 = vmatprep.subr.bf16.mxu0 %v13468_v58 }
0x12c8   :  { %10833 = vmatpush3.bf16.msra.mxu0 %v13472_v15 }
0x12c9   :  { %10835 = vmatprep.subr.bf16.mxu0 %v13479_v57 }
0x12cc   :  { %10837 = vmatpush3.bf16.msra.mxu0 %v13482_v18 }
0x12cd   :  { %10839 = vmatprep.subr.bf16.mxu0 %v13488_v0 }
0x1382   :  { %v5505_v34 = vpop.f32.mrb[76].mxu0 }
0x1383   :  { %v5513_v39 = vrot.slane %v5505_v34, %v12597_v10  ;;  %v5507_v3 = vpop.f32.mrb[77].mxu0  ;;  %v5868_v34 = vld [vmem:[%s14014_s21 + $0x50] sm:$0xff] }
0x1384   :  { %v5517_v38 = vrot.slane %v5507_v3, %v12597_v10 }
0x1385   :  { %v13556_v19 = vsub.f32 %v13491_v5, %v5513_v39  ;;  %v5858_v5 = vld [vmem:[%s14014_s21] sm:$0xff]  ;;  %v5869_v39 = vld [vmem:[%s14014_s21 + $0x58] sm:$0xff] }
0x1386   :  { %v13559_v21 = vsub.f32 %v13494_v20, %v5517_v38  ;;  %v5859_v20 = vld [vmem:[%s14014_s21 + $0x8] sm:$0xff]  ;;  %v10924_v3 = vpack.c.bf16 %v5869_v39, %v5868_v34  ;;  %v5886_v38 = vld [vmem:[%s14014_s21 + $0xe0] sm:$0xff]  ;;  %v8484_v34 = vld [vmem:[%s14014_s21 + $0x1d0] sm:$0xff] }
0x1387   :  { %v5520_v50 = vmul.f32 %v13556_v19, %v13556_v19  ;;  %v10904_v24 = vpack.c.bf16 %v5859_v20, %v5858_v5  ;;  %v8485_v39 = vld [vmem:[%s14014_s21 + $0x1d8] sm:$0xff] }
0x1388   :  { %v5521_v63 = vmul.f32 %v13559_v21, %v13559_v21 }
0x1389   :  { %v5522_v48 = vrot.slane %v5520_v50, 4  ;;  %10905 = vmatpush3.bf16.msra.mxu1 %v10904_v24 }
0x138a   :  { %v5528_v60 = vrot.slane %v5521_v63, 4  ;;  %10907 = vmatprep.subr.bf16.mxu1 %v10906_v27 }
0x138b   :  { %v5523_v59 = vadd.f32 %v5522_v48, %v5520_v50  ;;  %v5887_v50 = vld [vmem:[%s14014_s21 + $0xe8] sm:$0xff]  ;;  %v5870_v48 = vld [vmem:[%s14014_s21 + $0x60] sm:$0xff] }
0x138c   :  { %v5529_v49 = vadd.f32 %v5528_v60, %v5521_v63  ;;  %v10926_v63 = vpack.c.bf16 %v5887_v50, %v5886_v38  ;;  %v5871_v60 = vld [vmem:[%s14014_s21 + $0x68] sm:$0xff]  ;;  %v10890_v38 = vpack.c.bf16 %v8485_v39, %v8484_v34  ;;  %v8468_v50 = vld [vmem:[%s14014_s21 + $0x150] sm:$0xff]  ;;  %v8515_v39 = vld [vmem:[%s14014_s21 + $0x2b8] sm:$0xff] }
0x138d   :  { %v5524_v58 = vrot.slane %v5523_v59, 2  ;;  %10909 = vmatpush3.bf16.msra.mxu1 %v10908_v61  ;;  %v8474_v61 = vld [vmem:[%s14014_s21 + $0x180] sm:$0xff]  ;;  %v8514_v34 = vld [vmem:[%s14014_s21 + $0x2b0] sm:$0xff] }
0x138e   :  { %v5530_v15 = vrot.slane %v5529_v49, 2 }
0x138f   :  { %v5525_v28 = vadd.f32 %v5524_v58, %v5523_v59  ;;  %v10928_v59 = vpack.c.bf16 %v5871_v60, %v5870_v48  ;;  %v5889_v58 = vld [vmem:[%s14014_s21 + $0xf8] sm:$0xff]  ;;  %v8486_v48 = vld [vmem:[%s14014_s21 + $0x1e0] sm:$0xff]  ;;  %v8487_v60 = vld [vmem:[%s14014_s21 + $0x1e8] sm:$0xff] }
0x1390   :  { %v5531_v37 = vadd.f32 %v5530_v15, %v5529_v49  ;;  %v5888_v49 = vld [vmem:[%s14014_s21 + $0xf0] sm:$0xff] }
0x1391   :  { %v5526_v23 = vrot.slane %v5525_v28, 1  ;;  %v10930_v15 = vpack.c.bf16 %v5889_v58, %v5888_v49  ;;  %v10894_v49 = vpack.c.bf16 %v8487_v60, %v8486_v48  ;;  %v8470_v58 = vld [vmem:[%s14014_s21 + $0x160] sm:$0xff]  ;;  %v8551_v48 = vld [vmem:[%s14014_s21 + $0x3c8] sm:$0xff] }
0x1392   :  { %v5532_v57 = vrot.slane %v5531_v37, 1 }
0x1393   :  { %v5527_v18 = vadd.f32 %v5526_v23, %v5525_v28  ;;  %v5872_v28 = vld [vmem:[%s14014_s21 + $0x70] sm:$0xff] }
0x1394   :  { %v5533_v53 = vadd.f32 %v5532_v57, %v5531_v37  ;;  %v5873_v37 = vld [vmem:[%s14014_s21 + $0x78] sm:$0xff] }
0x1395   :  { %v10932_v23 = vpack.c.bf16 %v5873_v37, %v5872_v28  ;;  %v8488_v28 = vld [vmem:[%s14014_s21 + $0x1f0] sm:$0xff]  ;;  %v8489_v37 = vld [vmem:[%s14014_s21 + $0x1f8] sm:$0xff] }
0x1396   :  { %5598 = vmatprep.mubr.f32.mxu0 %v5533_v53 }
0x1397   :  { %5599 = vmatmul.mubr.f32.vlgmr.msra.gmra.mrb[78].mxu0 %v5527_v18 }
0x1398   :  { %10841 = vmatpush1.bf16.msra.mxu0 %v13503_v32  ;;  %5675 = vmatprep.mubr.f32.mxu0 %v11368_v7 }
0x1399   :  { %10843 = vmatprep.subr.bf16.mxu0 %v13505_v6 }
0x139c   :  { %10845 = vmatpush1.bf16.msra.mxu0 %v13512_v47 }
0x139d   :  { %10847 = vmatprep.subr.bf16.mxu0 %v13516_v44 }
0x13a0   :  { %10849 = vmatpush1.bf16.msra.mxu0 %v13521_v9 }
0x13a1   :  { %10851 = vmatprep.subr.bf16.mxu0 %v13527_v12 }
0x13a4   :  { %10853 = vmatpush1.bf16.msra.mxu0 %v13531_v46 }
0x13a5   :  { %10855 = vmatprep.subr.bf16.mxu0 %v13488_v0 }
0x146a   :  { %v8827_v14 = vpop.f32.mrb[78].mxu0 }
0x146b   :  { %v8828_v55 = vpop.f32.mrb[79].mxu0 }
0x146c   :  { %v8829_v0 = vadd.f32 %v8828_v55, %v8827_v14  ;;  %v8475_v14 = vld [vmem:[%s14014_s21 + $0x188] sm:$0xff]  ;;  %v5782_v55 = vld [vmem:[%s14017_s14] sm:$0xf] }
0x146e   :  { %v5604_v41 = vmul.f32 0.03125, %v8829_v0  ;;  %v10870_v0 = vpack.c.bf16 %v8475_v14, %v8474_v61  ;;  %v8545_v61 = vld [vmem:[%s14014_s21 + $0x398] sm:$0xff] }
0x1470   :  { %v5605_v2 = vadd.f32 1e-05, %v5604_v41  ;;  %v8458_v41 = vld [vmem:[%s14014_s21 + $0x100] sm:$0xff] }
0x1472   :  { %11311 = vrsqrt.f32 %v5605_v2  ;;  %v8459_v2 = vld [vmem:[%s14014_s21 + $0x108] sm:$0xff] }
0x147c   :  { %v11312_v13 = vpop.eup %11311 }
0x147d   :  { %v5607_v22 = vmul.f32 %v11312_v13, %v5302_v33  ;;  %v8476_v33 = vld [vmem:[%s14014_s21 + $0x190] sm:$0xff]  ;;  %v8477_v13 = vld [vmem:[%s14014_s21 + $0x198] sm:$0xff] }
0x147f   :  { %8453 = vmatmul.mubr.msk.f32.vlgmr.msra.gmra.mrb[80].mxu0 %vm495_vm0, %v5607_v22  ;;  %v8456_v22 = vld [vmem:[%s14017_s14 + $0x4] sm:$0xf] }
0x1480   :  { %10857 = vmatpush1.bf16.msra.mxu0 %v13503_v32  ;;  %5759 = vmatprep.mubr.f32.mxu0 %v11368_v7  ;;  %v5878_v32 = vld [vmem:[%s14014_s21 + $0xa0] sm:$0xff] }
0x1481   :  { %10859 = vmatprep.subr.bf16.mxu0 %v13505_v6  ;;  %v5879_v6 = vld [vmem:[%s14014_s21 + $0xa8] sm:$0xff] }
0x1482   :  { %v10910_v30 = vpack.c.bf16 %v5879_v6, %v5878_v32  ;;  %v10874_v32 = vpack.c.bf16 %v8477_v13, %v8476_v33  ;;  %v8460_v6 = vld [vmem:[%s14014_s21 + $0x110] sm:$0xff] }
0x1483   :  { %v8510_v13 = vld [vmem:[%s14014_s21 + $0x290] sm:$0xff] }
0x1484   :  { %10861 = vmatpush1.bf16.msra.mxu0 %v13512_v47  ;;  %10911 = vmatprep.subr.bf16.mxu1 %v10910_v30  ;;  %v5880_v47 = vld [vmem:[%s14014_s21 + $0xb0] sm:$0xff]  ;;  %v8461_v30 = vld [vmem:[%s14014_s21 + $0x118] sm:$0xff] }
0x1485   :  { %10863 = vmatprep.subr.bf16.mxu0 %v13516_v44  ;;  %v5881_v44 = vld [vmem:[%s14014_s21 + $0xb8] sm:$0xff]  ;;  %10913 = vmatpush3.bf16.msra.mxu1 %v10912_v45  ;;  %v10876_v45 = vpack.c.bf16 %v8461_v30, %v8460_v6  ;;  %v8546_v30 = vld [vmem:[%s14014_s21 + $0x3a0] sm:$0xff] }
0x1486   :  { %v10914_v35 = vpack.c.bf16 %v5881_v44, %v5880_v47  ;;  %v10878_v47 = vpack.c.bf16 %v8479_v29, %v8478_v31  ;;  %v8462_v44 = vld [vmem:[%s14014_s21 + $0x120] sm:$0xff]  ;;  %v8529_v6 = vld [vmem:[%s14014_s21 + $0x318] sm:$0xff]  ;;  %v8547_v31 = vld [vmem:[%s14014_s21 + $0x3a8] sm:$0xff] }
0x1487   :  { %v8490_v29 = vld [vmem:[%s14017_s14 + $0x8] sm:$0xf] }
0x1488   :  { %10865 = vmatpush1.bf16.msra.mxu0 %v13521_v9  ;;  %v5865_v9 = vld [vmem:[%s14014_s21 + $0x38] sm:$0xff]  ;;  %10915 = vmatprep.subr.bf16.mxu1 %v10914_v35  ;;  %v8480_v35 = vld [vmem:[%s14014_s21 + $0x1b0] sm:$0xff] }
0x1489   :  { %10867 = vmatprep.subr.bf16.mxu0 %v13527_v12  ;;  %v10916_v12 = vpack.c.bf16 %v5865_v9, %v5864_v8  ;;  %v8463_v8 = vld [vmem:[%s14014_s21 + $0x128] sm:$0xff]  ;;  %v8481_v9 = vld [vmem:[%s14014_s21 + $0x1b8] sm:$0xff] }
0x148a   :  { %v10880_v56 = vpack.c.bf16 %v8463_v8, %v8462_v44  ;;  %v10882_v51 = vpack.c.bf16 %v8481_v9, %v8480_v35  ;;  %v8494_v44 = vld [vmem:[%s14014_s21 + $0x210] sm:$0xff]  ;;  %v8495_v8 = vld [vmem:[%s14014_s21 + $0x218] sm:$0xff]  ;;  %v8512_v9 = vld [vmem:[%s14014_s21 + $0x2a0] sm:$0xff] }
0x148b   :  { %10917 = vmatpush3.bf16.msra.mxu1 %v10916_v12  ;;  %v8464_v12 = vld [vmem:[%s14014_s21 + $0x130] sm:$0xff] }
0x148c   :  { %10869 = vmatpush1.bf16.msra.mxu0 %v13531_v46  ;;  %v5867_v46 = vld [vmem:[%s14014_s21 + $0x48] sm:$0xff]  ;;  %10919 = vmatprep.subr.bf16.mxu1 %v10918_v11  ;;  %v8465_v11 = vld [vmem:[%s14014_s21 + $0x138] sm:$0xff] }
0x148d   :  { %v10920_v16 = vpack.c.bf16 %v5867_v46, %v5866_v4  ;;  %v8482_v4 = vld [vmem:[%s14014_s21 + $0x1c0] sm:$0xff]  ;;  %v8483_v46 = vld [vmem:[%s14014_s21 + $0x1c8] sm:$0xff]  ;;  %v10884_v42 = vpack.c.bf16 %v8465_v11, %v8464_v12  ;;  %v8548_v11 = vld [vmem:[%s14014_s21 + $0x3b0] sm:$0xff] }
0x148e   :  { %v10886_v26 = vpack.c.bf16 %v8483_v46, %v8482_v4  ;;  %v8531_v12 = vld [vmem:[%s14014_s21 + $0x328] sm:$0xff]  ;;  %v8549_v4 = vld [vmem:[%s14014_s21 + $0x3b8] sm:$0xff]  ;;  %v10940_v46 = vpack.c.bf16 %v8495_v8, %v8494_v44  ;;  %v8556_v44 = vld [vmem:[%s14014_s21 + $0x3f0] sm:$0xff] }
0x148f   :  { %8454 = vmatmul.mubr.msk.f32.vlgmr.msra.gmra.mrb[82].mxu0 %vm495_vm0, %v5303_v40  ;;  %10921 = vmatpush3.bf16.msra.mxu1 %v10920_v16  ;;  %v10872_v40 = vpack.c.bf16 %v8459_v2, %v8458_v41  ;;  %v8466_v16 = vld [vmem:[%s14014_s21 + $0x140] sm:$0xff]  ;;  %v8493_v2 = vld [vmem:[%s14014_s21 + $0x208] sm:$0xff]  ;;  %v8557_v8 = vld [vmem:[%s14014_s21 + $0x3f8] sm:$0xff] }
0x1490   :  { %5851 = vmatprep.mubr.f32.mxu0 %v11368_v7  ;;  %10923 = vmatprep.subr.bf16.mxu1 %v10922_v52  ;;  %v8467_v52 = vld [vmem:[%s14014_s21 + $0x148] sm:$0xff]  ;;  %v8492_v41 = vld [vmem:[%s14014_s21 + $0x200] sm:$0xff] }
0x1493   :  { %10925 = vmatpush3.bf16.msra.mxu1 %v10924_v3  ;;  %v10888_v3 = vpack.c.bf16 %v8467_v52, %v8466_v16  ;;  %v8497_v16 = vld [vmem:[%s14014_s21 + $0x228] sm:$0xff] }
0x1494   :  { %10927 = vmatprep.subr.bf16.mxu1 %v10926_v63  ;;  %v8469_v63 = vld [vmem:[%s14014_s21 + $0x158] sm:$0xff] }
0x1497   :  { %10929 = vmatpush3.bf16.msra.mxu1 %v10928_v59  ;;  %v10892_v59 = vpack.c.bf16 %v8469_v63, %v8468_v50  ;;  %v8533_v50 = vld [vmem:[%s14014_s21 + $0x338] sm:$0xff]  ;;  %v8550_v63 = vld [vmem:[%s14014_s21 + $0x3c0] sm:$0xff] }
0x1498   :  { %10931 = vmatprep.subr.bf16.mxu1 %v10930_v15  ;;  %v8471_v15 = vld [vmem:[%s14014_s21 + $0x168] sm:$0xff] }
0x149b   :  { %10933 = vmatpush3.bf16.msra.mxu1 %v10932_v23  ;;  %v10896_v23 = vpack.c.bf16 %v8471_v15, %v8470_v58  ;;  %v8499_v58 = vld [vmem:[%s14014_s21 + $0x238] sm:$0xff] }
0x1552   :  { %v5677_v57 = vpop.f32.mrb[80].mxu0 }
0x1553   :  { %v5679_v53 = vpop.f32.mrb[81].mxu0  ;;  %v5685_v18 = vrot.slane %v5677_v57, %v12597_v10  ;;  %v10898_v57 = vpack.c.bf16 %v8489_v37, %v8488_v28  ;;  %v8516_v28 = vld [vmem:[%s14014_s21 + $0x2c0] sm:$0xff]  ;;  %v8517_v37 = vld [vmem:[%s14014_s21 + $0x2c8] sm:$0xff] }
0x1554   :  { %v5689_v36 = vrot.slane %v5679_v53, %v12597_v10  ;;  %v8472_v53 = vld [vmem:[%s14014_s21 + $0x170] sm:$0xff] }
0x1555   :  { %v5690_v5 = vmul.f32 %v5685_v18, %v13556_v19  ;;  %v8473_v18 = vld [vmem:[%s14014_s21 + $0x178] sm:$0xff] }
0x1556   :  { %v5691_v17 = vmul.f32 %v5689_v36, %v13559_v21  ;;  %v10900_v36 = vpack.c.bf16 %v8473_v18, %v8472_v53  ;;  %v8535_v53 = vld [vmem:[%s14014_s21 + $0x348] sm:$0xff] }
0x1562   :  { %v5761_v1 = vpop.f32.mrb[82].mxu0 }
0x1563   :  { %v5769_v62 = vrot.slane %v5761_v1, %v12597_v10  ;;  %v5763_v20 = vpop.f32.mrb[83].mxu0  ;;  %v8542_v1 = vld [vmem:[%s14014_s21 + $0x380] sm:$0xff] }
0x1564   :  { %v5773_v25 = vrot.slane %v5763_v20, %v12597_v10 }
0x1565   :  { %v5774_v24 = vadd.f32 %v5769_v62, %v5690_v5  ;;  %v8543_v5 = vld [vmem:[%s14014_s21 + $0x388] sm:$0xff] }
0x1566   :  { %v5775_v27 = vadd.f32 %v5773_v25, %v5691_v17  ;;  %v8508_v17 = vld [vmem:[%s14014_s21 + $0x280] sm:$0xff]  ;;  %v10966_v25 = vpack.c.bf16 %v8543_v5, %v8542_v1  ;;  %v8501_v5 = vld [vmem:[%s14014_s21 + $0x248] sm:$0xff] }
0x1567   :  { %v5778_v54 = vmul.f32 0.2, %v5774_v24  ;;  %vm5776_vm2 = vcmp.gt.f32.partialorder %v5774_v24, 0.0  ;;  %v8500_v1 = vld [vmem:[%s14014_s21 + $0x240] sm:$0xff] }
0x1568   :  { %v5779_v43 = vmul.f32 0.2, %v5775_v27  ;;  %vm5777_vm1 = vcmp.gt.f32.partialorder %v5775_v27, 0.0 }
0x1569   :  { %v13632_v21 = vsel %vm5776_vm2, %v5774_v24, %v5778_v54  ;;  %v8509_v24 = vld [vmem:[%s14014_s21 + $0x288] sm:$0xff] }
0x156a   :  { %v13627_v19 = vsel %vm5777_vm1, %v5775_v27, %v5779_v43  ;;  %v8526_v27 = vld [vmem:[%s14014_s21 + $0x300] sm:$0xff]  ;;  %v8527_v54 = vld [vmem:[%s14014_s21 + $0x308] sm:$0xff]  ;;  %v8544_v43 = vld [vmem:[%s14014_s21 + $0x390] sm:$0xff] }
0x156b   :  { %5787 = vmatprep.subr.mxu0 %v13627_v19  ;;  %6324 = vmatprep.subr.mxu1 %v13627_v19  ;;  %v10968_v33 = vpack.c.bf16 %v8527_v54, %v8526_v27  ;;  %v8552_v27 = vld [vmem:[%s14014_s21 + $0x3d0] sm:$0xff]  ;;  %v8553_v54 = vld [vmem:[%s14014_s21 + $0x3d8] sm:$0xff] }
0x156c   :  { %5788 = vmatpush1.msra.mxu0 %v13632_v21 }
0x156d   :  { %8455 = vmatmul.mubr.msk.f32.vlgmr.msra.gmra.mrb[84].mxu0 %vm5783_vm3, %v5782_v55  ;;  %5895 = vmatprep.subr.mxu0 %v13627_v19 }
0x156e   :  { %5896 = vmatpush1.msra.mxu0 %v13632_v21  ;;  %5959 = vmatprep.mubr.f32.mxu0 %v11368_v7 }
0x156f   :  { %10871 = vmatprep.subr.bf16.mxu0 %v10870_v0  ;;  %v10934_v0 = vpack.c.bf16 %v8509_v24, %v8508_v17  ;;  %v8519_v17 = vld [vmem:[%s14014_s21 + $0x2d8] sm:$0xff] }
0x1571   :  { %8457 = vmatmul.mubr.msk.f32.vlgmr.msra.gmra.mrb[86].mxu0 %vm5783_vm3, %v8456_v22  ;;  %v8511_v22 = vld [vmem:[%s14014_s21 + $0x298] sm:$0xff] }
0x1572   :  { %10873 = vmatpush3.bf16.msra.mxu0 %v10872_v40  ;;  %v10970_v40 = vpack.c.bf16 %v8545_v61, %v8544_v43  ;;  %v10986_v43 = vpack.c.bf16 %v8553_v54, %v8552_v27  ;;  %v8536_v61 = vld [vmem:[%s14014_s21 + $0x350] sm:$0xff]  ;;  %v6513_v54 = vld [vmem:[%s11515_s8 + $0x60] sm:$0xff] }
0x1573   :  { %10875 = vmatprep.subr.bf16.mxu0 %v10874_v32  ;;  %v8528_v32 = vld [vmem:[%s14014_s21 + $0x310] sm:$0xff] }
0x1574   :  { %v10972_v35 = vpack.c.bf16 %v8529_v6, %v8528_v32  ;;  %v8538_v32 = vld [vmem:[%s14014_s21 + $0x360] sm:$0xff] }
0x1576   :  { %10877 = vmatpush3.bf16.msra.mxu0 %v10876_v45  ;;  %v10936_v45 = vpack.c.bf16 %v8493_v2, %v8492_v41  ;;  %v8554_v2 = vld [vmem:[%s14014_s21 + $0x3e0] sm:$0xff] }
0x1577   :  { %10879 = vmatprep.subr.bf16.mxu0 %v10878_v47  ;;  %v10938_v47 = vpack.c.bf16 %v8511_v22, %v8510_v13  ;;  %v8520_v13 = vld [vmem:[%s14014_s21 + $0x2e0] sm:$0xff]  ;;  %v8521_v22 = vld [vmem:[%s14014_s21 + $0x2e8] sm:$0xff] }
0x1578   :  { %v10958_v6 = vpack.c.bf16 %v8521_v22, %v8520_v13  ;;  %v6520_v13 = vld [vmem:[%s11520_s30 + $0x18] sm:$0xff] }
0x157a   :  { %10881 = vmatpush3.bf16.msra.mxu0 %v10880_v56  ;;  %v8513_v56 = vld [vmem:[%s14014_s21 + $0x2a8] sm:$0xff] }
0x157b   :  { %10883 = vmatprep.subr.bf16.mxu0 %v10882_v51  ;;  %v10974_v51 = vpack.c.bf16 %v8547_v31, %v8546_v30  ;;  %v8504_v30 = vld [vmem:[%s14014_s21 + $0x260] sm:$0xff]  ;;  %v8505_v31 = vld [vmem:[%s14014_s21 + $0x268] sm:$0xff] }
0x157e   :  { %10885 = vmatpush3.bf16.msra.mxu0 %v10884_v42  ;;  %v10942_v42 = vpack.c.bf16 %v8513_v56, %v8512_v9  ;;  %v8523_v9 = vld [vmem:[%s14014_s21 + $0x2f8] sm:$0xff]  ;;  %v10994_v56 = vpack.c.bf16 %v8557_v8, %v8556_v44 }
0x157f   :  { %10887 = vmatprep.subr.bf16.mxu0 %v10886_v26  ;;  %v8496_v26 = vld [vmem:[%s14014_s21 + $0x220] sm:$0xff] }
0x1580   :  { %v10944_v60 = vpack.c.bf16 %v8497_v16, %v8496_v26  ;;  %v11369_v26 = vmov 0.0|0.0  }
0x1582   :  { %10889 = vmatpush3.bf16.msra.mxu0 %v10888_v3  ;;  %v10978_v3 = vpack.c.bf16 %v8549_v4, %v8548_v11  ;;  %v8507_v11 = vld [vmem:[%s14014_s21 + $0x278] sm:$0xff] }
0x1583   :  { %10891 = vmatprep.subr.bf16.mxu0 %v10890_v38  ;;  %v8532_v38 = vld [vmem:[%s14014_s21 + $0x330] sm:$0xff]  ;;  %v8541_v4 = vld [vmem:[%s14014_s21 + $0x378] sm:$0xff] }
0x1584   :  { %v10980_v15 = vpack.c.bf16 %v8533_v50, %v8532_v38 }
0x1586   :  { %10893 = vmatpush3.bf16.msra.mxu0 %v10892_v59  ;;  %v10946_v59 = vpack.c.bf16 %v8515_v39, %v8514_v34 }
0x1587   :  { %10895 = vmatprep.subr.bf16.mxu0 %v10894_v49  ;;  %v8498_v49 = vld [vmem:[%s14014_s21 + $0x230] sm:$0xff] }
0x1588   :  { %v10948_v18 = vpack.c.bf16 %v8499_v58, %v8498_v49 }
0x158a   :  { %10897 = vmatpush3.bf16.msra.mxu0 %v10896_v23  ;;  %v10982_v23 = vpack.c.bf16 %v8551_v48, %v8550_v63  ;;  %v6501_v63 = vld [vmem:[%s11515_s8] sm:$0xff]  ;;  %v6502_v48 = vld [vmem:[%s11515_s8 + $0x8] sm:$0xff] }
0x158b   :  { %10899 = vmatprep.subr.bf16.mxu0 %v10898_v57  ;;  %v8534_v57 = vld [vmem:[%s14014_s21 + $0x340] sm:$0xff]  ;;  %v13750_v58 = vpack.c.bf16 %v6502_v48, %v6501_v63 }
0x158e   :  { %10901 = vmatpush3.bf16.msra.mxu0 %v10900_v36  ;;  %v10950_v36 = vpack.c.bf16 %v8517_v37, %v8516_v28  ;;  %v6503_v28 = vld [vmem:[%s11515_s8 + $0x10] sm:$0xff]  ;;  %v6504_v37 = vld [vmem:[%s11515_s8 + $0x18] sm:$0xff] }
0x158f   :  { %6144 = vmatprep.subr.mxu0 %v13627_v19  ;;  %v8524_v19 = vld [vmem:[%s14017_s14 + $0xc] sm:$0xf] }
0x1640   :  { %v5853_v62 = vpop.f32.mrb[84].mxu0 }
0x1641   :  { %v5855_v20 = vpop.f32.mrb[85].mxu0 }
0x1642   :  { %6133 = vmatprep.mubr.f32.mxu1 %v5855_v20  ;;  %v8518_v20 = vld [vmem:[%s14014_s21 + $0x2d0] sm:$0xff] }
0x1643   :  { %6134 = vmatmul.mubr.f32.vlgmr.msra.gmra.mrb[100].mxu1 %v5853_v62  ;;  %v10984_v62 = vpack.c.bf16 %v8535_v53, %v8534_v57  ;;  %v10954_v24 = vpack.c.bf16 %v8519_v17, %v8518_v20  ;;  %v6505_v57 = vld [vmem:[%s11515_s8 + $0x20] sm:$0xff]  ;;  %v6506_v53 = vld [vmem:[%s11515_s8 + $0x28] sm:$0xff] }
0x1644   :  { %6325 = vmatpush1.msra.mxu1 %v13632_v21  ;;  %v5961_v14 = vpop.f32.mrb[86].mxu0  ;;  %6388 = vmatprep.mubr.f32.mxu1 %v11368_v7  ;;  %v6510_v20 = vld [vmem:[%s11515_s8 + $0x48] sm:$0xff] }
0x1645   :  { %v5963_v55 = vpop.f32.mrb[87].mxu0  ;;  %10967 = vmatprep.subr.bf16.mxu1 %v10966_v25  ;;  %v10952_v25 = vpack.c.bf16 %v8501_v5, %v8500_v1  ;;  %v6508_v1 = vld [vmem:[%s11515_s8 + $0x38] sm:$0xff] }
0x1646   :  { %6063 = vmatprep.mubr.f32.mxu0 %v5963_v55  ;;  %v8503_v55 = vld [vmem:[%s14014_s21 + $0x258] sm:$0xff] }
0x1647   :  { %6064 = vmatmul.mubr.f32.vlgmr.msra.gmra.mrb[88].mxu0 %v5961_v14  ;;  %8525 = vmatmul.mubr.msk.f32.vlgmr.msra.gmra.mrb[102].mxu1 %vm5783_vm3, %v8524_v19  ;;  %v8537_v14 = vld [vmem:[%s14014_s21 + $0x358] sm:$0xff]  ;;  %v8502_v19 = vld [vmem:[%s14014_s21 + $0x250] sm:$0xff] }
0x1648   :  { %6145 = vmatpush1.msra.mxu0 %v13632_v21  ;;  %6208 = vmatprep.mubr.f32.mxu0 %v11368_v7  ;;  %v8530_v21 = vld [vmem:[%s14014_s21 + $0x320] sm:$0xff]  ;;  %v10956_v41 = vpack.c.bf16 %v8503_v55, %v8502_v19  ;;  %v6516_v19 = vld [vmem:[%s11515_s8 + $0x78] sm:$0xff] }
0x1649   :  { %10935 = vmatprep.subr.bf16.mxu0 %v10934_v0  ;;  %10969 = vmatpush3.bf16.msra.mxu1 %v10968_v33  ;;  %v10976_v52 = vpack.c.bf16 %v8531_v12, %v8530_v21  ;;  %v10988_v0 = vpack.c.bf16 %v8537_v14, %v8536_v61  ;;  %v8555_v33 = vld [vmem:[%s14014_s21 + $0x3e8] sm:$0xff]  ;;  %v8506_v12 = vld [vmem:[%s14014_s21 + $0x270] sm:$0xff] }
0x164a   :  { %10971 = vmatprep.subr.bf16.mxu1 %v10970_v40  ;;  %v10990_v40 = vpack.c.bf16 %v8555_v33, %v8554_v2  ;;  %v6515_v14 = vld [vmem:[%s11515_s8 + $0x70] sm:$0xff] }
0x164b   :  { %8491 = vmatmul.mubr.msk.f32.vlgmr.msra.gmra.mrb[90].mxu0 %vm5783_vm3, %v8490_v29  ;;  %v8539_v29 = vld [vmem:[%s14014_s21 + $0x368] sm:$0xff]  ;;  %v11020_v55 = vpack.c.bf16 %v6516_v19, %v6515_v14  ;;  %v6519_v2 = vld [vmem:[%s11520_s30 + $0x10] sm:$0xff]  ;;  %v6924_v19 = vld [vmem:[%s14019_s24] sm:$0x3] }
0x164c   :  { %10937 = vmatpush3.bf16.msra.mxu0 %v10936_v45  ;;  %v10960_v45 = vpack.c.bf16 %v8505_v31, %v8504_v30  ;;  %v13795_v22 = vpack.c.bf16 %v6520_v13, %v6519_v2  ;;  %v8582_v2 = vld [vmem:[%s14019_s24 + $0x4] sm:$0x3] }
0x164d   :  { %10939 = vmatprep.subr.bf16.mxu0 %v10938_v47  ;;  %10973 = vmatpush3.bf16.msra.mxu1 %v10972_v35  ;;  %v10992_v47 = vpack.c.bf16 %v8539_v29, %v8538_v32  ;;  %v8522_v35 = vld [vmem:[%s14014_s21 + $0x2f0] sm:$0xff]  ;;  %v6522_v32 = vld [vmem:[%s11520_s30 + $0x28] sm:$0xff] }
0x164e   :  { %10975 = vmatprep.subr.bf16.mxu1 %v10974_v51  ;;  %v8540_v51 = vld [vmem:[%s14014_s21 + $0x370] sm:$0xff]  ;;  %v10962_v21 = vpack.c.bf16 %v8523_v9, %v8522_v35 }
0x1650   :  { %10941 = vmatpush3.bf16.msra.mxu0 %v10940_v46  ;;  %v10964_v46 = vpack.c.bf16 %v8507_v11, %v8506_v12 }
0x1651   :  { %10943 = vmatprep.subr.bf16.mxu0 %v10942_v42  ;;  %10977 = vmatpush3.bf16.msra.mxu1 %v10976_v52  ;;  %v10996_v42 = vpack.c.bf16 %v8541_v4, %v8540_v51 }
0x1652   :  { %10979 = vmatprep.subr.bf16.mxu1 %v10978_v3 }
0x1654   :  { %10945 = vmatpush3.bf16.msra.mxu0 %v10944_v60 }
0x1655   :  { %10947 = vmatprep.subr.bf16.mxu0 %v10946_v59  ;;  %10981 = vmatpush3.bf16.msra.mxu1 %v10980_v15 }
0x1656   :  { %10983 = vmatprep.subr.bf16.mxu1 %v10982_v23  ;;  %v13755_v23 = vpack.c.bf16 %v6504_v37, %v6503_v28 }
0x1658   :  { %10949 = vmatpush3.bf16.msra.mxu0 %v10948_v18  ;;  %v13761_v18 = vpack.c.bf16 %v6506_v53, %v6505_v57 }
0x1659   :  { %10951 = vmatprep.subr.bf16.mxu0 %v10950_v36  ;;  %10985 = vmatpush3.bf16.msra.mxu1 %v10984_v62  ;;  %v6507_v36 = vld [vmem:[%s11515_s8 + $0x30] sm:$0xff]  ;;  %v6509_v62 = vld [vmem:[%s11515_s8 + $0x40] sm:$0xff] }
0x165a   :  { %10987 = vmatprep.subr.bf16.mxu1 %v10986_v43  ;;  %v13768_v5 = vpack.c.bf16 %v6508_v1, %v6507_v36  ;;  %v11011_v17 = vpack.c.bf16 %v6510_v20, %v6509_v62  ;;  %v6514_v43 = vld [vmem:[%s11515_s8 + $0x68] sm:$0xff]  ;;  %v6500_v62 = vld [vmem:[%s11510_s3] sm:$0x1]  ;;  %s11371_s3 = smov [#allocation2]  }
0x165b   :  { %v11017_v61 = vpack.c.bf16 %v6514_v43, %v6513_v54  ;;  %s7584_s6 = sshll.u32 %s11371_s3, 4  ;;  %s7585_s6 = int_to_ptr.vmem [resolvable:$true] %s7584_s6 }
0x165c   :  { %10953 = vmatpush3.bf16.msra.mxu0 %v10952_v25  ;;  %v6511_v25 = vld [vmem:[%s11515_s8 + $0x50] sm:$0xff]  ;;  %s11315_s12 = scalar_lea.vmem %s7585_s6, 32  ;;  %p11320_p1 = scmp.lt.s32.totalorder %s7585_s6, %s7585_s6 }
0x165d   :  { %10955 = vmatprep.subr.bf16.mxu0 %v10954_v24  ;;  %10989 = vmatpush3.bf16.msra.mxu1 %v10988_v0  ;;  %v6512_v24 = vld [vmem:[%s11515_s8 + $0x58] sm:$0xff]  ;;  %v6517_v0 = vld [vmem:[%s11520_s30] sm:$0xff]  ;;  %s14018_s8 = sld [smem:[#allocation16_spill]]  ;;  %p11316_p0 = scmp.ne.s32.totalorder %s7585_s6, %s11315_s12 }
0x165e   :  { %10991 = vmatprep.subr.bf16.mxu1 %v10990_v40  ;;  %v11014_v27 = vpack.c.bf16 %v6512_v24, %v6511_v25  ;;  %v6521_v40 = vld [vmem:[%s11520_s30 + $0x20] sm:$0xff]  ;;  %p11321_p2 = scmp.lt.s32.totalorder %s11315_s12, %s11315_s12 }
0x1660   :  { %10957 = vmatpush3.bf16.msra.mxu0 %v10956_v41  ;;  %v6518_v41 = vld [vmem:[%s11520_s30 + $0x8] sm:$0xff]  ;;  %p11322_p3 = por %p11321_p2, %p11320_p1 }
0x1661   :  { %10959 = vmatprep.subr.bf16.mxu0 %v10958_v6  ;;  %10993 = vmatpush3.bf16.msra.mxu1 %v10992_v47  ;;  %v13791_v33 = vpack.c.bf16 %v6518_v41, %v6517_v0  ;;  %v13801_v6 = vpack.c.bf16 %v6522_v32, %v6521_v40  ;;  %v8601_v40 = vld [vmem:[%s14019_s24 + $0x6] sm:$0x3] }
0x1662   :  { %10995 = vmatprep.subr.bf16.mxu1 %v10994_v56  ;;  %p11323_p4 = pnand %p11322_p3, %p11316_p0 }
0x1663   :  { %v6499_v36 = vld [vmem:[%s14018_s8] sm:$0x1] }
0x1664   :  { %10961 = vmatpush3.bf16.msra.mxu0 %v10960_v45 }
0x1665   :  { %10963 = vmatprep.subr.bf16.mxu0 %v10962_v21  ;;  %10997 = vmatpush3.bf16.msra.mxu1 %v10996_v42  ;;  %v6524_v42 = vld [vmem:[%s11520_s30 + $0x38] sm:$0xff] }
0x1666   :  { %11022 = vmatprep.subr.bf16.mxu1 %v11369_v26 }
0x1668   :  { %10965 = vmatpush3.bf16.msra.mxu0 %v10964_v46  ;;  %v6523_v46 = vld [vmem:[%s11520_s30 + $0x30] sm:$0xff]  ;;  %s14020_s30 = sld [smem:[#allocation10_spill]] }
0x1669   :  { %10998 = vmatprep.subr.bf16.mxu0 %v11369_v26 }
0x166e   :  { %v8566_v0 = vld [vmem:[%s14020_s30 + $0x80] sm:$0xff]  ;;  %v8567_v41 = vld [vmem:[%s14020_s30 + $0x88] sm:$0xff]  ;;  %v8568_v13 = vld [vmem:[%s14020_s30 + $0x90] sm:$0xff] }
0x1716   :  { %v8897_v16 = vpop.f32.mrb[100].mxu1 }
0x1717   :  { %v8898_v52 = vpop.f32.mrb[101].mxu1 }
0x1718   :  { %v8899_v34 = vadd.f32 %v8898_v52, %v8897_v16  ;;  %v11032_v16 = vpack.c.bf16 %v6524_v42, %v6523_v46  ;;  %v8581_v46 = vld [vmem:[%s14020_s30 + $0xf8] sm:$0xff] }
0x171a   :  { %v8862_v39 = vpop.f32.mrb[88].mxu0  ;;  %v6390_v3 = vpop.f32.mrb[102].mxu1 }
0x171b   :  { %v8863_v38 = vpop.f32.mrb[89].mxu0  ;;  %v6392_v50 = vpop.f32.mrb[103].mxu1 }
0x171c   :  { %v8864_v60 = vadd.f32 %v8863_v38, %v8862_v39  ;;  %6492 = vmatprep.mubr.f32.mxu1 %v6392_v50 }
0x171d   :  { %6493 = vmatmul.mubr.f32.vlgmr.msra.gmra.mrb[104].mxu1 %v6390_v3 }
0x171e   :  { %v13748_v59 = vadd.f32 %v8899_v34, %v8864_v60  ;;  %v6210_v49 = vpop.f32.mrb[90].mxu0  ;;  %9158 = vmatprep.mubr.msk.f32.mxu1 %vm11370_vm4, %v11368_v7  ;;  %11024 = vmatpush3.bf16.msra.mxu1 %v13791_v33 }
0x171f   :  { %v6212_v15 = vpop.f32.mrb[91].mxu0  ;;  %11025 = vmatprep.subr.bf16.mxu1 %v11369_v26 }
0x1720   :  { %6312 = vmatprep.mubr.f32.mxu0 %v6212_v15 }
0x1721   :  { %6313 = vmatmul.mubr.f32.vlgmr.msra.gmra.mrb[92].mxu0 %v6210_v49 }
0x1722   :  { %11000 = vmatpush3.bf16.msra.mxu0 %v13750_v58  ;;  %9139 = vmatprep.mubr.msk.f32.mxu0 %vm11370_vm4, %v11368_v7 }
0x1723   :  { %11001 = vmatprep.subr.bf16.mxu0 %v11369_v26  ;;  %11027 = vmatpush3.bf16.msra.mxu1 %v13795_v22 }
0x1724   :  { %11028 = vmatprep.subr.bf16.mxu1 %v11369_v26 }
0x1726   :  { %11003 = vmatpush3.bf16.msra.mxu0 %v13755_v23 }
0x1727   :  { %11004 = vmatprep.subr.bf16.mxu0 %v11369_v26  ;;  %11030 = vmatpush3.bf16.msra.mxu1 %v13801_v6 }
0x1728   :  { %11031 = vmatprep.subr.bf16.mxu1 %v11369_v26 }
0x172a   :  { %11006 = vmatpush3.bf16.msra.mxu0 %v13761_v18 }
0x172b   :  { %11007 = vmatprep.subr.bf16.mxu0 %v11369_v26  ;;  %11033 = vmatpush3.bf16.msra.mxu1 %v11032_v16 }
0x172c   :  { %11058 = vmatprep.subr.bf16.mxu1 %v11369_v26 }
0x172e   :  { %11009 = vmatpush3.bf16.msra.mxu0 %v13768_v5 }
0x172f   :  { %11010 = vmatprep.subr.bf16.mxu0 %v11369_v26 }
0x1732   :  { %11012 = vmatpush3.bf16.msra.mxu0 %v11011_v17 }
0x1733   :  { %11013 = vmatprep.subr.bf16.mxu0 %v11369_v26 }
0x1736   :  { %11015 = vmatpush3.bf16.msra.mxu0 %v11014_v27 }
0x1737   :  { %11016 = vmatprep.subr.bf16.mxu0 %v11369_v26 }
0x173a   :  { %11018 = vmatpush3.bf16.msra.mxu0 %v11017_v61 }
0x173b   :  { %11019 = vmatprep.subr.bf16.mxu0 %v11369_v26 }
0x173e   :  { %11021 = vmatpush3.bf16.msra.mxu0 %v11020_v55 }
0x173f   :  { %11034 = vmatprep.subr.bf16.mxu0 %v11369_v26 }
0x17f0   :  { %v8967_v30 = vpop.f32.mrb[104].mxu1 }
0x17f1   :  { %v8968_v31 = vpop.f32.mrb[105].mxu1 }
0x17f2   :  { %v8969_v29 = vadd.f32 %v8968_v31, %v8967_v30  ;;  %v8571_v30 = vld [vmem:[%s14020_s30 + $0xa8] sm:$0xff] }
0x17f4   :  { %v8932_v45 = vpop.f32.mrb[92].mxu0 }
0x17f5   :  { %v8933_v47 = vpop.f32.mrb[93].mxu0 }
0x17f6   :  { %v8934_v44 = vadd.f32 %v8933_v47, %v8932_v45  ;;  %v8573_v45 = vld [vmem:[%s14020_s30 + $0xb8] sm:$0xff] }
0x17f8   :  { %v6318_v8 = vadd.f32 %v8934_v44, %v13748_v59  ;;  %v8574_v44 = vld [vmem:[%s14020_s30 + $0xc0] sm:$0xff] }
0x17fa   :  { %v6498_v35 = vadd.f32 %v8969_v29, %v6318_v8  ;;  %v8572_v29 = vld [vmem:[%s14020_s30 + $0xb0] sm:$0xff]  ;;  %v8575_v8 = vld [vmem:[%s14020_s30 + $0xc8] sm:$0xff] }
0x17fb   :  { %v11092_v47 = vpack.c.bf16 %v8573_v45, %v8572_v29  ;;  %v8595_v29 = vld [vmem:[%s14020_s30 + $0x150] sm:$0xff]  ;;  %v8596_v45 = vld [vmem:[%s14020_s30 + $0x158] sm:$0xff] }
0x17fc   :  { %v6526_v9 = vsel %vm6525_vm5, %v6498_v35, 0.0 }
0x17fd   :  { %v6527_v56 = vrot.slane %v6526_v9, 4 }
0x17ff   :  { %v6528_v51 = vadd.f32 %v6527_v56, %v6526_v9  ;;  %v8576_v9 = vld [vmem:[%s14020_s30 + $0xd0] sm:$0xff]  ;;  %v8577_v56 = vld [vmem:[%s14020_s30 + $0xd8] sm:$0xff] }
0x1801   :  { %v6529_v21 = vrot.slane %v6528_v51, 2 }
0x1803   :  { %v6530_v12 = vadd.f32 %v6529_v21, %v6528_v51  ;;  %v11098_v51 = vpack.c.bf16 %v8577_v56, %v8576_v9  ;;  %v8578_v21 = vld [vmem:[%s14020_s30 + $0xe0] sm:$0xff]  ;;  %v8599_v9 = vld [vmem:[%s14020_s30 + $0x170] sm:$0xff]  ;;  %v8600_v56 = vld [vmem:[%s14020_s30 + $0x178] sm:$0xff] }
0x1805   :  { %v6531_v11 = vrot.slane %v6530_v12, 1 }
0x1807   :  { %v6532_v4 = vadd.f32 %v6531_v11, %v6530_v12  ;;  %v8579_v12 = vld [vmem:[%s14020_s30 + $0xe8] sm:$0xff] }
0x1808   :  { %v11101_v11 = vpack.c.bf16 %v8579_v12, %v8578_v21  ;;  %v8604_v21 = vld [vmem:[%s14020_s30 + $0x180] sm:$0xff]  ;;  %v8605_v12 = vld [vmem:[%s14020_s30 + $0x188] sm:$0xff] }
0x1809   :  { %9140 = vmatmul.mubr.f32.vlgmr.msra.gmra.mrb[94].mxu0 %v6532_v4  ;;  %v8580_v4 = vld [vmem:[%s14020_s30 + $0xf0] sm:$0xff] }
0x180a   :  { %11036 = vmatpush3.bf16.msra.mxu0 %v13750_v58  ;;  %9193 = vmatprep.mubr.msk.f32.mxu0 %vm11370_vm4, %v11368_v7  ;;  %v11104_v42 = vpack.c.bf16 %v8581_v46, %v8580_v4  ;;  %v8606_v4 = vld [vmem:[%s14020_s30 + $0x190] sm:$0xff]  ;;  %v8607_v46 = vld [vmem:[%s14020_s30 + $0x198] sm:$0xff] }
0x180b   :  { %11037 = vmatprep.subr.bf16.mxu0 %v11369_v26 }
0x180e   :  { %11039 = vmatpush3.bf16.msra.mxu0 %v13755_v23 }
0x180f   :  { %11040 = vmatprep.subr.bf16.mxu0 %v11369_v26 }
0x1812   :  { %11042 = vmatpush3.bf16.msra.mxu0 %v13761_v18 }
0x1813   :  { %11043 = vmatprep.subr.bf16.mxu0 %v11369_v26 }
0x1816   :  { %11045 = vmatpush3.bf16.msra.mxu0 %v13768_v5 }
0x1817   :  { %11046 = vmatprep.subr.bf16.mxu0 %v11369_v26 }
0x181a   :  { %11048 = vmatpush3.bf16.msra.mxu0 %v11011_v17 }
0x181b   :  { %11049 = vmatprep.subr.bf16.mxu0 %v11369_v26 }
0x181e   :  { %11051 = vmatpush3.bf16.msra.mxu0 %v11014_v27 }
0x181f   :  { %11052 = vmatprep.subr.bf16.mxu0 %v11369_v26 }
0x1822   :  { %11054 = vmatpush3.bf16.msra.mxu0 %v11017_v61 }
0x1823   :  { %11055 = vmatprep.subr.bf16.mxu0 %v11369_v26 }
0x1826   :  { %11057 = vmatpush3.bf16.msra.mxu0 %v11020_v55 }
0x1827   :  { %9234 = vmatprep.subr.mxu0 %v11368_v7 }
0x18dc   :  { %v6599_v52 = vpop.f32.mrb[94].mxu0 }
0x18dd   :  { %v6604_v34 = vmul.f32 0.125, %v6599_v52  ;;  %v9141_v39 = vpop.f32.mrb[95].mxu0  ;;  %v7003_v52 = vld [vmem:[%s14020_s30 + $0x8] sm:$0xff] }
0x18df   :  { %9159 = vmatmul.mubr.msk.f32.vlgmr.msra.gmra.mrb[106].mxu1 %vm495_vm0, %v6604_v34 }
0x18e0   :  { %11060 = vmatpush3.bf16.msra.mxu1 %v13791_v33  ;;  %9212 = vmatprep.mubr.msk.f32.mxu1 %vm11370_vm4, %v11368_v7 }
0x18e1   :  { %11061 = vmatprep.subr.bf16.mxu1 %v11369_v26 }
0x18e4   :  { %11063 = vmatpush3.bf16.msra.mxu1 %v13795_v22 }
0x18e5   :  { %11064 = vmatprep.subr.bf16.mxu1 %v11369_v26 }
0x18e8   :  { %11066 = vmatpush3.bf16.msra.mxu1 %v13801_v6 }
0x18e9   :  { %11067 = vmatprep.subr.bf16.mxu1 %v11369_v26 }
0x18ec   :  { %11069 = vmatpush3.bf16.msra.mxu1 %v11032_v16 }
0x18ed   :  { %11070 = vmatprep.subr.bf16.mxu1 %v11369_v26 }
0x19b2   :  { %v6674_v3 = vpop.f32.mrb[106].mxu1 }
0x19b3   :  { %v6681_v38 = vrot.slane %v6674_v3, %v12597_v10  ;;  %v9160_v50 = vpop.f32.mrb[107].mxu1 }
0x19b4   :  { %v7004_v50 = vld [vmem:[%s14020_s30 + $0x10] sm:$0xff] }
0x19b5   :  { %v6682_v63 = vsub.f32 %v6498_v35, %v6681_v38  ;;  %v11095_v35 = vpack.c.bf16 %v8575_v8, %v8574_v44  ;;  %v8597_v44 = vld [vmem:[%s14020_s30 + $0x160] sm:$0xff]  ;;  %v8598_v8 = vld [vmem:[%s14020_s30 + $0x168] sm:$0xff] }
0x19b7   :  { %v6683_v48 = vmul.f32 %v6682_v63, %v6682_v63 }
0x19b9   :  { %v6684_v60 = vsel %vm6525_vm5, %v6683_v48, 0.0 }
0x19ba   :  { %v6685_v59 = vrot.slane %v6684_v60, 4 }
0x19bc   :  { %v6686_v49 = vadd.f32 %v6685_v59, %v6684_v60 }
0x19be   :  { %v6687_v58 = vrot.slane %v6686_v49, 2 }
0x19c0   :  { %v6688_v15 = vadd.f32 %v6687_v58, %v6686_v49 }
0x19c2   :  { %v6689_v28 = vrot.slane %v6688_v15, 1 }
0x19c4   :  { %v6690_v37 = vadd.f32 %v6689_v28, %v6688_v15  ;;  %v7006_v15 = vld [vmem:[%s14020_s30 + $0x20] sm:$0xff]  ;;  %v7007_v28 = vld [vmem:[%s14020_s30 + $0x28] sm:$0xff] }
0x19c6   :  { %9194 = vmatmul.mubr.f32.vlgmr.msra.gmra.mrb[96].mxu0 %v6690_v37 }
0x19c7   :  { %9236 = vmatprep.mubr.msk.f32.mxu0 %vm11370_vm4, %v11368_v7 }
0x1a99   :  { %v6757_v23 = vpop.f32.mrb[96].mxu0 }
0x1a9a   :  { %v6761_v57 = vmul.f32 0.125, %v6757_v23  ;;  %v9195_v53 = vpop.f32.mrb[97].mxu0  ;;  %v11113_v23 = vpack.c.bf16 %v7007_v28, %v7006_v15  ;;  %v8617_v15 = vld [vmem:[%s14020_s30 + $0x1e8] sm:$0xff] }
0x1a9b   :  { %v7009_v53 = vld [vmem:[%s14020_s30 + $0x38] sm:$0xff] }
0x1a9c   :  { %v6762_v18 = vadd.f32 1e-05, %v6761_v57  ;;  %v7008_v57 = vld [vmem:[%s14020_s30 + $0x30] sm:$0xff] }
0x1a9e   :  { %11313 = vrsqrt.f32 %v6762_v18  ;;  %v11116_v18 = vpack.c.bf16 %v7009_v53, %v7008_v57 }
0x1aa8   :  { %v11314_v1 = vpop.eup %11313 }
0x1aa9   :  { %v6764_v5 = vmul.f32 %v11314_v1, %v6499_v36  ;;  %v7010_v36 = vld [vmem:[%s14020_s30 + $0x40] sm:$0xff]  ;;  %v7011_v1 = vld [vmem:[%s14020_s30 + $0x48] sm:$0xff] }
0x1aab   :  { %9213 = vmatmul.mubr.msk.f32.vlgmr.msra.gmra.mrb[108].mxu1 %vm495_vm0, %v6764_v5  ;;  %v11119_v5 = vpack.c.bf16 %v7011_v1, %v7010_v36 }
0x1aac   :  { %11072 = vmatpush3.bf16.msra.mxu1 %v13791_v33  ;;  %9231 = vmatprep.mubr.msk.f32.mxu1 %vm11370_vm4, %v11368_v7  ;;  %v11083_v33 = vpack.c.bf16 %v8567_v41, %v8566_v0  ;;  %v8587_v0 = vld [vmem:[%s14020_s30 + $0x110] sm:$0xff]  ;;  %v8588_v41 = vld [vmem:[%s14020_s30 + $0x118] sm:$0xff] }
0x1aad   :  { %11073 = vmatprep.subr.bf16.mxu1 %v11369_v26 }
0x1ab0   :  { %11075 = vmatpush3.bf16.msra.mxu1 %v13795_v22  ;;  %v8569_v22 = vld [vmem:[%s14020_s30 + $0x98] sm:$0xff] }
0x1ab1   :  { %11076 = vmatprep.subr.bf16.mxu1 %v11369_v26  ;;  %v11086_v32 = vpack.c.bf16 %v8569_v22, %v8568_v13  ;;  %v8591_v22 = vld [vmem:[%s14020_s30 + $0x130] sm:$0xff] }
0x1ab4   :  { %11078 = vmatpush3.bf16.msra.mxu1 %v13801_v6  ;;  %v8570_v6 = vld [vmem:[%s14020_s30 + $0xa0] sm:$0xff] }
0x1ab5   :  { %11079 = vmatprep.subr.bf16.mxu1 %v11369_v26  ;;  %v11089_v31 = vpack.c.bf16 %v8571_v30, %v8570_v6  ;;  %v8593_v6 = vld [vmem:[%s14020_s30 + $0x140] sm:$0xff]  ;;  %v8594_v30 = vld [vmem:[%s14020_s30 + $0x148] sm:$0xff] }
0x1ab8   :  { %11081 = vmatpush3.bf16.msra.mxu1 %v11032_v16  ;;  %v7002_v16 = vld [vmem:[%s14020_s30] sm:$0xff] }
0x1ab9   :  { %9314 = vmatprep.subr.mxu1 %v11368_v7  ;;  %v11107_v3 = vpack.c.bf16 %v7003_v52, %v7002_v16  ;;  %v8608_v16 = vld [vmem:[%s14020_s30 + $0x1a0] sm:$0xff]  ;;  %v8609_v52 = vld [vmem:[%s14020_s30 + $0x1a8] sm:$0xff] }
0x1abb   :  { %9232 = vmatmul.mubr.msk.f32.vlgmr.msra.gmra.mrb[110].mxu1 %vm495_vm0, %v6500_v62  ;;  %vm6925_vm0 = vcmask 31744   ;;  %v7012_v62 = vld [vmem:[%s14020_s30 + $0x50] sm:$0xff] }
0x1abc   :  { %9316 = vmatprep.mubr.msk.f32.mxu1 %vm11370_vm4, %v11368_v7 }
0x1b7e   :  { %v6834_v20 = vpop.f32.mrb[108].mxu1 }
0x1b7f   :  { %v9214_v17 = vpop.f32.mrb[109].mxu1  ;;  %v6841_v25 = vrot.slane %v6834_v20, %v12597_v10  ;;  %v7013_v20 = vld [vmem:[%s14020_s30 + $0x58] sm:$0xff] }
0x1b80   :  { %v11122_v17 = vpack.c.bf16 %v7013_v20, %v7012_v62 }
0x1b81   :  { %v6842_v27 = vmul.f32 %v6841_v25, %v6682_v63  ;;  %v7005_v63 = vld [vmem:[%s14020_s30 + $0x18] sm:$0xff]  ;;  %v7014_v25 = vld [vmem:[%s14020_s30 + $0x60] sm:$0xff] }
0x1b82   :  { %v11110_v49 = vpack.c.bf16 %v7005_v63, %v7004_v50  ;;  %v8613_v50 = vld [vmem:[%s14020_s30 + $0x1c8] sm:$0xff] }
0x1b8e   :  { %v6912_v24 = vpop.f32.mrb[110].mxu1 }
0x1b8f   :  { %v6919_v54 = vrot.slane %v6912_v24, %v12597_v10  ;;  %v9233_v43 = vpop.f32.mrb[111].mxu1  ;;  %v8563_v10 = vld [vmem:[%s14019_s24 + $0x2] sm:$0x3]  ;;  %v7015_v24 = vld [vmem:[%s14020_s30 + $0x68] sm:$0xff] }
0x1b90   :  { %v7017_v43 = vld [vmem:[%s14020_s30 + $0x78] sm:$0xff] }
0x1b91   :  { %v6920_v61 = vadd.f32 %v6919_v54, %v6842_v27  ;;  %v11125_v27 = vpack.c.bf16 %v7015_v24, %v7014_v25  ;;  %v7016_v54 = vld [vmem:[%s14020_s30 + $0x70] sm:$0xff] }
0x1b93   :  { %vm6921_vm6 = vcmp.gt.f32.partialorder %v6920_v61, 0.0  ;;  %v6922_v14 = vmul.f32 0.2, %v6920_v61 }
0x1b95   :  { %v6923_v55 = vsel %vm6921_vm6, %v6920_v61, %v6922_v14  ;;  %v11128_v61 = vpack.c.bf16 %v7017_v43, %v7016_v54  ;;  %v8585_v14 = vld [vmem:[%s14020_s30 + $0x100] sm:$0xff] }
0x1b96   :  { %9235 = vmatpush3.msk.msra.mxu0 %vm6525_vm5, %v6923_v55  ;;  %9315 = vmatpush3.msk.msra.mxu1 %vm6525_vm5, %v6923_v55 }
0x1b97   :  { %9237 = vmatmul.mubr.msk.f32.vlgmr.msra.gmra.mrb[98].mxu0 %vm6925_vm0, %v6924_v19  ;;  %9239 = vmatprep.subr.mxu0 %v11368_v7  ;;  %v8586_v19 = vld [vmem:[%s14020_s30 + $0x108] sm:$0xff] }
0x1b98   :  { %9354 = vmatprep.subr.mxu1 %v11368_v7  ;;  %9240 = vmatpush3.msk.msra.mxu0 %vm6525_vm5, %v6923_v55 }
0x1b99   :  { %9317 = vmatmul.mubr.msk.f32.vlgmr.msra.gmra.mrb[112].mxu1 %vm6925_vm0, %v8582_v2  ;;  %9241 = vmatprep.mubr.msk.f32.mxu0 %vm11370_vm4, %v11368_v7  ;;  %v11134_v2 = vpack.c.bf16 %v8588_v41, %v8587_v0 }
0x1b9a   :  { %9355 = vmatpush3.msk.msra.mxu1 %vm6525_vm5, %v6923_v55  ;;  %9356 = vmatprep.mubr.msk.f32.mxu1 %vm11370_vm4, %v11368_v7  ;;  %v11131_v55 = vpack.c.bf16 %v8586_v19, %v8585_v14 }
0x1b9b   :  { %9242 = vmatmul.mubr.msk.f32.vlgmr.msra.gmra.mrb[100].mxu0 %vm6925_vm0, %v8563_v10  ;;  %11082 = vmatprep.subr.bf16.mxu0 %v11369_v26  ;;  %v8589_v10 = vld [vmem:[%s14020_s30 + $0x120] sm:$0xff] }
0x1b9c   :  { %11084 = vmatpush3.bf16.msra.mxu0 %v11083_v33  ;;  %9276 = vmatprep.mubr.msk.f32.mxu0 %vm11370_vm4, %v11368_v7  ;;  %v8590_v33 = vld [vmem:[%s14020_s30 + $0x128] sm:$0xff] }
0x1b9d   :  { %9357 = vmatmul.mubr.msk.f32.vlgmr.msra.gmra.mrb[114].mxu1 %vm6925_vm0, %v8601_v40  ;;  %11085 = vmatprep.subr.bf16.mxu0 %v11369_v26  ;;  %v11137_v13 = vpack.c.bf16 %v8590_v33, %v8589_v10  ;;  %v8592_v40 = vld [vmem:[%s14020_s30 + $0x138] sm:$0xff] }
0x1ba0   :  { %11087 = vmatpush3.bf16.msra.mxu0 %v11086_v32  ;;  %v11140_v32 = vpack.c.bf16 %v8592_v40, %v8591_v22 }
0x1ba1   :  { %11088 = vmatprep.subr.bf16.mxu0 %v11369_v26 }
0x1ba4   :  { %11090 = vmatpush3.bf16.msra.mxu0 %v11089_v31  ;;  %v11143_v31 = vpack.c.bf16 %v8594_v30, %v8593_v6 }
0x1ba5   :  { %11091 = vmatprep.subr.bf16.mxu0 %v11369_v26 }
0x1ba8   :  { %11093 = vmatpush3.bf16.msra.mxu0 %v11092_v47  ;;  %v11146_v47 = vpack.c.bf16 %v8596_v45, %v8595_v29 }
0x1ba9   :  { %11094 = vmatprep.subr.bf16.mxu0 %v11369_v26 }
0x1bac   :  { %11096 = vmatpush3.bf16.msra.mxu0 %v11095_v35  ;;  %v11149_v35 = vpack.c.bf16 %v8598_v8, %v8597_v44 }
0x1bad   :  { %11097 = vmatprep.subr.bf16.mxu0 %v11369_v26 }
0x1bb0   :  { %11099 = vmatpush3.bf16.msra.mxu0 %v11098_v51  ;;  %v11152_v51 = vpack.c.bf16 %v8600_v56, %v8599_v9 }
0x1bb1   :  { %11100 = vmatprep.subr.bf16.mxu0 %v11369_v26 }
0x1bb4   :  { %11102 = vmatpush3.bf16.msra.mxu0 %v11101_v11  ;;  %v11155_v11 = vpack.c.bf16 %v8605_v12, %v8604_v21 }
0x1bb5   :  { %11103 = vmatprep.subr.bf16.mxu0 %v11369_v26 }
0x1bb8   :  { %11105 = vmatpush3.bf16.msra.mxu0 %v11104_v42  ;;  %v11158_v42 = vpack.c.bf16 %v8607_v46, %v8606_v4 }
0x1bb9   :  { %11106 = vmatprep.subr.bf16.mxu0 %v11369_v26 }
0x1c6a   :  { %v6998_v34 = vpop.f32.mrb[98].mxu0 }
0x1c6b   :  { %v9238_v39 = vpop.f32.mrb[99].mxu0 }
0x1c6c   :  { %v13903_v38 = vpop.f32.mrb[112].mxu1  ;;  %v8610_v39 = vld [vmem:[%s14020_s30 + $0x1b0] sm:$0xff] }
0x1c6d   :  { %v9318_v48 = vpop.f32.mrb[113].mxu1 }
0x1c6e   :  { %v7089_v60 = vpop.f32.mrb[100].mxu0  ;;  %v8614_v48 = vld [vmem:[%s14020_s30 + $0x1d0] sm:$0xff] }
0x1c6f   :  { %9277 = vmatmul.mubr.f32.vlgmr.msra.gmra.mrb[102].mxu0 %v7089_v60  ;;  %v9243_v59 = vpop.f32.mrb[101].mxu0  ;;  %v8615_v60 = vld [vmem:[%s14020_s30 + $0x1d8] sm:$0xff] }
0x1c70   :  { %11108 = vmatpush3.bf16.msra.mxu0 %v11107_v3  ;;  %9311 = vmatprep.mubr.msk.f32.mxu0 %vm11370_vm4, %v11368_v7  ;;  %v13909_v58 = vpop.f32.mrb[114].mxu1  ;;  %v8611_v3 = vld [vmem:[%s14020_s30 + $0x1b8] sm:$0xff]  ;;  %v11170_v59 = vpack.c.bf16 %v8615_v60, %v8614_v48 }
0x1c71   :  { %11109 = vmatprep.subr.bf16.mxu0 %v11369_v26  ;;  %v9358_v37 = vpop.f32.mrb[115].mxu1 }
0x1c72   :  { %v8618_v37 = vld [vmem:[%s14020_s30 + $0x1f0] sm:$0xff] }
0x1c74   :  { %11111 = vmatpush3.bf16.msra.mxu0 %v11110_v49  ;;  %v8616_v49 = vld [vmem:[%s14020_s30 + $0x1e0] sm:$0xff] }
0x1c75   :  { %11112 = vmatprep.subr.bf16.mxu0 %v11369_v26  ;;  %v11173_v28 = vpack.c.bf16 %v8617_v15, %v8616_v49 }
0x1c78   :  { %11114 = vmatpush3.bf16.msra.mxu0 %v11113_v23  ;;  %v8619_v23 = vld [vmem:[%s14020_s30 + $0x1f8] sm:$0xff] }
0x1c79   :  { %11115 = vmatprep.subr.bf16.mxu0 %v11369_v26  ;;  %v11176_v57 = vpack.c.bf16 %v8619_v23, %v8618_v37 }
0x1c7c   :  { %11117 = vmatpush3.bf16.msra.mxu0 %v11116_v18 }
0x1c7d   :  { %11118 = vmatprep.subr.bf16.mxu0 %v11369_v26 }
0x1c80   :  { %11120 = vmatpush3.bf16.msra.mxu0 %v11119_v5 }
0x1c81   :  { %11121 = vmatprep.subr.bf16.mxu0 %v11369_v26 }
0x1c84   :  { %11123 = vmatpush3.bf16.msra.mxu0 %v11122_v17 }
0x1c85   :  { %11124 = vmatprep.subr.bf16.mxu0 %v11369_v26 }
0x1c88   :  { %11126 = vmatpush3.bf16.msra.mxu0 %v11125_v27 }
0x1c89   :  { %11127 = vmatprep.subr.bf16.mxu0 %v11369_v26 }
0x1c8c   :  { %11129 = vmatpush3.bf16.msra.mxu0 %v11128_v61 }
0x1c8d   :  { %11130 = vmatprep.subr.bf16.mxu0 %v11369_v26 }
0x1c8f   :  { %9312 = vmatmul.mubr.f32.vlgmr.msra.gmra.mrb[102].mxu0 %v6998_v34  ;;  %v11161_v34 = vpack.c.bf16 %v8609_v52, %v8608_v16 }
0x1c90   :  { %11132 = vmatpush3.bf16.msra.mxu0 %v11131_v55  ;;  %9351 = vmatprep.mubr.msk.f32.mxu0 %vm11370_vm4, %v11368_v7 }
0x1c91   :  { %11133 = vmatprep.subr.bf16.mxu0 %v11369_v26 }
0x1c94   :  { %11135 = vmatpush3.bf16.msra.mxu0 %v11134_v2 }
0x1c95   :  { %11136 = vmatprep.subr.bf16.mxu0 %v11369_v26 }
0x1c98   :  { %11138 = vmatpush3.bf16.msra.mxu0 %v11137_v13 }
0x1c99   :  { %11139 = vmatprep.subr.bf16.mxu0 %v11369_v26 }
0x1c9c   :  { %11141 = vmatpush3.bf16.msra.mxu0 %v11140_v32 }
0x1c9d   :  { %11142 = vmatprep.subr.bf16.mxu0 %v11369_v26 }
0x1ca0   :  { %11144 = vmatpush3.bf16.msra.mxu0 %v11143_v31 }
0x1ca1   :  { %11145 = vmatprep.subr.bf16.mxu0 %v11369_v26 }
0x1ca4   :  { %11147 = vmatpush3.bf16.msra.mxu0 %v11146_v47 }
0x1ca5   :  { %11148 = vmatprep.subr.bf16.mxu0 %v11369_v26 }
0x1ca8   :  { %11150 = vmatpush3.bf16.msra.mxu0 %v11149_v35 }
0x1ca9   :  { %11151 = vmatprep.subr.bf16.mxu0 %v11369_v26 }
0x1cac   :  { %11153 = vmatpush3.bf16.msra.mxu0 %v11152_v51 }
0x1cad   :  { %11154 = vmatprep.subr.bf16.mxu0 %v11369_v26 }
0x1caf   :  { %9352 = vmatmul.mubr.f32.vlgmr.msra.gmra.mrb[102].mxu0 %v13903_v38  ;;  %v11164_v38 = vpack.c.bf16 %v8611_v3, %v8610_v39 }
0x1cb0   :  { %11156 = vmatpush3.bf16.msra.mxu0 %v11155_v11  ;;  %9391 = vmatprep.mubr.msk.f32.mxu0 %vm11370_vm4, %v11368_v7  ;;  %v8612_v7 = vld [vmem:[%s14020_s30 + $0x1c0] sm:$0xff] }
0x1cb1   :  { %11157 = vmatprep.subr.bf16.mxu0 %v11369_v26  ;;  %v11167_v63 = vpack.c.bf16 %v8613_v50, %v8612_v7 }
0x1cb4   :  { %11159 = vmatpush3.bf16.msra.mxu0 %v11158_v42 }
0x1cb5   :  { %11160 = vmatprep.subr.bf16.mxu0 %v11369_v26 }
0x1cb8   :  { %11162 = vmatpush3.bf16.msra.mxu0 %v11161_v34 }
0x1cb9   :  { %11163 = vmatprep.subr.bf16.mxu0 %v11369_v26 }
0x1cbc   :  { %11165 = vmatpush3.bf16.msra.mxu0 %v11164_v38 }
0x1cbd   :  { %11166 = vmatprep.subr.bf16.mxu0 %v11369_v26 }
0x1cc0   :  { %11168 = vmatpush3.bf16.msra.mxu0 %v11167_v63 }
0x1cc1   :  { %11169 = vmatprep.subr.bf16.mxu0 %v11369_v26 }
0x1cc4   :  { %11171 = vmatpush3.bf16.msra.mxu0 %v11170_v59 }
0x1cc5   :  { %11172 = vmatprep.subr.bf16.mxu0 %v11369_v26 }
0x1cc8   :  { %11174 = vmatpush3.bf16.msra.mxu0 %v11173_v28 }
0x1cc9   :  { %11175 = vmatprep.subr.bf16.mxu0 %v11369_v26 }
0x1ccc   :  { %11177 = vmatpush3.bf16.msra.mxu0 %v11176_v57 }
0x1ccf   :  { %9392 = vmatmul.mubr.f32.vlgmr.msra.gmra.mrb[102].mxu0 %v13909_v58 }
0x1da2   :  { %v7571_v53 = vpop.f32.mrb[102].mxu0 }
0x1da3   :  { %7577 = vst.msk [vmem:[#allocation2] sm:$0x3] %vm7576_vm7, %v7571_v53  ;;  %v9393_v18 = vpop.f32.mrb[103].mxu0 }
0x1da4   :  { %11326 = shalt.err (!%p11323_p4)
}
0x1da5   :  { %s11327_s20 = scalar_lea.hbm %s11525_s19, 32 }
0x1da6   :  { %p11328_p5 = scmp.ne.s32.totalorder %s11525_s19, %s11327_s20  ;;  %p11331_p6 = scmp.lt.u32.totalorder %s11327_s20, %s11525_s19 }
0x1da8   :  { %p11333_p7 = pnand %p11331_p6, %p11328_p5 }
0x1daa   :  { %11336 = shalt.err (!%p11333_p7)
}
0x1dab   :  { %7587 = dma.vmem_to_hbm [thread:$0]  %s7585_s6, 32, %s11525_s19, [#allocation3]  }
0x1dac   :  { %11337 = dma.done.wait [#allocation3], 32  }
0x1dad   :  { %11338 = vsyncadd [#allocation3], 4294967264 }
0x1dae   :  { %7591 = vsyncpa [#allocation3], 1 }

</bundles_post_ra>
